<compile_context>
chip_gen: v7x
topology: tpu7x:2x2x1
jax: 0.10.0
libtpu: 0.0.40
codegen_flags: <defaults>
</compile_context>

<pallas_src>
import functools

import jax
import jax.numpy as jnp
import numpy as np
from jax.experimental import pallas as pl
from jax.experimental.pallas import tpu as pltpu


def attention_kernel(x_ref, ctx_ref, wq_ref, wkv_ref, wo_ref, bo_ref, o_ref,
                     k_scr, v_scr, *, heads, dim_head, scale):
    # x_ref:   (1, tq, dim)        query rows of this grid step
    # ctx_ref: (1, m,  dim)        full context (resident per batch)
    # wq_ref:  (dim, inner)        wkv_ref: (dim, 2*inner)
    # wo_ref:  (heads, dim_head, dim)   head-major output weights
    # bo_ref:  (1, dim)
    # o_ref:   (1, tq, dim)
    # k_scr/v_scr: (heads, m, dim_head) VMEM caches, filled once per batch.
    inner = heads * dim_head
    dtype = x_ref.dtype                       # MXU operand dtype (bf16-ready)
    tq = x_ref.shape[1]
    m = ctx_ref.shape[1]

    # --- once per batch: fused K/V projection + head split into scratch ---
    @pl.when(pl.program_id(1) == 0)
    def _():
        ctx = ctx_ref[0]                                               # (m, dim)
        # One MXU dot for both K and V (fills the 256-wide MXU on v6e/v7x);
        # the 128-column split below is lane-aligned (no relayout).
        kv = jnp.dot(ctx, wkv_ref[...],
                     preferred_element_type=jnp.float32)               # (m, 2*inner)
        k = kv[:, :inner].astype(dtype)
        v = kv[:, inner:].astype(dtype)
        # Head-major layout, paid once per batch and reused by every q-tile.
        k_scr[...] = k.reshape(m, heads, dim_head).transpose(1, 0, 2)  # (h, m, d)
        v_scr[...] = v.reshape(m, heads, dim_head).transpose(1, 0, 2)  # (h, m, d)

    # --- per q-tile work ---
    x = x_ref[0]                                                       # (tq, dim)
    q = jnp.dot(x, wq_ref[...], preferred_element_type=jnp.float32)    # (tq, inner)
    # Fold the softmax scale into q (tq*inner muls instead of h*tq*m).
    q = (q * scale).astype(dtype)
    qh = q.reshape(tq, heads, dim_head).transpose(1, 0, 2)             # (h, tq, d)

    # All heads in one batched contraction (leading batch dim -> proven lowering).
    dots = jnp.einsum('hnd,hmd->hnm', qh, k_scr[...],
                      preferred_element_type=jnp.float32)              # (h, tq, m) f32

    # Numerically-stable softmax; statistics kept in f32.
    row_max = jnp.max(dots, axis=-1, keepdims=True)
    e = jnp.exp(dots - row_max)
    denom = jnp.sum(e, axis=-1, keepdims=True)                         # (h, tq, 1)

    # Un-normalized attn @ V; a single per-row reciprocal is folded into the
    # (h, tq, d) result instead of dividing the (h, tq, m) score matrix.
    pv = jnp.einsum('hnm,hmd->hnd', e.astype(dtype), v_scr[...],
                    preferred_element_type=jnp.float32)                # (h, tq, d) f32
    inv = pl.reciprocal(denom, approx=True)                            # EUP slot
    inv = inv * (2.0 - denom * inv)                                    # 1 Newton step
    out_h = (pv * inv).astype(dtype)                                   # (h, tq, d)

    # Output projection without the head-merge relayout: per-head batched matmul
    # against head-major wo, then a cheap VPU sum over the leading head axis.
    partial = jnp.einsum('hnd,hdD->hnD', out_h, wo_ref[...],
                         preferred_element_type=jnp.float32)           # (h, tq, dim)
    res = jnp.sum(partial, axis=0) + bo_ref[...].astype(jnp.float32)   # (tq, dim)
    o_ref[0] = res.astype(o_ref.dtype)


def attention_forward(x, context, wq, wkv, wo, bo, *, heads, dim_head, block_q=128):
    b, n, dim = x.shape
    m = context.shape[1]
    inner = heads * dim_head
    assert wq.shape == (dim, inner) and wkv.shape == (dim, 2 * inner)
    assert wo.shape == (inner, dim)
    scale = dim_head ** (-0.5)

    # q-tile: whole sequence if short, otherwise block_q (keep a multiple of 8/16).
    tq = n if n <= block_q else block_q
    grid = (b, pl.cdiv(n, tq))
    # NOTE: if n % tq != 0 the padded query rows are garbage-in/garbage-out but
    # masked on store; softmax is per-row so valid rows are unaffected.

    # Head-major output weights: (inner, dim) -> (heads, dim_head, dim).
    wo_h = wo.reshape(heads, dim_head, dim)

    # --- generation-aware VMEM budget hint (capped for v7x's 64 MiB VMEM) ---
    itemsize = jnp.dtype(x.dtype).itemsize
    d_pad = ((dim_head + 127) // 128) * 128          # lane padding of head-split
    resident = itemsize * (
        2 * m * dim                                   # context block (dbl-buffered)
        + 2 * 2 * tq * dim                            # x tile + out tile
        + 2 * (dim * inner + dim * 2 * inner + inner * dim + dim))  # weights
    scratch = 2 * itemsize * heads * m * d_pad        # K and V caches
    body_f32 = 4 * (2 * heads * tq * m                # dots + e
                    + heads * tq * d_pad              # pv
                    + heads * tq * dim                # partial
                    + m * 2 * inner)                  # kv temp
    footprint = resident + scratch + body_f32
    vmem_limit = int(min(max(2 * footprint, 24 * 1024 * 1024), 56 * 1024 * 1024))

    kernel = functools.partial(
        attention_kernel, heads=heads, dim_head=dim_head, scale=scale)

    return pl.pallas_call(
        kernel,
        out_shape=jax.ShapeDtypeStruct((b, n, dim), x.dtype),
        grid=grid,
        in_specs=[
            pl.BlockSpec((1, tq, dim), lambda i, j: (i, j, 0)),        # x (q tile)
            pl.BlockSpec((1, m, dim), lambda i, j: (i, 0, 0)),         # context
            pl.BlockSpec((dim, inner), lambda i, j: (0, 0)),           # wq
            pl.BlockSpec((dim, 2 * inner), lambda i, j: (0, 0)),       # wkv
            pl.BlockSpec((heads, dim_head, dim), lambda i, j: (0, 0, 0)),  # wo (head-major)
            pl.BlockSpec((1, dim), lambda i, j: (0, 0)),               # bias
        ],
        out_specs=pl.BlockSpec((1, tq, dim), lambda i, j: (i, j, 0)),
        scratch_shapes=[
            pltpu.VMEM((heads, m, dim_head), x.dtype),                 # K cache
            pltpu.VMEM((heads, m, dim_head), x.dtype),                 # V cache
        ],
        compiler_params=pltpu.CompilerParams(
            # batch parallel (megacore), q-tile arbitrary so the K/V scratch
            # carries sequentially across tiles within a batch.
            dimension_semantics=("parallel", "arbitrary"),
            vmem_limit_bytes=vmem_limit),
    )(x, context, wq, wkv, wo_h, bo)


def attention_reference(x, context, wq, wkv, wo, bo, *, heads, dim_head):
    """Pure-JAX reference mirroring the PyTorch forward (eval mode)."""
    b, n, dim = x.shape
    inner = heads * dim_head
    scale = dim_head ** (-0.5)
    q = x @ wq                                   # (b, n, inner)
    kv = context @ wkv                           # (b, m, 2*inner)
    k, v = kv[..., :inner], kv[..., inner:]

    def split(t):
        bb, nn, _ = t.shape
        return t.reshape(bb, nn, heads, dim_head).transpose(0, 2, 1, 3)

    q, k, v = split(q), split(k), split(v)       # (b, h, n, d)
    dots = jnp.einsum('bhid,bhjd->bhij', q, k) * scale
    attn = jax.nn.softmax(dots, axis=-1)
    out = jnp.einsum('bhij,bhjd->bhid', attn, v)
    out = out.transpose(0, 2, 1, 3).reshape(b, n, inner)
    return out @ wo + bo


if __name__ == "__main__":
    # Small but lane-dense shapes: dim = inner = 128, seq = 256 (-> 2 q-tiles of
    # 128, exercising the per-batch K/V scratch carry), 4 heads x 32.
    B, N, DIM = 2, 256, 128
    HEADS, DIM_HEAD = 4, 32
    INNER = HEADS * DIM_HEAD

    key = jax.random.PRNGKey(0)
    kx, kq, kkv, kwo, kbo = jax.random.split(key, 5)

    x = jax.random.normal(kx, (B, N, DIM), dtype=jnp.float32)
    # Linear weights stored as (in_features, out_features).
    wq = jax.random.normal(kq, (DIM, INNER), dtype=jnp.float32) * (1.0 / np.sqrt(DIM))
    wkv = jax.random.normal(kkv, (DIM, 2 * INNER), dtype=jnp.float32) * (1.0 / np.sqrt(DIM))
    wo = jax.random.normal(kwo, (INNER, DIM), dtype=jnp.float32) * (1.0 / np.sqrt(INNER))
    bo = jax.random.normal(kbo, (1, DIM), dtype=jnp.float32) * 0.01

    # context=None, kv_include_self=False  ->  context = x
    out = attention_forward(x, x, wq, wkv, wo, bo,
                            heads=HEADS, dim_head=DIM_HEAD, block_q=128)
    out = jax.block_until_ready(out)

    ref = attention_reference(x, x, wq, wkv, wo, bo, heads=HEADS, dim_head=DIM_HEAD)
    np.testing.assert_allclose(np.asarray(out), np.asarray(ref), rtol=1e-4, atol=1e-4)

    # bf16 path: native-dtype MXU operands in-kernel; checked against an f32-math
    # reference built from the same bf16-rounded inputs, with loose tolerance
    # (in-kernel probabilities are cast to bf16 before the PV matmul).
    xb = x.astype(jnp.bfloat16)
    wq_b, wkv_b = wq.astype(jnp.bfloat16), wkv.astype(jnp.bfloat16)
    wo_b, bo_b = wo.astype(jnp.bfloat16), bo.astype(jnp.bfloat16)
    out_bf16 = attention_forward(xb, xb, wq_b, wkv_b, wo_b, bo_b,
                                 heads=HEADS, dim_head=DIM_HEAD, block_q=128)
    out_bf16 = jax.block_until_ready(out_bf16)
    ref_bf16 = attention_reference(
        xb.astype(jnp.float32), xb.astype(jnp.float32),
        wq_b.astype(jnp.float32), wkv_b.astype(jnp.float32),
        wo_b.astype(jnp.float32), bo_b.astype(jnp.float32),
        heads=HEADS, dim_head=DIM_HEAD)
    assert bool(jnp.all(jnp.isfinite(out_bf16.astype(jnp.float32))))
    np.testing.assert_allclose(np.asarray(out_bf16.astype(jnp.float32)),
                               np.asarray(ref_bf16), rtol=5e-2, atol=5e-2)

    print("KERNEL_OK")
</pallas_src>

<mosaic_0001>
module attributes {stable_mosaic.version = 11 : i64} {
  func.func @attention_kernel(%arg0: i32, %arg1: i32, %arg2: memref<1x128x128xf32, #tpu.memory_space<vmem>>, %arg3: memref<1x256x128xf32, #tpu.memory_space<vmem>>, %arg4: memref<128x128xf32, #tpu.memory_space<vmem>>, %arg5: memref<128x256xf32, #tpu.memory_space<vmem>>, %arg6: memref<4x32x128xf32, #tpu.memory_space<vmem>>, %arg7: memref<1x128xf32, #tpu.memory_space<vmem>>, %arg8: memref<1x128x128xf32, #tpu.memory_space<vmem>>, %arg9: memref<4x256x32xf32, #tpu.memory_space<vmem>>, %arg10: memref<4x256x32xf32, #tpu.memory_space<vmem>>) attributes {dimension_semantics = [#tpu.dimension_semantics<parallel>, #tpu.dimension_semantics<arbitrary>], iteration_bounds = array<i64: 2, 2>, scalar_prefetch = 0 : i64, scratch_operands = 2 : i64, tpu.core_type = #tpu.core_type<tc>, window_params = [{transform_indices = @transform_0, window_bounds = array<i64: 1, 128, 128>}, {transform_indices = @transform_1, window_bounds = array<i64: 1, 256, 128>}, {pipeline_mode = #tpu.pipeline_mode<synchronous>, transform_indices = @transform_2, window_bounds = array<i64: 128, 128>}, {pipeline_mode = #tpu.pipeline_mode<synchronous>, transform_indices = @transform_3, window_bounds = array<i64: 128, 256>}, {pipeline_mode = #tpu.pipeline_mode<synchronous>, transform_indices = @transform_4, window_bounds = array<i64: 4, 32, 128>}, {pipeline_mode = #tpu.pipeline_mode<synchronous>, transform_indices = @transform_5, window_bounds = array<i64: 1, 128>}, {transform_indices = @transform_6, window_bounds = array<i64: 1, 128, 128>}]} {
    %c0_i32 = arith.constant 0 : i32
    %0 = arith.cmpi eq, %arg1, %c0_i32 : i32
    %1 = arith.extui %0 : i1 to i32
    %c0_i32_0 = arith.constant 0 : i32
    %2 = arith.cmpi ne, %1, %c0_i32_0 : i32
    scf.if %2 {
      %c0_27 = arith.constant 0 : index
      %c0_28 = arith.constant 0 : index
      %c0_29 = arith.constant 0 : index
      %38 = vector.load %arg3[%c0_27, %c0_28, %c0_29] : memref<1x256x128xf32, #tpu.memory_space<vmem>>, vector<1x256x128xf32>
      %39 = vector.shape_cast %38 : vector<1x256x128xf32> to vector<256x128xf32>
      %c0_30 = arith.constant 0 : index
      %c0_31 = arith.constant 0 : index
      %40 = vector.load %arg5[%c0_30, %c0_31] : memref<128x256xf32, #tpu.memory_space<vmem>>, vector<128x256xf32>
      %cst_32 = arith.constant dense<0.000000e+00> : vector<256x256xf32>
      %41 = tpu.matmul %39, %40, %cst_32 {dimension_numbers = #tpu.dot_dimension_numbers<[1], [0], [0], [1], [0, 0, 1, 1], [], []>} : vector<256x128xf32>, vector<128x256xf32>, vector<256x256xf32> -> vector<256x256xf32>
      %42 = vector.extract_strided_slice %41 {offsets = [0, 0], sizes = [256, 128], strides = [1, 1]} : vector<256x256xf32> to vector<256x128xf32>
      %43 = vector.extract_strided_slice %41 {offsets = [0, 128], sizes = [256, 128], strides = [1, 1]} : vector<256x256xf32> to vector<256x128xf32>
      %44 = vector.shape_cast %42 : vector<256x128xf32> to vector<256x4x32xf32>
      %45 = tpu.transpose %44, [1, 0, 2] : vector<256x4x32xf32> -> vector<4x256x32xf32>
      %c0_33 = arith.constant 0 : index
      %c0_34 = arith.constant 0 : index
      %c0_35 = arith.constant 0 : index
      %46 = vector.load %arg9[%c0_33, %c0_34, %c0_35] : memref<4x256x32xf32, #tpu.memory_space<vmem>>, vector<4x256x32xf32>
      tpu.vector_store %arg9[%c0_33, %c0_34, %c0_35], %45 {strides = array<i32>} : memref<4x256x32xf32, #tpu.memory_space<vmem>>, vector<4x256x32xf32>,
      %47 = vector.shape_cast %43 : vector<256x128xf32> to vector<256x4x32xf32>
      %48 = tpu.transpose %47, [1, 0, 2] : vector<256x4x32xf32> -> vector<4x256x32xf32>
      %c0_36 = arith.constant 0 : index
      %c0_37 = arith.constant 0 : index
      %c0_38 = arith.constant 0 : index
      %49 = vector.load %arg10[%c0_36, %c0_37, %c0_38] : memref<4x256x32xf32, #tpu.memory_space<vmem>>, vector<4x256x32xf32>
      tpu.vector_store %arg10[%c0_36, %c0_37, %c0_38], %48 {strides = array<i32>} : memref<4x256x32xf32, #tpu.memory_space<vmem>>, vector<4x256x32xf32>,
    } else {
    }
    %c0 = arith.constant 0 : index
    %c0_1 = arith.constant 0 : index
    %c0_2 = arith.constant 0 : index
    %3 = vector.load %arg2[%c0, %c0_1, %c0_2] : memref<1x128x128xf32, #tpu.memory_space<vmem>>, vector<1x128x128xf32>
    %4 = vector.shape_cast %3 : vector<1x128x128xf32> to vector<128x128xf32>
    %c0_3 = arith.constant 0 : index
    %c0_4 = arith.constant 0 : index
    %5 = vector.load %arg4[%c0_3, %c0_4] : memref<128x128xf32, #tpu.memory_space<vmem>>, vector<128x128xf32>
    %cst = arith.constant dense<0.000000e+00> : vector<128x128xf32>
    %6 = tpu.matmul %4, %5, %cst {dimension_numbers = #tpu.dot_dimension_numbers<[1], [0], [0], [1], [0, 0, 1, 1], [], []>} : vector<128x128xf32>, vector<128x128xf32>, vector<128x128xf32> -> vector<128x128xf32>
    %cst_5 = arith.constant 0.176776692 : f32
    %7 = vector.broadcast %cst_5 : f32 to vector<128x128xf32>
    %8 = arith.mulf %6, %7 : vector<128x128xf32>
    %9 = vector.shape_cast %8 : vector<128x128xf32> to vector<128x4x32xf32>
    %10 = tpu.transpose %9, [1, 0, 2] : vector<128x4x32xf32> -> vector<4x128x32xf32>
    %c0_6 = arith.constant 0 : index
    %c0_7 = arith.constant 0 : index
    %c0_8 = arith.constant 0 : index
    %11 = vector.load %arg9[%c0_6, %c0_7, %c0_8] : memref<4x256x32xf32, #tpu.memory_space<vmem>>, vector<4x256x32xf32>
    "tpu.trace_start"() <{level = 10 : i32, message = "hnd,hmd->hnm"}> : () -> ()
    %cst_9 = arith.constant dense<0.000000e+00> : vector<4x128x256xf32>
    %12 = tpu.matmul %10, %11, %cst_9 {dimension_numbers = #tpu.dot_dimension_numbers<[2], [2], [1], [1], [0, 0, 0, 1, 1, 1], [0], [0]>} : vector<4x128x32xf32>, vector<4x256x32xf32>, vector<4x128x256xf32> -> vector<4x128x256xf32>
    "tpu.trace_stop"() : () -> ()
    %cst_10 = arith.constant dense<0xFF800000> : vector<4x128xf32>
    %13 = vector.multi_reduction <maximumf>, %12, %cst_10 [2] : vector<4x128x256xf32> to vector<4x128xf32>
    %14 = vector.shape_cast %13 : vector<4x128xf32> to vector<4x128x1xf32>
    %15 = vector.broadcast %14 : vector<4x128x1xf32> to vector<4x128x256xf32>
    %16 = arith.subf %12, %15 : vector<4x128x256xf32>
    %17 = math.exp %16 : vector<4x128x256xf32>
    %cst_11 = arith.constant dense<0.000000e+00> : vector<4x128xf32>
    %18 = vector.multi_reduction <add>, %17, %cst_11 [2] : vector<4x128x256xf32> to vector<4x128xf32>
    %19 = vector.shape_cast %18 : vector<4x128xf32> to vector<4x128x1xf32>
    %c0_12 = arith.constant 0 : index
    %c0_13 = arith.constant 0 : index
    %c0_14 = arith.constant 0 : index
    %20 = vector.load %arg10[%c0_12, %c0_13, %c0_14] : memref<4x256x32xf32, #tpu.memory_space<vmem>>, vector<4x256x32xf32>
    "tpu.trace_start"() <{level = 10 : i32, message = "hnm,hmd->hnd"}> : () -> ()
    %cst_15 = arith.constant dense<0.000000e+00> : vector<4x128x32xf32>
    %21 = tpu.matmul %17, %20, %cst_15 {dimension_numbers = #tpu.dot_dimension_numbers<[2], [1], [1], [2], [0, 0, 0, 1, 1, 2], [0], [0]>} : vector<4x128x256xf32>, vector<4x256x32xf32>, vector<4x128x32xf32> -> vector<4x128x32xf32>
    "tpu.trace_stop"() : () -> ()
    %22 = tpu.reciprocal %19 {approx = true} : vector<4x128x1xf32> -> vector<4x128x1xf32>
    %23 = arith.mulf %19, %22 : vector<4x128x1xf32>
    %cst_16 = arith.constant 2.000000e+00 : f32
    %24 = vector.broadcast %cst_16 : f32 to vector<4x128x1xf32>
    %25 = arith.subf %24, %23 : vector<4x128x1xf32>
    %26 = arith.mulf %22, %25 : vector<4x128x1xf32>
    %27 = vector.broadcast %26 : vector<4x128x1xf32> to vector<4x128x32xf32>
    %28 = arith.mulf %21, %27 : vector<4x128x32xf32>
    %c0_17 = arith.constant 0 : index
    %c0_18 = arith.constant 0 : index
    %c0_19 = arith.constant 0 : index
    %29 = vector.load %arg6[%c0_17, %c0_18, %c0_19] : memref<4x32x128xf32, #tpu.memory_space<vmem>>, vector<4x32x128xf32>
    "tpu.trace_start"() <{level = 10 : i32, message = "hnd,hdD->hnD"}> : () -> ()
    %cst_20 = arith.constant dense<0.000000e+00> : vector<4x128x128xf32>
    %30 = tpu.matmul %28, %29, %cst_20 {dimension_numbers = #tpu.dot_dimension_numbers<[2], [1], [1], [2], [0, 0, 0, 1, 1, 2], [0], [0]>} : vector<4x128x32xf32>, vector<4x32x128xf32>, vector<4x128x128xf32> -> vector<4x128x128xf32>
    "tpu.trace_stop"() : () -> ()
    %cst_21 = arith.constant dense<0.000000e+00> : vector<128x128xf32>
    %31 = vector.multi_reduction <add>, %30, %cst_21 [0] : vector<4x128x128xf32> to vector<128x128xf32>
    %c0_22 = arith.constant 0 : index
    %c0_23 = arith.constant 0 : index
    %32 = vector.load %arg7[%c0_22, %c0_23] : memref<1x128xf32, #tpu.memory_space<vmem>>, vector<1x128xf32>
    %33 = vector.broadcast %32 : vector<1x128xf32> to vector<128x128xf32>
    %34 = arith.addf %31, %33 : vector<128x128xf32>
    %c0_24 = arith.constant 0 : index
    %c0_25 = arith.constant 0 : index
    %c0_26 = arith.constant 0 : index
    %35 = vector.load %arg8[%c0_24, %c0_25, %c0_26] : memref<1x128x128xf32, #tpu.memory_space<vmem>>, vector<1x128x128xf32>
    %36 = vector.shape_cast %35 : vector<1x128x128xf32> to vector<128x128xf32>
    %37 = vector.shape_cast %34 : vector<128x128xf32> to vector<1x128x128xf32>
    tpu.vector_store %arg8[%c0_24, %c0_25, %c0_26], %37 {strides = array<i32>} : memref<1x128x128xf32, #tpu.memory_space<vmem>>, vector<1x128x128xf32>,
    return
  }
  func.func @transform_0(%arg0: i32, %arg1: i32) -> (i32, i32, i32) {
    %c0_i32 = arith.constant 0 : i32
    %c0_i32_0 = arith.constant 0 : i32
    return %arg0, %arg1, %c0_i32 : i32, i32, i32
  }
  func.func @transform_1(%arg0: i32, %arg1: i32) -> (i32, i32, i32) {
    %c0_i32 = arith.constant 0 : i32
    %c0_i32_0 = arith.constant 0 : i32
    %c0_i32_1 = arith.constant 0 : i32
    return %arg0, %c0_i32, %c0_i32_0 : i32, i32, i32
  }
  func.func @transform_2(%arg0: i32, %arg1: i32) -> (i32, i32) {
    %c0_i32 = arith.constant 0 : i32
    %c0_i32_0 = arith.constant 0 : i32
    %c0_i32_1 = arith.constant 0 : i32
    return %c0_i32, %c0_i32_0 : i32, i32
  }
  func.func @transform_3(%arg0: i32, %arg1: i32) -> (i32, i32) {
    %c0_i32 = arith.constant 0 : i32
    %c0_i32_0 = arith.constant 0 : i32
    %c0_i32_1 = arith.constant 0 : i32
    return %c0_i32, %c0_i32_0 : i32, i32
  }
  func.func @transform_4(%arg0: i32, %arg1: i32) -> (i32, i32, i32) {
    %c0_i32 = arith.constant 0 : i32
    %c0_i32_0 = arith.constant 0 : i32
    %c0_i32_1 = arith.constant 0 : i32
    %c0_i32_2 = arith.constant 0 : i32
    return %c0_i32, %c0_i32_0, %c0_i32_1 : i32, i32, i32
  }
  func.func @transform_5(%arg0: i32, %arg1: i32) -> (i32, i32) {
    %c0_i32 = arith.constant 0 : i32
    %c0_i32_0 = arith.constant 0 : i32
    %c0_i32_1 = arith.constant 0 : i32
    return %c0_i32, %c0_i32_0 : i32, i32
  }
  func.func @transform_6(%arg0: i32, %arg1: i32) -> (i32, i32, i32) {
    %c0_i32 = arith.constant 0 : i32
    %c0_i32_0 = arith.constant 0 : i32
    return %arg0, %arg1, %c0_i32 : i32, i32, i32
  }
}

</mosaic_0001>

<bundles_post_ra>
// kernel: tpu_custom_call.1
= control target key start
LH: loop header
LB: loop body
LE: loop exit
PB: predicated region body
PF: predicated region fallthrough
CT: control target
= control target key end

     0   :  { %s25730_s0 = inlined_call_operand.hbm [shape: f32[2,256,128], index: 0, kind: input, shape index: {}]   ;;  %s25731_s1 = inlined_call_operand.hbm [shape: f32[2,256,128], index: 1, kind: input, shape index: {}]   ;;  %s25732_s2 = inlined_call_operand.hbm [shape: f32[128,128], index: 2, kind: input, shape index: {}]   ;;  %s25733_s3 = inlined_call_operand.hbm [shape: f32[128,256], index: 3, kind: input, shape index: {}]   ;;  %s25734_s4 = inlined_call_operand.hbm [shape: f32[4,32,128], index: 4, kind: input, shape index: {}]   ;;  %s25735_s5 = inlined_call_operand.vmem [shape: f32[1,128], index: 5, kind: input, shape index: {}]   ;;  %s25736_s6 = inlined_call_operand.hbm [shape: f32[2,256,128], index: 6, kind: output, shape index: {}]  }
   0x1   :  { %26005 = sst [smem:[#allocation170_spill]] %s25732_s2 }
   0x2   :  { %26006 = sst [smem:[#allocation171_spill]] %s25733_s3 }
   0x3   :  { %26007 = sst [smem:[#allocation172_spill]] %s25734_s4 }
   0x4   :  { %26008 = sst [smem:[#allocation173_spill]] %s25735_s5 }
   0x5   :  { %26009 = sst [smem:[#allocation174_spill]] %s25736_s6 }
   0x6   :  { %11 = vsyncpa [#allocation5], 0 }
   0x7   :  { %13 = vsyncpa [#allocation5 + $0x1], 0 }
   0x8   :  { %14 = vsyncpa [#allocation8], 0 }
   0x9   :  { %16 = vsyncpa [#allocation8 + $0x1], 0 }
   0xa   :  { %17 = vsyncpa [#allocation11], 0 }
   0xb   :  { %18 = vsyncpa [#allocation6], 0 }
   0xc   :  { %20 = vsyncpa [#allocation6 + $0x1], 0  ;;  %s19696_s21 = smov 0   ;;  %s19698_s22 = smov 0  }
   0xd   :  { %s19700_s23 = smov 0   ;;  %s19702_s24 = smov 0  }
   0xe   :  { %s19704_s25 = smov 0   ;;  %s19706_s26 = smov 0  }
   0xf   :  { %s19708_s27 = smov 0   ;;  %s19710_s28 = smov 0  }
  0x10   :  { %s19712_s29 = smov 0   ;;  %s19714_s30 = smov 0  }
  0x11   :  { %s19716_s7 = smov 0  }
  0x12 LB: > { %26010 = sst [smem:[#allocation19_spill]] %s19608_s24  ;;  %s19750_s8 = sadd.s32 4294967295, %s19636_s7   ;;  %s19636_s7 = sphi %s19716_s7, %s26_s7   ;;  %s19632_s30 = sphi %s19714_s30, %s26627_s30   ;;  %s19628_s29 = sphi %s19712_s29, %s26626_s29   ;;  %s19624_s28 = sphi %s19710_s28, %s26625_s28   ;;  %s19620_s27 = sphi %s19708_s27, %s26624_s27   ;;  %s19616_s26 = sphi %s19706_s26, %s26623_s26   ;;  %s19612_s25 = sphi %s19704_s25, %s26622_s25   ;;  %s19608_s24 = sphi %s19702_s24, %s26621_s24   ;;  %s19604_s23 = sphi %s19700_s23, %s26620_s23   ;;  %s19600_s22 = sphi %s19698_s22, %s26619_s22   ;;  %s19596_s21 = sphi %s19696_s21, %s26618_s21  }
  0x13   : > { %26011 = sst [smem:[#allocation20_spill]] %s19620_s27  ;;  %s17006_s9 = sadd.s32 4294967294, %s19636_s7  }
  0x14   : > { %26012 = sst [smem:[#allocation21_spill]] %s19624_s28  ;;  %p60_p0 = scmp.ne.s32.totalorder %s19612_s25, %s19608_s24 }
  0x15   : > { %p25739_p1 = scmp.eq.s32.totalorder %s19750_s8, 0  ;;  %p86_p2 = scmp.ne.s32.totalorder %s19600_s22, %s19596_s21 }
  0x16   : > { %p202_p5 = scmp.eq.s32.totalorder %s17006_s9, 3  ;;  %p17007_p7 = scmp.ge.s32.totalorder %s19636_s7, 1 }
  0x17   : > { %p19760_p4 = por %p25739_p1, %p60_p0  ;;  %p19766_p6 = por %p86_p2, %p25739_p1 }
  0x18   : > { %p19771_p8 = por %p202_p5, %p60_p0  ;;  %p209_p9 = scmp.lt.s32.totalorder %s19636_s7, 5 }
  0x19   : > { %s26013_s10 = scalar_select %p19760_p4, 1, 0 }
  0x1a   : > { %s26014_s11 = scalar_select %p19766_p6, 1, 0 }
  0x1b   : > { %s26016_s12 = scalar_select %p19771_p8, 1, 0 }
  0x1c   : > { %26015 = sst [smem:[#allocation22_spill]] %s26014_s11  ;;  %p19776_p10 = pnand %p17007_p7, %p209_p9 }
  0x1d   : > { %26017 = sst [smem:[#allocation23_spill]] %s26016_s12  ;;  %s19638_s14 = smov [#allocation9]  }
  0x1e   : > { %s26018_s13 = scalar_select %p19776_p10, 1, 0 }
  0x1f   : > { %s221_s15 = sshll.u32 %s19638_s14, 4  ;;  %p18837_p11 = pneg %p19776_p10  ;;  %s222_s15 = int_to_ptr.vmem [resolvable:$true] %s221_s15 }
  0x20   : > { %s19639_s17 = smov [#allocation10]   ;;  %s26020_s2 = sld [smem:[#allocation170_spill]] }
  0x21   : > { %p19784_p12 = pnand %p18837_p11, %p25739_p1  ;;  %s234_s18 = sshll.u32 %s19639_s17, 4  ;;  %s19788_s18 = int_to_ptr.vmem [resolvable:$true] %s234_s18 }
  0x23   : > { %p19798_p0 = pneg %p19784_p12 }
  0x26   : > { %s19358_s21 = scalar_lea.hbm %s26020_s2, 2048 }
  0x27   : > { %p19359_p13 = scmp.ne.s32.totalorder %s26020_s2, %s19358_s21  ;;  %p19365_p7 = scmp.lt.u32.totalorder %s19358_s21, %s26020_s2 }
  0x29   : > { %p19361_p2 = pnand %p19798_p0, %p19359_p13 }
  0x2b   : > { %p19362_p5 = pneg %p19361_p2 }
  0x2d   : > { %p19367_p9 = pnand %p19365_p7, %p19362_p5 }
  0x2f   : > { %19370 = shalt.err (!%p19367_p9)
}
  0x30   : > { %s19371_s19 = scalar_lea.vmem %s222_s15, 2048  ;;  %p19379_p8 = scmp.lt.s32.totalorder %s222_s15, %s222_s15 }
  0x31   : > { %p19372_p11 = scmp.ne.s32.totalorder %s222_s15, %s19371_s19  ;;  %p19380_p6 = scmp.lt.s32.totalorder %s19371_s19, %s19371_s19 }
  0x33   : > { %p19374_p1 = pnand %p19372_p11, %p19798_p0  ;;  %p19381_p4 = por %p19380_p6, %p19379_p8 }
  0x35   : > { %p19375_p3 = pneg %p19374_p1 }
  0x37   : > { %p19382_p10 = pnand %p19381_p4, %p19375_p3 }
  0x39   : > { %19385 = shalt.err (!%p19382_p10)
}
  0x3a   : > { %s25744_s12 = smov 128   ;;  %s25746_s20 = smov 8  }
  0x3b   : > { %18840 = dma.hbm_to_vmem [thread:$0]  (!%p19784_p12), %s26020_s2, 2048, %s222_s15, [#allocation8], %s25744_s12, %s25744_s12, %s25746_s20  }
  0x3c   : > { %s26022_s3 = sld [smem:[#allocation171_spill]] }
  0x42   : > { %s19386_s6 = scalar_lea.hbm %s26022_s3, 4096 }
  0x43   : > { %p19387_p1 = scmp.ne.s32.totalorder %s26022_s3, %s19386_s6  ;;  %p19393_p6 = scmp.lt.u32.totalorder %s19386_s6, %s26022_s3 }
  0x45   : > { %p19389_p3 = pnand %p19387_p1, %p19798_p0 }
  0x47   : > { %p19390_p4 = pneg %p19389_p3 }
  0x49   : > { %p19395_p8 = pnand %p19393_p6, %p19390_p4 }
  0x4b   : > { %19398 = shalt.err (!%p19395_p8)
}
  0x4c   : > { %s19399_s15 = scalar_lea.vmem %s19788_s18, 4096  ;;  %p19407_p5 = scmp.lt.s32.totalorder %s19788_s18, %s19788_s18 }
  0x4d   : > { %p19400_p10 = scmp.ne.s32.totalorder %s19788_s18, %s19399_s15  ;;  %p19408_p7 = scmp.lt.s32.totalorder %s19399_s15, %s19399_s15 }
  0x4f   : > { %p19402_p13 = pnand %p19400_p10, %p19798_p0  ;;  %p19409_p9 = por %p19408_p7, %p19407_p5 }
  0x51   : > { %p19403_p2 = pneg %p19402_p13 }
  0x53   : > { %p19410_p11 = pnand %p19409_p9, %p19403_p2 }
  0x55   : > { %19413 = shalt.err (!%p19410_p11)
}
  0x56   : > { %s19642_s28 = smov 256   ;;  %s19643_s5 = smov 16  }
  0x57   : > { %18843 = dma.hbm_to_vmem [thread:$0]  (!%p19784_p12), %s26022_s3, 4096, %s19788_s18, [#allocation11], %s19642_s28, %s19642_s28, %s19643_s5  }
  0x58   : > { %s19644_s24 = smov [#allocation12]   ;;  %s26023_s4 = sld [smem:[#allocation172_spill]] }
  0x59   : > { %s247_s21 = sshll.u32 %s19644_s24, 4  ;;  %s248_s21 = int_to_ptr.vmem [resolvable:$true] %s247_s21 }
  0x5e   : > { %s19414_s19 = scalar_lea.hbm %s26023_s4, 2048 }
  0x5f   : > { %p19415_p1 = scmp.ne.s32.totalorder %s26023_s4, %s19414_s19  ;;  %p19421_p6 = scmp.lt.u32.totalorder %s19414_s19, %s26023_s4 }
  0x61   : > { %p19417_p3 = pnand %p19415_p1, %p19798_p0 }
  0x63   : > { %p19418_p4 = pneg %p19417_p3 }
  0x65   : > { %p19423_p8 = pnand %p19421_p6, %p19418_p4 }
  0x67   : > { %19426 = shalt.err (!%p19423_p8)
}
  0x68   : > { %s19427_s18 = scalar_lea.vmem %s248_s21, 2048  ;;  %p19435_p5 = scmp.lt.s32.totalorder %s248_s21, %s248_s21 }
  0x69   : > { %p19428_p10 = scmp.ne.s32.totalorder %s248_s21, %s19427_s18  ;;  %p19436_p7 = scmp.lt.s32.totalorder %s19427_s18, %s19427_s18 }
  0x6b   : > { %p19430_p13 = pnand %p19428_p10, %p19798_p0  ;;  %p19437_p9 = por %p19436_p7, %p19435_p5 }
  0x6d   : > { %p19431_p2 = pneg %p19430_p13 }
  0x6f   : > { %p19438_p11 = pnand %p19437_p9, %p19431_p2 }
  0x71   : > { %19441 = shalt.err (!%p19438_p11)
}
  0x72   : > { %s26024_s12 = smov 8   ;;  %s26025_s28 = smov 128  }
  0x73   : > { %18846 = dma.hbm_to_vmem [thread:$0]  (!%p19784_p12), %s26023_s4, 2048, %s248_s21, [#allocation11], %s26025_s28, %s26025_s28, %s26024_s12  }
  0x74   : > { %s35_s16 = sadd.s32 1, %s19628_s29  ;;  %s38_s14 = sadd.s32 1, %s19632_s30 }
  0x75   : > { %p36_p0 = scmp.ge.s32.totalorder %s35_s16, 2  ;;  %s47_s5 = sadd.s32 1, %s19616_s26 }
  0x76   : > { %p54_p1 = scmp.ne.s32.totalorder %s19616_s26, %s19612_s25  ;;  %p25755_p3 = scmp.eq.s32.totalorder %s19636_s7, 0 }
  0x77   : > { %s26629_s16 = smov (%p36_p0, %s35_s16), 0  ;;  %s26631_s14 = smov (!%p36_p0, %s38_s14), %s19632_s30 }
  0x78   : > { %26026 = sst [smem:[#allocation24_spill]] %s26629_s16  ;;  %s43_s6 = ssub.s32 %s19628_s29, %s26629_s16 }
  0x79   : > { %p40_p4 = scmp.ge.s32.totalorder %s26631_s14, 2  ;;  %p26027_p6 = scmp.eq.s32.totalorder %s19750_s8, 3 }
  0x7a   : > { %p19880_p12 = por %p25755_p3, %p54_p1  ;;  %p25754_p10 = scmp.lt.s32.totalorder %s19636_s7, 4 }
  0x7b   : > { %p19874_p8 = por %p26027_p6, %p54_p1  ;;  %s26633_s14 = smov (%p40_p4, %s26631_s14), 0 }
  0x7c   : > { %26031 = sst [smem:[#allocation26_spill]] %s26633_s14  ;;  %s264_s21 = sand.u32 1, %s19616_s26  }
  0x7d   : > { %s26028_s27 = scalar_select %p19874_p8, 1, 0 }
  0x7e   : > { %s17013_s9 = sshll.u32 %s19628_s29, 4  ;;  %s19891_s17 = ssub.s32 %s19632_s30, %s26633_s14 }
  0x7f   : > { %26029 = sst [smem:[#allocation25_spill]] %s26028_s27  ;;  %s44_s19 = sor.u32 %s43_s6, %s19891_s17 }
  0x80   : > { %p45_p2 = scmp.eq.s32.totalorder %s44_s19, 0  ;;  %s17012_s15 = sshll.u32 %s264_s21, 7 }
  0x81   : > { %s17014_s18 = sshll.u32 %s19632_s30, 5  ;;  %s268_s3 = scalar_lea.vmem [#allocation4], %s17012_s15 }
  0x82   : > { %s19897_s2 = scalar_select %p45_p2, %s19616_s26, %s47_s5  }
  0x83   : > { %s274_s20 = sadd.s32 %s17014_s18, %s17013_s9  ;;  %s277_s4 = sshll.u32 %s268_s3, 4  ;;  %s19899_s4 = int_to_ptr.vmem [resolvable:$true] %s277_s4 }
  0x84   : > { %s17015_s16 = sshll.u32 %s274_s20, 7  ;;  %p19910_p5 = pnand %p25754_p10, %p19880_p12 }
  0x85   : > { %s19904_s14 = scalar_lea.hbm %s25730_s0, %s17015_s16  ;;  %s287_s3 = sand.u32 1, %s19636_s7  }
  0x86   : > { %s19915_s6 = scalar_lea.sflag [#allocation5], %s264_s21  ;;  %s19442_s9 = scalar_lea.hbm %s19904_s14, 2048 }
  0x87   : > { %p19443_p7 = scmp.ne.s32.totalorder %s19904_s14, %s19442_s9  ;;  %p19444_p9 = pneg %p19910_p5 }
  0x88   : > { %s19447_s27 = scalar_lea.hbm %s25730_s0, 8192  ;;  %p19448_p1 = scmp.lt.u32.totalorder %s19904_s14, %s25730_s0 }
  0x89   : > { %p19445_p11 = pnand %p19444_p9, %p19443_p7  ;;  %p19449_p4 = scmp.lt.u32.totalorder %s19447_s27, %s19442_s9 }
  0x8a   : > { %p19451_p12 = scmp.lt.u32.totalorder %s19442_s9, %s19904_s14 }
  0x8b   : > { %p19446_p0 = pneg %p19445_p11  ;;  %p19450_p6 = por %p19449_p4, %p19448_p1 }
  0x8d   : > { %p19452_p2 = por %p19451_p12, %p19450_p6 }
  0x8f   : > { %p19453_p10 = pnand %p19452_p2, %p19446_p0 }
  0x91   : > { %19456 = shalt.err (!%p19453_p10)
}
  0x92   : > { %s19457_s21 = scalar_lea.vmem %s19899_s4, 2048  ;;  %s19645_s15 = smov [#allocation4]  }
  0x93   : > { %p19458_p7 = scmp.ne.s32.totalorder %s19899_s4, %s19457_s21  ;;  %s19462_s18 = sshll.u32 %s19645_s15, 4  ;;  %s19463_s18 = int_to_ptr.vmem [resolvable:$false] %s19462_s18 }
  0x94   : > { %s19464_s20 = scalar_lea.vmem %s19463_s18, 4096  ;;  %p19465_p13 = scmp.lt.s32.totalorder %s19899_s4, %s19463_s18 }
  0x95   : > { %p19460_p11 = pnand %p19458_p7, %p19444_p9  ;;  %p19466_p1 = scmp.lt.s32.totalorder %s19464_s20, %s19457_s21 }
  0x97   : > { %p19461_p3 = pneg %p19460_p11  ;;  %p19467_p4 = por %p19466_p1, %p19465_p13 }
  0x99   : > { %p19468_p6 = pnand %p19467_p4, %p19461_p3 }
  0x9b   : > { %19471 = shalt.err (!%p19468_p6)
}
  0x9c   : > { %18850 = dma.hbm_to_vmem [thread:$0]  (!%p19910_p5), %s19904_s14, 2048, %s19899_s4, %s19915_s6, %s26025_s28, %s26025_s28, %s26024_s12  }
  0x9d   : > { %s73_s9 = sadd.s32 1, %s19604_s23  ;;  %p80_p3 = scmp.ne.s32.totalorder %s19604_s23, %s19600_s22 }
  0x9e   : > { %p26033_p10 = scmp.eq.s32.totalorder %s19891_s17, 0  ;;  %p26034_p13 = scmp.eq.s32.totalorder %s19636_s7, 0 }
  0x9f   : > { %s289_s11 = sand.u32 1, %s19604_s23   ;;  %s17450_s16 = sshll.u32 %s19632_s30, 12 }
  0xa0   : > { %s19952_s5 = scalar_select %p26033_p10, %s19604_s23, %s73_s9  }
  0xa1   : > { %p82_p9 = por %p80_p3, %p26034_p13  ;;  %s17016_s27 = sshll.u32 %s289_s11, 8 }
  0xa2   : > { %s19961_s21 = scalar_lea.hbm %s25731_s1, %s17450_s16  ;;  %p26035_p0 = scmp.lt.s32.totalorder %s19636_s7, 4 }
  0xa3   : > { %s291_s14 = scalar_lea.vmem [#allocation7], %s17016_s27  ;;  %s19973_s6 = scalar_lea.sflag [#allocation8], %s287_s3 }
  0xa4   : > { %p19965_p5 = pnand %p26035_p0, %p82_p9  ;;  %s298_s17 = sshll.u32 %s291_s14, 4  ;;  %s19969_s17 = int_to_ptr.vmem [resolvable:$true] %s298_s17 }
  0xa5   : > { %s19472_s15 = scalar_lea.hbm %s19961_s21, 4096  ;;  %s19477_s9 = scalar_lea.hbm %s25731_s1, 8192 }
  0xa6   : > { %p19473_p12 = scmp.ne.s32.totalorder %s19961_s21, %s19472_s15  ;;  %p19474_p2 = pneg %p19965_p5 }
  0xa7   : > { %p19478_p1 = scmp.lt.u32.totalorder %s19961_s21, %s25731_s1  ;;  %p19479_p4 = scmp.lt.u32.totalorder %s19477_s9, %s19472_s15 }
  0xa8   : > { %p19475_p7 = pnand %p19474_p2, %p19473_p12  ;;  %p19481_p3 = scmp.lt.u32.totalorder %s19472_s15, %s19961_s21 }
  0xa9   : > { %p19480_p6 = por %p19479_p4, %p19478_p1 }
  0xaa   : > { %p19476_p11 = pneg %p19475_p7 }
  0xab   : > { %p19482_p10 = por %p19481_p3, %p19480_p6 }
  0xad   : > { %p19483_p13 = pnand %p19482_p10, %p19476_p11 }
  0xaf   : > { %19486 = shalt.err (!%p19483_p13)
}
  0xb0   : > { %s19487_s3 = scalar_lea.vmem %s19969_s17, 4096  ;;  %s19646_s27 = smov [#allocation7]  }
  0xb1   : > { %p19488_p9 = scmp.ne.s32.totalorder %s19969_s17, %s19487_s3  ;;  %s19492_s24 = sshll.u32 %s19646_s27, 4  ;;  %s19493_s24 = int_to_ptr.vmem [resolvable:$false] %s19492_s24 }
  0xb2   : > { %s19494_s19 = scalar_lea.vmem %s19493_s24, 8192  ;;  %p19495_p7 = scmp.lt.s32.totalorder %s19969_s17, %s19493_s24 }
  0xb3   : > { %p19490_p0 = pnand %p19488_p9, %p19474_p2  ;;  %p19496_p1 = scmp.lt.s32.totalorder %s19494_s19, %s19487_s3 }
  0xb5   : > { %p19491_p12 = pneg %p19490_p0  ;;  %p19497_p4 = por %p19496_p1, %p19495_p7 }
  0xb7   : > { %p19498_p6 = pnand %p19497_p4, %p19491_p12 }
  0xb9   : > { %19501 = shalt.err (!%p19498_p6)
}
  0xba   : > { %18853 = dma.hbm_to_vmem [thread:$0]  (!%p19965_p5), %s19961_s21, 4096, %s19969_s17, %s19973_s6, %s26025_s28, %s26025_s28, %s26024_s12  }
  0xbb   : > { %p26037_p2 = scmp.ne.s32.totalorder %s26018_s13, 0 }
  0xbd   : > { %310 = sbr.rel (%p26037_p2) target bundleno = 2685 (0xa7d), region = 44 }
  0xc4   : > { %s20007_s14 = sand.u32 1, %s19612_s25   ;;  %p26038_p11 = scmp.ne.s32.totalorder %s26013_s10, 0 }
  0xc5   : > { %s17020_s15 = sshll.u32 %s20007_s14, 7  ;;  %s313_s18 = scalar_lea.sflag [#allocation5], %s20007_s14 }
  0xc6   : > { %s20011_s20 = scalar_lea.vmem [#allocation4], %s17020_s15 }
  0xc7   : > { %19575 = dma.done.wait (%p26038_p11), %s313_s18, 2048  }
  0xc8   : > { %19577 = vsyncadd (%p26038_p11), %s313_s18, 4294965248  ;;  %s26039_s12 = sld [smem:[#allocation22_spill]]  ;;  %s321_s13 = sand.u32 1, %s19750_s8  }
  0xc9   : > { %s323_s28 = sand.u32 1, %s19600_s22   ;;  %s322_s4 = scalar_lea.sflag [#allocation8], %s321_s13 }
  0xca   : > { %s17021_s21 = sshll.u32 %s323_s28, 8 }
  0xcb   : > { %s20019_s17 = scalar_lea.vmem [#allocation7], %s17021_s21 }
  0xce   : > { %p26040_p5 = scmp.ne.s32.totalorder %s26039_s12, 0 }
  0xd0   : > { %19579 = dma.done.wait (%p26040_p5), %s322_s4, 4096  }
  0xd1   : > { %19581 = vsyncadd (%p26040_p5), %s322_s4, 4294963200  ;;  %p26041_p3 = scmp.eq.s32.totalorder %s19750_s8, 0 }
  0xd3   : > { %19583 = dma.done.wait (%p26041_p3), [#allocation8], 2048   ;;  %p26042_p10 = pmov %p26041_p3 }
  0xd4   : > { %p26043_p13 = pmov %p26041_p3 }
  0xd5   : > { %19585 = vsyncadd (%p26042_p10), [#allocation8], 4294965248 }
  0xd6   : > { %19587 = dma.done.wait (%p26043_p13), [#allocation11], 6144   ;;  %p26044_p9 = pmov %p26041_p3 }
  0xd7   : > { %s20033_s10 = scalar_lea.vmem [#allocation13], %s17020_s15  ;;  %s26045_s6 = sld [smem:[#allocation20_spill]] }
  0xd8   : > { %19589 = vsyncadd (%p26044_p9), [#allocation11], 4294961152 }
  0xdd   : > { %p17026_p0 = scmp.ne.s32.totalorder %s26045_s6, 0 }
  0xdf   : > { %376 = sbr.rel (%p17026_p0) target bundleno = 1236 (0x4d4), region = 68 }
  0xe6   : > { %v410_v0 = vld [vmem:[#allocation10 + $0x8] sm:$0xff]  ;;  %v412_v1 = vld [vmem:[#allocation10 + $0x18] sm:$0xff]  ;;  %v409_v2 = vld [vmem:[#allocation10] sm:$0xff]  ;;  %v19647_v7 = vmov 0.0   ;;  %s19648_s8 = smov 96   ;;  %s19649_s9 = smov 64  }
  0xe7   : > { %v18323_v3 = vpack.c.bf16 %v412_v1, %v410_v0  ;;  %v411_v4 = vld [vmem:[#allocation10 + $0x10] sm:$0xff]  ;;  %v414_v5 = vld [vmem:[#allocation10 + $0x28] sm:$0xff]  ;;  %v416_v6 = vld [vmem:[#allocation10 + $0x38] sm:$0xff]  ;;  %505 = vmatprep.mubr.f32.mxu0 %v19647_v7  ;;  %601 = vmatprep.mubr.f32.mxu1 %v19647_v7  ;;  %s19650_s11 = smov 32   ;;  %vm5370_vm0 = vcmask 261120  }
  0xe8   : > { %v18325_v8 = vpack.c.bf16 %v411_v4, %v409_v2  ;;  %v18327_v9 = vpack.c.bf16 %v416_v6, %v414_v5  ;;  %v413_v10 = vld [vmem:[#allocation10 + $0x20] sm:$0xff]  ;;  %v415_v11 = vld [vmem:[#allocation10 + $0x30] sm:$0xff]  ;;  %v418_v12 = vld [vmem:[#allocation10 + $0x48] sm:$0xff] }
  0xe9   : > { %18324 = vmatprep.subr.bf16.mxu0 %v18323_v3  ;;  %18739 = vmatprep.subr.bf16.mxu1 %v18323_v3  ;;  %v420_v13 = vld [vmem:[#allocation10 + $0x58] sm:$0xff]  ;;  %v18329_v14 = vpack.c.bf16 %v415_v11, %v413_v10  ;;  %v417_v16 = vld [vmem:[#allocation10 + $0x40] sm:$0xff]  ;;  %v419_v17 = vld [vmem:[#allocation10 + $0x50] sm:$0xff] }
  0xea   : > { %18326 = vmatpush1.bf16.msra.mxu0 %v18325_v8  ;;  %18747 = vmatpush1.bf16.msra.mxu1 %v18325_v8  ;;  %v18331_v15 = vpack.c.bf16 %v420_v13, %v418_v12  ;;  %v422_v18 = vld [vmem:[#allocation10 + $0x68] sm:$0xff]  ;;  %v424_v19 = vld [vmem:[#allocation10 + $0x78] sm:$0xff]  ;;  %v18333_v20 = vpack.c.bf16 %v419_v17, %v417_v16  ;;  %v421_v22 = vld [vmem:[#allocation10 + $0x60] sm:$0xff] }
  0xeb   : > { %18328 = vmatprep.subr.bf16.mxu0 %v18327_v9  ;;  %18740 = vmatprep.subr.bf16.mxu1 %v18327_v9  ;;  %v18335_v21 = vpack.c.bf16 %v424_v19, %v422_v18  ;;  %v423_v23 = vld [vmem:[#allocation10 + $0x70] sm:$0xff]  ;;  %v426_v24 = vld [vmem:[#allocation10 + $0x88] sm:$0xff]  ;;  %v428_v25 = vld [vmem:[#allocation10 + $0x98] sm:$0xff] }
  0xec   : > { %v18337_v26 = vpack.c.bf16 %v423_v23, %v421_v22  ;;  %v18339_v27 = vpack.c.bf16 %v428_v25, %v426_v24  ;;  %v425_v28 = vld [vmem:[#allocation10 + $0x80] sm:$0xff]  ;;  %v427_v29 = vld [vmem:[#allocation10 + $0x90] sm:$0xff]  ;;  %v430_v30 = vld [vmem:[#allocation10 + $0xa8] sm:$0xff] }
  0xed   : > { %v432_v31 = vld [vmem:[#allocation10 + $0xb8] sm:$0xff]  ;;  %v18341_v32 = vpack.c.bf16 %v427_v29, %v425_v28  ;;  %v429_v34 = vld [vmem:[#allocation10 + $0xa0] sm:$0xff]  ;;  %v431_v35 = vld [vmem:[#allocation10 + $0xb0] sm:$0xff] }
  0xee   : > { %18330 = vmatpush1.bf16.msra.mxu0 %v18329_v14  ;;  %18748 = vmatpush1.bf16.msra.mxu1 %v18329_v14  ;;  %v18343_v33 = vpack.c.bf16 %v432_v31, %v430_v30  ;;  %v434_v36 = vld [vmem:[#allocation10 + $0xc8] sm:$0xff]  ;;  %v436_v37 = vld [vmem:[#allocation10 + $0xd8] sm:$0xff]  ;;  %v18345_v38 = vpack.c.bf16 %v431_v35, %v429_v34  ;;  %v433_v40 = vld [vmem:[#allocation10 + $0xc0] sm:$0xff] }
  0xef   : > { %18332 = vmatprep.subr.bf16.mxu0 %v18331_v15  ;;  %18741 = vmatprep.subr.bf16.mxu1 %v18331_v15  ;;  %v18347_v39 = vpack.c.bf16 %v436_v37, %v434_v36  ;;  %v435_v41 = vld [vmem:[#allocation10 + $0xd0] sm:$0xff]  ;;  %v438_v42 = vld [vmem:[#allocation10 + $0xe8] sm:$0xff]  ;;  %v440_v43 = vld [vmem:[#allocation10 + $0xf8] sm:$0xff] }
  0xf0   : > { %v18349_v44 = vpack.c.bf16 %v435_v41, %v433_v40  ;;  %v18351_v45 = vpack.c.bf16 %v440_v43, %v438_v42  ;;  %v437_v46 = vld [vmem:[#allocation10 + $0xe0] sm:$0xff]  ;;  %v439_v47 = vld [vmem:[#allocation10 + $0xf0] sm:$0xff]  ;;  %v394_v51 = vld [vmem:[%s20019_s17 + $0x88] sm:$0xff] }
  0xf1   : > { %v18353_v48 = vpack.c.bf16 %v439_v47, %v437_v46  ;;  %v377_v49 = vld [vmem:[%s20019_s17] sm:$0xff]  ;;  %v378_v52 = vld [vmem:[%s20019_s17 + $0x8] sm:$0xff]  ;;  %v379_v53 = vld [vmem:[%s20019_s17 + $0x10] sm:$0xff] }
  0xf2   : > { %18334 = vmatpush1.bf16.msra.mxu0 %v18333_v20  ;;  %18749 = vmatpush1.bf16.msra.mxu1 %v18333_v20  ;;  %v393_v50 = vld [vmem:[%s20019_s17 + $0x80] sm:$0xff]  ;;  %v395_v54 = vld [vmem:[%s20019_s17 + $0x90] sm:$0xff]  ;;  %v380_v55 = vld [vmem:[%s20019_s17 + $0x18] sm:$0xff] }
  0xf3   : > { %18336 = vmatprep.subr.bf16.mxu0 %v18335_v21  ;;  %18742 = vmatprep.subr.bf16.mxu1 %v18335_v21  ;;  %v396_v56 = vld [vmem:[%s20019_s17 + $0x98] sm:$0xff]  ;;  %v381_v57 = vld [vmem:[%s20019_s17 + $0x20] sm:$0xff]  ;;  %v382_v59 = vld [vmem:[%s20019_s17 + $0x28] sm:$0xff] }
  0xf4   : > { %v397_v58 = vld [vmem:[%s20019_s17 + $0xa0] sm:$0xff]  ;;  %v398_v60 = vld [vmem:[%s20019_s17 + $0xa8] sm:$0xff]  ;;  %v383_v61 = vld [vmem:[%s20019_s17 + $0x30] sm:$0xff] }
  0xf5   : > { %v399_v62 = vld [vmem:[%s20019_s17 + $0xb0] sm:$0xff]  ;;  %v384_v63 = vld [vmem:[%s20019_s17 + $0x38] sm:$0xff]  ;;  %v385_v1 = vld [vmem:[%s20019_s17 + $0x40] sm:$0xff] }
  0xf6   : > { %18338 = vmatpush1.bf16.msra.mxu0 %v18337_v26  ;;  %18750 = vmatpush1.bf16.msra.mxu1 %v18337_v26  ;;  %v400_v0 = vld [vmem:[%s20019_s17 + $0xb8] sm:$0xff]  ;;  %v401_v2 = vld [vmem:[%s20019_s17 + $0xc0] sm:$0xff]  ;;  %v386_v3 = vld [vmem:[%s20019_s17 + $0x48] sm:$0xff] }
  0xf7   : > { %18340 = vmatprep.subr.bf16.mxu0 %v18339_v27  ;;  %18743 = vmatprep.subr.bf16.mxu1 %v18339_v27  ;;  %v402_v4 = vld [vmem:[%s20019_s17 + $0xc8] sm:$0xff]  ;;  %v387_v5 = vld [vmem:[%s20019_s17 + $0x50] sm:$0xff]  ;;  %v388_v8 = vld [vmem:[%s20019_s17 + $0x58] sm:$0xff] }
  0xf8   : > { %v403_v6 = vld [vmem:[%s20019_s17 + $0xd0] sm:$0xff]  ;;  %v404_v9 = vld [vmem:[%s20019_s17 + $0xd8] sm:$0xff]  ;;  %v389_v10 = vld [vmem:[%s20019_s17 + $0x60] sm:$0xff] }
  0xf9   : > { %v390_v11 = vld [vmem:[%s20019_s17 + $0x68] sm:$0xff]  ;;  %v405_v12 = vld [vmem:[%s20019_s17 + $0xe0] sm:$0xff]  ;;  %v391_v14 = vld [vmem:[%s20019_s17 + $0x70] sm:$0xff] }
  0xfa   : > { %18342 = vmatpush1.bf16.msra.mxu0 %v18341_v32  ;;  %18751 = vmatpush1.bf16.msra.mxu1 %v18341_v32  ;;  %v406_v13 = vld [vmem:[%s20019_s17 + $0xe8] sm:$0xff]  ;;  %v407_v15 = vld [vmem:[%s20019_s17 + $0xf0] sm:$0xff]  ;;  %v392_v16 = vld [vmem:[%s20019_s17 + $0x78] sm:$0xff] }
  0xfb   : > { %18344 = vmatprep.subr.bf16.mxu0 %v18343_v33  ;;  %18744 = vmatprep.subr.bf16.mxu1 %v18343_v33  ;;  %v408_v17 = vld [vmem:[%s20019_s17 + $0xf8] sm:$0xff] }
  0xfe   : > { %18346 = vmatpush1.bf16.msra.mxu0 %v18345_v38  ;;  %18752 = vmatpush1.bf16.msra.mxu1 %v18345_v38 }
  0xff   : > { %18348 = vmatprep.subr.bf16.mxu0 %v18347_v39  ;;  %18745 = vmatprep.subr.bf16.mxu1 %v18347_v39 }
 0x102   : > { %18350 = vmatpush1.bf16.msra.mxu0 %v18349_v44  ;;  %18753 = vmatpush1.bf16.msra.mxu1 %v18349_v44 }
 0x103   : > { %18352 = vmatprep.subr.bf16.mxu0 %v18351_v45  ;;  %18746 = vmatprep.subr.bf16.mxu1 %v18351_v45 }
 0x106   : > { %18354 = vmatpush1.bf16.msra.mxu0 %v18353_v48  ;;  %18754 = vmatpush1.bf16.msra.mxu1 %v18353_v48 }
 0x109   : > { %506 = vmatmul.mubr.f32.vlgmr.msra.gmra.mrb[0].mxu0 %v377_v49  ;;  %602 = vmatmul.mubr.f32.vlgmr.msra.gmra.mrb[0].mxu1 %v393_v50 }
 0x10a   : > { %607 = vmatprep.mubr.f32.mxu1 %v19647_v7  ;;  %511 = vmatprep.mubr.f32.mxu0 %v19647_v7 }
 0x10d   : > { %608 = vmatmul.mubr.f32.gmra.mrb[2].mxu1 %v394_v51  ;;  %512 = vmatmul.mubr.f32.gmra.mrb[2].mxu0 %v378_v52 }
 0x10e   : > { %517 = vmatprep.mubr.f32.mxu0 %v19647_v7  ;;  %613 = vmatprep.mubr.f32.mxu1 %v19647_v7 }
 0x111   : > { %518 = vmatmul.mubr.f32.gmra.mrb[4].mxu0 %v379_v53  ;;  %614 = vmatmul.mubr.f32.gmra.mrb[4].mxu1 %v395_v54 }
 0x112   : > { %523 = vmatprep.mubr.f32.mxu0 %v19647_v7  ;;  %619 = vmatprep.mubr.f32.mxu1 %v19647_v7 }
 0x115   : > { %524 = vmatmul.mubr.f32.gmra.mrb[6].mxu0 %v380_v55  ;;  %620 = vmatmul.mubr.f32.gmra.mrb[6].mxu1 %v396_v56 }
 0x116   : > { %529 = vmatprep.mubr.f32.mxu0 %v19647_v7  ;;  %625 = vmatprep.mubr.f32.mxu1 %v19647_v7 }
 0x119   : > { %530 = vmatmul.mubr.f32.gmra.mrb[8].mxu0 %v381_v57  ;;  %626 = vmatmul.mubr.f32.gmra.mrb[8].mxu1 %v397_v58 }
 0x11a   : > { %535 = vmatprep.mubr.f32.mxu0 %v19647_v7  ;;  %631 = vmatprep.mubr.f32.mxu1 %v19647_v7 }
 0x11d   : > { %536 = vmatmul.mubr.f32.gmra.mrb[10].mxu0 %v382_v59  ;;  %632 = vmatmul.mubr.f32.gmra.mrb[10].mxu1 %v398_v60 }
 0x11e   : > { %541 = vmatprep.mubr.f32.mxu0 %v19647_v7  ;;  %637 = vmatprep.mubr.f32.mxu1 %v19647_v7 }
 0x121   : > { %542 = vmatmul.mubr.f32.gmra.mrb[12].mxu0 %v383_v61  ;;  %638 = vmatmul.mubr.f32.gmra.mrb[12].mxu1 %v399_v62 }
 0x122   : > { %547 = vmatprep.mubr.f32.mxu0 %v19647_v7  ;;  %643 = vmatprep.mubr.f32.mxu1 %v19647_v7 }
 0x125   : > { %548 = vmatmul.mubr.f32.gmra.mrb[14].mxu0 %v384_v63  ;;  %644 = vmatmul.mubr.f32.gmra.mrb[14].mxu1 %v400_v0 }
 0x126   : > { %553 = vmatprep.mubr.f32.mxu0 %v19647_v7  ;;  %649 = vmatprep.mubr.f32.mxu1 %v19647_v7 }
 0x129   : > { %554 = vmatmul.mubr.f32.gmra.mrb[16].mxu0 %v385_v1  ;;  %650 = vmatmul.mubr.f32.gmra.mrb[16].mxu1 %v401_v2 }
 0x12a   : > { %559 = vmatprep.mubr.f32.mxu0 %v19647_v7  ;;  %655 = vmatprep.mubr.f32.mxu1 %v19647_v7 }
 0x12d   : > { %560 = vmatmul.mubr.f32.gmra.mrb[18].mxu0 %v386_v3  ;;  %656 = vmatmul.mubr.f32.gmra.mrb[18].mxu1 %v402_v4  ;;  %v19651_v4 = vmov 1983009808  }
 0x12e   : > { %565 = vmatprep.mubr.f32.mxu0 %v19647_v7  ;;  %661 = vmatprep.mubr.f32.mxu1 %v19647_v7 }
 0x131   : > { %566 = vmatmul.mubr.f32.gmra.mrb[20].mxu0 %v387_v5  ;;  %662 = vmatmul.mubr.f32.gmra.mrb[20].mxu1 %v403_v6  ;;  %v1021_v5 = vunpack.c.l.s4 %v19651_v4  ;;  %v1023_v6 = vlaneseq }
 0x132   : > { %571 = vmatprep.mubr.f32.mxu0 %v19647_v7  ;;  %667 = vmatprep.mubr.f32.mxu1 %v19647_v7 }
 0x135   : > { %572 = vmatmul.mubr.f32.gmra.mrb[22].mxu0 %v388_v8  ;;  %668 = vmatmul.mubr.f32.gmra.mrb[22].mxu1 %v404_v9 }
 0x136   : > { %577 = vmatprep.mubr.f32.mxu0 %v19647_v7  ;;  %673 = vmatprep.mubr.f32.mxu1 %v19647_v7 }
 0x139   : > { %578 = vmatmul.mubr.f32.gmra.mrb[24].mxu0 %v389_v10  ;;  %674 = vmatmul.mubr.f32.gmra.mrb[24].mxu1 %v405_v12  ;;  %v19652_v10 = vmov 1934713408   ;;  %v1022_v12 = vunpack.c.0.s8 %v1021_v5 }
 0x13a   : > { %583 = vmatprep.mubr.f32.mxu0 %v19647_v7  ;;  %679 = vmatprep.mubr.f32.mxu1 %v19647_v7 }
 0x13d   : > { %584 = vmatmul.mubr.f32.gmra.mrb[26].mxu0 %v390_v11  ;;  %680 = vmatmul.mubr.f32.gmra.mrb[26].mxu1 %v406_v13  ;;  %v1053_v11 = vunpack.c.l.s4 %v19652_v10  ;;  %v1024_v13 = vshrl.u32 %v1023_v6, 7 }
 0x13e   : > { %589 = vmatprep.mubr.f32.mxu0 %v19647_v7  ;;  %685 = vmatprep.mubr.f32.mxu1 %v19647_v7 }
 0x13f   : > { %v20344_v6 = vsub.s32 %v1022_v12, %v1024_v13 }
 0x141   : > { %590 = vmatmul.mubr.f32.gmra.mrb[28].mxu0 %v391_v14  ;;  %686 = vmatmul.mubr.f32.gmra.mrb[28].mxu1 %v407_v15 }
 0x142   : > { %595 = vmatprep.mubr.f32.mxu0 %v19647_v7  ;;  %691 = vmatprep.mubr.f32.mxu1 %v19647_v7 }
 0x145   : > { %596 = vmatmul.mubr.f32.gmra.mrb[30].mxu0 %v392_v16  ;;  %692 = vmatmul.mubr.f32.gmra.mrb[30].mxu1 %v408_v17 }
 0x1dc   : > { %v20100_v18 = vpop.f32.mrb[0].mxu0  ;;  %v20102_v19 = vpop.f32.mrb[0].mxu1 }
 0x1dd   : > { %v20104_v20 = vpop.f32.mrb[1].mxu1  ;;  %730 = vrot.lane.b32.xlu0 %v20100_v18, %s19648_s8  ;;  %v20108_v21 = vpop.f32.mrb[1].mxu0 }
 0x1de   : > { %26046 = vst [vmem:[#allocation27_spill] sm:$0xff] %v20104_v20  ;;  %26047 = vst [vmem:[#allocation28_spill] sm:$0xff] %v20108_v21 }
 0x1e0   : > { %v20110_v22 = vpop.f32.mrb[2].mxu1  ;;  %v20112_v23 = vpop.f32.mrb[2].mxu0 }
 0x1e1   : > { %764 = vrot.lane.b32.xlu1 %v20110_v22, %s19648_s8  ;;  %v20116_v7 = vpop.f32.mrb[3].mxu1  ;;  %762 = vrot.lane.b32.xlu0 %v20102_v19, %s19648_s8  ;;  %v20120_v24 = vpop.f32.mrb[3].mxu0 }
 0x1e2   : > { %26048 = vst [vmem:[#allocation29_spill] sm:$0xff] %v20116_v7  ;;  %26049 = vst [vmem:[#allocation30_spill] sm:$0xff] %v20120_v24 }
 0x1e4   : > { %v20122_v25 = vpop.f32.mrb[4].mxu0  ;;  %v20124_v26 = vpop.f32.mrb[4].mxu1 }
 0x1e5   : > { %826 = vrot.lane.b32.xlu0 %v20100_v18, %s19649_s9  ;;  %828 = vrot.lane.b32.xlu1 %v20112_v23, %s19649_s9  ;;  %v20130_v27 = vpop.f32.mrb[5].mxu0  ;;  %v20132_v28 = vpop.f32.mrb[5].mxu1 }
 0x1e6   : > { %26050 = vst [vmem:[#allocation31_spill] sm:$0xff] %v20132_v28 }
 0x1e8   : > { %v20134_v29 = vpop.f32.mrb[6].mxu0  ;;  %v20136_v30 = vpop.f32.mrb[6].mxu1 }
 0x1e9   : > { %858 = vrot.lane.b32.xlu0 %v20102_v19, %s19649_s9  ;;  %860 = vrot.lane.b32.xlu1 %v20110_v22, %s19649_s9  ;;  %v20142_v31 = vpop.f32.mrb[7].mxu0  ;;  %v20144_v32 = vpop.f32.mrb[7].mxu1 }
 0x1ea   : > { %26051 = vst [vmem:[#allocation32_spill] sm:$0xff] %v20144_v32 }
 0x1ec   : > { %v20146_v33 = vpop.f32.mrb[8].mxu0  ;;  %v20148_v34 = vpop.f32.mrb[8].mxu1 }
 0x1ed   : > { %922 = vrot.lane.b32.xlu0 %v20100_v18, %s19650_s11  ;;  %924 = vrot.lane.b32.xlu1 %v20112_v23, %s19650_s11  ;;  %v20154_v35 = vpop.f32.mrb[9].mxu0  ;;  %v20156_v36 = vpop.f32.mrb[9].mxu1 }
 0x1ee   : > { %26052 = vst [vmem:[#allocation33_spill] sm:$0xff] %v20154_v35  ;;  %26053 = vst [vmem:[#allocation34_spill] sm:$0xff] %v20156_v36 }
 0x1f0   : > { %v20158_v37 = vpop.f32.mrb[10].mxu0  ;;  %v20160_v38 = vpop.f32.mrb[10].mxu1 }
 0x1f1   : > { %26054 = vst [vmem:[#allocation35_spill] sm:$0xff] %v20160_v38  ;;  %954 = vrot.lane.b32.xlu0 %v20102_v19, %s19650_s11  ;;  %956 = vrot.lane.b32.xlu1 %v20110_v22, %s19650_s11  ;;  %v20166_v39 = vpop.f32.mrb[11].mxu0  ;;  %v20168_v40 = vpop.f32.mrb[11].mxu1 }
 0x1f2   : > { %26055 = vst [vmem:[#allocation36_spill] sm:$0xff] %v20166_v39  ;;  %26056 = vst [vmem:[#allocation37_spill] sm:$0xff] %v20168_v40 }
 0x1f4   : > { %v20170_v41 = vpop.f32.mrb[12].mxu0  ;;  %v20172_v42 = vpop.f32.mrb[12].mxu1 }
 0x1f5   : > { %26057 = vst [vmem:[#allocation38_spill] sm:$0xff] %v20170_v41  ;;  %5531 = vrot.lane.b32.xlu0 %v20108_v21, %s19648_s8  ;;  %5533 = vrot.lane.b32.xlu1 %v20120_v24, %s19648_s8  ;;  %v20178_v43 = vpop.f32.mrb[13].mxu0  ;;  %v20180_v44 = vpop.f32.mrb[13].mxu1 }
 0x1f8   : > { %v20182_v45 = vpop.f32.mrb[14].mxu0  ;;  %v20184_v46 = vpop.f32.mrb[14].mxu1 }
 0x1f9   : > { %26058 = vst [vmem:[#allocation39_spill] sm:$0xff] %v20182_v45  ;;  %5563 = vrot.lane.b32.xlu0 %v20104_v20, %s19648_s8  ;;  %5565 = vrot.lane.b32.xlu1 %v20116_v7, %s19648_s8  ;;  %v20190_v47 = vpop.f32.mrb[15].mxu0  ;;  %v20192_v48 = vpop.f32.mrb[15].mxu1 }
 0x1fa   : > { %26059 = vst [vmem:[#allocation40_spill] sm:$0xff] %v20192_v48 }
 0x1fc   : > { %v20206_v49 = vpop.f32.mrb[16].mxu0  ;;  %v20214_v51 = vpop.f32.mrb[16].mxu1 }
 0x1fd   : > { %5627 = vrot.lane.b32.xlu0 %v20108_v21, %s19649_s9  ;;  %5629 = vrot.lane.b32.xlu1 %v20120_v24, %s19649_s9  ;;  %v20208_v50 = vpop.f32.mrb[17].mxu0  ;;  %v20220_v54 = vpop.f32.mrb[17].mxu1 }
 0x200   : > { %v20216_v52 = vpop.f32.mrb[18].mxu0  ;;  %v20226_v55 = vpop.f32.mrb[18].mxu1 }
 0x201   : > { %5659 = vrot.lane.b32.xlu0 %v20104_v20, %s19649_s9  ;;  %5661 = vrot.lane.b32.xlu1 %v20116_v7, %s19649_s9  ;;  %v20218_v53 = vpop.f32.mrb[19].mxu0  ;;  %v20228_v56 = vpop.f32.mrb[19].mxu1 }
 0x204   : > { %v20270_v57 = vpop.f32.mrb[20].mxu0  ;;  %v20272_v58 = vpop.f32.mrb[20].mxu1 }
 0x205   : > { %732 = vrot.lane.b32.xlu0 %v20112_v23, %s19648_s8  ;;  %734 = vrot.lane.b32.xlu1 %v20122_v25, %s19648_s8  ;;  %v20274_v59 = vpop.f32.mrb[21].mxu0  ;;  %v20276_v60 = vpop.f32.mrb[21].mxu1 }
 0x206   : > { %26060 = vst [vmem:[#allocation41_spill] sm:$0xff] %v20274_v59  ;;  %26061 = vst [vmem:[#allocation42_spill] sm:$0xff] %v20276_v60 }
 0x208   : > { %v20278_v61 = vpop.f32.mrb[22].mxu0  ;;  %v20280_v62 = vpop.f32.mrb[22].mxu1 }
 0x209   : > { %766 = vrot.lane.b32.xlu0 %v20124_v26, %s19648_s8  ;;  %736 = vrot.lane.b32.xlu1 %v20134_v29, %s19648_s8  ;;  %v20282_v63 = vpop.f32.mrb[23].mxu0  ;;  %v20284_v0 = vpop.f32.mrb[23].mxu1 }
 0x20a   : > { %26062 = vst [vmem:[#allocation43_spill] sm:$0xff] %v20282_v63  ;;  %26063 = vst [vmem:[#allocation44_spill] sm:$0xff] %v20284_v0 }
 0x20c   : > { %v20328_v14 = vpop.f32.mrb[24].mxu0  ;;  %v20330_v15 = vpop.f32.mrb[24].mxu1 }
 0x20d   : > { %830 = vrot.lane.b32.xlu0 %v20122_v25, %s19649_s9  ;;  %768 = vrot.lane.b32.xlu1 %v20136_v30, %s19648_s8  ;;  %26064 = vst [vmem:[#allocation45_spill] sm:$0xff] %v20328_v14  ;;  %26065 = vst [vmem:[#allocation46_spill] sm:$0xff] %v20330_v15  ;;  %v20332_v4 = vpop.f32.mrb[25].mxu0 }
 0x20e   : > { %26066 = vst [vmem:[#allocation47_spill] sm:$0xff] %v20332_v4 }
 0x210   : > { %v20340_v10 = vpop.f32.mrb[26].mxu0 }
 0x211   : > { %862 = vrot.lane.b32.xlu0 %v20124_v26, %s19649_s9  ;;  %832 = vrot.lane.b32.xlu1 %v20134_v29, %s19649_s9  ;;  %26068 = vst [vmem:[#allocation49_spill] sm:$0xff] %v20340_v10  ;;  %v20348_v4 = vpop.f32.mrb[27].mxu0 }
 0x212   : > { %26070 = vst [vmem:[#allocation51_spill] sm:$0xff] %v20348_v4 }
 0x215   : > { %926 = vrot.lane.b32.xlu0 %v20122_v25, %s19650_s11  ;;  %864 = vrot.lane.b32.xlu1 %v20136_v30, %s19649_s9 }
 0x219   : > { %958 = vrot.lane.b32.xlu0 %v20124_v26, %s19650_s11  ;;  %928 = vrot.lane.b32.xlu1 %v20134_v29, %s19650_s11 }
 0x21d   : > { %5535 = vrot.lane.b32.xlu0 %v20130_v27, %s19648_s8  ;;  %960 = vrot.lane.b32.xlu1 %v20136_v30, %s19650_s11 }
 0x221   : > { %5567 = vrot.lane.b32.xlu0 %v20132_v28, %s19648_s8  ;;  %5537 = vrot.lane.b32.xlu1 %v20142_v31, %s19648_s8 }
 0x225   : > { %5631 = vrot.lane.b32.xlu0 %v20130_v27, %s19649_s9  ;;  %5569 = vrot.lane.b32.xlu1 %v20144_v32, %s19648_s8 }
 0x229   : > { %5663 = vrot.lane.b32.xlu0 %v20132_v28, %s19649_s9  ;;  %5633 = vrot.lane.b32.xlu1 %v20142_v31, %s19649_s9 }
 0x22d   : > { %5665 = vrot.lane.b32.xlu1 %v20144_v32, %s19649_s9  ;;  %738 = vrot.lane.b32.xlu0 %v20146_v33, %s19648_s8 }
 0x231   : > { %770 = vrot.lane.b32.xlu0 %v20148_v34, %s19648_s8  ;;  %740 = vrot.lane.b32.xlu1 %v20158_v37, %s19648_s8 }
 0x235   : > { %834 = vrot.lane.b32.xlu0 %v20146_v33, %s19649_s9  ;;  %772 = vrot.lane.b32.xlu1 %v20160_v38, %s19648_s8 }
 0x239   : > { %866 = vrot.lane.b32.xlu0 %v20148_v34, %s19649_s9  ;;  %836 = vrot.lane.b32.xlu1 %v20158_v37, %s19649_s9 }
 0x23d   : > { %930 = vrot.lane.b32.xlu0 %v20146_v33, %s19650_s11  ;;  %868 = vrot.lane.b32.xlu1 %v20160_v38, %s19649_s9 }
 0x241   : > { %962 = vrot.lane.b32.xlu0 %v20148_v34, %s19650_s11  ;;  %932 = vrot.lane.b32.xlu1 %v20158_v37, %s19650_s11 }
 0x245   : > { %5539 = vrot.lane.b32.xlu0 %v20154_v35, %s19648_s8  ;;  %964 = vrot.lane.b32.xlu1 %v20160_v38, %s19650_s11 }
 0x249   : > { %5571 = vrot.lane.b32.xlu0 %v20156_v36, %s19648_s8  ;;  %5541 = vrot.lane.b32.xlu1 %v20166_v39, %s19648_s8 }
 0x24d   : > { %5635 = vrot.lane.b32.xlu0 %v20154_v35, %s19649_s9  ;;  %5573 = vrot.lane.b32.xlu1 %v20168_v40, %s19648_s8 }
 0x24f   : > { %v731_v1 = vpop.permute.xlu0 %730 }
 0x251   : > { %5667 = vrot.lane.b32.xlu0 %v20156_v36, %s19649_s9  ;;  %5637 = vrot.lane.b32.xlu1 %v20166_v39, %s19649_s9  ;;  %v1054_v39 = vunpack.c.0.s8 %v1053_v11 }
 0x253   : > { %v20314_v2 = vpop.permute.xlu1 %764  ;;  %v20316_v3 = vpop.permute.xlu0 %762  ;;  %v20358_v60 = vsub.s32 %v1054_v39, %v1024_v13 }
 0x255   : > { %5669 = vrot.lane.b32.xlu1 %v20168_v40, %s19649_s9  ;;  %742 = vrot.lane.b32.xlu0 %v20170_v41, %s19648_s8  ;;  %v20334_v40 = vpop.f32.mrb[25].mxu1 }
 0x256   : > { %26067 = vst [vmem:[#allocation48_spill] sm:$0xff] %v20334_v40  ;;  %v20342_v5 = vpop.f32.mrb[26].mxu1 }
 0x257   : > { %v827_v8 = vpop.permute.xlu0 %826  ;;  %v20322_v9 = vpop.permute.xlu1 %828  ;;  %26069 = vst [vmem:[#allocation50_spill] sm:$0xff] %v20342_v5 }
 0x258   : > { %v1018_v36 = vcombine.low %v20100_v18, %v827_v8  ;;  %v1019_v15 = vcombine.high %v20100_v18, %v827_v8  ;;  %v20350_v40 = vpop.f32.mrb[27].mxu1 }
 0x259   : > { %774 = vrot.lane.b32.xlu0 %v20172_v42, %s19648_s8  ;;  %744 = vrot.lane.b32.xlu1 %v20182_v45, %s19648_s8  ;;  %26071 = vst [vmem:[#allocation52_spill] sm:$0xff] %v20350_v40 }
 0x25a   : > { %v1026_v18 = vrot.slane %v1018_v36, %v20344_v6 }
 0x25b   : > { %v859_v16 = vpop.permute.xlu0 %858  ;;  %v861_v17 = vpop.permute.xlu1 %860 }
 0x25c   : > { %v2106_v14 = vcombine.low %v20102_v19, %v859_v16  ;;  %v2107_v35 = vcombine.high %v20102_v19, %v859_v16  ;;  %v2174_v11 = vcombine.low %v20110_v22, %v861_v17  ;;  %v2175_v10 = vcombine.high %v20110_v22, %v861_v17 }
 0x25d   : > { %838 = vrot.lane.b32.xlu0 %v20170_v41, %s19649_s9  ;;  %776 = vrot.lane.b32.xlu1 %v20184_v46, %s19648_s8  ;;  %v1033_v19 = vrot.slane %v1019_v15, %v20344_v6 }
 0x25e   : > { %v2114_v16 = vrot.slane %v2106_v14, %v20344_v6  ;;  %v20371_v39 = vrot.slane %v2174_v11, %v20344_v6 }
 0x25f   : > { %v923_v0 = vpop.permute.xlu0 %922  ;;  %v20356_v5 = vpop.permute.xlu1 %924 }
 0x260   : > { %v1034_v12 = vcombine.low %v731_v1, %v923_v0  ;;  %v1035_v63 = vcombine.high %v731_v1, %v923_v0  ;;  %v2121_v0 = vrot.slane %v2107_v35, %v20344_v6  ;;  %v20374_v1 = vrot.slane %v2175_v10, %v20344_v6 }
 0x261   : > { %870 = vrot.lane.b32.xlu0 %v20172_v42, %s19649_s9  ;;  %840 = vrot.lane.b32.xlu1 %v20182_v45, %s19649_s9 }
 0x262   : > { %v1042_v8 = vrot.slane %v1034_v12, %v20344_v6  ;;  %v1049_v22 = vrot.slane %v1035_v63, %v20344_v6 }
 0x263   : > { %v955_v13 = vpop.permute.xlu0 %954  ;;  %v957_v17 = vpop.permute.xlu1 %956 }
 0x264   : > { %v1050_v40 = vcombine.low %v1026_v18, %v1042_v8  ;;  %v1051_v36 = vcombine.high %v1026_v18, %v1042_v8  ;;  %v1066_v4 = vcombine.low %v1033_v19, %v1049_v22  ;;  %v1067_v15 = vcombine.high %v1033_v19, %v1049_v22 }
 0x265   : > { %v2122_v12 = vcombine.low %v20316_v3, %v955_v13  ;;  %v2123_v63 = vcombine.high %v20316_v3, %v955_v13  ;;  %v2190_v14 = vcombine.low %v20314_v2, %v957_v17  ;;  %v2191_v35 = vcombine.high %v20314_v2, %v957_v17  ;;  %934 = vrot.lane.b32.xlu0 %v20170_v41, %s19650_s11 }
 0x266   : > { %v1058_v10 = vrot.slane %v1050_v40, %v20358_v60  ;;  %v1065_v11 = vrot.slane %v1051_v36, %v20358_v60  ;;  %v1074_v59 = vrot.slane %v1066_v4, %v20358_v60  ;;  %v1081_v18 = vrot.slane %v1067_v15, %v20358_v60  ;;  %872 = vrot.lane.b32.xlu1 %v20184_v46, %s19649_s9 }
 0x267   : > { %v2130_v3 = vrot.slane %v2122_v12, %v20344_v6  ;;  %v2137_v19 = vrot.slane %v2123_v63, %v20344_v6  ;;  %v20391_v2 = vrot.slane %v2190_v14, %v20344_v6  ;;  %v20394_v8 = vrot.slane %v2191_v35, %v20344_v6  ;;  %v20396_v40 = vpop.permute.xlu0 %5531  ;;  %v20398_v22 = vpop.permute.xlu1 %5533 }
 0x268   : > { %26072 = vst [vmem:[#allocation53_spill] sm:$0xff] %v20396_v40  ;;  %26073 = vst [vmem:[#allocation54_spill] sm:$0xff] %v20398_v22  ;;  %v3194_v4 = vcombine.low %v1058_v10, %v1065_v11  ;;  %v17027_v13 = vcombine.high %v1058_v10, %v1065_v11  ;;  %v3210_v17 = vcombine.low %v1074_v59, %v1081_v18 }
 0x269   : > { %v17028_v36 = vcombine.high %v1074_v59, %v1081_v18  ;;  %v2138_v15 = vcombine.low %v2114_v16, %v2130_v3  ;;  %v2139_v41 = vcombine.high %v2114_v16, %v2130_v3  ;;  %v2154_v38 = vcombine.low %v2121_v0, %v2137_v19  ;;  %966 = vrot.lane.b32.xlu0 %v20172_v42, %s19650_s11 }
 0x26a   : > { %v2155_v12 = vcombine.high %v2121_v0, %v2137_v19  ;;  %v3201_v63 = vrot.slane %v3194_v4, %v20344_v6  ;;  %v3209_v14 = vrot.slane %v17027_v13, %v20344_v6  ;;  %v3217_v35 = vrot.slane %v3210_v17, %v20344_v6  ;;  %936 = vrot.lane.b32.xlu1 %v20182_v45, %s19650_s11 }
 0x26b   : > { %v3225_v40 = vrot.slane %v17028_v36, %v20344_v6  ;;  %v2146_v59 = vrot.slane %v2138_v15, %v20358_v60  ;;  %v2153_v16 = vrot.slane %v2139_v41, %v20358_v60  ;;  %v2162_v0 = vrot.slane %v2154_v38, %v20358_v60  ;;  %v20412_v11 = vpop.permute.xlu0 %5563  ;;  %v20414_v18 = vpop.permute.xlu1 %5565 }
 0x26c   : > { %v2169_v10 = vrot.slane %v2155_v12, %v20358_v60  ;;  %26074 = vst [vmem:[#allocation55_spill] sm:$0xff] %v20412_v11  ;;  %26075 = vst [vmem:[#allocation56_spill] sm:$0xff] %v20414_v18  ;;  %v3226_v3 = vcombine.low %v3201_v63, %v3209_v14  ;;  %v3227_v19 = vcombine.high %v3201_v63, %v3209_v14 }
 0x26d   : > { %v3242_v4 = vcombine.low %v3217_v35, %v3225_v40  ;;  %v3243_v13 = vcombine.high %v3217_v35, %v3225_v40  ;;  %v4282_v17 = vcombine.low %v2146_v59, %v2153_v16  ;;  %v17059_v36 = vcombine.high %v2146_v59, %v2153_v16  ;;  %5543 = vrot.lane.b32.xlu0 %v20178_v43, %s19648_s8 }
 0x26e   : > { %v4298_v22 = vcombine.low %v2162_v0, %v2169_v10  ;;  %v17060_v45 = vcombine.high %v2162_v0, %v2169_v10  ;;  %v3234_v41 = vrot.slane %v3226_v3, %v20358_v60  ;;  %v3241_v38 = vrot.slane %v3227_v19, %v20358_v60  ;;  %968 = vrot.lane.b32.xlu1 %v20184_v46, %s19650_s11 }
 0x26f   : > { %v3250_v15 = vrot.slane %v3242_v4, %v20358_v60  ;;  %v3257_v12 = vrot.slane %v3243_v13, %v20358_v60  ;;  %v4289_v40 = vrot.slane %v4282_v17, %v20344_v6  ;;  %v4297_v63 = vrot.slane %v17059_v36, %v20344_v6  ;;  %v20428_v59 = vpop.permute.xlu0 %5627  ;;  %v20430_v16 = vpop.permute.xlu1 %5629 }
 0x270   : > { %v4305_v14 = vrot.slane %v4298_v22, %v20344_v6  ;;  %v4313_v35 = vrot.slane %v17060_v45, %v20344_v6  ;;  %v2206_v45 = vcombine.low %v20371_v39, %v20391_v2  ;;  %v2207_v22 = vcombine.high %v20371_v39, %v20391_v2 }
 0x271   : > { %v3258_v0 = vcombine.low %v3234_v41, %v3250_v15  ;;  %v3259_v10 = vcombine.high %v3234_v41, %v3250_v15  ;;  %v3260_v3 = vcombine.low %v3241_v38, %v3257_v12  ;;  %v3261_v19 = vcombine.high %v3241_v38, %v3257_v12  ;;  %5575 = vrot.lane.b32.xlu0 %v20180_v44, %s19648_s8 }
 0x272   : > { %v4314_v4 = vcombine.low %v4289_v40, %v4297_v63  ;;  %v4315_v13 = vcombine.high %v4289_v40, %v4297_v63  ;;  %v4330_v18 = vcombine.low %v4305_v14, %v4313_v35  ;;  %v4331_v11 = vcombine.high %v4305_v14, %v4313_v35  ;;  %5545 = vrot.lane.b32.xlu1 %v20190_v47, %s19648_s8 }
 0x273   : > { %5371 = vst.msk [vmem:[#allocation2] sm:$0xff] %vm5370_vm0, %v3258_v0  ;;  %5403 = vst.msk [vmem:[#allocation2 + $0x100] sm:$0xff] %vm5370_vm0, %v3259_v10  ;;  %v2222_v17 = vcombine.low %v20374_v1, %v20394_v8  ;;  %v2223_v36 = vcombine.high %v20374_v1, %v20394_v8  ;;  %v20452_v40 = vpop.permute.xlu0 %5659  ;;  %v20454_v39 = vpop.permute.xlu1 %5661  ;;  %v2214_v2 = vrot.slane %v2206_v45, %v20358_v60 }
 0x274   : > { %5435 = vst.msk [vmem:[#allocation2 + $0x200] sm:$0xff] %vm5370_vm0, %v3260_v3  ;;  %5467 = vst.msk [vmem:[#allocation2 + $0x300] sm:$0xff] %vm5370_vm0, %v3261_v19  ;;  %v4322_v41 = vrot.slane %v4314_v4, %v20358_v60  ;;  %v4329_v38 = vrot.slane %v4315_v13, %v20358_v60  ;;  %v4338_v15 = vrot.slane %v4330_v18, %v20358_v60 }
 0x275   : > { %v4345_v12 = vrot.slane %v4331_v11, %v20358_v60  ;;  %v2221_v63 = vrot.slane %v2207_v22, %v20358_v60  ;;  %v2230_v1 = vrot.slane %v2222_v17, %v20358_v60  ;;  %v2237_v8 = vrot.slane %v2223_v36, %v20358_v60  ;;  %5639 = vrot.lane.b32.xlu0 %v20178_v43, %s19649_s9 }
 0x276   : > { %v4346_v14 = vcombine.low %v4322_v41, %v4338_v15  ;;  %v4347_v35 = vcombine.high %v4322_v41, %v4338_v15  ;;  %5577 = vrot.lane.b32.xlu1 %v20192_v48, %s19648_s8  ;;  %v1086_v41 = vcombine.low %v20112_v23, %v20322_v9 }
 0x277   : > { %v4348_v0 = vcombine.low %v4329_v38, %v4345_v12  ;;  %v4349_v10 = vcombine.high %v4329_v38, %v4345_v12  ;;  %v4350_v11 = vcombine.low %v2214_v2, %v2221_v63  ;;  %v17061_v18 = vcombine.high %v2214_v2, %v2221_v63  ;;  %v733_v4 = vpop.permute.xlu0 %732  ;;  %v20468_v13 = vpop.permute.xlu1 %734 }
 0x278   : > { %v4366_v3 = vcombine.low %v2230_v1, %v2237_v8  ;;  %v17062_v19 = vcombine.high %v2230_v1, %v2237_v8  ;;  %5387 = vst.msk [vmem:[#allocation2 + $0x80] sm:$0xff] %vm5370_vm0, %v4346_v14  ;;  %5419 = vst.msk [vmem:[#allocation2 + $0x180] sm:$0xff] %vm5370_vm0, %v4347_v35  ;;  %v1087_v38 = vcombine.high %v20112_v23, %v20322_v9 }
 0x279   : > { %5451 = vst.msk [vmem:[#allocation2 + $0x280] sm:$0xff] %vm5370_vm0, %v4348_v0  ;;  %5483 = vst.msk [vmem:[#allocation2 + $0x380] sm:$0xff] %vm5370_vm0, %v4349_v10  ;;  %v4357_v45 = vrot.slane %v4350_v11, %v20344_v6  ;;  %v4365_v22 = vrot.slane %v17061_v18, %v20344_v6  ;;  %5671 = vrot.lane.b32.xlu0 %v20180_v44, %s19649_s9  ;;  %v5819_v1 = vcombine.low %v20108_v21, %v20428_v59 }
 0x27a   : > { %v4373_v17 = vrot.slane %v4366_v3, %v20344_v6  ;;  %v4381_v36 = vrot.slane %v17062_v19, %v20344_v6  ;;  %5641 = vrot.lane.b32.xlu1 %v20190_v47, %s19649_s9  ;;  %v5820_v8 = vcombine.high %v20108_v21, %v20428_v59  ;;  %v5887_v14 = vcombine.low %v20120_v24, %v20430_v16 }
 0x27b   : > { %v4382_v15 = vcombine.low %v4357_v45, %v4365_v22  ;;  %v4383_v12 = vcombine.high %v4357_v45, %v4365_v22  ;;  %v5888_v23 = vcombine.high %v20120_v24, %v20430_v16  ;;  %v20490_v9 = vpop.permute.xlu0 %766  ;;  %v20492_v35 = vpop.permute.xlu1 %736  ;;  %v6907_v59 = vcombine.low %v20104_v20, %v20452_v40 }
 0x27c   : > { %v4398_v2 = vcombine.low %v4373_v17, %v4381_v36  ;;  %v4399_v63 = vcombine.high %v4373_v17, %v4381_v36  ;;  %v6908_v3 = vcombine.high %v20104_v20, %v20452_v40  ;;  %v1094_v17 = vrot.slane %v1086_v41, %v20344_v6 }
 0x27d   : > { %v4390_v0 = vrot.slane %v4382_v15, %v20358_v60  ;;  %v4397_v10 = vrot.slane %v4383_v12, %v20358_v60  ;;  %746 = vrot.lane.b32.xlu0 %v20206_v49, %s19648_s8  ;;  %v1101_v36 = vrot.slane %v1087_v38, %v20344_v6  ;;  %v1102_v15 = vcombine.low %v733_v4, %v20356_v5 }
 0x27e   : > { %v4406_v11 = vrot.slane %v4398_v2, %v20358_v60  ;;  %v4413_v18 = vrot.slane %v4399_v63, %v20358_v60  ;;  %5673 = vrot.lane.b32.xlu1 %v20192_v48, %s19649_s9  ;;  %v1103_v12 = vcombine.high %v733_v4, %v20356_v5  ;;  %v20517_v63 = vrot.slane %v5819_v1, %v20344_v6  ;;  %v20528_v4 = vpop.f32.mrb[28].mxu0 }
 0x27f   : > { %v831_v2 = vpop.permute.xlu0 %830  ;;  %v20510_v40 = vpop.permute.xlu1 %768  ;;  %v20520_v41 = vrot.slane %v5820_v8, %v20344_v6  ;;  %v20523_v38 = vrot.slane %v5887_v14, %v20344_v6  ;;  %v20526_v5 = vrot.slane %v5888_v23, %v20344_v6  ;;  %v1110_v1 = vrot.slane %v1102_v15, %v20344_v6 }
 0x280   : > { %v4414_v16 = vcombine.low %v4390_v0, %v4406_v11  ;;  %v4415_v19 = vcombine.high %v4390_v0, %v4406_v11  ;;  %v4416_v45 = vcombine.low %v4397_v10, %v4413_v18  ;;  %v4417_v22 = vcombine.high %v4397_v10, %v4413_v18  ;;  %26076 = vst [vmem:[#allocation57_spill] sm:$0xff] %v20517_v63 }
 0x281   : > { %26077 = vst [vmem:[#allocation58_spill] sm:$0xff] %v20520_v41  ;;  %26078 = vst [vmem:[#allocation59_spill] sm:$0xff] %v20523_v38  ;;  %v1117_v11 = vrot.slane %v1103_v12, %v20344_v6  ;;  %778 = vrot.lane.b32.xlu0 %v20214_v51, %s19648_s8  ;;  %v20539_v8 = vrot.slane %v6907_v59, %v20344_v6  ;;  %v20542_v14 = vrot.slane %v6908_v3, %v20344_v6 }
 0x282   : > { %5388 = vst.msk [vmem:[#allocation2 + $0x88] sm:$0xff] %vm5370_vm0, %v4414_v16  ;;  %5420 = vst.msk [vmem:[#allocation2 + $0x188] sm:$0xff] %vm5370_vm0, %v4415_v19  ;;  %v1154_v23 = vcombine.low %v20122_v25, %v831_v2  ;;  %v1155_v18 = vcombine.high %v20122_v25, %v831_v2  ;;  %748 = vrot.lane.b32.xlu1 %v20216_v52, %s19648_s8  ;;  %v20548_v16 = vpop.f32.mrb[29].mxu0  ;;  %v20550_v19 = vpop.f32.mrb[28].mxu1 }
 0x283   : > { %5452 = vst.msk [vmem:[#allocation2 + $0x288] sm:$0xff] %vm5370_vm0, %v4416_v45  ;;  %5484 = vst.msk [vmem:[#allocation2 + $0x388] sm:$0xff] %vm5370_vm0, %v4417_v22  ;;  %v1118_v45 = vcombine.low %v1094_v17, %v1110_v1  ;;  %v1119_v22 = vcombine.high %v1094_v17, %v1110_v1  ;;  %v1134_v15 = vcombine.low %v1101_v36, %v1117_v11  ;;  %v863_v59 = vpop.permute.xlu0 %862  ;;  %v833_v10 = vpop.permute.xlu1 %832 }
 0x284   : > { %26079 = vst [vmem:[#allocation60_spill] sm:$0xff] %v20526_v5  ;;  %26080 = vst [vmem:[#allocation61_spill] sm:$0xff] %v20539_v8  ;;  %v1135_v12 = vcombine.high %v1101_v36, %v1117_v11  ;;  %v2242_v3 = vcombine.low %v20124_v26, %v863_v59  ;;  %v2243_v0 = vcombine.high %v20124_v26, %v863_v59  ;;  %v20556_v2 = vpop.f32.mrb[30].mxu0  ;;  %v20558_v8 = vpop.f32.mrb[29].mxu1 }
 0x285   : > { %26081 = vst [vmem:[#allocation62_spill] sm:$0xff] %v20542_v14  ;;  %26082 = vst [vmem:[#allocation63_spill] sm:$0xff] %v20548_v16  ;;  %v1222_v14 = vcombine.low %v20134_v29, %v833_v10  ;;  %v1223_v25 = vcombine.high %v20134_v29, %v833_v10  ;;  %v1126_v5 = vrot.slane %v1118_v45, %v20358_v60  ;;  %842 = vrot.lane.b32.xlu0 %v20206_v49, %s19649_s9  ;;  %v20566_v26 = vpop.f32.mrb[31].mxu0  ;;  %v20568_v11 = vpop.f32.mrb[30].mxu1 }
 0x286   : > { %26083 = vst [vmem:[#allocation64_spill] sm:$0xff] %v20558_v8  ;;  %v1133_v17 = vrot.slane %v1119_v22, %v20358_v60  ;;  %v1142_v36 = vrot.slane %v1134_v15, %v20358_v60  ;;  %v1149_v1 = vrot.slane %v1135_v12, %v20358_v60  ;;  %26084 = vst [vmem:[#allocation65_spill] sm:$0xff] %v20566_v26  ;;  %780 = vrot.lane.b32.xlu1 %v20226_v55, %s19648_s8  ;;  %v20580_v22 = vpop.f32.mrb[31].mxu1 }
 0x287   : > { %26085 = vst [vmem:[#allocation66_spill] sm:$0xff] %v20568_v11  ;;  %v1162_v29 = vrot.slane %v1154_v23, %v20344_v6  ;;  %v1169_v10 = vrot.slane %v1155_v18, %v20344_v6  ;;  %v20573_v59 = vrot.slane %v2242_v3, %v20344_v6  ;;  %v20576_v45 = vrot.slane %v2243_v0, %v20344_v6  ;;  %v927_v63 = vpop.permute.xlu0 %926  ;;  %v20582_v20 = vpop.permute.xlu1 %864 }
 0x288   : > { %26086 = vst [vmem:[#allocation67_spill] sm:$0xff] %v20580_v22  ;;  %v3262_v15 = vcombine.low %v1126_v5, %v1133_v17  ;;  %v17029_v12 = vcombine.high %v1126_v5, %v1133_v17  ;;  %v3278_v38 = vcombine.low %v1142_v36, %v1149_v1  ;;  %v17030_v41 = vcombine.high %v1142_v36, %v1149_v1 }
 0x289   : > { %v20585_v23 = vrot.slane %v1222_v14, %v20344_v6  ;;  %v20588_v18 = vrot.slane %v1223_v25, %v20344_v6  ;;  %v1170_v0 = vcombine.low %v20468_v13, %v927_v63  ;;  %v1171_v3 = vcombine.high %v20468_v13, %v927_v63  ;;  %874 = vrot.lane.b32.xlu0 %v20214_v51, %s19649_s9 }
 0x28a   : > { %v3269_v24 = vrot.slane %v3262_v15, %v20344_v6  ;;  %v3277_v21 = vrot.slane %v17029_v12, %v20344_v6  ;;  %v3285_v5 = vrot.slane %v3278_v38, %v20344_v6  ;;  %v3293_v17 = vrot.slane %v17030_v41, %v20344_v6  ;;  %844 = vrot.lane.b32.xlu1 %v20216_v52, %s19649_s9 }
 0x28b   : > { %v1178_v14 = vrot.slane %v1170_v0, %v20344_v6  ;;  %v1185_v25 = vrot.slane %v1171_v3, %v20344_v6  ;;  %v959_v15 = vpop.permute.xlu0 %958  ;;  %v929_v12 = vpop.permute.xlu1 %928 }
 0x28c   : > { %v3294_v63 = vcombine.low %v3269_v24, %v3277_v21  ;;  %v3295_v38 = vcombine.high %v3269_v24, %v3277_v21  ;;  %v3310_v1 = vcombine.low %v3285_v5, %v3293_v17  ;;  %v3311_v41 = vcombine.high %v3285_v5, %v3293_v17 }
 0x28d   : > { %v1186_v22 = vcombine.low %v1162_v29, %v1178_v14  ;;  %v1187_v26 = vcombine.high %v1162_v29, %v1178_v14  ;;  %v1202_v0 = vcombine.low %v1169_v10, %v1185_v25  ;;  %v1203_v8 = vcombine.high %v1169_v10, %v1185_v25  ;;  %938 = vrot.lane.b32.xlu0 %v20206_v49, %s19650_s11 }
 0x28e   : > { %v3302_v3 = vrot.slane %v3294_v63, %v20358_v60  ;;  %v3309_v36 = vrot.slane %v3295_v38, %v20358_v60  ;;  %v3318_v16 = vrot.slane %v3310_v1, %v20358_v60  ;;  %v3325_v13 = vrot.slane %v3311_v41, %v20358_v60  ;;  %876 = vrot.lane.b32.xlu1 %v20226_v55, %s19649_s9 }
 0x28f   : > { %v1194_v21 = vrot.slane %v1186_v22, %v20358_v60  ;;  %v1201_v24 = vrot.slane %v1187_v26, %v20358_v60  ;;  %v1210_v5 = vrot.slane %v1202_v0, %v20358_v60  ;;  %v1217_v29 = vrot.slane %v1203_v8, %v20358_v60  ;;  %v20618_v63 = vpop.permute.xlu0 %5535  ;;  %v20620_v38 = vpop.permute.xlu1 %960 }
 0x290   : > { %v3326_v10 = vcombine.low %v3302_v3, %v3318_v16  ;;  %v3327_v17 = vcombine.high %v3302_v3, %v3318_v16  ;;  %v3328_v14 = vcombine.low %v3309_v36, %v3325_v13  ;;  %v3329_v25 = vcombine.high %v3309_v36, %v3325_v13  ;;  %26087 = vst [vmem:[#allocation68_spill] sm:$0xff] %v20618_v63 }
 0x291   : > { %v3330_v1 = vcombine.low %v1194_v21, %v1201_v24  ;;  %v17031_v41 = vcombine.high %v1194_v21, %v1201_v24  ;;  %v3346_v22 = vcombine.low %v1210_v5, %v1217_v29  ;;  %v17032_v48 = vcombine.high %v1210_v5, %v1217_v29  ;;  %970 = vrot.lane.b32.xlu0 %v20214_v51, %s19650_s11 }
 0x292   : > { %5372 = vst.msk [vmem:[#allocation2 + $0x8] sm:$0xff] %vm5370_vm0, %v3326_v10  ;;  %5404 = vst.msk [vmem:[#allocation2 + $0x108] sm:$0xff] %vm5370_vm0, %v3327_v17  ;;  %v2258_v8 = vcombine.low %v20490_v9, %v959_v15  ;;  %v2259_v16 = vcombine.high %v20490_v9, %v959_v15  ;;  %v1238_v26 = vcombine.low %v20492_v35, %v929_v12  ;;  %940 = vrot.lane.b32.xlu1 %v20216_v52, %s19650_s11 }
 0x293   : > { %5436 = vst.msk [vmem:[#allocation2 + $0x208] sm:$0xff] %vm5370_vm0, %v3328_v14  ;;  %5468 = vst.msk [vmem:[#allocation2 + $0x308] sm:$0xff] %vm5370_vm0, %v3329_v25  ;;  %v1239_v36 = vcombine.high %v20492_v35, %v929_v12  ;;  %v3337_v13 = vrot.slane %v3330_v1, %v20344_v6  ;;  %v3345_v0 = vrot.slane %v17031_v41, %v20344_v6  ;;  %v20642_v24 = vpop.permute.xlu0 %5567  ;;  %v20644_v5 = vpop.permute.xlu1 %5537 }
 0x294   : > { %v3353_v3 = vrot.slane %v3346_v22, %v20344_v6  ;;  %v3361_v21 = vrot.slane %v17032_v48, %v20344_v6  ;;  %v2266_v9 = vrot.slane %v2258_v8, %v20344_v6  ;;  %v2273_v15 = vrot.slane %v2259_v16, %v20344_v6  ;;  %26088 = vst [vmem:[#allocation69_spill] sm:$0xff] %v20642_v24 }
 0x295   : > { %v1246_v35 = vrot.slane %v1238_v26, %v20344_v6  ;;  %v1253_v12 = vrot.slane %v1239_v36, %v20344_v6  ;;  %26089 = vst [vmem:[#allocation70_spill] sm:$0xff] %v20644_v5  ;;  %v3362_v29 = vcombine.low %v3337_v13, %v3345_v0  ;;  %v3363_v10 = vcombine.high %v3337_v13, %v3345_v0 }
 0x296   : > { %v3378_v17 = vcombine.low %v3353_v3, %v3361_v21  ;;  %v3379_v14 = vcombine.high %v3353_v3, %v3361_v21  ;;  %v2274_v48 = vcombine.low %v20573_v59, %v2266_v9  ;;  %v2275_v25 = vcombine.high %v20573_v59, %v2266_v9  ;;  %5547 = vrot.lane.b32.xlu0 %v20208_v50, %s19648_s8 }
 0x297   : > { %v2290_v1 = vcombine.low %v20576_v45, %v2273_v15  ;;  %v2291_v41 = vcombine.high %v20576_v45, %v2273_v15  ;;  %v3370_v22 = vrot.slane %v3362_v29, %v20358_v60  ;;  %v3377_v8 = vrot.slane %v3363_v10, %v20358_v60  ;;  %972 = vrot.lane.b32.xlu1 %v20226_v55, %s19650_s11  ;;  %v20662_v0 = vpop.permute.xlu0 %5631  ;;  %v20664_v3 = vpop.permute.xlu1 %5569 }
 0x298   : > { %v3386_v16 = vrot.slane %v3378_v17, %v20358_v60  ;;  %v3393_v26 = vrot.slane %v3379_v14, %v20358_v60  ;;  %v2282_v59 = vrot.slane %v2274_v48, %v20358_v60  ;;  %v2289_v36 = vrot.slane %v2275_v25, %v20358_v60  ;;  %26090 = vst [vmem:[#allocation71_spill] sm:$0xff] %v20664_v3 }
 0x299   : > { %v2298_v45 = vrot.slane %v2290_v1, %v20358_v60  ;;  %v2305_v13 = vrot.slane %v2291_v41, %v20358_v60  ;;  %v1254_v48 = vcombine.low %v20585_v23, %v1246_v35  ;;  %v1255_v25 = vcombine.high %v20585_v23, %v1246_v35 }
 0x29a   : > { %v3394_v21 = vcombine.low %v3370_v22, %v3386_v16  ;;  %v3395_v9 = vcombine.high %v3370_v22, %v3386_v16  ;;  %v3396_v15 = vcombine.low %v3377_v8, %v3393_v26  ;;  %v3397_v29 = vcombine.high %v3377_v8, %v3393_v26  ;;  %5579 = vrot.lane.b32.xlu0 %v20220_v54, %s19648_s8 }
 0x29b   : > { %v4418_v10 = vcombine.low %v2282_v59, %v2289_v36  ;;  %v17063_v17 = vcombine.high %v2282_v59, %v2289_v36  ;;  %v4434_v14 = vcombine.low %v2298_v45, %v2305_v13  ;;  %v17064_v24 = vcombine.high %v2298_v45, %v2305_v13  ;;  %5549 = vrot.lane.b32.xlu1 %v20218_v53, %s19648_s8  ;;  %v20682_v59 = vpop.permute.xlu0 %5663  ;;  %v20684_v36 = vpop.permute.xlu1 %5633 }
 0x29c   : > { %5373 = vst.msk [vmem:[#allocation2 + $0x10] sm:$0xff] %vm5370_vm0, %v3394_v21  ;;  %5405 = vst.msk [vmem:[#allocation2 + $0x110] sm:$0xff] %vm5370_vm0, %v3395_v9  ;;  %v1270_v1 = vcombine.low %v20588_v18, %v1253_v12  ;;  %v1271_v41 = vcombine.high %v20588_v18, %v1253_v12  ;;  %v1262_v23 = vrot.slane %v1254_v48, %v20358_v60 }
 0x29d   : > { %5437 = vst.msk [vmem:[#allocation2 + $0x210] sm:$0xff] %vm5370_vm0, %v3396_v15  ;;  %5469 = vst.msk [vmem:[#allocation2 + $0x310] sm:$0xff] %vm5370_vm0, %v3397_v29  ;;  %v4425_v22 = vrot.slane %v4418_v10, %v20344_v6  ;;  %v4433_v8 = vrot.slane %v17063_v17, %v20344_v6  ;;  %v4441_v16 = vrot.slane %v4434_v14, %v20344_v6 }
 0x29e   : > { %v4449_v26 = vrot.slane %v17064_v24, %v20344_v6  ;;  %v1269_v35 = vrot.slane %v1255_v25, %v20358_v60  ;;  %v1278_v18 = vrot.slane %v1270_v1, %v20358_v60  ;;  %v1285_v12 = vrot.slane %v1271_v41, %v20358_v60  ;;  %5643 = vrot.lane.b32.xlu0 %v20208_v50, %s19649_s9 }
 0x29f   : > { %v4450_v45 = vcombine.low %v4425_v22, %v4433_v8  ;;  %v4451_v13 = vcombine.high %v4425_v22, %v4433_v8  ;;  %5581 = vrot.lane.b32.xlu1 %v20228_v56, %s19648_s8  ;;  %v20698_v1 = vpop.permute.xlu1 %5665  ;;  %v20700_v41 = vpop.permute.xlu0 %738 }
 0x2a0   : > { %v4466_v21 = vcombine.low %v4441_v16, %v4449_v26  ;;  %v4467_v9 = vcombine.high %v4441_v16, %v4449_v26  ;;  %v3398_v24 = vcombine.low %v1262_v23, %v1269_v35  ;;  %v17033_v15 = vcombine.high %v1262_v23, %v1269_v35 }
 0x2a1   : > { %v3414_v29 = vcombine.low %v1278_v18, %v1285_v12  ;;  %v17034_v10 = vcombine.high %v1278_v18, %v1285_v12  ;;  %v4458_v17 = vrot.slane %v4450_v45, %v20358_v60  ;;  %v4465_v14 = vrot.slane %v4451_v13, %v20358_v60 }
 0x2a2   : > { %v4474_v48 = vrot.slane %v4466_v21, %v20358_v60  ;;  %v4481_v25 = vrot.slane %v4467_v9, %v20358_v60  ;;  %v3405_v22 = vrot.slane %v3398_v24, %v20344_v6  ;;  %v3413_v8 = vrot.slane %v17033_v15, %v20344_v6  ;;  %5675 = vrot.lane.b32.xlu0 %v20220_v54, %s19649_s9 }
 0x2a3   : > { %v3421_v16 = vrot.slane %v3414_v29, %v20344_v6  ;;  %v3429_v26 = vrot.slane %v17034_v10, %v20344_v6  ;;  %5645 = vrot.lane.b32.xlu1 %v20218_v53, %s19649_s9  ;;  %v26091_v24 = vcombine.low %v20136_v30, %v20582_v20  ;;  %v26092_v29 = vcombine.high %v20136_v30, %v20582_v20 }
 0x2a4   : > { %v4482_v23 = vcombine.low %v4458_v17, %v4474_v48  ;;  %v4483_v35 = vcombine.high %v4458_v17, %v4474_v48  ;;  %v4484_v18 = vcombine.low %v4465_v14, %v4481_v25  ;;  %v4485_v12 = vcombine.high %v4465_v14, %v4481_v25  ;;  %v20726_v48 = vpop.permute.xlu0 %770  ;;  %v20728_v25 = vpop.permute.xlu1 %740 }
 0x2a5   : > { %v3430_v45 = vcombine.low %v3405_v22, %v3413_v8  ;;  %v3431_v13 = vcombine.high %v3405_v22, %v3413_v8  ;;  %v3446_v21 = vcombine.low %v3421_v16, %v3429_v26  ;;  %v3447_v9 = vcombine.high %v3421_v16, %v3429_v26 }
 0x2a6   : > { %v2318_v15 = vrot.slane %v26091_v24, %v20344_v6  ;;  %v2325_v10 = vrot.slane %v26092_v29, %v20344_v6  ;;  %5389 = vst.msk [vmem:[#allocation2 + $0x90] sm:$0xff] %vm5370_vm0, %v4482_v23  ;;  %5421 = vst.msk [vmem:[#allocation2 + $0x190] sm:$0xff] %vm5370_vm0, %v4483_v35  ;;  %v2326_v17 = vcombine.low %v20510_v40, %v20620_v38  ;;  %750 = vrot.lane.b32.xlu0 %v20270_v57, %s19648_s8 }
 0x2a7   : > { %5453 = vst.msk [vmem:[#allocation2 + $0x290] sm:$0xff] %vm5370_vm0, %v4484_v18  ;;  %5485 = vst.msk [vmem:[#allocation2 + $0x390] sm:$0xff] %vm5370_vm0, %v4485_v12  ;;  %v2327_v14 = vcombine.high %v20510_v40, %v20620_v38  ;;  %v3438_v20 = vrot.slane %v3430_v45, %v20358_v60  ;;  %v3445_v30 = vrot.slane %v3431_v13, %v20358_v60  ;;  %5677 = vrot.lane.b32.xlu1 %v20228_v56, %s19649_s9 }
 0x2a8   : > { %v3454_v22 = vrot.slane %v3446_v21, %v20358_v60  ;;  %v3461_v8 = vrot.slane %v3447_v9, %v20358_v60  ;;  %v2334_v16 = vrot.slane %v2326_v17, %v20344_v6  ;;  %v5955_v23 = vcombine.low %v20130_v27, %v20662_v0  ;;  %v835_v24 = vpop.permute.xlu0 %834  ;;  %v20744_v29 = vpop.permute.xlu1 %772 }
 0x2a9   : > { %v2341_v26 = vrot.slane %v2327_v14, %v20344_v6  ;;  %v5956_v40 = vcombine.high %v20130_v27, %v20662_v0  ;;  %v7043_v0 = vcombine.low %v20132_v28, %v20682_v59  ;;  %v7044_v17 = vcombine.high %v20132_v28, %v20682_v59 }
 0x2aa   : > { %v3462_v38 = vcombine.low %v3438_v20, %v3454_v22  ;;  %v3463_v35 = vcombine.high %v3438_v20, %v3454_v22  ;;  %v3464_v18 = vcombine.low %v3445_v30, %v3461_v8  ;;  %v3465_v12 = vcombine.high %v3445_v30, %v3461_v8  ;;  %782 = vrot.lane.b32.xlu0 %v20272_v58, %s19648_s8 }
 0x2ab   : > { %v2342_v45 = vcombine.low %v2318_v15, %v2334_v16  ;;  %v2343_v13 = vcombine.high %v2318_v15, %v2334_v16  ;;  %v2358_v21 = vcombine.low %v2325_v10, %v2341_v26  ;;  %v2359_v9 = vcombine.high %v2325_v10, %v2341_v26  ;;  %752 = vrot.lane.b32.xlu1 %v20278_v61, %s19648_s8 }
 0x2ac   : > { %5374 = vst.msk [vmem:[#allocation2 + $0x18] sm:$0xff] %vm5370_vm0, %v3462_v38  ;;  %5406 = vst.msk [vmem:[#allocation2 + $0x118] sm:$0xff] %vm5370_vm0, %v3463_v35  ;;  %v6023_v15 = vcombine.low %v20142_v31, %v20684_v36  ;;  %v6024_v10 = vcombine.high %v20142_v31, %v20684_v36  ;;  %v26093_v59 = vcombine.low %v20116_v7, %v20454_v39 }
 0x2ad   : > { %5438 = vst.msk [vmem:[#allocation2 + $0x218] sm:$0xff] %vm5370_vm0, %v3464_v18  ;;  %5470 = vst.msk [vmem:[#allocation2 + $0x318] sm:$0xff] %vm5370_vm0, %v3465_v12  ;;  %v2350_v14 = vrot.slane %v2342_v45, %v20358_v60  ;;  %v2357_v20 = vrot.slane %v2343_v13, %v20358_v60  ;;  %v2366_v30 = vrot.slane %v2358_v21, %v20358_v60  ;;  %v867_v13 = vpop.permute.xlu0 %866  ;;  %v837_v21 = vpop.permute.xlu1 %836 }
 0x2ae   : > { %v2373_v22 = vrot.slane %v2359_v9, %v20358_v60  ;;  %v20768_v8 = vrot.slane %v26093_v59, %v20344_v6  ;;  %v26095_v36 = vcombine.high %v20116_v7, %v20454_v39  ;;  %v20777_v26 = vrot.slane %v5955_v23, %v20344_v6  ;;  %846 = vrot.lane.b32.xlu0 %v20270_v57, %s19649_s9 }
 0x2af   : > { %v20780_v38 = vrot.slane %v5956_v40, %v20344_v6  ;;  %v4486_v35 = vcombine.low %v2350_v14, %v2357_v20  ;;  %v17065_v18 = vcombine.high %v2350_v14, %v2357_v20  ;;  %v20785_v9 = vrot.slane %v7043_v0, %v20344_v6  ;;  %784 = vrot.lane.b32.xlu1 %v20280_v62, %s19648_s8 }
 0x2b0   : > { %26094 = vst [vmem:[#allocation72_spill] sm:$0xff] %v20768_v8  ;;  %v20774_v16 = vrot.slane %v26095_v36, %v20344_v6  ;;  %26097 = vst [vmem:[#allocation74_spill] sm:$0xff] %v20777_v26  ;;  %v4502_v12 = vcombine.low %v2366_v30, %v2373_v22  ;;  %v17066_v45 = vcombine.high %v2366_v30, %v2373_v22 }
 0x2b1   : > { %26098 = vst [vmem:[#allocation75_spill] sm:$0xff] %v20780_v38  ;;  %26099 = vst [vmem:[#allocation76_spill] sm:$0xff] %v20785_v9  ;;  %v20788_v39 = vrot.slane %v7044_v17, %v20344_v6  ;;  %v20791_v23 = vrot.slane %v6023_v15, %v20344_v6  ;;  %v20794_v40 = vrot.slane %v6024_v10, %v20344_v6 }
 0x2b2   : > { %26096 = vst [vmem:[#allocation73_spill] sm:$0xff] %v20774_v16  ;;  %v4493_v59 = vrot.slane %v4486_v35, %v20344_v6  ;;  %v4501_v14 = vrot.slane %v17065_v18, %v20344_v6  ;;  %v4509_v20 = vrot.slane %v4502_v12, %v20344_v6  ;;  %v4517_v30 = vrot.slane %v17066_v45, %v20344_v6  ;;  %v931_v12 = vpop.permute.xlu0 %930  ;;  %v20810_v45 = vpop.permute.xlu1 %868 }
 0x2b3   : > { %26100 = vst [vmem:[#allocation77_spill] sm:$0xff] %v20788_v39  ;;  %26101 = vst [vmem:[#allocation78_spill] sm:$0xff] %v20791_v23  ;;  %v1290_v15 = vcombine.low %v20146_v33, %v835_v24  ;;  %v1291_v10 = vcombine.high %v20146_v33, %v835_v24  ;;  %v2378_v16 = vcombine.low %v20148_v34, %v867_v13  ;;  %878 = vrot.lane.b32.xlu0 %v20272_v58, %s19649_s9 }
 0x2b4   : > { %26102 = vst [vmem:[#allocation79_spill] sm:$0xff] %v20794_v40  ;;  %v4518_v22 = vcombine.low %v4493_v59, %v4501_v14  ;;  %v4519_v36 = vcombine.high %v4493_v59, %v4501_v14  ;;  %v4534_v35 = vcombine.low %v4509_v20, %v4517_v30  ;;  %v4535_v18 = vcombine.high %v4509_v20, %v4517_v30 }
 0x2b5   : > { %v2379_v0 = vcombine.high %v20148_v34, %v867_v13  ;;  %v1358_v17 = vcombine.low %v20158_v37, %v837_v21  ;;  %v1359_v8 = vcombine.high %v20158_v37, %v837_v21  ;;  %v1298_v14 = vrot.slane %v1290_v15, %v20344_v6  ;;  %848 = vrot.lane.b32.xlu1 %v20278_v61, %s19649_s9 }
 0x2b6   : > { %v4526_v33 = vrot.slane %v4518_v22, %v20358_v60  ;;  %v4533_v24 = vrot.slane %v4519_v36, %v20358_v60  ;;  %v4542_v39 = vrot.slane %v4534_v35, %v20358_v60  ;;  %v4549_v59 = vrot.slane %v4535_v18, %v20358_v60  ;;  %v963_v36 = vpop.permute.xlu0 %962  ;;  %v933_v35 = vpop.permute.xlu1 %932 }
 0x2b7   : > { %v1305_v20 = vrot.slane %v1291_v10, %v20344_v6  ;;  %v2386_v34 = vrot.slane %v2378_v16, %v20344_v6  ;;  %v2393_v13 = vrot.slane %v2379_v0, %v20344_v6  ;;  %v20829_v18 = vrot.slane %v1358_v17, %v20344_v6  ;;  %942 = vrot.lane.b32.xlu0 %v20270_v57, %s19650_s11 }
 0x2b8   : > { %v4550_v37 = vcombine.low %v4526_v33, %v4542_v39  ;;  %v4551_v21 = vcombine.high %v4526_v33, %v4542_v39  ;;  %v4552_v30 = vcombine.low %v4533_v24, %v4549_v59  ;;  %v4553_v22 = vcombine.high %v4533_v24, %v4549_v59  ;;  %v26103_v33 = vld [vmem:[#allocation35_spill] sm:$0xff] }
 0x2b9   : > { %v20832_v15 = vrot.slane %v1359_v8, %v20344_v6  ;;  %v1306_v10 = vcombine.low %v20700_v41, %v931_v12  ;;  %v1307_v16 = vcombine.high %v20700_v41, %v931_v12  ;;  %v2394_v39 = vcombine.low %v20726_v48, %v963_v36  ;;  %880 = vrot.lane.b32.xlu1 %v20280_v62, %s19649_s9 }
 0x2ba   : > { %5390 = vst.msk [vmem:[#allocation2 + $0x98] sm:$0xff] %vm5370_vm0, %v4550_v37  ;;  %5422 = vst.msk [vmem:[#allocation2 + $0x198] sm:$0xff] %vm5370_vm0, %v4551_v21  ;;  %v2395_v0 = vcombine.high %v20726_v48, %v963_v36  ;;  %v1374_v17 = vcombine.low %v20728_v25, %v933_v35  ;;  %v1375_v8 = vcombine.high %v20728_v25, %v933_v35 }
 0x2bb   : > { %5454 = vst.msk [vmem:[#allocation2 + $0x298] sm:$0xff] %vm5370_vm0, %v4552_v30  ;;  %5486 = vst.msk [vmem:[#allocation2 + $0x398] sm:$0xff] %vm5370_vm0, %v4553_v22  ;;  %v1314_v41 = vrot.slane %v1306_v10, %v20344_v6  ;;  %v1321_v12 = vrot.slane %v1307_v16, %v20344_v6  ;;  %v2402_v48 = vrot.slane %v2394_v39, %v20344_v6  ;;  %v20862_v30 = vpop.permute.xlu0 %5539  ;;  %v20864_v22 = vpop.permute.xlu1 %964  ;;  %974 = vrot.lane.b32.xlu0 %v20272_v58, %s19650_s11 }
 0x2bc   : > { %v2409_v25 = vrot.slane %v2395_v0, %v20344_v6  ;;  %v20857_v37 = vrot.slane %v1374_v17, %v20344_v6  ;;  %v20860_v21 = vrot.slane %v1375_v8, %v20344_v6  ;;  %26104 = vst [vmem:[#allocation35_spill] sm:$0xff] %v20862_v30 }
 0x2bd   : > { %v1322_v36 = vcombine.low %v1298_v14, %v1314_v41  ;;  %v1323_v35 = vcombine.high %v1298_v14, %v1314_v41  ;;  %v1338_v10 = vcombine.low %v1305_v20, %v1321_v12  ;;  %v1339_v16 = vcombine.high %v1305_v20, %v1321_v12  ;;  %944 = vrot.lane.b32.xlu1 %v20278_v61, %s19650_s11 }
 0x2be   : > { %v2410_v59 = vcombine.low %v2386_v34, %v2402_v48  ;;  %v2411_v24 = vcombine.high %v2386_v34, %v2402_v48  ;;  %v2426_v9 = vcombine.low %v2393_v13, %v2409_v25  ;;  %v2427_v39 = vcombine.high %v2393_v13, %v2409_v25 }
 0x2bf   : > { %v1330_v0 = vrot.slane %v1322_v36, %v20358_v60  ;;  %v1337_v17 = vrot.slane %v1323_v35, %v20358_v60  ;;  %v1346_v8 = vrot.slane %v1338_v10, %v20358_v60  ;;  %v1353_v3 = vrot.slane %v1339_v16, %v20358_v60  ;;  %v20878_v41 = vpop.permute.xlu0 %5571  ;;  %v20880_v12 = vpop.permute.xlu1 %5541 }
 0x2c0   : > { %v2418_v14 = vrot.slane %v2410_v59, %v20358_v60  ;;  %v2425_v20 = vrot.slane %v2411_v24, %v20358_v60  ;;  %v2434_v34 = vrot.slane %v2426_v9, %v20358_v60  ;;  %v2441_v13 = vrot.slane %v2427_v39, %v20358_v60  ;;  %26105 = vst [vmem:[#allocation80_spill] sm:$0xff] %v20878_v41  ;;  %v26107_v59 = vld [vmem:[#allocation41_spill] sm:$0xff] }
 0x2c1   : > { %26106 = vst [vmem:[#allocation81_spill] sm:$0xff] %v20880_v12  ;;  %v3466_v48 = vcombine.low %v1330_v0, %v1337_v17  ;;  %v17035_v25 = vcombine.high %v1330_v0, %v1337_v17  ;;  %v3482_v36 = vcombine.low %v1346_v8, %v1353_v3  ;;  %v17036_v35 = vcombine.high %v1346_v8, %v1353_v3 }
 0x2c2   : > { %v4554_v10 = vcombine.low %v2418_v14, %v2425_v20  ;;  %v17067_v16 = vcombine.high %v2418_v14, %v2425_v20  ;;  %v4570_v40 = vcombine.low %v2434_v34, %v2441_v13  ;;  %v17068_v23 = vcombine.high %v2434_v34, %v2441_v13  ;;  %5551 = vrot.lane.b32.xlu0 %v26107_v59, %s19648_s8 }
 0x2c3   : > { %v3473_v24 = vrot.slane %v3466_v48, %v20344_v6  ;;  %v3481_v9 = vrot.slane %v17035_v25, %v20344_v6  ;;  %v3489_v39 = vrot.slane %v3482_v36, %v20344_v6  ;;  %v3497_v41 = vrot.slane %v17036_v35, %v20344_v6  ;;  %976 = vrot.lane.b32.xlu1 %v20280_v62, %s19650_s11  ;;  %v20894_v14 = vpop.permute.xlu0 %5635  ;;  %v20896_v20 = vpop.permute.xlu1 %5573 }
 0x2c4   : > { %v4561_v3 = vrot.slane %v4554_v10, %v20344_v6  ;;  %v4569_v0 = vrot.slane %v17067_v16, %v20344_v6  ;;  %v4577_v17 = vrot.slane %v4570_v40, %v20344_v6  ;;  %v4585_v8 = vrot.slane %v17068_v23, %v20344_v6  ;;  %26108 = vst [vmem:[#allocation41_spill] sm:$0xff] %v20896_v20  ;;  %v26109_v10 = vld [vmem:[#allocation42_spill] sm:$0xff]  ;;  %v26110_v20 = vld [vmem:[#allocation43_spill] sm:$0xff] }
 0x2c5   : > { %v3498_v34 = vcombine.low %v3473_v24, %v3481_v9  ;;  %v3499_v13 = vcombine.high %v3473_v24, %v3481_v9  ;;  %v3514_v48 = vcombine.low %v3489_v39, %v3497_v41  ;;  %v3515_v25 = vcombine.high %v3489_v39, %v3497_v41 }
 0x2c6   : > { %v4586_v36 = vcombine.low %v4561_v3, %v4569_v0  ;;  %v4587_v35 = vcombine.high %v4561_v3, %v4569_v0  ;;  %v4602_v12 = vcombine.low %v4577_v17, %v4585_v8  ;;  %v4603_v5 = vcombine.high %v4577_v17, %v4585_v8  ;;  %5583 = vrot.lane.b32.xlu0 %v26109_v10, %s19648_s8 }
 0x2c7   : > { %v3506_v16 = vrot.slane %v3498_v34, %v20358_v60  ;;  %v3513_v40 = vrot.slane %v3499_v13, %v20358_v60  ;;  %v3522_v23 = vrot.slane %v3514_v48, %v20358_v60  ;;  %v3529_v30 = vrot.slane %v3515_v25, %v20358_v60  ;;  %5553 = vrot.lane.b32.xlu1 %v26110_v20, %s19648_s8  ;;  %v20910_v3 = vpop.permute.xlu0 %5667  ;;  %v20912_v0 = vpop.permute.xlu1 %5637 }
 0x2c8   : > { %v4594_v41 = vrot.slane %v4586_v36, %v20358_v60  ;;  %v4601_v24 = vrot.slane %v4587_v35, %v20358_v60  ;;  %v4610_v9 = vrot.slane %v4602_v12, %v20358_v60  ;;  %v4617_v39 = vrot.slane %v4603_v5, %v20358_v60  ;;  %v26111_v35 = vld [vmem:[#allocation44_spill] sm:$0xff] }
 0x2c9   : > { %v3530_v17 = vcombine.low %v3506_v16, %v3522_v23  ;;  %v3531_v8 = vcombine.high %v3506_v16, %v3522_v23  ;;  %v3532_v34 = vcombine.low %v3513_v40, %v3529_v30  ;;  %v3533_v13 = vcombine.high %v3513_v40, %v3529_v30 }
 0x2ca   : > { %v4618_v48 = vcombine.low %v4594_v41, %v4610_v9  ;;  %v4619_v25 = vcombine.high %v4594_v41, %v4610_v9  ;;  %v4620_v38 = vcombine.low %v4601_v24, %v4617_v39  ;;  %v4621_v26 = vcombine.high %v4601_v24, %v4617_v39  ;;  %5647 = vrot.lane.b32.xlu0 %v26107_v59, %s19649_s9  ;;  %v26114_v39 = vld [vmem:[#allocation33_spill] sm:$0xff] }
 0x2cb   : > { %5375 = vst.msk [vmem:[#allocation2 + $0x20] sm:$0xff] %vm5370_vm0, %v3530_v17  ;;  %5407 = vst.msk [vmem:[#allocation2 + $0x120] sm:$0xff] %vm5370_vm0, %v3531_v8  ;;  %v1390_v5 = vcombine.low %v20829_v18, %v20857_v37  ;;  %v1391_v30 = vcombine.high %v20829_v18, %v20857_v37  ;;  %v1406_v12 = vcombine.low %v20832_v15, %v20860_v21  ;;  %5585 = vrot.lane.b32.xlu1 %v26111_v35, %s19648_s8  ;;  %v20946_v37 = vpop.permute.xlu1 %5669 }
 0x2cc   : > { %5439 = vst.msk [vmem:[#allocation2 + $0x220] sm:$0xff] %vm5370_vm0, %v3532_v34  ;;  %5471 = vst.msk [vmem:[#allocation2 + $0x320] sm:$0xff] %vm5370_vm0, %v3533_v13  ;;  %v1407_v36 = vcombine.high %v20832_v15, %v20860_v21  ;;  %v26112_v16 = vcombine.low %v26103_v33, %v20810_v45  ;;  %v26113_v23 = vcombine.high %v26103_v33, %v20810_v45  ;;  %v20948_v21 = vpop.permute.xlu0 %742 }
 0x2cd   : > { %5391 = vst.msk [vmem:[#allocation2 + $0xa0] sm:$0xff] %vm5370_vm0, %v4618_v48  ;;  %5423 = vst.msk [vmem:[#allocation2 + $0x1a0] sm:$0xff] %vm5370_vm0, %v4619_v25  ;;  %v2462_v18 = vcombine.low %v20744_v29, %v20864_v22  ;;  %v2463_v15 = vcombine.high %v20744_v29, %v20864_v22  ;;  %v1398_v45 = vrot.slane %v1390_v5, %v20358_v60  ;;  %v26115_v22 = vld [vmem:[#allocation45_spill] sm:$0xff] }
 0x2ce   : > { %v2454_v40 = vrot.slane %v26112_v16, %v20344_v6  ;;  %v2461_v41 = vrot.slane %v26113_v23, %v20344_v6  ;;  %5455 = vst.msk [vmem:[#allocation2 + $0x2a0] sm:$0xff] %vm5370_vm0, %v4620_v38  ;;  %5487 = vst.msk [vmem:[#allocation2 + $0x3a0] sm:$0xff] %vm5370_vm0, %v4621_v26  ;;  %v1405_v33 = vrot.slane %v1391_v30, %v20358_v60  ;;  %754 = vrot.lane.b32.xlu0 %v26115_v22, %s19648_s8 }
 0x2cf   : > { %v1414_v24 = vrot.slane %v1406_v12, %v20358_v60  ;;  %v1421_v38 = vrot.slane %v1407_v36, %v20358_v60  ;;  %v2470_v26 = vrot.slane %v2462_v18, %v20344_v6  ;;  %v2477_v9 = vrot.slane %v2463_v15, %v20344_v6  ;;  %5649 = vrot.lane.b32.xlu1 %v26110_v20, %s19649_s9  ;;  %v20966_v16 = vpop.permute.xlu1 %744 }
 0x2d0   : > { %v3534_v8 = vcombine.low %v1398_v45, %v1405_v33  ;;  %v17037_v34 = vcombine.high %v1398_v45, %v1405_v33  ;;  %v20964_v36 = vpop.permute.xlu0 %774 }
 0x2d1   : > { %v3550_v13 = vcombine.low %v1414_v24, %v1421_v38  ;;  %v17038_v48 = vcombine.high %v1414_v24, %v1421_v38  ;;  %v2478_v25 = vcombine.low %v2454_v40, %v2470_v26  ;;  %v2479_v5 = vcombine.high %v2454_v40, %v2470_v26  ;;  %v26116_v38 = vld [vmem:[#allocation46_spill] sm:$0xff] }
 0x2d2   : > { %v2494_v30 = vcombine.low %v2461_v41, %v2477_v9  ;;  %v2495_v12 = vcombine.high %v2461_v41, %v2477_v9  ;;  %v3541_v23 = vrot.slane %v3534_v8, %v20344_v6  ;;  %v3549_v18 = vrot.slane %v17037_v34, %v20344_v6  ;;  %786 = vrot.lane.b32.xlu0 %v26116_v38, %s19648_s8  ;;  %v26117_v34 = vld [vmem:[#allocation49_spill] sm:$0xff] }
 0x2d3   : > { %v3557_v15 = vrot.slane %v3550_v13, %v20344_v6  ;;  %v3565_v45 = vrot.slane %v17038_v48, %v20344_v6  ;;  %v2486_v33 = vrot.slane %v2478_v25, %v20358_v60  ;;  %v2493_v24 = vrot.slane %v2479_v5, %v20358_v60  ;;  %756 = vrot.lane.b32.xlu1 %v26117_v34, %s19648_s8  ;;  %v20982_v5 = vpop.permute.xlu1 %776 }
 0x2d4   : > { %v2502_v40 = vrot.slane %v2494_v30, %v20358_v60  ;;  %v2509_v41 = vrot.slane %v2495_v12, %v20358_v60  ;;  %v3566_v26 = vcombine.low %v3541_v23, %v3549_v18  ;;  %v3567_v9 = vcombine.high %v3541_v23, %v3549_v18  ;;  %v20980_v63 = vpop.permute.xlu0 %838 }
 0x2d5   : > { %v3582_v8 = vcombine.low %v3557_v15, %v3565_v45  ;;  %v3583_v29 = vcombine.high %v3557_v15, %v3565_v45  ;;  %v4622_v13 = vcombine.low %v2486_v33, %v2493_v24  ;;  %v17069_v48 = vcombine.high %v2486_v33, %v2493_v24 }
 0x2d6   : > { %v4638_v17 = vcombine.low %v2502_v40, %v2509_v41  ;;  %v17070_v25 = vcombine.high %v2502_v40, %v2509_v41  ;;  %v3574_v30 = vrot.slane %v3566_v26, %v20358_v60  ;;  %v3581_v12 = vrot.slane %v3567_v9, %v20358_v60  ;;  %850 = vrot.lane.b32.xlu0 %v26115_v22, %s19649_s9  ;;  %v26118_v9 = vld [vmem:[#allocation50_spill] sm:$0xff] }
 0x2d7   : > { %v3590_v7 = vrot.slane %v3582_v8, %v20358_v60  ;;  %v3597_v23 = vrot.slane %v3583_v29, %v20358_v60  ;;  %v4629_v18 = vrot.slane %v4622_v13, %v20344_v6  ;;  %v4637_v15 = vrot.slane %v17069_v48, %v20344_v6  ;;  %788 = vrot.lane.b32.xlu1 %v26118_v9, %s19648_s8  ;;  %v841_v48 = vpop.permute.xlu1 %840 }
 0x2d8   : > { %v4645_v45 = vrot.slane %v4638_v17, %v20344_v6  ;;  %v4653_v33 = vrot.slane %v17070_v25, %v20344_v6  ;;  %v871_v20 = vpop.permute.xlu0 %870  ;;  %v26119_v17 = vcombine.low %v20144_v32, %v20698_v1 }
 0x2d9   : > { %v3598_v24 = vcombine.low %v3574_v30, %v3590_v7  ;;  %v3599_v40 = vcombine.high %v3574_v30, %v3590_v7  ;;  %v3600_v41 = vcombine.low %v3581_v12, %v3597_v23  ;;  %v3601_v26 = vcombine.high %v3581_v12, %v3597_v23  ;;  %v26123_v12 = vld [vmem:[#allocation34_spill] sm:$0xff] }
 0x2da   : > { %v4654_v8 = vcombine.low %v4629_v18, %v4637_v15  ;;  %v4655_v29 = vcombine.high %v4629_v18, %v4637_v15  ;;  %v4670_v28 = vcombine.low %v4645_v45, %v4653_v33  ;;  %v4671_v13 = vcombine.high %v4645_v45, %v4653_v33  ;;  %882 = vrot.lane.b32.xlu0 %v26116_v38, %s19649_s9 }
 0x2db   : > { %v21000_v25 = vrot.slane %v26119_v17, %v20344_v6  ;;  %v26121_v7 = vcombine.high %v20144_v32, %v20698_v1  ;;  %5376 = vst.msk [vmem:[#allocation2 + $0x28] sm:$0xff] %vm5370_vm0, %v3598_v24  ;;  %5408 = vst.msk [vmem:[#allocation2 + $0x128] sm:$0xff] %vm5370_vm0, %v3599_v40  ;;  %v7179_v23 = vcombine.low %v26123_v12, %v20910_v3  ;;  %852 = vrot.lane.b32.xlu1 %v26117_v34, %s19649_s9 }
 0x2dc   : > { %5440 = vst.msk [vmem:[#allocation2 + $0x228] sm:$0xff] %vm5370_vm0, %v3600_v41  ;;  %5472 = vst.msk [vmem:[#allocation2 + $0x328] sm:$0xff] %vm5370_vm0, %v3601_v26  ;;  %v7180_v18 = vcombine.high %v26123_v12, %v20910_v3  ;;  %v4662_v15 = vrot.slane %v4654_v8, %v20358_v60  ;;  %v4669_v1 = vrot.slane %v4655_v29, %v20358_v60  ;;  %v26128_v26 = vld [vmem:[#allocation36_spill] sm:$0xff] }
 0x2dd   : > { %26120 = vst [vmem:[#allocation42_spill] sm:$0xff] %v21000_v25  ;;  %v21006_v30 = vrot.slane %v26121_v7, %v20344_v6  ;;  %v4678_v45 = vrot.slane %v4670_v28, %v20358_v60  ;;  %v4685_v33 = vrot.slane %v4671_v13, %v20358_v60  ;;  %v26124_v24 = vcombine.low %v26114_v39, %v20894_v14 }
 0x2de   : > { %v26126_v3 = vcombine.high %v26114_v39, %v20894_v14  ;;  %v6159_v28 = vcombine.low %v26128_v26, %v20912_v0  ;;  %v6160_v8 = vcombine.high %v26128_v26, %v20912_v0  ;;  %v21044_v14 = vrot.slane %v7180_v18, %v20344_v6  ;;  %946 = vrot.lane.b32.xlu0 %v26115_v22, %s19650_s11 }
 0x2df   : > { %26122 = vst [vmem:[#allocation44_spill] sm:$0xff] %v21006_v30  ;;  %v21026_v40 = vrot.slane %v26124_v24, %v20344_v6  ;;  %v4686_v29 = vcombine.low %v4662_v15, %v4678_v45  ;;  %v4687_v13 = vcombine.high %v4662_v15, %v4678_v45  ;;  %v4688_v17 = vcombine.low %v4669_v1, %v4685_v33  ;;  %v935_v24 = vpop.permute.xlu0 %934  ;;  %v26132_v15 = vld [vmem:[#allocation39_spill] sm:$0xff] }
 0x2e0   : > { %v21032_v41 = vrot.slane %v26126_v3, %v20344_v6  ;;  %v4689_v7 = vcombine.high %v4669_v1, %v4685_v33  ;;  %v21041_v30 = vrot.slane %v7179_v23, %v20344_v6  ;;  %26130 = vst [vmem:[#allocation83_spill] sm:$0xff] %v21044_v14  ;;  %v26131_v3 = vld [vmem:[#allocation38_spill] sm:$0xff]  ;;  %v2514_v23 = vcombine.low %v20172_v42, %v871_v20 }
 0x2e1   : > { %26125 = vst [vmem:[#allocation33_spill] sm:$0xff] %v21026_v40  ;;  %v1426_v25 = vcombine.low %v26131_v3, %v20980_v63  ;;  %v1427_v0 = vcombine.high %v26131_v3, %v20980_v63  ;;  %5392 = vst.msk [vmem:[#allocation2 + $0xa8] sm:$0xff] %vm5370_vm0, %v4686_v29  ;;  %v2515_v18 = vcombine.high %v20172_v42, %v871_v20  ;;  %v26135_v29 = vld [vmem:[#allocation37_spill] sm:$0xff]  ;;  %884 = vrot.lane.b32.xlu1 %v26118_v9, %s19649_s9 }
 0x2e2   : > { %26127 = vst [vmem:[#allocation82_spill] sm:$0xff] %v21032_v41  ;;  %26129 = vst [vmem:[#allocation36_spill] sm:$0xff] %v21041_v30  ;;  %v21050_v41 = vpop.permute.xlu1 %872  ;;  %v1494_v1 = vcombine.low %v26132_v15, %v841_v48  ;;  %v1495_v45 = vcombine.high %v26132_v15, %v841_v48  ;;  %v21063_v63 = vrot.slane %v6159_v28, %v20344_v6  ;;  %978 = vrot.lane.b32.xlu0 %v26116_v38, %s19650_s11 }
 0x2e3   : > { %5424 = vst.msk [vmem:[#allocation2 + $0x1a8] sm:$0xff] %vm5370_vm0, %v4687_v13  ;;  %5456 = vst.msk [vmem:[#allocation2 + $0x2a8] sm:$0xff] %vm5370_vm0, %v4688_v17  ;;  %v21066_v33 = vrot.slane %v6160_v8, %v20344_v6  ;;  %v1434_v42 = vrot.slane %v1426_v25, %v20344_v6  ;;  %v1441_v20 = vrot.slane %v1427_v0, %v20344_v6 }
 0x2e4   : > { %5488 = vst.msk [vmem:[#allocation2 + $0x3a8] sm:$0xff] %vm5370_vm0, %v4689_v7  ;;  %26133 = vst [vmem:[#allocation38_spill] sm:$0xff] %v21063_v63  ;;  %v2522_v48 = vrot.slane %v2514_v23, %v20344_v6  ;;  %v2529_v28 = vrot.slane %v2515_v18, %v20344_v6  ;;  %v967_v7 = vpop.permute.xlu0 %966  ;;  %v21079_v8 = vrot.slane %v1494_v1, %v20344_v6 }
 0x2e5   : > { %26134 = vst [vmem:[#allocation39_spill] sm:$0xff] %v21066_v33  ;;  %v21082_v3 = vrot.slane %v1495_v45, %v20344_v6  ;;  %v1442_v15 = vcombine.low %v20948_v21, %v935_v24  ;;  %v1443_v17 = vcombine.high %v20948_v21, %v935_v24  ;;  %v2530_v25 = vcombine.low %v20964_v36, %v967_v7 }
 0x2e6   : > { %v937_v13 = vpop.permute.xlu1 %936  ;;  %v2531_v0 = vcombine.high %v20964_v36, %v967_v7  ;;  %948 = vrot.lane.b32.xlu1 %v26117_v34, %s19650_s11 }
 0x2e7   : > { %v1510_v23 = vcombine.low %v20966_v16, %v937_v13  ;;  %v1511_v18 = vcombine.high %v20966_v16, %v937_v13  ;;  %v1450_v1 = vrot.slane %v1442_v15, %v20344_v6  ;;  %v1457_v45 = vrot.slane %v1443_v17, %v20344_v6 }
 0x2e8   : > { %v2538_v36 = vrot.slane %v2530_v25, %v20344_v6  ;;  %v2545_v16 = vrot.slane %v2531_v0, %v20344_v6  ;;  %v21108_v17 = vpop.permute.xlu0 %5543  ;;  %v26137_v0 = vld [vmem:[#allocation47_spill] sm:$0xff] }
 0x2e9   : > { %v21103_v24 = vrot.slane %v1510_v23, %v20344_v6  ;;  %v21106_v13 = vrot.slane %v1511_v18, %v20344_v6  ;;  %26136 = vst [vmem:[#allocation37_spill] sm:$0xff] %v21108_v17  ;;  %v1458_v7 = vcombine.low %v1434_v42, %v1450_v1  ;;  %v1459_v15 = vcombine.high %v1434_v42, %v1450_v1 }
 0x2ea   : > { %v1474_v14 = vcombine.low %v1441_v20, %v1457_v45  ;;  %v1475_v30 = vcombine.high %v1441_v20, %v1457_v45  ;;  %v21110_v21 = vpop.permute.xlu1 %968  ;;  %v2546_v33 = vcombine.low %v2522_v48, %v2538_v36  ;;  %v2547_v63 = vcombine.high %v2522_v48, %v2538_v36  ;;  %5555 = vrot.lane.b32.xlu0 %v26137_v0, %s19648_s8 }
 0x2eb   : > { %v2562_v40 = vcombine.low %v2529_v28, %v2545_v16  ;;  %v2563_v25 = vcombine.high %v2529_v28, %v2545_v16  ;;  %v1466_v23 = vrot.slane %v1458_v7, %v20358_v60  ;;  %v1473_v18 = vrot.slane %v1459_v15, %v20358_v60  ;;  %980 = vrot.lane.b32.xlu1 %v26118_v9, %s19650_s11 }
 0x2ec   : > { %v1482_v34 = vrot.slane %v1474_v14, %v20358_v60  ;;  %v1489_v17 = vrot.slane %v1475_v30, %v20358_v60  ;;  %v2554_v42 = vrot.slane %v2546_v33, %v20358_v60  ;;  %v2561_v20 = vrot.slane %v2547_v63, %v20358_v60  ;;  %v21124_v1 = vpop.permute.xlu0 %5575  ;;  %v26140_v33 = vld [vmem:[#allocation48_spill] sm:$0xff] }
 0x2ed   : > { %v2570_v48 = vrot.slane %v2562_v40, %v20358_v60  ;;  %v2577_v28 = vrot.slane %v2563_v25, %v20358_v60  ;;  %26138 = vst [vmem:[#allocation84_spill] sm:$0xff] %v21124_v1  ;;  %v3602_v45 = vcombine.low %v1466_v23, %v1473_v18  ;;  %v17039_v36 = vcombine.high %v1466_v23, %v1473_v18  ;;  %v26141_v23 = vld [vmem:[#allocation51_spill] sm:$0xff] }
 0x2ee   : > { %v3618_v16 = vcombine.low %v1482_v34, %v1489_v17  ;;  %v17040_v7 = vcombine.high %v1482_v34, %v1489_v17  ;;  %v21126_v14 = vpop.permute.xlu1 %5545  ;;  %v4690_v30 = vcombine.low %v2554_v42, %v2561_v20  ;;  %v17071_v15 = vcombine.high %v2554_v42, %v2561_v20  ;;  %5587 = vrot.lane.b32.xlu0 %v26140_v33, %s19648_s8 }
 0x2ef   : > { %26139 = vst [vmem:[#allocation85_spill] sm:$0xff] %v21126_v14  ;;  %v4706_v38 = vcombine.low %v2570_v48, %v2577_v28  ;;  %v17072_v9 = vcombine.high %v2570_v48, %v2577_v28  ;;  %v3609_v63 = vrot.slane %v3602_v45, %v20344_v6  ;;  %v3617_v40 = vrot.slane %v17039_v36, %v20344_v6 }
 0x2f0   : > { %v3625_v25 = vrot.slane %v3618_v16, %v20344_v6  ;;  %v3633_v1 = vrot.slane %v17040_v7, %v20344_v6  ;;  %5557 = vrot.lane.b32.xlu1 %v26141_v23, %s19648_s8  ;;  %v4697_v34 = vrot.slane %v4690_v30, %v20344_v6  ;;  %v4705_v17 = vrot.slane %v17071_v15, %v20344_v6  ;;  %v21140_v20 = vpop.permute.xlu0 %5639 }
 0x2f1   : > { %v4713_v18 = vrot.slane %v4706_v38, %v20344_v6  ;;  %v4721_v42 = vrot.slane %v17072_v9, %v20344_v6  ;;  %v3634_v48 = vcombine.low %v3609_v63, %v3617_v40  ;;  %v3635_v28 = vcombine.high %v3609_v63, %v3617_v40  ;;  %v26143_v63 = vld [vmem:[#allocation52_spill] sm:$0xff] }
 0x2f2   : > { %v3650_v45 = vcombine.low %v3625_v25, %v3633_v1  ;;  %v3651_v36 = vcombine.high %v3625_v25, %v3633_v1  ;;  %v21142_v16 = vpop.permute.xlu1 %5577  ;;  %v4722_v7 = vcombine.low %v4697_v34, %v4705_v17  ;;  %v4723_v14 = vcombine.high %v4697_v34, %v4705_v17  ;;  %5651 = vrot.lane.b32.xlu0 %v26137_v0, %s19649_s9 }
 0x2f3   : > { %26142 = vst [vmem:[#allocation48_spill] sm:$0xff] %v21142_v16  ;;  %v4738_v22 = vcombine.low %v4713_v18, %v4721_v42  ;;  %v4739_v32 = vcombine.high %v4713_v18, %v4721_v42  ;;  %v3642_v30 = vrot.slane %v3634_v48, %v20358_v60  ;;  %v3649_v38 = vrot.slane %v3635_v28, %v20358_v60 }
 0x2f4   : > { %v3658_v9 = vrot.slane %v3650_v45, %v20358_v60  ;;  %v3665_v15 = vrot.slane %v3651_v36, %v20358_v60  ;;  %5589 = vrot.lane.b32.xlu1 %v26143_v63, %s19648_s8  ;;  %v4730_v1 = vrot.slane %v4722_v7, %v20358_v60  ;;  %v4737_v40 = vrot.slane %v4723_v14, %v20358_v60  ;;  %v21156_v17 = vpop.permute.xlu0 %5671 }
 0x2f5   : > { %v4746_v25 = vrot.slane %v4738_v22, %v20358_v60  ;;  %v4753_v34 = vrot.slane %v4739_v32, %v20358_v60  ;;  %v1526_v32 = vcombine.low %v21079_v8, %v21103_v24  ;;  %v1527_v22 = vcombine.high %v21079_v8, %v21103_v24 }
 0x2f6   : > { %v3666_v18 = vcombine.low %v3642_v30, %v3658_v9  ;;  %v3667_v42 = vcombine.high %v3642_v30, %v3658_v9  ;;  %v3668_v48 = vcombine.low %v3649_v38, %v3665_v15  ;;  %v3669_v28 = vcombine.high %v3649_v38, %v3665_v15  ;;  %v21158_v45 = vpop.permute.xlu1 %5641  ;;  %758 = vrot.lane.b32.xlu0 %v20528_v4, %s19648_s8 }
 0x2f7   : > { %v4754_v36 = vcombine.low %v4730_v1, %v4746_v25  ;;  %v4755_v16 = vcombine.high %v4730_v1, %v4746_v25  ;;  %v4756_v12 = vcombine.low %v4737_v40, %v4753_v34  ;;  %v4757_v0 = vcombine.high %v4737_v40, %v4753_v34 }
 0x2f8   : > { %5377 = vst.msk [vmem:[#allocation2 + $0x30] sm:$0xff] %vm5370_vm0, %v3666_v18  ;;  %5409 = vst.msk [vmem:[#allocation2 + $0x130] sm:$0xff] %vm5370_vm0, %v3667_v42  ;;  %v1542_v14 = vcombine.low %v21082_v3, %v21106_v13  ;;  %v1543_v7 = vcombine.high %v21082_v3, %v21106_v13  ;;  %5653 = vrot.lane.b32.xlu1 %v26141_v23, %s19649_s9  ;;  %v26144_v30 = vcombine.low %v20184_v46, %v21050_v41  ;;  %v21192_v24 = vpop.permute.xlu0 %746 }
 0x2f9   : > { %5441 = vst.msk [vmem:[#allocation2 + $0x230] sm:$0xff] %vm5370_vm0, %v3668_v48  ;;  %5473 = vst.msk [vmem:[#allocation2 + $0x330] sm:$0xff] %vm5370_vm0, %v3669_v28  ;;  %v26145_v9 = vcombine.high %v20184_v46, %v21050_v41  ;;  %v2598_v8 = vcombine.low %v20982_v5, %v21110_v21  ;;  %v2599_v3 = vcombine.high %v20982_v5, %v21110_v21 }
 0x2fa   : > { %v2590_v38 = vrot.slane %v26144_v30, %v20344_v6  ;;  %5393 = vst.msk [vmem:[#allocation2 + $0xb0] sm:$0xff] %vm5370_vm0, %v4754_v36  ;;  %5425 = vst.msk [vmem:[#allocation2 + $0x1b0] sm:$0xff] %vm5370_vm0, %v4755_v16  ;;  %v1534_v13 = vrot.slane %v1526_v32, %v20358_v60  ;;  %v1541_v46 = vrot.slane %v1527_v22, %v20358_v60  ;;  %v21198_v1 = vpop.permute.xlu1 %5673  ;;  %790 = vrot.lane.b32.xlu0 %v20550_v19, %s19648_s8 }
 0x2fb   : > { %v2597_v15 = vrot.slane %v26145_v9, %v20344_v6  ;;  %5457 = vst.msk [vmem:[#allocation2 + $0x2b0] sm:$0xff] %vm5370_vm0, %v4756_v12  ;;  %5489 = vst.msk [vmem:[#allocation2 + $0x3b0] sm:$0xff] %vm5370_vm0, %v4757_v0  ;;  %v1550_v41 = vrot.slane %v1542_v14, %v20358_v60  ;;  %v1557_v16 = vrot.slane %v1543_v7, %v20358_v60 }
 0x2fc   : > { %v2606_v12 = vrot.slane %v2598_v8, %v20344_v6  ;;  %v2613_v0 = vrot.slane %v2599_v3, %v20344_v6  ;;  %v6227_v40 = vcombine.low %v20178_v43, %v21140_v20  ;;  %v6228_v5 = vcombine.high %v20178_v43, %v21140_v20  ;;  %5681 = vrot.lane.b32.xlu1 %v26111_v35, %s19649_s9  ;;  %v21210_v32 = vpop.permute.xlu0 %778 }
 0x2fd   : > { %v3670_v21 = vcombine.low %v1534_v13, %v1541_v46  ;;  %v17041_v25 = vcombine.high %v1534_v13, %v1541_v46  ;;  %v3686_v34 = vcombine.low %v1550_v41, %v1557_v16  ;;  %v17042_v18 = vcombine.high %v1550_v41, %v1557_v16 }
 0x2fe   : > { %v2614_v42 = vcombine.low %v2590_v38, %v2606_v12  ;;  %v2615_v48 = vcombine.high %v2590_v38, %v2606_v12  ;;  %v2630_v28 = vcombine.low %v2597_v15, %v2613_v0  ;;  %v2631_v36 = vcombine.high %v2597_v15, %v2613_v0  ;;  %v21216_v9 = vpop.permute.xlu1 %748  ;;  %854 = vrot.lane.b32.xlu0 %v20528_v4, %s19649_s9 }
 0x2ff   : > { %v3677_v22 = vrot.slane %v3670_v21, %v20344_v6  ;;  %v3685_v14 = vrot.slane %v17041_v25, %v20344_v6  ;;  %v3693_v7 = vrot.slane %v3686_v34, %v20344_v6  ;;  %v3701_v30 = vrot.slane %v17042_v18, %v20344_v6 }
 0x300   : > { %v2622_v8 = vrot.slane %v2614_v42, %v20358_v60  ;;  %v2629_v3 = vrot.slane %v2615_v48, %v20358_v60  ;;  %v2638_v38 = vrot.slane %v2630_v28, %v20358_v60  ;;  %v2645_v15 = vrot.slane %v2631_v36, %v20358_v60  ;;  %760 = vrot.lane.b32.xlu1 %v20556_v2, %s19648_s8  ;;  %v21226_v34 = vpop.permute.xlu0 %842 }
 0x301   : > { %v3702_v13 = vcombine.low %v3677_v22, %v3685_v14  ;;  %v3703_v46 = vcombine.high %v3677_v22, %v3685_v14  ;;  %v3718_v41 = vcombine.low %v3693_v7, %v3701_v30  ;;  %v3719_v16 = vcombine.high %v3693_v7, %v3701_v30 }
 0x302   : > { %v4758_v12 = vcombine.low %v2622_v8, %v2629_v3  ;;  %v17073_v0 = vcombine.high %v2622_v8, %v2629_v3  ;;  %v4774_v21 = vcombine.low %v2638_v38, %v2645_v15  ;;  %v17074_v25 = vcombine.high %v2638_v38, %v2645_v15  ;;  %v21232_v36 = vpop.permute.xlu1 %780  ;;  %886 = vrot.lane.b32.xlu0 %v20550_v19, %s19649_s9 }
 0x303   : > { %v3710_v18 = vrot.slane %v3702_v13, %v20358_v60  ;;  %v3717_v42 = vrot.slane %v3703_v46, %v20358_v60  ;;  %v3726_v48 = vrot.slane %v3718_v41, %v20358_v60  ;;  %v3733_v28 = vrot.slane %v3719_v16, %v20358_v60 }
 0x304   : > { %v4765_v22 = vrot.slane %v4758_v12, %v20344_v6  ;;  %v4773_v14 = vrot.slane %v17073_v0, %v20344_v6  ;;  %v4781_v7 = vrot.slane %v4774_v21, %v20344_v6  ;;  %v4789_v30 = vrot.slane %v17074_v25, %v20344_v6  ;;  %792 = vrot.lane.b32.xlu1 %v20568_v11, %s19648_s8  ;;  %v875_v12 = vpop.permute.xlu0 %874 }
 0x305   : > { %v3734_v8 = vcombine.low %v3710_v18, %v3726_v48  ;;  %v3735_v3 = vcombine.high %v3710_v18, %v3726_v48  ;;  %v3736_v38 = vcombine.low %v3717_v42, %v3733_v28  ;;  %v3737_v15 = vcombine.high %v3717_v42, %v3733_v28 }
 0x306   : > { %v4790_v13 = vcombine.low %v4765_v22, %v4773_v14  ;;  %v4791_v46 = vcombine.high %v4765_v22, %v4773_v14  ;;  %v4806_v41 = vcombine.low %v4781_v7, %v4789_v30  ;;  %v4807_v16 = vcombine.high %v4781_v7, %v4789_v30  ;;  %v845_v28 = vpop.permute.xlu1 %844  ;;  %950 = vrot.lane.b32.xlu0 %v20528_v4, %s19650_s11 }
 0x307   : > { %v26146_v0 = vcombine.low %v26135_v29, %v20946_v37  ;;  %v26148_v25 = vcombine.high %v26135_v29, %v20946_v37  ;;  %5378 = vst.msk [vmem:[#allocation2 + $0x38] sm:$0xff] %vm5370_vm0, %v3734_v8  ;;  %5410 = vst.msk [vmem:[#allocation2 + $0x138] sm:$0xff] %vm5370_vm0, %v3735_v3  ;;  %v7315_v42 = vcombine.low %v20180_v44, %v21156_v17 }
 0x308   : > { %5442 = vst.msk [vmem:[#allocation2 + $0x238] sm:$0xff] %vm5370_vm0, %v3736_v38  ;;  %5474 = vst.msk [vmem:[#allocation2 + $0x338] sm:$0xff] %vm5370_vm0, %v3737_v15  ;;  %v7316_v48 = vcombine.high %v20180_v44, %v21156_v17  ;;  %v4798_v22 = vrot.slane %v4790_v13, %v20358_v60  ;;  %v4805_v37 = vrot.slane %v4791_v46, %v20358_v60  ;;  %856 = vrot.lane.b32.xlu1 %v20556_v2, %s19649_s9  ;;  %v939_v46 = vpop.permute.xlu0 %938 }
 0x309   : > { %v21246_v21 = vrot.slane %v26146_v0, %v20344_v6  ;;  %v21252_v18 = vrot.slane %v26148_v25, %v20344_v6  ;;  %v4814_v14 = vrot.slane %v4806_v41, %v20358_v60  ;;  %v4821_v7 = vrot.slane %v4807_v16, %v20358_v60 }
 0x30a   : > { %v21272_v30 = vrot.slane %v6227_v40, %v20344_v6  ;;  %v21278_v17 = vrot.slane %v6228_v5, %v20344_v6  ;;  %v6295_v8 = vcombine.low %v20190_v47, %v21158_v45  ;;  %v6296_v3 = vcombine.high %v20190_v47, %v21158_v45  ;;  %v21296_v16 = vpop.permute.xlu1 %876  ;;  %982 = vrot.lane.b32.xlu0 %v20550_v19, %s19650_s11 }
 0x30b   : > { %26147 = vst [vmem:[#allocation51_spill] sm:$0xff] %v21246_v21  ;;  %26149 = vst [vmem:[#allocation52_spill] sm:$0xff] %v21252_v18  ;;  %v4822_v38 = vcombine.low %v4798_v22, %v4814_v14  ;;  %v4823_v15 = vcombine.high %v4798_v22, %v4814_v14  ;;  %v4824_v13 = vcombine.low %v4805_v37, %v4821_v7  ;;  %v26156_v22 = vld [vmem:[#allocation40_spill] sm:$0xff] }
 0x30c   : > { %26150 = vst [vmem:[#allocation86_spill] sm:$0xff] %v21272_v30  ;;  %26151 = vst [vmem:[#allocation87_spill] sm:$0xff] %v21278_v17  ;;  %v4825_v40 = vcombine.high %v4805_v37, %v4821_v7  ;;  %v21287_v41 = vrot.slane %v7315_v42, %v20344_v6  ;;  %v21290_v20 = vrot.slane %v7316_v48, %v20344_v6  ;;  %888 = vrot.lane.b32.xlu1 %v20568_v11, %s19649_s9  ;;  %v971_v7 = vpop.permute.xlu0 %970 }
 0x30d   : > { %v1562_v5 = vcombine.low %v20206_v49, %v21226_v34  ;;  %v1563_v45 = vcombine.high %v20206_v49, %v21226_v34  ;;  %5394 = vst.msk [vmem:[#allocation2 + $0xb8] sm:$0xff] %vm5370_vm0, %v4822_v38  ;;  %5426 = vst.msk [vmem:[#allocation2 + $0x1b8] sm:$0xff] %vm5370_vm0, %v4823_v15  ;;  %v2650_v0 = vcombine.low %v20214_v51, %v875_v12 }
 0x30e   : > { %26152 = vst [vmem:[#allocation88_spill] sm:$0xff] %v21287_v41  ;;  %26153 = vst [vmem:[#allocation89_spill] sm:$0xff] %v21290_v20  ;;  %v2651_v25 = vcombine.high %v20214_v51, %v875_v12  ;;  %v1630_v42 = vcombine.low %v20216_v52, %v845_v28  ;;  %v1631_v48 = vcombine.high %v20216_v52, %v845_v28 }
 0x30f   : > { %5458 = vst.msk [vmem:[#allocation2 + $0x2b8] sm:$0xff] %vm5370_vm0, %v4824_v13  ;;  %5490 = vst.msk [vmem:[#allocation2 + $0x3b8] sm:$0xff] %vm5370_vm0, %v4825_v40  ;;  %v21309_v49 = vrot.slane %v6295_v8, %v20344_v6  ;;  %v21312_v34 = vrot.slane %v6296_v3, %v20344_v6  ;;  %v1570_v51 = vrot.slane %v1562_v5, %v20344_v6  ;;  %v941_v13 = vpop.permute.xlu1 %940 }
 0x310   : > { %v1577_v52 = vrot.slane %v1563_v45, %v20344_v6  ;;  %v2658_v12 = vrot.slane %v2650_v0, %v20344_v6  ;;  %v2665_v28 = vrot.slane %v2651_v25, %v20344_v6  ;;  %v21325_v8 = vrot.slane %v1630_v42, %v20344_v6  ;;  %v26157_v25 = vld [vmem:[#allocation63_spill] sm:$0xff]  ;;  %952 = vrot.lane.b32.xlu1 %v20556_v2, %s19650_s11 }
 0x311   : > { %26154 = vst [vmem:[#allocation90_spill] sm:$0xff] %v21309_v49  ;;  %26155 = vst [vmem:[#allocation91_spill] sm:$0xff] %v21312_v34  ;;  %v21328_v3 = vrot.slane %v1631_v48, %v20344_v6  ;;  %v1578_v38 = vcombine.low %v21192_v24, %v939_v46  ;;  %v1579_v15 = vcombine.high %v21192_v24, %v939_v46  ;;  %5559 = vrot.lane.b32.xlu0 %v26157_v25, %s19648_s8 }
 0x312   : > { %v2666_v40 = vcombine.low %v21210_v32, %v971_v7  ;;  %v2667_v5 = vcombine.high %v21210_v32, %v971_v7  ;;  %v1646_v45 = vcombine.low %v21216_v9, %v941_v13  ;;  %v1647_v0 = vcombine.high %v21216_v9, %v941_v13 }
 0x313   : > { %v1586_v42 = vrot.slane %v1578_v38, %v20344_v6  ;;  %v1593_v48 = vrot.slane %v1579_v15, %v20344_v6  ;;  %v21354_v38 = vpop.permute.xlu0 %5547  ;;  %v21356_v24 = vpop.permute.xlu1 %972 }
 0x314   : > { %v2674_v32 = vrot.slane %v2666_v40, %v20344_v6  ;;  %v2681_v9 = vrot.slane %v2667_v5, %v20344_v6  ;;  %v21349_v46 = vrot.slane %v1646_v45, %v20344_v6  ;;  %v21352_v7 = vrot.slane %v1647_v0, %v20344_v6  ;;  %26158 = vst [vmem:[#allocation40_spill] sm:$0xff] %v21354_v38  ;;  %v26159_v5 = vld [vmem:[#allocation64_spill] sm:$0xff] }
 0x315   : > { %v1594_v15 = vcombine.low %v1570_v51, %v1586_v42  ;;  %v1595_v13 = vcombine.high %v1570_v51, %v1586_v42  ;;  %v1610_v37 = vcombine.low %v1577_v52, %v1593_v48  ;;  %v1611_v14 = vcombine.high %v1577_v52, %v1593_v48  ;;  %5591 = vrot.lane.b32.xlu0 %v26159_v5, %s19648_s8 }
 0x316   : > { %v2682_v18 = vcombine.low %v2658_v12, %v2674_v32  ;;  %v2683_v21 = vcombine.high %v2658_v12, %v2674_v32  ;;  %v2698_v20 = vcombine.low %v2665_v28, %v2681_v9  ;;  %v2699_v40 = vcombine.high %v2665_v28, %v2681_v9  ;;  %984 = vrot.lane.b32.xlu1 %v20568_v11, %s19650_s11 }
 0x317   : > { %v1602_v45 = vrot.slane %v1594_v15, %v20358_v60  ;;  %v1609_v0 = vrot.slane %v1595_v13, %v20358_v60  ;;  %v1618_v41 = vrot.slane %v1610_v37, %v20358_v60  ;;  %v1625_v34 = vrot.slane %v1611_v14, %v20358_v60  ;;  %v21370_v42 = vpop.permute.xlu0 %5579  ;;  %v21372_v37 = vpop.permute.xlu1 %5549 }
 0x318   : > { %v2690_v51 = vrot.slane %v2682_v18, %v20358_v60  ;;  %v2697_v52 = vrot.slane %v2683_v21, %v20358_v60  ;;  %v2706_v12 = vrot.slane %v2698_v20, %v20358_v60  ;;  %v2713_v28 = vrot.slane %v2699_v40, %v20358_v60  ;;  %26160 = vst [vmem:[#allocation63_spill] sm:$0xff] %v21370_v42 }
 0x319   : > { %v3738_v48 = vcombine.low %v1602_v45, %v1609_v0  ;;  %v17043_v32 = vcombine.high %v1602_v45, %v1609_v0  ;;  %v3754_v9 = vcombine.low %v1618_v41, %v1625_v34  ;;  %v17044_v15 = vcombine.high %v1618_v41, %v1625_v34  ;;  %26161 = vst [vmem:[#allocation64_spill] sm:$0xff] %v21372_v37  ;;  %v26162_v45 = vld [vmem:[#allocation65_spill] sm:$0xff] }
 0x31a   : > { %v4826_v14 = vcombine.low %v2690_v51, %v2697_v52  ;;  %v17075_v13 = vcombine.high %v2690_v51, %v2697_v52  ;;  %v4842_v49 = vcombine.low %v2706_v12, %v2713_v28  ;;  %v17076_v38 = vcombine.high %v2706_v12, %v2713_v28  ;;  %5655 = vrot.lane.b32.xlu0 %v26157_v25, %s19649_s9 }
 0x31b   : > { %v3745_v21 = vrot.slane %v3738_v48, %v20344_v6  ;;  %v3753_v18 = vrot.slane %v17043_v32, %v20344_v6  ;;  %v3761_v20 = vrot.slane %v3754_v9, %v20344_v6  ;;  %v3769_v40 = vrot.slane %v17044_v15, %v20344_v6  ;;  %5561 = vrot.lane.b32.xlu1 %v26162_v45, %s19648_s8  ;;  %v21386_v52 = vpop.permute.xlu0 %5643  ;;  %v21388_v9 = vpop.permute.xlu1 %5581 }
 0x31c   : > { %v4833_v41 = vrot.slane %v4826_v14, %v20344_v6  ;;  %v4841_v34 = vrot.slane %v17075_v13, %v20344_v6  ;;  %v4849_v0 = vrot.slane %v4842_v49, %v20344_v6  ;;  %v4857_v51 = vrot.slane %v17076_v38, %v20344_v6  ;;  %26163 = vst [vmem:[#allocation65_spill] sm:$0xff] %v21388_v9 }
 0x31d   : > { %v3770_v12 = vcombine.low %v3745_v21, %v3753_v18  ;;  %v3771_v28 = vcombine.high %v3745_v21, %v3753_v18  ;;  %v3786_v48 = vcombine.low %v3761_v20, %v3769_v40  ;;  %v3787_v32 = vcombine.high %v3761_v20, %v3769_v40  ;;  %v26164_v21 = vld [vmem:[#allocation67_spill] sm:$0xff] }
 0x31e   : > { %v4858_v15 = vcombine.low %v4833_v41, %v4841_v34  ;;  %v4859_v42 = vcombine.high %v4833_v41, %v4841_v34  ;;  %v4874_v37 = vcombine.low %v4849_v0, %v4857_v51  ;;  %v4875_v17 = vcombine.high %v4849_v0, %v4857_v51  ;;  %5679 = vrot.lane.b32.xlu0 %v26109_v10, %s19649_s9 }
 0x31f   : > { %v3778_v14 = vrot.slane %v3770_v12, %v20358_v60  ;;  %v3785_v49 = vrot.slane %v3771_v28, %v20358_v60  ;;  %v3794_v38 = vrot.slane %v3786_v48, %v20358_v60  ;;  %v3801_v13 = vrot.slane %v3787_v32, %v20358_v60  ;;  %5593 = vrot.lane.b32.xlu1 %v26164_v21, %s19648_s8  ;;  %v21402_v34 = vpop.permute.xlu0 %5675  ;;  %v21404_v48 = vpop.permute.xlu1 %5645 }
 0x320   : > { %v4866_v18 = vrot.slane %v4858_v15, %v20358_v60  ;;  %v4873_v20 = vrot.slane %v4859_v42, %v20358_v60  ;;  %v4882_v40 = vrot.slane %v4874_v37, %v20358_v60  ;;  %v4889_v41 = vrot.slane %v4875_v17, %v20358_v60 }
 0x321   : > { %v3802_v0 = vcombine.low %v3778_v14, %v3794_v38  ;;  %v3803_v51 = vcombine.high %v3778_v14, %v3794_v38  ;;  %v3804_v12 = vcombine.low %v3785_v49, %v3801_v13  ;;  %v3805_v28 = vcombine.high %v3785_v49, %v3801_v13 }
 0x322   : > { %v4890_v32 = vcombine.low %v4866_v18, %v4882_v40  ;;  %v4891_v9 = vcombine.high %v4866_v18, %v4882_v40  ;;  %v4892_v30 = vcombine.low %v4873_v20, %v4889_v41  ;;  %v4893_v11 = vcombine.high %v4873_v20, %v4889_v41  ;;  %5683 = vrot.lane.b32.xlu0 %v26140_v33, %s19649_s9 }
 0x323   : > { %5379 = vst.msk [vmem:[#allocation2 + $0x40] sm:$0xff] %vm5370_vm0, %v3802_v0  ;;  %5411 = vst.msk [vmem:[#allocation2 + $0x140] sm:$0xff] %vm5370_vm0, %v3803_v51  ;;  %v1662_v17 = vcombine.low %v21325_v8, %v21349_v46  ;;  %v1663_v42 = vcombine.high %v21325_v8, %v21349_v46  ;;  %v1678_v37 = vcombine.low %v21328_v3, %v21352_v7  ;;  %5657 = vrot.lane.b32.xlu1 %v26162_v45, %s19649_s9  ;;  %v21434_v14 = vpop.permute.xlu0 %750  ;;  %v21440_v38 = vpop.permute.xlu1 %5677 }
 0x324   : > { %5443 = vst.msk [vmem:[#allocation2 + $0x240] sm:$0xff] %vm5370_vm0, %v3804_v12  ;;  %5475 = vst.msk [vmem:[#allocation2 + $0x340] sm:$0xff] %vm5370_vm0, %v3805_v28  ;;  %v1679_v15 = vcombine.high %v21328_v3, %v21352_v7  ;;  %v2734_v8 = vcombine.low %v21232_v36, %v21356_v24  ;;  %v2735_v46 = vcombine.high %v21232_v36, %v21356_v24 }
 0x325   : > { %5395 = vst.msk [vmem:[#allocation2 + $0xc0] sm:$0xff] %vm5370_vm0, %v4890_v32  ;;  %5427 = vst.msk [vmem:[#allocation2 + $0x1c0] sm:$0xff] %vm5370_vm0, %v4891_v9  ;;  %v6363_v3 = vcombine.low %v20208_v50, %v21386_v52  ;;  %v1670_v9 = vrot.slane %v1662_v17, %v20358_v60  ;;  %v26165_v36 = vcombine.low %v20226_v55, %v21296_v16 }
 0x326   : > { %5459 = vst.msk [vmem:[#allocation2 + $0x2c0] sm:$0xff] %vm5370_vm0, %v4892_v30  ;;  %5491 = vst.msk [vmem:[#allocation2 + $0x3c0] sm:$0xff] %vm5370_vm0, %v4893_v11  ;;  %v1677_v30 = vrot.slane %v1663_v42, %v20358_v60  ;;  %v1686_v11 = vrot.slane %v1678_v37, %v20358_v60  ;;  %v1693_v49 = vrot.slane %v1679_v15, %v20358_v60  ;;  %5687 = vrot.lane.b32.xlu0 %v26159_v5, %s19649_s9 }
 0x327   : > { %v2726_v24 = vrot.slane %v26165_v36, %v20344_v6  ;;  %v26166_v13 = vcombine.high %v20226_v55, %v21296_v16  ;;  %v2742_v20 = vrot.slane %v2734_v8, %v20344_v6  ;;  %v2749_v40 = vrot.slane %v2735_v46, %v20344_v6  ;;  %5685 = vrot.lane.b32.xlu1 %v26143_v63, %s19649_s9  ;;  %v21456_v55 = vpop.permute.xlu0 %782  ;;  %v21462_v46 = vpop.permute.xlu1 %752  ;;  %v26167_v36 = vld [vmem:[#allocation28_spill] sm:$0xff] }
 0x328   : > { %v3806_v41 = vcombine.low %v1670_v9, %v1677_v30  ;;  %v17045_v0 = vcombine.high %v1670_v9, %v1677_v30  ;;  %v3822_v51 = vcombine.low %v1686_v11, %v1693_v49  ;;  %v17046_v12 = vcombine.high %v1686_v11, %v1693_v49 }
 0x329   : > { %v2733_v18 = vrot.slane %v26166_v13, %v20344_v6  ;;  %v2750_v28 = vcombine.low %v2726_v24, %v2742_v20  ;;  %v2751_v32 = vcombine.high %v2726_v24, %v2742_v20 }
 0x32a   : > { %v3813_v16 = vrot.slane %v3806_v41, %v20344_v6  ;;  %v3821_v37 = vrot.slane %v17045_v0, %v20344_v6  ;;  %v3829_v15 = vrot.slane %v3822_v51, %v20344_v6  ;;  %v3837_v8 = vrot.slane %v17046_v12, %v20344_v6  ;;  %5723 = vrot.lane.b32.xlu0 %v26167_v36, %s19650_s11 }
 0x32b   : > { %v2766_v17 = vcombine.low %v2733_v18, %v2749_v40  ;;  %v2767_v42 = vcombine.high %v2733_v18, %v2749_v40  ;;  %v2758_v9 = vrot.slane %v2750_v28, %v20358_v60  ;;  %v2765_v30 = vrot.slane %v2751_v32, %v20358_v60  ;;  %5689 = vrot.lane.b32.xlu1 %v26164_v21, %s19649_s9  ;;  %v21472_v12 = vpop.permute.xlu0 %846 }
 0x32c   : > { %v3838_v24 = vcombine.low %v3813_v16, %v3821_v37  ;;  %v3839_v13 = vcombine.high %v3813_v16, %v3821_v37  ;;  %v3854_v18 = vcombine.low %v3829_v15, %v3837_v8  ;;  %v3855_v20 = vcombine.high %v3829_v15, %v3837_v8  ;;  %v21478_v16 = vpop.permute.xlu1 %784 }
 0x32d   : > { %v2774_v11 = vrot.slane %v2766_v17, %v20358_v60  ;;  %v2781_v49 = vrot.slane %v2767_v42, %v20358_v60  ;;  %v4894_v40 = vcombine.low %v2758_v9, %v2765_v30  ;;  %v17077_v41 = vcombine.high %v2758_v9, %v2765_v30 }
 0x32e   : > { %v3846_v28 = vrot.slane %v3838_v24, %v20358_v60  ;;  %v3853_v32 = vrot.slane %v3839_v13, %v20358_v60  ;;  %v3862_v17 = vrot.slane %v3854_v18, %v20358_v60  ;;  %v3869_v42 = vrot.slane %v3855_v20, %v20358_v60  ;;  %5727 = vrot.lane.b32.xlu0 %v20130_v27, %s19650_s11  ;;  %v26168_v24 = vld [vmem:[#allocation30_spill] sm:$0xff] }
 0x32f   : > { %v4910_v0 = vcombine.low %v2774_v11, %v2781_v49  ;;  %v17078_v51 = vcombine.high %v2774_v11, %v2781_v49  ;;  %v4901_v37 = vrot.slane %v4894_v40, %v20344_v6  ;;  %v4909_v15 = vrot.slane %v17077_v41, %v20344_v6  ;;  %5725 = vrot.lane.b32.xlu1 %v26168_v24, %s19650_s11  ;;  %v879_v7 = vpop.permute.xlu0 %878 }
 0x330   : > { %v3870_v30 = vcombine.low %v3846_v28, %v3862_v17  ;;  %v3871_v11 = vcombine.high %v3846_v28, %v3862_v17  ;;  %v3872_v49 = vcombine.low %v3853_v32, %v3869_v42  ;;  %v3873_v36 = vcombine.high %v3853_v32, %v3869_v42  ;;  %v849_v28 = vpop.permute.xlu1 %848 }
 0x331   : > { %v4917_v8 = vrot.slane %v4910_v0, %v20344_v6  ;;  %v4925_v9 = vrot.slane %v17078_v51, %v20344_v6  ;;  %v4926_v13 = vcombine.low %v4901_v37, %v4909_v15  ;;  %v4927_v18 = vcombine.high %v4901_v37, %v4909_v15 }
 0x332   : > { %5380 = vst.msk [vmem:[#allocation2 + $0x48] sm:$0xff] %vm5370_vm0, %v3870_v30  ;;  %5412 = vst.msk [vmem:[#allocation2 + $0x148] sm:$0xff] %vm5370_vm0, %v3871_v11  ;;  %v7451_v27 = vcombine.low %v20220_v54, %v21402_v34  ;;  %v7452_v41 = vcombine.high %v20220_v54, %v21402_v34  ;;  %v6431_v0 = vcombine.low %v20218_v53, %v21404_v48  ;;  %5731 = vrot.lane.b32.xlu0 %v26114_v39, %s19650_s11 }
 0x333   : > { %v4942_v20 = vcombine.low %v4917_v8, %v4925_v9  ;;  %v4943_v40 = vcombine.high %v4917_v8, %v4925_v9  ;;  %5444 = vst.msk [vmem:[#allocation2 + $0x248] sm:$0xff] %vm5370_vm0, %v3872_v49  ;;  %5476 = vst.msk [vmem:[#allocation2 + $0x348] sm:$0xff] %vm5370_vm0, %v3873_v36  ;;  %v6432_v51 = vcombine.high %v20218_v53, %v21404_v48  ;;  %5729 = vrot.lane.b32.xlu1 %v20142_v31, %s19650_s11  ;;  %v943_v24 = vpop.permute.xlu0 %942 }
 0x334   : > { %v4934_v32 = vrot.slane %v4926_v13, %v20358_v60  ;;  %v4941_v17 = vrot.slane %v4927_v18, %v20358_v60  ;;  %v26169_v34 = vcombine.low %v26156_v22, %v21198_v1  ;;  %v26170_v48 = vcombine.high %v26156_v22, %v21198_v1 }
 0x335   : > { %v4950_v42 = vrot.slane %v4942_v20, %v20358_v60  ;;  %v4957_v37 = vrot.slane %v4943_v40, %v20358_v60  ;;  %v21522_v9 = vrot.slane %v6363_v3, %v20344_v6  ;;  %v26172_v39 = vcombine.high %v20208_v50, %v21386_v52  ;;  %v21540_v20 = vpop.permute.xlu1 %880 }
 0x336   : > { %v21510_v15 = vrot.slane %v26169_v34, %v20344_v6  ;;  %v21516_v8 = vrot.slane %v26170_v48, %v20344_v6  ;;  %v1698_v18 = vcombine.low %v20270_v57, %v21472_v12  ;;  %v1699_v52 = vcombine.high %v20270_v57, %v21472_v12  ;;  %5735 = vrot.lane.b32.xlu0 %v20178_v43, %s19650_s11 }
 0x337   : > { %v21528_v30 = vrot.slane %v26172_v39, %v20344_v6  ;;  %v4958_v11 = vcombine.low %v4934_v32, %v4950_v42  ;;  %v4959_v49 = vcombine.high %v4934_v32, %v4950_v42  ;;  %v4960_v1 = vcombine.low %v4941_v17, %v4957_v37  ;;  %5733 = vrot.lane.b32.xlu1 %v26128_v26, %s19650_s11 }
 0x338   : > { %26171 = vst [vmem:[#allocation67_spill] sm:$0xff] %v21516_v8  ;;  %v4961_v36 = vcombine.high %v4941_v17, %v4957_v37  ;;  %v2786_v31 = vcombine.low %v20272_v58, %v879_v7  ;;  %v2787_v40 = vcombine.high %v20272_v58, %v879_v7  ;;  %v1766_v32 = vcombine.low %v20278_v61, %v849_v28 }
 0x339   : > { %5396 = vst.msk [vmem:[#allocation2 + $0xc8] sm:$0xff] %vm5370_vm0, %v4958_v11  ;;  %5428 = vst.msk [vmem:[#allocation2 + $0x1c8] sm:$0xff] %vm5370_vm0, %v4959_v49  ;;  %v1767_v17 = vcombine.high %v20278_v61, %v849_v28  ;;  %v21553_v57 = vrot.slane %v7451_v27, %v20344_v6  ;;  %v21556_v12 = vrot.slane %v7452_v41, %v20344_v6  ;;  %v975_v27 = vpop.permute.xlu0 %974  ;;  %v945_v26 = vpop.permute.xlu1 %944 }
 0x33a   : > { %5460 = vst.msk [vmem:[#allocation2 + $0x2c8] sm:$0xff] %vm5370_vm0, %v4960_v1  ;;  %5492 = vst.msk [vmem:[#allocation2 + $0x3c8] sm:$0xff] %vm5370_vm0, %v4961_v36  ;;  %v21559_v42 = vrot.slane %v6431_v0, %v20344_v6  ;;  %v21562_v37 = vrot.slane %v6432_v51, %v20344_v6  ;;  %v1706_v58 = vrot.slane %v1698_v18, %v20344_v6  ;;  %5739 = vrot.lane.b32.xlu0 %v20208_v50, %s19650_s11 }
 0x33b   : > { %v1713_v61 = vrot.slane %v1699_v52, %v20344_v6  ;;  %v2794_v43 = vrot.slane %v2786_v31, %v20344_v6  ;;  %v2801_v7 = vrot.slane %v2787_v40, %v20344_v6  ;;  %v21571_v41 = vrot.slane %v1766_v32, %v20344_v6  ;;  %5737 = vrot.lane.b32.xlu1 %v20190_v47, %s19650_s11 }
 0x33c   : > { %v21574_v0 = vrot.slane %v1767_v17, %v20344_v6  ;;  %v1714_v51 = vcombine.low %v21434_v14, %v943_v24  ;;  %v1715_v28 = vcombine.high %v21434_v14, %v943_v24  ;;  %v2802_v34 = vcombine.low %v21456_v55, %v975_v27 }
 0x33d   : > { %v2803_v48 = vcombine.high %v21456_v55, %v975_v27  ;;  %v1782_v39 = vcombine.low %v21462_v46, %v945_v26  ;;  %v1783_v11 = vcombine.high %v21462_v46, %v945_v26  ;;  %v21600_v18 = vpop.permute.xlu0 %5551  ;;  %v21602_v17 = vpop.permute.xlu1 %976 }
 0x33e   : > { %v1722_v49 = vrot.slane %v1714_v51, %v20344_v6  ;;  %v1729_v1 = vrot.slane %v1715_v28, %v20344_v6  ;;  %v2810_v55 = vrot.slane %v2802_v34, %v20344_v6  ;;  %5743 = vrot.lane.b32.xlu0 %v26107_v59, %s19650_s11 }
 0x33f   : > { %v2817_v46 = vrot.slane %v2803_v48, %v20344_v6  ;;  %v21595_v24 = vrot.slane %v1782_v39, %v20344_v6  ;;  %v21598_v50 = vrot.slane %v1783_v11, %v20344_v6  ;;  %5741 = vrot.lane.b32.xlu1 %v20218_v53, %s19650_s11 }
 0x340   : > { %v1730_v52 = vcombine.low %v1706_v58, %v1722_v49  ;;  %v1731_v31 = vcombine.high %v1706_v58, %v1722_v49  ;;  %v1746_v40 = vcombine.low %v1713_v61, %v1729_v1  ;;  %v1747_v32 = vcombine.high %v1713_v61, %v1729_v1 }
 0x341   : > { %v2818_v27 = vcombine.low %v2794_v43, %v2810_v55  ;;  %v2819_v47 = vcombine.high %v2794_v43, %v2810_v55  ;;  %v2834_v51 = vcombine.low %v2801_v7, %v2817_v46  ;;  %v2835_v28 = vcombine.high %v2801_v7, %v2817_v46  ;;  %v21616_v11 = vpop.permute.xlu0 %5583 }
 0x342   : > { %v1738_v26 = vrot.slane %v1730_v52, %v20358_v60  ;;  %v1745_v34 = vrot.slane %v1731_v31, %v20358_v60  ;;  %v1754_v48 = vrot.slane %v1746_v40, %v20358_v60  ;;  %v1761_v39 = vrot.slane %v1747_v32, %v20358_v60  ;;  %26173 = vst [vmem:[#allocation28_spill] sm:$0xff] %v21616_v11  ;;  %v21618_v52 = vpop.permute.xlu1 %5553 }
 0x343   : > { %v2826_v58 = vrot.slane %v2818_v27, %v20358_v60  ;;  %v2833_v61 = vrot.slane %v2819_v47, %v20358_v60  ;;  %v2842_v43 = vrot.slane %v2834_v51, %v20358_v60  ;;  %v2849_v7 = vrot.slane %v2835_v28, %v20358_v60  ;;  %v26174_v27 = vld [vmem:[#allocation47_spill] sm:$0xff] }
 0x344   : > { %v3874_v49 = vcombine.low %v1738_v26, %v1745_v34  ;;  %v17047_v1 = vcombine.high %v1738_v26, %v1745_v34  ;;  %v3890_v55 = vcombine.low %v1754_v48, %v1761_v39  ;;  %v17048_v46 = vcombine.high %v1754_v48, %v1761_v39  ;;  %5747 = vrot.lane.b32.xlu0 %v26174_v27, %s19650_s11  ;;  %v26175_v26 = vld [vmem:[#allocation43_spill] sm:$0xff] }
 0x345   : > { %v4962_v31 = vcombine.low %v2826_v58, %v2833_v61  ;;  %v17079_v40 = vcombine.high %v2826_v58, %v2833_v61  ;;  %v4978_v32 = vcombine.low %v2842_v43, %v2849_v7  ;;  %v17080_v53 = vcombine.high %v2842_v43, %v2849_v7  ;;  %5745 = vrot.lane.b32.xlu1 %v26175_v26, %s19650_s11  ;;  %v21632_v61 = vpop.permute.xlu0 %5647 }
 0x346   : > { %v3881_v47 = vrot.slane %v3874_v49, %v20344_v6  ;;  %v3889_v51 = vrot.slane %v17047_v1, %v20344_v6  ;;  %v3897_v28 = vrot.slane %v3890_v55, %v20344_v6  ;;  %v3905_v3 = vrot.slane %v17048_v46, %v20344_v6  ;;  %v21634_v55 = vpop.permute.xlu1 %5585 }
 0x347   : > { %v4969_v34 = vrot.slane %v4962_v31, %v20344_v6  ;;  %v4977_v48 = vrot.slane %v17079_v40, %v20344_v6  ;;  %v4985_v39 = vrot.slane %v4978_v32, %v20344_v6  ;;  %v4993_v58 = vrot.slane %v17080_v53, %v20344_v6  ;;  %26176 = vst [vmem:[#allocation30_spill] sm:$0xff] %v21634_v55 }
 0x348   : > { %v3906_v43 = vcombine.low %v3881_v47, %v3889_v51  ;;  %v3907_v7 = vcombine.high %v3881_v47, %v3889_v51  ;;  %v3922_v49 = vcombine.low %v3897_v28, %v3905_v3  ;;  %v3923_v1 = vcombine.high %v3897_v28, %v3905_v3  ;;  %5751 = vrot.lane.b32.xlu0 %v26157_v25, %s19650_s11 }
 0x349   : > { %v4994_v46 = vcombine.low %v4969_v34, %v4977_v48  ;;  %v4995_v13 = vcombine.high %v4969_v34, %v4977_v48  ;;  %v5010_v14 = vcombine.low %v4985_v39, %v4993_v58  ;;  %v5011_v36 = vcombine.high %v4985_v39, %v4993_v58  ;;  %5749 = vrot.lane.b32.xlu1 %v26141_v23, %s19650_s11  ;;  %v21648_v34 = vpop.permute.xlu0 %754 }
 0x34a   : > { %v3914_v31 = vrot.slane %v3906_v43, %v20358_v60  ;;  %v3921_v40 = vrot.slane %v3907_v7, %v20358_v60  ;;  %v3930_v32 = vrot.slane %v3922_v49, %v20358_v60  ;;  %v3937_v53 = vrot.slane %v3923_v1, %v20358_v60  ;;  %v21650_v7 = vpop.permute.xlu1 %5649 }
 0x34b   : > { %v5002_v3 = vrot.slane %v4994_v46, %v20358_v60  ;;  %v5009_v47 = vrot.slane %v4995_v13, %v20358_v60  ;;  %v5018_v51 = vrot.slane %v5010_v14, %v20358_v60  ;;  %v5025_v28 = vrot.slane %v5011_v36, %v20358_v60  ;;  %v26177_v46 = vld [vmem:[#allocation27_spill] sm:$0xff] }
 0x34c   : > { %v3938_v48 = vcombine.low %v3914_v31, %v3930_v32  ;;  %v3939_v39 = vcombine.high %v3914_v31, %v3930_v32  ;;  %v3940_v58 = vcombine.low %v3921_v40, %v3937_v53  ;;  %v3941_v43 = vcombine.high %v3921_v40, %v3937_v53  ;;  %5755 = vrot.lane.b32.xlu0 %v26177_v46, %s19650_s11  ;;  %v26181_v46 = vld [vmem:[#allocation29_spill] sm:$0xff] }
 0x34d   : > { %v5026_v49 = vcombine.low %v5002_v3, %v5018_v51  ;;  %v5027_v1 = vcombine.high %v5002_v3, %v5018_v51  ;;  %v5028_v55 = vcombine.low %v5009_v47, %v5025_v28  ;;  %v5029_v11 = vcombine.high %v5009_v47, %v5025_v28  ;;  %5753 = vrot.lane.b32.xlu1 %v26162_v45, %s19650_s11  ;;  %v21680_v40 = vpop.permute.xlu0 %786 }
 0x34e   : > { %5381 = vst.msk [vmem:[#allocation2 + $0x50] sm:$0xff] %vm5370_vm0, %v3938_v48  ;;  %5413 = vst.msk [vmem:[#allocation2 + $0x150] sm:$0xff] %vm5370_vm0, %v3939_v39  ;;  %v1798_v13 = vcombine.low %v21571_v41, %v21595_v24  ;;  %v1799_v36 = vcombine.high %v21571_v41, %v21595_v24  ;;  %v1814_v14 = vcombine.low %v21574_v0, %v21598_v50  ;;  %v21686_v3 = vpop.permute.xlu1 %756  ;;  %v26180_v39 = vld [vmem:[#allocation31_spill] sm:$0xff] }
 0x34f   : > { %5445 = vst.msk [vmem:[#allocation2 + $0x250] sm:$0xff] %vm5370_vm0, %v3940_v58  ;;  %5477 = vst.msk [vmem:[#allocation2 + $0x350] sm:$0xff] %vm5370_vm0, %v3941_v43  ;;  %v1815_v31 = vcombine.high %v21574_v0, %v21598_v50  ;;  %v2870_v41 = vcombine.low %v21478_v16, %v21602_v17  ;;  %v2871_v24 = vcombine.high %v21478_v16, %v21602_v17 }
 0x350   : > { %5397 = vst.msk [vmem:[#allocation2 + $0xd0] sm:$0xff] %vm5370_vm0, %v5026_v49  ;;  %5429 = vst.msk [vmem:[#allocation2 + $0x1d0] sm:$0xff] %vm5370_vm0, %v5027_v1  ;;  %v6499_v0 = vcombine.low %v26107_v59, %v21632_v61  ;;  %v1806_v32 = vrot.slane %v1798_v13, %v20358_v60  ;;  %v26178_v16 = vcombine.low %v20280_v62, %v21540_v20  ;;  %5759 = vrot.lane.b32.xlu0 %v26180_v39, %s19650_s11 }
 0x351   : > { %5461 = vst.msk [vmem:[#allocation2 + $0x2d0] sm:$0xff] %vm5370_vm0, %v5028_v55  ;;  %5493 = vst.msk [vmem:[#allocation2 + $0x3d0] sm:$0xff] %vm5370_vm0, %v5029_v11  ;;  %v1813_v55 = vrot.slane %v1799_v36, %v20358_v60  ;;  %v1822_v11 = vrot.slane %v1814_v14, %v20358_v60  ;;  %v1829_v53 = vrot.slane %v1815_v31, %v20358_v60  ;;  %5757 = vrot.lane.b32.xlu1 %v26181_v46, %s19650_s11 }
 0x352   : > { %v2862_v17 = vrot.slane %v26178_v16, %v20344_v6  ;;  %v26179_v47 = vcombine.high %v20280_v62, %v21540_v20  ;;  %v2878_v28 = vrot.slane %v2870_v41, %v20344_v6  ;;  %v2885_v48 = vrot.slane %v2871_v24, %v20344_v6  ;;  %v21702_v62 = vpop.permute.xlu0 %850 }
 0x353   : > { %v3942_v58 = vcombine.low %v1806_v32, %v1813_v55  ;;  %v17049_v43 = vcombine.high %v1806_v32, %v1813_v55  ;;  %v3958_v49 = vcombine.low %v1822_v11, %v1829_v53  ;;  %v17050_v1 = vcombine.high %v1822_v11, %v1829_v53  ;;  %v21708_v32 = vpop.permute.xlu1 %788 }
 0x354   : > { %v2869_v51 = vrot.slane %v26179_v47, %v20344_v6  ;;  %v2886_v13 = vcombine.low %v2862_v17, %v2878_v28  ;;  %v2887_v36 = vcombine.high %v2862_v17, %v2878_v28  ;;  %v26182_v47 = vld [vmem:[#allocation34_spill] sm:$0xff] }
 0x355   : > { %v3949_v20 = vrot.slane %v3942_v58, %v20344_v6  ;;  %v3957_v41 = vrot.slane %v17049_v43, %v20344_v6  ;;  %v3965_v24 = vrot.slane %v3958_v49, %v20344_v6  ;;  %v3973_v16 = vrot.slane %v17050_v1, %v20344_v6  ;;  %5763 = vrot.lane.b32.xlu0 %v26182_v47, %s19650_s11  ;;  %v26183_v58 = vld [vmem:[#allocation32_spill] sm:$0xff] }
 0x356   : > { %v2902_v14 = vcombine.low %v2869_v51, %v2885_v48  ;;  %v2903_v31 = vcombine.high %v2869_v51, %v2885_v48  ;;  %v2894_v55 = vrot.slane %v2886_v13, %v20358_v60  ;;  %v2901_v11 = vrot.slane %v2887_v36, %v20358_v60  ;;  %5761 = vrot.lane.b32.xlu1 %v26183_v58, %s19650_s11  ;;  %v883_v13 = vpop.permute.xlu0 %882 }
 0x357   : > { %v3974_v51 = vcombine.low %v3949_v20, %v3957_v41  ;;  %v3975_v28 = vcombine.high %v3949_v20, %v3957_v41  ;;  %v3990_v48 = vcombine.low %v3965_v24, %v3973_v16  ;;  %v3991_v39 = vcombine.high %v3965_v24, %v3973_v16  ;;  %v853_v50 = vpop.permute.xlu1 %852 }
 0x358   : > { %v2910_v53 = vrot.slane %v2902_v14, %v20358_v60  ;;  %v2917_v17 = vrot.slane %v2903_v31, %v20358_v60  ;;  %v5030_v43 = vcombine.low %v2894_v55, %v2901_v11  ;;  %v17081_v49 = vcombine.high %v2894_v55, %v2901_v11 }
 0x359   : > { %v3982_v36 = vrot.slane %v3974_v51, %v20358_v60  ;;  %v3989_v14 = vrot.slane %v3975_v28, %v20358_v60  ;;  %v3998_v31 = vrot.slane %v3990_v48, %v20358_v60  ;;  %v4005_v47 = vrot.slane %v3991_v39, %v20358_v60  ;;  %5767 = vrot.lane.b32.xlu0 %v20180_v44, %s19650_s11 }
 0x35a   : > { %v5046_v1 = vcombine.low %v2910_v53, %v2917_v17  ;;  %v17082_v46 = vcombine.high %v2910_v53, %v2917_v17  ;;  %v5037_v20 = vrot.slane %v5030_v43, %v20344_v6  ;;  %v5045_v41 = vrot.slane %v17081_v49, %v20344_v6  ;;  %5765 = vrot.lane.b32.xlu1 %v26135_v29, %s19650_s11  ;;  %v947_v58 = vpop.permute.xlu0 %946  ;;  %v26184_v29 = vld [vmem:[#allocation45_spill] sm:$0xff] }
 0x35b   : > { %v4006_v55 = vcombine.low %v3982_v36, %v3998_v31  ;;  %v4007_v11 = vcombine.high %v3982_v36, %v3998_v31  ;;  %v4008_v53 = vcombine.low %v3989_v14, %v4005_v47  ;;  %v4009_v17 = vcombine.high %v3989_v14, %v4005_v47 }
 0x35c   : > { %v5053_v24 = vrot.slane %v5046_v1, %v20344_v6  ;;  %v5061_v16 = vrot.slane %v17082_v46, %v20344_v6  ;;  %v5062_v51 = vcombine.low %v5037_v20, %v5045_v41  ;;  %v5063_v28 = vcombine.high %v5037_v20, %v5045_v41  ;;  %v21742_v46 = vpop.permute.xlu1 %884 }
 0x35d   : > { %5382 = vst.msk [vmem:[#allocation2 + $0x58] sm:$0xff] %vm5370_vm0, %v4006_v55  ;;  %5414 = vst.msk [vmem:[#allocation2 + $0x158] sm:$0xff] %vm5370_vm0, %v4007_v11  ;;  %v1834_v49 = vcombine.low %v26184_v29, %v21702_v62  ;;  %v1835_v1 = vcombine.high %v26184_v29, %v21702_v62  ;;  %5771 = vrot.lane.b32.xlu0 %v20220_v54, %s19650_s11  ;;  %v26185_v20 = vcombine.low %v20228_v56, %v21440_v38 }
 0x35e   : > { %v5078_v48 = vcombine.low %v5053_v24, %v5061_v16  ;;  %v5079_v39 = vcombine.high %v5053_v24, %v5061_v16  ;;  %5446 = vst.msk [vmem:[#allocation2 + $0x258] sm:$0xff] %vm5370_vm0, %v4008_v53  ;;  %5478 = vst.msk [vmem:[#allocation2 + $0x358] sm:$0xff] %vm5370_vm0, %v4009_v17  ;;  %v5070_v36 = vrot.slane %v5062_v51, %v20358_v60  ;;  %5769 = vrot.lane.b32.xlu1 %v26156_v22, %s19650_s11  ;;  %v979_v51 = vpop.permute.xlu0 %978 }
 0x35f   : > { %v5077_v14 = vrot.slane %v5063_v28, %v20358_v60  ;;  %v21754_v41 = vrot.slane %v26185_v20, %v20344_v6  ;;  %v26187_v62 = vcombine.high %v20228_v56, %v21440_v38  ;;  %v21766_v16 = vrot.slane %v6499_v0, %v20344_v6  ;;  %v26190_v28 = vld [vmem:[#allocation46_spill] sm:$0xff]  ;;  %v26191_v0 = vld [vmem:[#allocation49_spill] sm:$0xff] }
 0x360   : > { %v5086_v31 = vrot.slane %v5078_v48, %v20358_v60  ;;  %v5093_v47 = vrot.slane %v5079_v39, %v20358_v60  ;;  %v26189_v54 = vcombine.high %v26107_v59, %v21632_v61  ;;  %v2922_v48 = vcombine.low %v26190_v28, %v883_v13 }
 0x361   : > { %26186 = vst [vmem:[#allocation47_spill] sm:$0xff] %v21754_v41  ;;  %v21760_v24 = vrot.slane %v26187_v62, %v20344_v6  ;;  %v2923_v39 = vcombine.high %v26190_v28, %v883_v13  ;;  %v1902_v29 = vcombine.low %v26191_v0, %v853_v50  ;;  %v1903_v20 = vcombine.high %v26191_v0, %v853_v50  ;;  %v949_v62 = vpop.permute.xlu1 %948 }
 0x362   : > { %v21772_v55 = vrot.slane %v26189_v54, %v20344_v6  ;;  %v5094_v11 = vcombine.low %v5070_v36, %v5086_v31  ;;  %v5095_v53 = vcombine.high %v5070_v36, %v5086_v31  ;;  %v5096_v38 = vcombine.low %v5077_v14, %v5093_v47  ;;  %5775 = vrot.lane.b32.xlu0 %v26109_v10, %s19650_s11  ;;  %v21806_v54 = vpop.permute.xlu0 %5555 }
 0x363   : > { %26188 = vst [vmem:[#allocation43_spill] sm:$0xff] %v21760_v24  ;;  %v5097_v17 = vcombine.high %v5077_v14, %v5093_v47  ;;  %v1842_v59 = vrot.slane %v1834_v49, %v20344_v6  ;;  %v1849_v22 = vrot.slane %v1835_v1, %v20344_v6  ;;  %v1850_v61 = vcombine.low %v21648_v34, %v947_v58  ;;  %v26192_v14 = vld [vmem:[#allocation50_spill] sm:$0xff] }
 0x364   : > { %5398 = vst.msk [vmem:[#allocation2 + $0xd8] sm:$0xff] %vm5370_vm0, %v5094_v11  ;;  %5430 = vst.msk [vmem:[#allocation2 + $0x1d8] sm:$0xff] %vm5370_vm0, %v5095_v53  ;;  %v1851_v13 = vcombine.high %v21648_v34, %v947_v58  ;;  %v2930_v50 = vrot.slane %v2922_v48, %v20344_v6  ;;  %v2937_v36 = vrot.slane %v2923_v39, %v20344_v6  ;;  %5773 = vrot.lane.b32.xlu1 %v20228_v56, %s19650_s11 }
 0x365   : > { %5462 = vst.msk [vmem:[#allocation2 + $0x2d8] sm:$0xff] %vm5370_vm0, %v5096_v38  ;;  %5494 = vst.msk [vmem:[#allocation2 + $0x3d8] sm:$0xff] %vm5370_vm0, %v5097_v17  ;;  %v21799_v49 = vrot.slane %v1902_v29, %v20344_v6  ;;  %v21802_v34 = vrot.slane %v1903_v20, %v20344_v6  ;;  %v1858_v58 = vrot.slane %v1850_v61, %v20344_v6  ;;  %v21812_v17 = vpop.permute.xlu1 %980 }
 0x366   : > { %v1865_v1 = vrot.slane %v1851_v13, %v20344_v6  ;;  %v2938_v11 = vcombine.low %v21680_v40, %v979_v51  ;;  %v2939_v53 = vcombine.high %v21680_v40, %v979_v51  ;;  %v1918_v38 = vcombine.low %v21686_v3, %v949_v62  ;;  %5779 = vrot.lane.b32.xlu0 %v26140_v33, %s19650_s11 }
 0x367   : > { %v1919_v56 = vcombine.high %v21686_v3, %v949_v62  ;;  %v1866_v28 = vcombine.low %v1842_v59, %v1858_v58  ;;  %v1867_v48 = vcombine.high %v1842_v59, %v1858_v58 }
 0x368   : > { %v1882_v39 = vcombine.low %v1849_v22, %v1865_v1  ;;  %v1883_v0 = vcombine.high %v1849_v22, %v1865_v1  ;;  %v2946_v29 = vrot.slane %v2938_v11, %v20344_v6  ;;  %v2953_v20 = vrot.slane %v2939_v53, %v20344_v6  ;;  %5777 = vrot.lane.b32.xlu1 %v26111_v35, %s19650_s11  ;;  %v21830_v22 = vpop.permute.xlu0 %5587 }
 0x369   : > { %v21819_v61 = vrot.slane %v1918_v38, %v20344_v6  ;;  %v21822_v40 = vrot.slane %v1919_v56, %v20344_v6  ;;  %v1874_v3 = vrot.slane %v1866_v28, %v20358_v60  ;;  %v1881_v51 = vrot.slane %v1867_v48, %v20358_v60  ;;  %26193 = vst [vmem:[#allocation27_spill] sm:$0xff] %v21830_v22  ;;  %v21832_v53 = vpop.permute.xlu1 %5557 }
 0x36a   : > { %v1890_v62 = vrot.slane %v1882_v39, %v20358_v60  ;;  %v1897_v59 = vrot.slane %v1883_v0, %v20358_v60  ;;  %v2954_v13 = vcombine.low %v2930_v50, %v2946_v29  ;;  %v2955_v58 = vcombine.high %v2930_v50, %v2946_v29  ;;  %5783 = vrot.lane.b32.xlu0 %v26159_v5, %s19650_s11 }
 0x36b   : > { %v2970_v1 = vcombine.low %v2937_v36, %v2953_v20  ;;  %v2971_v11 = vcombine.high %v2937_v36, %v2953_v20  ;;  %v4010_v38 = vcombine.low %v1874_v3, %v1881_v51  ;;  %v17051_v56 = vcombine.high %v1874_v3, %v1881_v51 }
 0x36c   : > { %v4026_v43 = vcombine.low %v1890_v62, %v1897_v59  ;;  %v17052_v44 = vcombine.high %v1890_v62, %v1897_v59  ;;  %v2962_v28 = vrot.slane %v2954_v13, %v20358_v60  ;;  %v2969_v48 = vrot.slane %v2955_v58, %v20358_v60  ;;  %5781 = vrot.lane.b32.xlu1 %v26143_v63, %s19650_s11  ;;  %v21846_v3 = vpop.permute.xlu0 %5651 }
 0x36d   : > { %v2978_v39 = vrot.slane %v2970_v1, %v20358_v60  ;;  %v2985_v0 = vrot.slane %v2971_v11, %v20358_v60  ;;  %v4017_v50 = vrot.slane %v4010_v38, %v20344_v6  ;;  %v4025_v36 = vrot.slane %v17051_v56, %v20344_v6  ;;  %v21848_v58 = vpop.permute.xlu1 %5589 }
 0x36e   : > { %v4033_v29 = vrot.slane %v4026_v43, %v20344_v6  ;;  %v4041_v20 = vrot.slane %v17052_v44, %v20344_v6  ;;  %v5098_v51 = vcombine.low %v2962_v28, %v2969_v48  ;;  %v17083_v62 = vcombine.high %v2962_v28, %v2969_v48  ;;  %26194 = vst [vmem:[#allocation31_spill] sm:$0xff] %v21848_v58 }
 0x36f   : > { %v5114_v59 = vcombine.low %v2978_v39, %v2985_v0  ;;  %v17084_v13 = vcombine.high %v2978_v39, %v2985_v0  ;;  %v4042_v1 = vcombine.low %v4017_v50, %v4025_v36  ;;  %v4043_v11 = vcombine.high %v4017_v50, %v4025_v36 }
 0x370   : > { %v4058_v47 = vcombine.low %v4033_v29, %v4041_v20  ;;  %v4059_v31 = vcombine.high %v4033_v29, %v4041_v20  ;;  %v5105_v38 = vrot.slane %v5098_v51, %v20344_v6  ;;  %v5113_v56 = vrot.slane %v17083_v62, %v20344_v6  ;;  %5785 = vrot.lane.b32.xlu1 %v26164_v21, %s19650_s11  ;;  %v21860_v50 = vpop.permute.xlu0 %758 }
 0x371   : > { %v5121_v43 = vrot.slane %v5114_v59, %v20344_v6  ;;  %v5129_v44 = vrot.slane %v17084_v13, %v20344_v6  ;;  %v4050_v28 = vrot.slane %v4042_v1, %v20358_v60  ;;  %v4057_v48 = vrot.slane %v4043_v11, %v20358_v60  ;;  %v21862_v62 = vpop.permute.xlu1 %5653 }
 0x372   : > { %v4066_v39 = vrot.slane %v4058_v47, %v20358_v60  ;;  %v4073_v0 = vrot.slane %v4059_v31, %v20358_v60  ;;  %v5130_v36 = vcombine.low %v5105_v38, %v5113_v56  ;;  %v5131_v29 = vcombine.high %v5105_v38, %v5113_v56 }
 0x373   : > { %v5146_v20 = vcombine.low %v5121_v43, %v5129_v44  ;;  %v5147_v51 = vcombine.high %v5121_v43, %v5129_v44  ;;  %v1934_v38 = vcombine.low %v21799_v49, %v21819_v61  ;;  %v1935_v56 = vcombine.high %v21799_v49, %v21819_v61 }
 0x374   : > { %v4074_v59 = vcombine.low %v4050_v28, %v4066_v39  ;;  %v4075_v13 = vcombine.high %v4050_v28, %v4066_v39  ;;  %v4076_v58 = vcombine.low %v4057_v48, %v4073_v0  ;;  %v4077_v24 = vcombine.high %v4057_v48, %v4073_v0  ;;  %v21880_v28 = vpop.permute.xlu0 %790 }
 0x375   : > { %v5138_v1 = vrot.slane %v5130_v36, %v20358_v60  ;;  %v5145_v11 = vrot.slane %v5131_v29, %v20358_v60  ;;  %v5154_v47 = vrot.slane %v5146_v20, %v20358_v60  ;;  %v5161_v31 = vrot.slane %v5147_v51, %v20358_v60  ;;  %v21882_v36 = vpop.permute.xlu1 %5681 }
 0x376   : > { %5383 = vst.msk [vmem:[#allocation2 + $0x60] sm:$0xff] %vm5370_vm0, %v4074_v59  ;;  %5415 = vst.msk [vmem:[#allocation2 + $0x160] sm:$0xff] %vm5370_vm0, %v4075_v13  ;;  %v1950_v43 = vcombine.low %v21802_v34, %v21822_v40  ;;  %v1951_v44 = vcombine.high %v21802_v34, %v21822_v40  ;;  %v1949_v29 = vrot.slane %v1935_v56, %v20358_v60 }
 0x377   : > { %5447 = vst.msk [vmem:[#allocation2 + $0x260] sm:$0xff] %vm5370_vm0, %v4076_v58  ;;  %5479 = vst.msk [vmem:[#allocation2 + $0x360] sm:$0xff] %vm5370_vm0, %v4077_v24  ;;  %v5162_v48 = vcombine.low %v5138_v1, %v5154_v47  ;;  %v5163_v39 = vcombine.high %v5138_v1, %v5154_v47  ;;  %v5164_v0 = vcombine.low %v5145_v11, %v5161_v31 }
 0x378   : > { %v5165_v58 = vcombine.high %v5145_v11, %v5161_v31  ;;  %v1942_v24 = vrot.slane %v1934_v38, %v20358_v60  ;;  %v1958_v49 = vrot.slane %v1950_v43, %v20358_v60  ;;  %v1965_v61 = vrot.slane %v1951_v44, %v20358_v60  ;;  %v21900_v47 = vpop.permute.xlu0 %854 }
 0x379   : > { %5399 = vst.msk [vmem:[#allocation2 + $0xe0] sm:$0xff] %vm5370_vm0, %v5162_v48  ;;  %5431 = vst.msk [vmem:[#allocation2 + $0x1e0] sm:$0xff] %vm5370_vm0, %v5163_v39  ;;  %v3006_v34 = vcombine.low %v21708_v32, %v21812_v17  ;;  %v3007_v40 = vcombine.high %v21708_v32, %v21812_v17  ;;  %v6635_v20 = vcombine.low %v26174_v27, %v21846_v3 }
 0x37a   : > { %5463 = vst.msk [vmem:[#allocation2 + $0x2e0] sm:$0xff] %vm5370_vm0, %v5164_v0  ;;  %5495 = vst.msk [vmem:[#allocation2 + $0x3e0] sm:$0xff] %vm5370_vm0, %v5165_v58  ;;  %v6636_v51 = vcombine.high %v26174_v27, %v21846_v3  ;;  %v4078_v59 = vcombine.low %v1942_v24, %v1949_v29  ;;  %v17053_v13 = vcombine.high %v1942_v24, %v1949_v29  ;;  %v21912_v3 = vpop.permute.xlu1 %760 }
 0x37b   : > { %v4094_v1 = vcombine.low %v1958_v49, %v1965_v61  ;;  %v17054_v11 = vcombine.high %v1958_v49, %v1965_v61  ;;  %v26195_v31 = vcombine.low %v26192_v14, %v21742_v46  ;;  %v26196_v32 = vcombine.high %v26192_v14, %v21742_v46 }
 0x37c   : > { %v3014_v56 = vrot.slane %v3006_v34, %v20344_v6  ;;  %v3021_v27 = vrot.slane %v3007_v40, %v20344_v6  ;;  %v4085_v43 = vrot.slane %v4078_v59, %v20344_v6  ;;  %v4093_v44 = vrot.slane %v17053_v13, %v20344_v6  ;;  %v21918_v34 = vpop.permute.xlu0 %886 }
 0x37d   : > { %v2998_v38 = vrot.slane %v26195_v31, %v20344_v6  ;;  %v3005_v17 = vrot.slane %v26196_v32, %v20344_v6  ;;  %v4101_v48 = vrot.slane %v4094_v1, %v20344_v6  ;;  %v4109_v39 = vrot.slane %v17054_v11, %v20344_v6 }
 0x37e   : > { %v4110_v46 = vcombine.low %v4085_v43, %v4093_v44  ;;  %v4111_v14 = vcombine.high %v4085_v43, %v4093_v44  ;;  %v21924_v31 = vpop.permute.xlu1 %792 }
 0x37f   : > { %v3022_v0 = vcombine.low %v2998_v38, %v3014_v56  ;;  %v3023_v58 = vcombine.high %v2998_v38, %v3014_v56  ;;  %v3038_v24 = vcombine.low %v3005_v17, %v3021_v27  ;;  %v3039_v29 = vcombine.high %v3005_v17, %v3021_v27 }
 0x380   : > { %v4126_v49 = vcombine.low %v4101_v48, %v4109_v39  ;;  %v4127_v61 = vcombine.high %v4101_v48, %v4109_v39  ;;  %v4118_v11 = vrot.slane %v4110_v46, %v20358_v60  ;;  %v4125_v38 = vrot.slane %v4111_v14, %v20358_v60 }
 0x381   : > { %v3030_v40 = vrot.slane %v3022_v0, %v20358_v60  ;;  %v3037_v59 = vrot.slane %v3023_v58, %v20358_v60  ;;  %v3046_v13 = vrot.slane %v3038_v24, %v20358_v60  ;;  %v3053_v1 = vrot.slane %v3039_v29, %v20358_v60  ;;  %v951_v24 = vpop.permute.xlu0 %950 }
 0x382   : > { %v4134_v32 = vrot.slane %v4126_v49, %v20358_v60  ;;  %v4141_v17 = vrot.slane %v4127_v61, %v20358_v60  ;;  %v857_v49 = vpop.permute.xlu1 %856  ;;  %v6703_v61 = vcombine.low %v26141_v23, %v21862_v62 }
 0x383   : > { %v5166_v56 = vcombine.low %v3030_v40, %v3037_v59  ;;  %v17085_v27 = vcombine.high %v3030_v40, %v3037_v59  ;;  %v5182_v43 = vcombine.low %v3046_v13, %v3053_v1  ;;  %v17086_v44 = vcombine.high %v3046_v13, %v3053_v1 }
 0x384   : > { %v4142_v48 = vcombine.low %v4118_v11, %v4134_v32  ;;  %v4143_v39 = vcombine.high %v4118_v11, %v4134_v32  ;;  %v4144_v0 = vcombine.low %v4125_v38, %v4141_v17  ;;  %v4145_v58 = vcombine.high %v4125_v38, %v4141_v17 }
 0x385   : > { %v5173_v29 = vrot.slane %v5166_v56, %v20344_v6  ;;  %v5181_v41 = vrot.slane %v17085_v27, %v20344_v6  ;;  %v5189_v46 = vrot.slane %v5182_v43, %v20344_v6  ;;  %v5197_v14 = vrot.slane %v17086_v44, %v20344_v6 }
 0x386   : > { %5384 = vst.msk [vmem:[#allocation2 + $0x68] sm:$0xff] %vm5370_vm0, %v4142_v48  ;;  %5416 = vst.msk [vmem:[#allocation2 + $0x168] sm:$0xff] %vm5370_vm0, %v4143_v39  ;;  %v6704_v40 = vcombine.high %v26141_v23, %v21862_v62  ;;  %v26197_v17 = vcombine.low %v26175_v26, %v21650_v7  ;;  %v26198_v23 = vcombine.high %v26175_v26, %v21650_v7 }
 0x387   : > { %5448 = vst.msk [vmem:[#allocation2 + $0x268] sm:$0xff] %vm5370_vm0, %v4144_v0  ;;  %5480 = vst.msk [vmem:[#allocation2 + $0x368] sm:$0xff] %vm5370_vm0, %v4145_v58  ;;  %v5198_v1 = vcombine.low %v5173_v29, %v5181_v41  ;;  %v5199_v11 = vcombine.high %v5173_v29, %v5181_v41  ;;  %v5214_v38 = vcombine.low %v5189_v46, %v5197_v14  ;;  %v983_v41 = vpop.permute.xlu0 %982  ;;  %v21968_v58 = vpop.permute.xlu1 %888 }
 0x388   : > { %v5215_v32 = vcombine.high %v5189_v46, %v5197_v14  ;;  %v21950_v56 = vrot.slane %v26197_v17, %v20344_v6  ;;  %v21956_v62 = vrot.slane %v26198_v23, %v20344_v6  ;;  %v21959_v27 = vrot.slane %v6635_v20, %v20344_v6 }
 0x389   : > { %v21962_v43 = vrot.slane %v6636_v51, %v20344_v6  ;;  %v5206_v44 = vrot.slane %v5198_v1, %v20358_v60  ;;  %v5213_v48 = vrot.slane %v5199_v11, %v20358_v60  ;;  %v5222_v39 = vrot.slane %v5214_v38, %v20358_v60 }
 0x38a   : > { %v5229_v0 = vrot.slane %v5215_v32, %v20358_v60  ;;  %v1970_v26 = vcombine.low %v20528_v4, %v21900_v47  ;;  %v1971_v7 = vcombine.high %v20528_v4, %v21900_v47  ;;  %v3058_v20 = vcombine.low %v20550_v19, %v21918_v34 }
 0x38b   : > { %v3059_v51 = vcombine.high %v20550_v19, %v21918_v34  ;;  %v5230_v29 = vcombine.low %v5206_v44, %v5222_v39  ;;  %v5231_v46 = vcombine.high %v5206_v44, %v5222_v39  ;;  %v21979_v11 = vrot.slane %v6703_v61, %v20344_v6  ;;  %v21986_v47 = vpop.permute.xlu0 %5559  ;;  %v21996_v17 = vpop.permute.xlu1 %952 }
 0x38c   : > { %v5232_v14 = vcombine.low %v5213_v48, %v5229_v0  ;;  %v5233_v1 = vcombine.high %v5213_v48, %v5229_v0  ;;  %v21982_v38 = vrot.slane %v6704_v40, %v20344_v6  ;;  %v1978_v32 = vrot.slane %v1970_v26, %v20344_v6 }
 0x38d   : > { %v1985_v4 = vrot.slane %v1971_v7, %v20344_v6  ;;  %5400 = vst.msk [vmem:[#allocation2 + $0xe8] sm:$0xff] %vm5370_vm0, %v5230_v29  ;;  %5432 = vst.msk [vmem:[#allocation2 + $0x1e8] sm:$0xff] %vm5370_vm0, %v5231_v46  ;;  %v1986_v19 = vcombine.low %v21860_v50, %v951_v24  ;;  %v1987_v34 = vcombine.high %v21860_v50, %v951_v24  ;;  %v26199_v50 = vld [vmem:[#allocation66_spill] sm:$0xff] }
 0x38e   : > { %5464 = vst.msk [vmem:[#allocation2 + $0x2e8] sm:$0xff] %vm5370_vm0, %v5232_v14  ;;  %5496 = vst.msk [vmem:[#allocation2 + $0x3e8] sm:$0xff] %vm5370_vm0, %v5233_v1  ;;  %v2038_v61 = vcombine.low %v20556_v2, %v857_v49  ;;  %v2039_v40 = vcombine.high %v20556_v2, %v857_v49  ;;  %v3066_v23 = vrot.slane %v3058_v20, %v20344_v6 }
 0x38f   : > { %v3073_v44 = vrot.slane %v3059_v51, %v20344_v6  ;;  %v3074_v48 = vcombine.low %v21880_v28, %v983_v41  ;;  %v3075_v39 = vcombine.high %v21880_v28, %v983_v41  ;;  %v1994_v0 = vrot.slane %v1986_v19, %v20344_v6  ;;  %v22016_v41 = vpop.permute.xlu0 %5591  ;;  %v22018_v1 = vpop.permute.xlu1 %984 }
 0x390   : > { %v2001_v26 = vrot.slane %v1987_v34, %v20344_v6  ;;  %v22009_v49 = vrot.slane %v2038_v61, %v20344_v6  ;;  %v22012_v7 = vrot.slane %v2039_v40, %v20344_v6  ;;  %26200 = vst [vmem:[#allocation29_spill] sm:$0xff] %v22016_v41 }
 0x391   : > { %v3082_v20 = vrot.slane %v3074_v48, %v20344_v6  ;;  %v3089_v28 = vrot.slane %v3075_v39, %v20344_v6  ;;  %v2002_v51 = vcombine.low %v1978_v32, %v1994_v0  ;;  %v2003_v29 = vcombine.high %v1978_v32, %v1994_v0 }
 0x392   : > { %v2018_v46 = vcombine.low %v1985_v4, %v2001_v26  ;;  %v2019_v14 = vcombine.high %v1985_v4, %v2001_v26 }
 0x393   : > { %v3090_v19 = vcombine.low %v3066_v23, %v3082_v20  ;;  %v3091_v34 = vcombine.high %v3066_v23, %v3082_v20  ;;  %v3106_v2 = vcombine.low %v3073_v44, %v3089_v28  ;;  %v3107_v61 = vcombine.high %v3073_v44, %v3089_v28  ;;  %v22028_v28 = vpop.permute.xlu0 %5655 }
 0x394   : > { %v2010_v24 = vrot.slane %v2002_v51, %v20358_v60  ;;  %v2017_v40 = vrot.slane %v2003_v29, %v20358_v60  ;;  %v2026_v48 = vrot.slane %v2018_v46, %v20358_v60  ;;  %v2033_v39 = vrot.slane %v2019_v14, %v20358_v60  ;;  %v22030_v51 = vpop.permute.xlu1 %5561 }
 0x395   : > { %v3098_v13 = vrot.slane %v3090_v19, %v20358_v60  ;;  %v3105_v32 = vrot.slane %v3091_v34, %v20358_v60  ;;  %v3114_v4 = vrot.slane %v3106_v2, %v20358_v60  ;;  %v3121_v0 = vrot.slane %v3107_v61, %v20358_v60 }
 0x396   : > { %v4146_v26 = vcombine.low %v2010_v24, %v2017_v40  ;;  %v17055_v23 = vcombine.high %v2010_v24, %v2017_v40  ;;  %v4162_v20 = vcombine.low %v2026_v48, %v2033_v39  ;;  %v17056_v44 = vcombine.high %v2026_v48, %v2033_v39 }
 0x397   : > { %v5234_v29 = vcombine.low %v3098_v13, %v3105_v32  ;;  %v17087_v46 = vcombine.high %v3098_v13, %v3105_v32  ;;  %v5250_v59 = vcombine.low %v3114_v4, %v3121_v0  ;;  %v17088_v14 = vcombine.high %v3114_v4, %v3121_v0  ;;  %v22044_v8 = vpop.permute.xlu0 %5679 }
 0x398   : > { %v4153_v19 = vrot.slane %v4146_v26, %v20344_v6  ;;  %v4161_v34 = vrot.slane %v17055_v23, %v20344_v6  ;;  %v4169_v2 = vrot.slane %v4162_v20, %v20344_v6  ;;  %v4177_v61 = vrot.slane %v17056_v44, %v20344_v6 }
 0x399   : > { %v5241_v24 = vrot.slane %v5234_v29, %v20344_v6  ;;  %v5249_v40 = vrot.slane %v17087_v46, %v20344_v6  ;;  %v5257_v48 = vrot.slane %v5250_v59, %v20344_v6  ;;  %v5265_v39 = vrot.slane %v17088_v14, %v20344_v6  ;;  %v22046_v59 = vpop.permute.xlu1 %5593 }
 0x39a   : > { %v4178_v41 = vcombine.low %v4153_v19, %v4161_v34  ;;  %v4179_v13 = vcombine.high %v4153_v19, %v4161_v34  ;;  %v4194_v32 = vcombine.low %v4169_v2, %v4177_v61  ;;  %v4195_v4 = vcombine.high %v4169_v2, %v4177_v61 }
 0x39b   : > { %v5266_v0 = vcombine.low %v5241_v24, %v5249_v40  ;;  %v5267_v26 = vcombine.high %v5241_v24, %v5249_v40  ;;  %v5282_v22 = vcombine.low %v5257_v48, %v5265_v39  ;;  %v5283_v23 = vcombine.high %v5257_v48, %v5265_v39 }
 0x39c   : > { %v4186_v20 = vrot.slane %v4178_v41, %v20358_v60  ;;  %v4193_v44 = vrot.slane %v4179_v13, %v20358_v60  ;;  %v4202_v29 = vrot.slane %v4194_v32, %v20358_v60  ;;  %v4209_v46 = vrot.slane %v4195_v4, %v20358_v60 }
 0x39d   : > { %v5274_v14 = vrot.slane %v5266_v0, %v20358_v60  ;;  %v5281_v19 = vrot.slane %v5267_v26, %v20358_v60  ;;  %v5290_v34 = vrot.slane %v5282_v22, %v20358_v60  ;;  %v5297_v2 = vrot.slane %v5283_v23, %v20358_v60 }
 0x39e   : > { %v4210_v61 = vcombine.low %v4186_v20, %v4202_v29  ;;  %v4211_v41 = vcombine.high %v4186_v20, %v4202_v29  ;;  %v4212_v24 = vcombine.low %v4193_v44, %v4209_v46  ;;  %v4213_v40 = vcombine.high %v4193_v44, %v4209_v46  ;;  %v22080_v46 = vpop.permute.xlu0 %5683 }
 0x39f   : > { %v5298_v48 = vcombine.low %v5274_v14, %v5290_v34  ;;  %v5299_v39 = vcombine.high %v5274_v14, %v5290_v34  ;;  %v5300_v13 = vcombine.low %v5281_v19, %v5297_v2  ;;  %v5301_v32 = vcombine.high %v5281_v19, %v5297_v2  ;;  %v22082_v14 = vpop.permute.xlu1 %5657 }
 0x3a0   : > { %5385 = vst.msk [vmem:[#allocation2 + $0x70] sm:$0xff] %vm5370_vm0, %v4210_v61  ;;  %5417 = vst.msk [vmem:[#allocation2 + $0x170] sm:$0xff] %vm5370_vm0, %v4211_v41  ;;  %v2054_v22 = vcombine.low %v21912_v3, %v21996_v17  ;;  %v2055_v4 = vcombine.high %v21912_v3, %v21996_v17  ;;  %v3142_v0 = vcombine.low %v21924_v31, %v22018_v1 }
 0x3a1   : > { %5449 = vst.msk [vmem:[#allocation2 + $0x270] sm:$0xff] %vm5370_vm0, %v4212_v24  ;;  %5481 = vst.msk [vmem:[#allocation2 + $0x370] sm:$0xff] %vm5370_vm0, %v4213_v40  ;;  %v3143_v26 = vcombine.high %v21924_v31, %v22018_v1  ;;  %v6771_v23 = vcombine.low %v26157_v25, %v22028_v28  ;;  %v6772_v3 = vcombine.high %v26157_v25, %v22028_v28 }
 0x3a2   : > { %5401 = vst.msk [vmem:[#allocation2 + $0xf0] sm:$0xff] %vm5370_vm0, %v5298_v48  ;;  %5433 = vst.msk [vmem:[#allocation2 + $0x1f0] sm:$0xff] %vm5370_vm0, %v5299_v39  ;;  %v2062_v1 = vrot.slane %v2054_v22, %v20344_v6  ;;  %v2069_v20 = vrot.slane %v2055_v4, %v20344_v6  ;;  %v3150_v44 = vrot.slane %v3142_v0, %v20344_v6 }
 0x3a3   : > { %5465 = vst.msk [vmem:[#allocation2 + $0x2f0] sm:$0xff] %vm5370_vm0, %v5300_v13  ;;  %5497 = vst.msk [vmem:[#allocation2 + $0x3f0] sm:$0xff] %vm5370_vm0, %v5301_v32  ;;  %v3157_v29 = vrot.slane %v3143_v26, %v20344_v6  ;;  %v26201_v19 = vcombine.low %v26111_v35, %v21882_v36  ;;  %v26202_v2 = vcombine.high %v26111_v35, %v21882_v36 }
 0x3a4   : > { %v26203_v41 = vcombine.low %v26199_v50, %v21968_v58  ;;  %v26204_v40 = vcombine.high %v26199_v50, %v21968_v58  ;;  %v2070_v39 = vcombine.low %v22009_v49, %v2062_v1  ;;  %v2071_v13 = vcombine.high %v22009_v49, %v2062_v1 }
 0x3a5   : > { %v22088_v34 = vrot.slane %v26201_v19, %v20344_v6  ;;  %v22094_v61 = vrot.slane %v26202_v2, %v20344_v6  ;;  %v2086_v32 = vcombine.low %v22012_v7, %v2069_v20  ;;  %v2087_v35 = vcombine.high %v22012_v7, %v2069_v20 }
 0x3a6   : > { %v3134_v24 = vrot.slane %v26203_v41, %v20344_v6  ;;  %v3141_v48 = vrot.slane %v26204_v40, %v20344_v6  ;;  %v2078_v26 = vrot.slane %v2070_v39, %v20358_v60  ;;  %v2085_v19 = vrot.slane %v2071_v13, %v20358_v60  ;;  %v22118_v40 = vpop.permute.xlu1 %5685 }
 0x3a7   : > { %v2094_v2 = vrot.slane %v2086_v32, %v20358_v60  ;;  %v2101_v58 = vrot.slane %v2087_v35, %v20358_v60 }
 0x3a8   : > { %v3158_v36 = vcombine.low %v3134_v24, %v3150_v44  ;;  %v3159_v22 = vcombine.high %v3134_v24, %v3150_v44  ;;  %v3174_v4 = vcombine.low %v3141_v48, %v3157_v29  ;;  %v3175_v0 = vcombine.high %v3141_v48, %v3157_v29  ;;  %v22116_v24 = vpop.permute.xlu0 %5687 }
 0x3a9   : > { %v4214_v20 = vcombine.low %v2078_v26, %v2085_v19  ;;  %v17057_v44 = vcombine.high %v2078_v26, %v2085_v19  ;;  %v4230_v41 = vcombine.low %v2094_v2, %v2101_v58  ;;  %v17058_v29 = vcombine.high %v2094_v2, %v2101_v58 }
 0x3aa   : > { %v3166_v50 = vrot.slane %v3158_v36, %v20358_v60  ;;  %v3173_v49 = vrot.slane %v3159_v22, %v20358_v60  ;;  %v3182_v1 = vrot.slane %v3174_v4, %v20358_v60  ;;  %v3189_v7 = vrot.slane %v3175_v0, %v20358_v60 }
 0x3ab   : > { %v4221_v35 = vrot.slane %v4214_v20, %v20344_v6  ;;  %v4229_v36 = vrot.slane %v17057_v44, %v20344_v6  ;;  %v4237_v22 = vrot.slane %v4230_v41, %v20344_v6  ;;  %v4245_v4 = vrot.slane %v17058_v29, %v20344_v6 }
 0x3ac   : > { %v5302_v48 = vcombine.low %v3166_v50, %v3173_v49  ;;  %v17089_v39 = vcombine.high %v3166_v50, %v3173_v49  ;;  %v5318_v13 = vcombine.low %v3182_v1, %v3189_v7  ;;  %v17090_v32 = vcombine.high %v3182_v1, %v3189_v7  ;;  %v5724_v17 = vpop.permute.xlu0 %5723 }
 0x3ad   : > { %v4246_v58 = vcombine.low %v4221_v35, %v4229_v36  ;;  %v4247_v50 = vcombine.high %v4221_v35, %v4229_v36  ;;  %v4262_v49 = vcombine.low %v4237_v22, %v4245_v4  ;;  %v4263_v1 = vcombine.high %v4237_v22, %v4245_v4 }
 0x3ae   : > { %v5309_v0 = vrot.slane %v5302_v48, %v20344_v6  ;;  %v5317_v26 = vrot.slane %v17089_v39, %v20344_v6  ;;  %v5325_v19 = vrot.slane %v5318_v13, %v20344_v6  ;;  %v5333_v2 = vrot.slane %v17090_v32, %v20344_v6  ;;  %v22132_v13 = vpop.permute.xlu1 %5689 }
 0x3af   : > { %v4254_v41 = vrot.slane %v4246_v58, %v20358_v60  ;;  %v4261_v29 = vrot.slane %v4247_v50, %v20358_v60  ;;  %v4270_v48 = vrot.slane %v4262_v49, %v20358_v60  ;;  %v4277_v39 = vrot.slane %v4263_v1, %v20358_v60 }
 0x3b0   : > { %v5334_v7 = vcombine.low %v5309_v0, %v5317_v26  ;;  %v5335_v20 = vcombine.high %v5309_v0, %v5317_v26  ;;  %v5350_v31 = vcombine.low %v5325_v19, %v5333_v2  ;;  %v5351_v44 = vcombine.high %v5325_v19, %v5333_v2 }
 0x3b1   : > { %v4278_v4 = vcombine.low %v4254_v41, %v4270_v48  ;;  %v4279_v0 = vcombine.high %v4254_v41, %v4270_v48  ;;  %v4280_v26 = vcombine.low %v4261_v29, %v4277_v39  ;;  %v4281_v19 = vcombine.high %v4261_v29, %v4277_v39 }
 0x3b2   : > { %v5342_v32 = vrot.slane %v5334_v7, %v20358_v60  ;;  %v5349_v35 = vrot.slane %v5335_v20, %v20358_v60  ;;  %v5358_v36 = vrot.slane %v5350_v31, %v20358_v60  ;;  %v5365_v22 = vrot.slane %v5351_v44, %v20358_v60  ;;  %v5726_v39 = vpop.permute.xlu1 %5725 }
 0x3b3   : > { %5386 = vst.msk [vmem:[#allocation2 + $0x78] sm:$0xff] %vm5370_vm0, %v4278_v4  ;;  %5418 = vst.msk [vmem:[#allocation2 + $0x178] sm:$0xff] %vm5370_vm0, %v4279_v0  ;;  %v7723_v31 = vcombine.low %v26140_v33, %v22080_v46  ;;  %v7724_v1 = vcombine.high %v26140_v33, %v22080_v46  ;;  %v6839_v7 = vcombine.low %v26162_v45, %v22082_v14  ;;  %v26208_v4 = vld [vmem:[#allocation68_spill] sm:$0xff] }
 0x3b4   : > { %v5366_v2 = vcombine.low %v5342_v32, %v5358_v36  ;;  %v5367_v58 = vcombine.high %v5342_v32, %v5358_v36  ;;  %v5368_v50 = vcombine.low %v5349_v35, %v5365_v22  ;;  %v5369_v49 = vcombine.high %v5349_v35, %v5365_v22  ;;  %5450 = vst.msk [vmem:[#allocation2 + $0x278] sm:$0xff] %vm5370_vm0, %v4280_v26  ;;  %v26207_v35 = vld [vmem:[#allocation53_spill] sm:$0xff] }
 0x3b5   : > { %5482 = vst.msk [vmem:[#allocation2 + $0x378] sm:$0xff] %vm5370_vm0, %v4281_v19  ;;  %v6840_v20 = vcombine.high %v26162_v45, %v22082_v14  ;;  %v7859_v44 = vcombine.low %v26159_v5, %v22116_v24  ;;  %v7860_v33 = vcombine.high %v26159_v5, %v22116_v24  ;;  %v22166_v14 = vrot.slane %v6771_v23, %v20344_v6  ;;  %v5728_v23 = vpop.permute.xlu0 %5727  ;;  %v26209_v19 = vld [vmem:[#allocation54_spill] sm:$0xff] }
 0x3b6   : > { %5402 = vst.msk [vmem:[#allocation2 + $0xf8] sm:$0xff] %vm5370_vm0, %v5366_v2  ;;  %5434 = vst.msk [vmem:[#allocation2 + $0x1f8] sm:$0xff] %vm5370_vm0, %v5367_v58  ;;  %v22172_v41 = vrot.slane %v6772_v3, %v20344_v6  ;;  %v26205_v5 = vcombine.low %v26109_v10, %v22044_v8  ;;  %v26206_v29 = vcombine.high %v26109_v10, %v22044_v8 }
 0x3b7   : > { %5466 = vst.msk [vmem:[#allocation2 + $0x2f8] sm:$0xff] %vm5370_vm0, %v5368_v50  ;;  %5498 = vst.msk [vmem:[#allocation2 + $0x3f8] sm:$0xff] %vm5370_vm0, %v5369_v49  ;;  %v22187_v32 = vrot.slane %v7723_v31, %v20344_v6  ;;  %v22190_v25 = vrot.slane %v7724_v1, %v20344_v6  ;;  %v22193_v28 = vrot.slane %v6839_v7, %v20344_v6 }
 0x3b8   : > { %v22178_v24 = vrot.slane %v26205_v5, %v20344_v6  ;;  %v22184_v48 = vrot.slane %v26206_v29, %v20344_v6  ;;  %v22196_v3 = vrot.slane %v6840_v20, %v20344_v6  ;;  %v5835_v36 = vcombine.low %v26207_v35, %v5724_v17  ;;  %v26211_v29 = vld [vmem:[#allocation57_spill] sm:$0xff] }
 0x3b9   : > { %v5836_v10 = vcombine.high %v26207_v35, %v5724_v17  ;;  %v5971_v0 = vcombine.low %v26208_v4, %v5728_v23  ;;  %v5972_v26 = vcombine.high %v26208_v4, %v5728_v23  ;;  %v5903_v2 = vcombine.low %v26209_v19, %v5726_v39 }
 0x3ba   : > { %v5904_v58 = vcombine.high %v26209_v19, %v5726_v39  ;;  %v22209_v50 = vrot.slane %v7859_v44, %v20344_v6  ;;  %v22212_v49 = vrot.slane %v7860_v33, %v20344_v6  ;;  %v5843_v17 = vrot.slane %v5835_v36, %v20344_v6  ;;  %v26212_v33 = vld [vmem:[#allocation58_spill] sm:$0xff] }
 0x3bb   : > { %v5850_v31 = vrot.slane %v5836_v10, %v20344_v6  ;;  %v5979_v1 = vrot.slane %v5971_v0, %v20344_v6  ;;  %v5986_v7 = vrot.slane %v5972_v26, %v20344_v6  ;;  %v22219_v20 = vrot.slane %v5903_v2, %v20344_v6  ;;  %v26213_v36 = vld [vmem:[#allocation74_spill] sm:$0xff]  ;;  %v26214_v0 = vld [vmem:[#allocation75_spill] sm:$0xff] }
 0x3bc   : > { %26210 = vst [vmem:[#allocation34_spill] sm:$0xff] %v22212_v49  ;;  %v22222_v5 = vrot.slane %v5904_v58, %v20344_v6  ;;  %v5851_v44 = vcombine.low %v26211_v29, %v5843_v17  ;;  %v5852_v23 = vcombine.high %v26211_v29, %v5843_v17 }
 0x3bd   : > { %v5867_v39 = vcombine.low %v26212_v33, %v5850_v31  ;;  %v5868_v35 = vcombine.high %v26212_v33, %v5850_v31  ;;  %v5987_v10 = vcombine.low %v26213_v36, %v5979_v1  ;;  %v5988_v4 = vcombine.high %v26213_v36, %v5979_v1 }
 0x3be   : > { %v6003_v26 = vcombine.low %v26214_v0, %v5986_v7  ;;  %v6004_v19 = vcombine.high %v26214_v0, %v5986_v7  ;;  %v5859_v2 = vrot.slane %v5851_v44, %v20358_v60  ;;  %v5866_v58 = vrot.slane %v5852_v23, %v20358_v60 }
 0x3bf   : > { %v5875_v22 = vrot.slane %v5867_v39, %v20358_v60  ;;  %v5882_v17 = vrot.slane %v5868_v35, %v20358_v60  ;;  %v5995_v29 = vrot.slane %v5987_v10, %v20358_v60  ;;  %v6002_v31 = vrot.slane %v5988_v4, %v20358_v60 }
 0x3c0   : > { %v6011_v33 = vrot.slane %v6003_v26, %v20358_v60  ;;  %v6018_v1 = vrot.slane %v6004_v19, %v20358_v60  ;;  %v7995_v36 = vcombine.low %v5859_v2, %v5866_v58  ;;  %v17091_v8 = vcombine.high %v5859_v2, %v5866_v58 }
 0x3c1   : > { %v8011_v45 = vcombine.low %v5875_v22, %v5882_v17  ;;  %v17092_v7 = vcombine.high %v5875_v22, %v5882_v17  ;;  %v8131_v0 = vcombine.low %v5995_v29, %v6002_v31  ;;  %v17095_v44 = vcombine.high %v5995_v29, %v6002_v31 }
 0x3c2   : > { %v8147_v46 = vcombine.low %v6011_v33, %v6018_v1  ;;  %v17096_v23 = vcombine.high %v6011_v33, %v6018_v1  ;;  %v8002_v39 = vrot.slane %v7995_v36, %v20344_v6  ;;  %v8010_v35 = vrot.slane %v17091_v8, %v20344_v6 }
 0x3c3   : > { %v8018_v10 = vrot.slane %v8011_v45, %v20344_v6  ;;  %v8026_v4 = vrot.slane %v17092_v7, %v20344_v6  ;;  %v8138_v26 = vrot.slane %v8131_v0, %v20344_v6  ;;  %v8146_v19 = vrot.slane %v17095_v44, %v20344_v6 }
 0x3c4   : > { %v8154_v2 = vrot.slane %v8147_v46, %v20344_v6  ;;  %v8162_v22 = vrot.slane %v17096_v23, %v20344_v6  ;;  %v8027_v58 = vcombine.low %v8002_v39, %v8010_v35  ;;  %v8028_v17 = vcombine.high %v8002_v39, %v8010_v35 }
 0x3c5   : > { %v8043_v29 = vcombine.low %v8018_v10, %v8026_v4  ;;  %v8044_v31 = vcombine.high %v8018_v10, %v8026_v4  ;;  %v8163_v33 = vcombine.low %v8138_v26, %v8146_v19  ;;  %v8164_v1 = vcombine.high %v8138_v26, %v8146_v19 }
 0x3c6   : > { %v8179_v36 = vcombine.low %v8154_v2, %v8162_v22  ;;  %v8180_v8 = vcombine.high %v8154_v2, %v8162_v22  ;;  %v8035_v45 = vrot.slane %v8027_v58, %v20358_v60  ;;  %v8042_v7 = vrot.slane %v8028_v17, %v20358_v60  ;;  %v5732_v2 = vpop.permute.xlu0 %5731  ;;  %v5730_v22 = vpop.permute.xlu1 %5729 }
 0x3c7   : > { %v8051_v0 = vrot.slane %v8043_v29, %v20358_v60  ;;  %v8058_v44 = vrot.slane %v8044_v31, %v20358_v60  ;;  %v8171_v46 = vrot.slane %v8163_v33, %v20358_v60  ;;  %v8178_v23 = vrot.slane %v8164_v1, %v20358_v60  ;;  %v26215_v31 = vld [vmem:[#allocation59_spill] sm:$0xff] }
 0x3c8   : > { %v8187_v39 = vrot.slane %v8179_v36, %v20358_v60  ;;  %v8194_v35 = vrot.slane %v8180_v8, %v20358_v60  ;;  %v5919_v33 = vcombine.low %v26215_v31, %v22219_v20  ;;  %v5920_v1 = vcombine.high %v26215_v31, %v22219_v20  ;;  %v26216_v36 = vld [vmem:[#allocation60_spill] sm:$0xff] }
 0x3c9   : > { %v8059_v10 = vcombine.low %v8035_v45, %v8051_v0  ;;  %v8060_v4 = vcombine.high %v8035_v45, %v8051_v0  ;;  %v8061_v26 = vcombine.low %v8042_v7, %v8058_v44  ;;  %v8062_v19 = vcombine.high %v8042_v7, %v8058_v44  ;;  %v26217_v7 = vld [vmem:[#allocation35_spill] sm:$0xff] }
 0x3ca   : > { %v8195_v58 = vcombine.low %v8171_v46, %v8187_v39  ;;  %v8196_v17 = vcombine.high %v8171_v46, %v8187_v39  ;;  %v8197_v49 = vcombine.low %v8178_v23, %v8194_v35  ;;  %v8198_v29 = vcombine.high %v8178_v23, %v8194_v35  ;;  %v26218_v46 = vld [vmem:[#allocation70_spill] sm:$0xff] }
 0x3cb   : > { %10171 = vst.msk [vmem:[#allocation3] sm:$0xff] %vm5370_vm0, %v8059_v10  ;;  %10203 = vst.msk [vmem:[#allocation3 + $0x100] sm:$0xff] %vm5370_vm0, %v8060_v4  ;;  %v5935_v8 = vcombine.low %v26216_v36, %v22222_v5  ;;  %v5936_v45 = vcombine.high %v26216_v36, %v22222_v5  ;;  %v6107_v0 = vcombine.low %v26217_v7, %v5732_v2 }
 0x3cc   : > { %10235 = vst.msk [vmem:[#allocation3 + $0x200] sm:$0xff] %vm5370_vm0, %v8061_v26  ;;  %10267 = vst.msk [vmem:[#allocation3 + $0x300] sm:$0xff] %vm5370_vm0, %v8062_v19  ;;  %v6108_v44 = vcombine.high %v26217_v7, %v5732_v2  ;;  %v6039_v20 = vcombine.low %v26218_v46, %v5730_v22  ;;  %v6040_v23 = vcombine.high %v26218_v46, %v5730_v22 }
 0x3cd   : > { %10173 = vst.msk [vmem:[#allocation3 + $0x10] sm:$0xff] %vm5370_vm0, %v8195_v58  ;;  %10205 = vst.msk [vmem:[#allocation3 + $0x110] sm:$0xff] %vm5370_vm0, %v8196_v17  ;;  %v5927_v39 = vrot.slane %v5919_v33, %v20358_v60  ;;  %v5934_v5 = vrot.slane %v5920_v1, %v20358_v60  ;;  %v5943_v35 = vrot.slane %v5935_v8, %v20358_v60  ;;  %v26220_v1 = vld [vmem:[#allocation82_spill] sm:$0xff] }
 0x3ce   : > { %10237 = vst.msk [vmem:[#allocation3 + $0x210] sm:$0xff] %vm5370_vm0, %v8197_v49  ;;  %10269 = vst.msk [vmem:[#allocation3 + $0x310] sm:$0xff] %vm5370_vm0, %v8198_v29  ;;  %v5950_v10 = vrot.slane %v5936_v45, %v20358_v60  ;;  %v6115_v49 = vrot.slane %v6107_v0, %v20344_v6  ;;  %v6122_v4 = vrot.slane %v6108_v44, %v20344_v6  ;;  %v26219_v29 = vld [vmem:[#allocation33_spill] sm:$0xff] }
 0x3cf   : > { %v6047_v26 = vrot.slane %v6039_v20, %v20344_v6  ;;  %v6054_v19 = vrot.slane %v6040_v23, %v20344_v6  ;;  %v8063_v2 = vcombine.low %v5927_v39, %v5934_v5  ;;  %v17093_v58 = vcombine.high %v5927_v39, %v5934_v5 }
 0x3d0   : > { %v8079_v17 = vcombine.low %v5943_v35, %v5950_v10  ;;  %v17094_v22 = vcombine.high %v5943_v35, %v5950_v10  ;;  %v6123_v31 = vcombine.low %v26219_v29, %v6115_v49  ;;  %v6124_v33 = vcombine.high %v26219_v29, %v6115_v49 }
 0x3d1   : > { %v6139_v36 = vcombine.low %v26220_v1, %v6122_v4  ;;  %v6140_v8 = vcombine.high %v26220_v1, %v6122_v4  ;;  %v8070_v45 = vrot.slane %v8063_v2, %v20344_v6  ;;  %v8078_v7 = vrot.slane %v17093_v58, %v20344_v6 }
 0x3d2   : > { %v8086_v0 = vrot.slane %v8079_v17, %v20344_v6  ;;  %v8094_v44 = vrot.slane %v17094_v22, %v20344_v6  ;;  %v6131_v46 = vrot.slane %v6123_v31, %v20358_v60  ;;  %v6138_v20 = vrot.slane %v6124_v33, %v20358_v60 }
 0x3d3   : > { %v6147_v23 = vrot.slane %v6139_v36, %v20358_v60  ;;  %v6154_v39 = vrot.slane %v6140_v8, %v20358_v60  ;;  %v8095_v5 = vcombine.low %v8070_v45, %v8078_v7  ;;  %v8096_v35 = vcombine.high %v8070_v45, %v8078_v7 }
 0x3d4   : > { %v8111_v10 = vcombine.low %v8086_v0, %v8094_v44  ;;  %v8112_v49 = vcombine.high %v8086_v0, %v8094_v44  ;;  %v8267_v4 = vcombine.low %v6131_v46, %v6138_v20  ;;  %v17099_v2 = vcombine.high %v6131_v46, %v6138_v20 }
 0x3d5   : > { %v8283_v29 = vcombine.low %v6147_v23, %v6154_v39  ;;  %v17100_v58 = vcombine.high %v6147_v23, %v6154_v39  ;;  %v8103_v17 = vrot.slane %v8095_v5, %v20358_v60  ;;  %v8110_v22 = vrot.slane %v8096_v35, %v20358_v60  ;;  %v26221_v35 = vld [vmem:[#allocation78_spill] sm:$0xff] }
 0x3d6   : > { %v8119_v31 = vrot.slane %v8111_v10, %v20358_v60  ;;  %v8126_v33 = vrot.slane %v8112_v49, %v20358_v60  ;;  %v8274_v1 = vrot.slane %v8267_v4, %v20344_v6  ;;  %v8282_v36 = vrot.slane %v17099_v2, %v20344_v6  ;;  %v26222_v4 = vld [vmem:[#allocation79_spill] sm:$0xff] }
 0x3d7   : > { %v8290_v8 = vrot.slane %v8283_v29, %v20344_v6  ;;  %v8298_v45 = vrot.slane %v17100_v58, %v20344_v6  ;;  %v6055_v10 = vcombine.low %v26221_v35, %v6047_v26  ;;  %v6056_v49 = vcombine.high %v26221_v35, %v6047_v26 }
 0x3d8   : > { %v8127_v7 = vcombine.low %v8103_v17, %v8119_v31  ;;  %v8128_v0 = vcombine.high %v8103_v17, %v8119_v31  ;;  %v8129_v44 = vcombine.low %v8110_v22, %v8126_v33  ;;  %v8130_v46 = vcombine.high %v8110_v22, %v8126_v33 }
 0x3d9   : > { %v8299_v20 = vcombine.low %v8274_v1, %v8282_v36  ;;  %v8300_v23 = vcombine.high %v8274_v1, %v8282_v36  ;;  %v8315_v39 = vcombine.low %v8290_v8, %v8298_v45  ;;  %v8316_v5 = vcombine.high %v8290_v8, %v8298_v45  ;;  %v5736_v8 = vpop.permute.xlu0 %5735  ;;  %v5734_v45 = vpop.permute.xlu1 %5733 }
 0x3da   : > { %10172 = vst.msk [vmem:[#allocation3 + $0x8] sm:$0xff] %vm5370_vm0, %v8127_v7  ;;  %10204 = vst.msk [vmem:[#allocation3 + $0x108] sm:$0xff] %vm5370_vm0, %v8128_v0  ;;  %v6071_v2 = vcombine.low %v26222_v4, %v6054_v19  ;;  %v6072_v29 = vcombine.high %v26222_v4, %v6054_v19  ;;  %v6063_v33 = vrot.slane %v6055_v10, %v20358_v60 }
 0x3db   : > { %10236 = vst.msk [vmem:[#allocation3 + $0x208] sm:$0xff] %vm5370_vm0, %v8129_v44  ;;  %10268 = vst.msk [vmem:[#allocation3 + $0x308] sm:$0xff] %vm5370_vm0, %v8130_v46  ;;  %v8307_v58 = vrot.slane %v8299_v20, %v20358_v60  ;;  %v8314_v17 = vrot.slane %v8300_v23, %v20358_v60  ;;  %v8323_v22 = vrot.slane %v8315_v39, %v20358_v60 }
 0x3dc   : > { %v8330_v31 = vrot.slane %v8316_v5, %v20358_v60  ;;  %v6070_v1 = vrot.slane %v6056_v49, %v20358_v60  ;;  %v6079_v36 = vrot.slane %v6071_v2, %v20358_v60  ;;  %v6086_v26 = vrot.slane %v6072_v29, %v20358_v60  ;;  %v26223_v5 = vld [vmem:[#allocation37_spill] sm:$0xff] }
 0x3dd   : > { %v8331_v7 = vcombine.low %v8307_v58, %v8323_v22  ;;  %v8332_v19 = vcombine.high %v8307_v58, %v8323_v22  ;;  %v6243_v35 = vcombine.low %v26223_v5, %v5736_v8  ;;  %v6244_v10 = vcombine.high %v26223_v5, %v5736_v8  ;;  %v26224_v49 = vld [vmem:[#allocation81_spill] sm:$0xff] }
 0x3de   : > { %v8333_v0 = vcombine.low %v8314_v17, %v8330_v31  ;;  %v8334_v44 = vcombine.high %v8314_v17, %v8330_v31  ;;  %v8199_v46 = vcombine.low %v6063_v33, %v6070_v1  ;;  %v17097_v20 = vcombine.high %v6063_v33, %v6070_v1 }
 0x3df   : > { %v8215_v23 = vcombine.low %v6079_v36, %v6086_v26  ;;  %v17098_v39 = vcombine.high %v6079_v36, %v6086_v26  ;;  %10175 = vst.msk [vmem:[#allocation3 + $0x20] sm:$0xff] %vm5370_vm0, %v8331_v7  ;;  %10207 = vst.msk [vmem:[#allocation3 + $0x120] sm:$0xff] %vm5370_vm0, %v8332_v19  ;;  %v6175_v4 = vcombine.low %v26224_v49, %v5734_v45  ;;  %v26225_v19 = vld [vmem:[#allocation86_spill] sm:$0xff] }
 0x3e0   : > { %10239 = vst.msk [vmem:[#allocation3 + $0x220] sm:$0xff] %vm5370_vm0, %v8333_v0  ;;  %10271 = vst.msk [vmem:[#allocation3 + $0x320] sm:$0xff] %vm5370_vm0, %v8334_v44  ;;  %v6176_v2 = vcombine.high %v26224_v49, %v5734_v45  ;;  %v8206_v29 = vrot.slane %v8199_v46, %v20344_v6  ;;  %v8214_v58 = vrot.slane %v17097_v20, %v20344_v6  ;;  %v26226_v46 = vld [vmem:[#allocation87_spill] sm:$0xff] }
 0x3e1   : > { %v8222_v17 = vrot.slane %v8215_v23, %v20344_v6  ;;  %v8230_v22 = vrot.slane %v17098_v39, %v20344_v6  ;;  %v6251_v31 = vrot.slane %v6243_v35, %v20344_v6  ;;  %v6258_v33 = vrot.slane %v6244_v10, %v20344_v6 }
 0x3e2   : > { %v6183_v1 = vrot.slane %v6175_v4, %v20344_v6  ;;  %v6190_v36 = vrot.slane %v6176_v2, %v20344_v6  ;;  %v8231_v26 = vcombine.low %v8206_v29, %v8214_v58  ;;  %v8232_v8 = vcombine.high %v8206_v29, %v8214_v58 }
 0x3e3   : > { %v8247_v7 = vcombine.low %v8222_v17, %v8230_v22  ;;  %v8248_v45 = vcombine.high %v8222_v17, %v8230_v22  ;;  %v6259_v0 = vcombine.low %v26225_v19, %v6251_v31  ;;  %v6260_v44 = vcombine.high %v26225_v19, %v6251_v31 }
 0x3e4   : > { %v6275_v20 = vcombine.low %v26226_v46, %v6258_v33  ;;  %v6276_v23 = vcombine.high %v26226_v46, %v6258_v33  ;;  %v8239_v39 = vrot.slane %v8231_v26, %v20358_v60  ;;  %v8246_v5 = vrot.slane %v8232_v8, %v20358_v60 }
 0x3e5   : > { %v8255_v35 = vrot.slane %v8247_v7, %v20358_v60  ;;  %v8262_v10 = vrot.slane %v8248_v45, %v20358_v60  ;;  %v6267_v49 = vrot.slane %v6259_v0, %v20358_v60  ;;  %v6274_v4 = vrot.slane %v6260_v44, %v20358_v60  ;;  %v26227_v7 = vld [vmem:[#allocation38_spill] sm:$0xff]  ;;  %v26228_v44 = vld [vmem:[#allocation39_spill] sm:$0xff] }
 0x3e6   : > { %v6283_v2 = vrot.slane %v6275_v20, %v20358_v60  ;;  %v6290_v29 = vrot.slane %v6276_v23, %v20358_v60  ;;  %v6191_v45 = vcombine.low %v26227_v7, %v6183_v1  ;;  %v6192_v0 = vcombine.high %v26227_v7, %v6183_v1 }
 0x3e7   : > { %v8263_v58 = vcombine.low %v8239_v39, %v8255_v35  ;;  %v8264_v17 = vcombine.high %v8239_v39, %v8255_v35  ;;  %v8265_v22 = vcombine.low %v8246_v5, %v8262_v10  ;;  %v8266_v31 = vcombine.high %v8246_v5, %v8262_v10 }
 0x3e8   : > { %v8403_v33 = vcombine.low %v6267_v49, %v6274_v4  ;;  %v17103_v26 = vcombine.high %v6267_v49, %v6274_v4  ;;  %v8419_v19 = vcombine.low %v6283_v2, %v6290_v29  ;;  %v17104_v8 = vcombine.high %v6283_v2, %v6290_v29 }
 0x3e9   : > { %10174 = vst.msk [vmem:[#allocation3 + $0x18] sm:$0xff] %vm5370_vm0, %v8263_v58  ;;  %10206 = vst.msk [vmem:[#allocation3 + $0x118] sm:$0xff] %vm5370_vm0, %v8264_v17  ;;  %v6207_v46 = vcombine.low %v26228_v44, %v6190_v36  ;;  %v6208_v20 = vcombine.high %v26228_v44, %v6190_v36  ;;  %v6199_v10 = vrot.slane %v6191_v45, %v20358_v60 }
 0x3ea   : > { %10238 = vst.msk [vmem:[#allocation3 + $0x218] sm:$0xff] %vm5370_vm0, %v8265_v22  ;;  %10270 = vst.msk [vmem:[#allocation3 + $0x318] sm:$0xff] %vm5370_vm0, %v8266_v31  ;;  %v8410_v23 = vrot.slane %v8403_v33, %v20344_v6  ;;  %v8418_v39 = vrot.slane %v17103_v26, %v20344_v6  ;;  %v8426_v5 = vrot.slane %v8419_v19, %v20344_v6 }
 0x3eb   : > { %v8434_v35 = vrot.slane %v17104_v8, %v20344_v6  ;;  %v6206_v49 = vrot.slane %v6192_v0, %v20358_v60  ;;  %v6215_v4 = vrot.slane %v6207_v46, %v20358_v60  ;;  %v6222_v1 = vrot.slane %v6208_v20, %v20358_v60  ;;  %v5740_v20 = vpop.permute.xlu0 %5739 }
 0x3ec   : > { %v8435_v2 = vcombine.low %v8410_v23, %v8418_v39  ;;  %v8436_v29 = vcombine.high %v8410_v23, %v8418_v39  ;;  %v5738_v23 = vpop.permute.xlu1 %5737 }
 0x3ed   : > { %v8451_v58 = vcombine.low %v8426_v5, %v8434_v35  ;;  %v8452_v36 = vcombine.high %v8426_v5, %v8434_v35  ;;  %v8335_v17 = vcombine.low %v6199_v10, %v6206_v49  ;;  %v17101_v22 = vcombine.high %v6199_v10, %v6206_v49 }
 0x3ee   : > { %v8351_v31 = vcombine.low %v6215_v4, %v6222_v1  ;;  %v17102_v33 = vcombine.high %v6215_v4, %v6222_v1  ;;  %v8443_v26 = vrot.slane %v8435_v2, %v20358_v60  ;;  %v8450_v19 = vrot.slane %v8436_v29, %v20358_v60  ;;  %v26229_v29 = vld [vmem:[#allocation40_spill] sm:$0xff] }
 0x3ef   : > { %v8459_v8 = vrot.slane %v8451_v58, %v20358_v60  ;;  %v8466_v7 = vrot.slane %v8452_v36, %v20358_v60  ;;  %v8342_v45 = vrot.slane %v8335_v17, %v20344_v6  ;;  %v8350_v0 = vrot.slane %v17101_v22, %v20344_v6  ;;  %v26230_v17 = vld [vmem:[#allocation85_spill] sm:$0xff] }
 0x3f0   : > { %v8358_v44 = vrot.slane %v8351_v31, %v20344_v6  ;;  %v8366_v46 = vrot.slane %v17102_v33, %v20344_v6  ;;  %v6379_v58 = vcombine.low %v26229_v29, %v5740_v20  ;;  %v6380_v36 = vcombine.high %v26229_v29, %v5740_v20  ;;  %v26232_v29 = vld [vmem:[#allocation91_spill] sm:$0xff] }
 0x3f1   : > { %v8467_v39 = vcombine.low %v8443_v26, %v8459_v8  ;;  %v8468_v5 = vcombine.high %v8443_v26, %v8459_v8  ;;  %v8469_v35 = vcombine.low %v8450_v19, %v8466_v7  ;;  %v8470_v10 = vcombine.high %v8450_v19, %v8466_v7 }
 0x3f2   : > { %v8367_v49 = vcombine.low %v8342_v45, %v8350_v0  ;;  %v8368_v4 = vcombine.high %v8342_v45, %v8350_v0  ;;  %v8383_v1 = vcombine.low %v8358_v44, %v8366_v46  ;;  %v8384_v2 = vcombine.high %v8358_v44, %v8366_v46 }
 0x3f3   : > { %10177 = vst.msk [vmem:[#allocation3 + $0x30] sm:$0xff] %vm5370_vm0, %v8467_v39  ;;  %10209 = vst.msk [vmem:[#allocation3 + $0x130] sm:$0xff] %vm5370_vm0, %v8468_v5  ;;  %v6311_v22 = vcombine.low %v26230_v17, %v5738_v23  ;;  %v6312_v31 = vcombine.high %v26230_v17, %v5738_v23  ;;  %v6387_v7 = vrot.slane %v6379_v58, %v20344_v6 }
 0x3f4   : > { %10241 = vst.msk [vmem:[#allocation3 + $0x230] sm:$0xff] %vm5370_vm0, %v8469_v35  ;;  %10273 = vst.msk [vmem:[#allocation3 + $0x330] sm:$0xff] %vm5370_vm0, %v8470_v10  ;;  %v8375_v33 = vrot.slane %v8367_v49, %v20358_v60  ;;  %v8382_v26 = vrot.slane %v8368_v4, %v20358_v60  ;;  %v8391_v19 = vrot.slane %v8383_v1, %v20358_v60  ;;  %v26231_v4 = vld [vmem:[#allocation90_spill] sm:$0xff] }
 0x3f5   : > { %v8398_v8 = vrot.slane %v8384_v2, %v20358_v60  ;;  %v6394_v45 = vrot.slane %v6380_v36, %v20344_v6  ;;  %v6319_v0 = vrot.slane %v6311_v22, %v20344_v6  ;;  %v6326_v44 = vrot.slane %v6312_v31, %v20344_v6 }
 0x3f6   : > { %v8399_v46 = vcombine.low %v8375_v33, %v8391_v19  ;;  %v8400_v20 = vcombine.high %v8375_v33, %v8391_v19  ;;  %v6395_v5 = vcombine.low %v21522_v9, %v6387_v7  ;;  %v6396_v35 = vcombine.high %v21522_v9, %v6387_v7 }
 0x3f7   : > { %v8401_v39 = vcombine.low %v8382_v26, %v8398_v8  ;;  %v8402_v23 = vcombine.high %v8382_v26, %v8398_v8  ;;  %v6411_v10 = vcombine.low %v21528_v30, %v6394_v45  ;;  %v6412_v49 = vcombine.high %v21528_v30, %v6394_v45 }
 0x3f8   : > { %10176 = vst.msk [vmem:[#allocation3 + $0x28] sm:$0xff] %vm5370_vm0, %v8399_v46  ;;  %10208 = vst.msk [vmem:[#allocation3 + $0x128] sm:$0xff] %vm5370_vm0, %v8400_v20  ;;  %v6327_v1 = vcombine.low %v26231_v4, %v6319_v0  ;;  %v6328_v2 = vcombine.high %v26231_v4, %v6319_v0  ;;  %v6343_v58 = vcombine.low %v26232_v29, %v6326_v44  ;;  %v5742_v4 = vpop.permute.xlu1 %5741 }
 0x3f9   : > { %10240 = vst.msk [vmem:[#allocation3 + $0x228] sm:$0xff] %vm5370_vm0, %v8401_v39  ;;  %10272 = vst.msk [vmem:[#allocation3 + $0x328] sm:$0xff] %vm5370_vm0, %v8402_v23  ;;  %v6344_v9 = vcombine.high %v26232_v29, %v6326_v44  ;;  %v6403_v36 = vrot.slane %v6395_v5, %v20358_v60  ;;  %v6410_v30 = vrot.slane %v6396_v35, %v20358_v60 }
 0x3fa   : > { %v6419_v17 = vrot.slane %v6411_v10, %v20358_v60  ;;  %v6426_v22 = vrot.slane %v6412_v49, %v20358_v60  ;;  %v6335_v31 = vrot.slane %v6327_v1, %v20358_v60  ;;  %v6342_v33 = vrot.slane %v6328_v2, %v20358_v60  ;;  %v5744_v49 = vpop.permute.xlu0 %5743 }
 0x3fb   : > { %v6351_v26 = vrot.slane %v6343_v58, %v20358_v60  ;;  %v6358_v19 = vrot.slane %v6344_v9, %v20358_v60  ;;  %v8539_v8 = vcombine.low %v6403_v36, %v6410_v30  ;;  %v17107_v7 = vcombine.high %v6403_v36, %v6410_v30 }
 0x3fc   : > { %v8555_v45 = vcombine.low %v6419_v17, %v6426_v22  ;;  %v17108_v0 = vcombine.high %v6419_v17, %v6426_v22  ;;  %v8471_v44 = vcombine.low %v6335_v31, %v6342_v33  ;;  %v17105_v46 = vcombine.high %v6335_v31, %v6342_v33 }
 0x3fd   : > { %v8487_v20 = vcombine.low %v6351_v26, %v6358_v19  ;;  %v17106_v39 = vcombine.high %v6351_v26, %v6358_v19  ;;  %v8546_v23 = vrot.slane %v8539_v8, %v20344_v6  ;;  %v8554_v5 = vrot.slane %v17107_v7, %v20344_v6 }
 0x3fe   : > { %v8562_v35 = vrot.slane %v8555_v45, %v20344_v6  ;;  %v8570_v10 = vrot.slane %v17108_v0, %v20344_v6  ;;  %v8478_v1 = vrot.slane %v8471_v44, %v20344_v6  ;;  %v8486_v2 = vrot.slane %v17105_v46, %v20344_v6 }
 0x3ff   : > { %v8494_v29 = vrot.slane %v8487_v20, %v20344_v6  ;;  %v8502_v58 = vrot.slane %v17106_v39, %v20344_v6  ;;  %v8571_v9 = vcombine.low %v8546_v23, %v8554_v5  ;;  %v8572_v36 = vcombine.high %v8546_v23, %v8554_v5 }
 0x400   : > { %v8587_v30 = vcombine.low %v8562_v35, %v8570_v10  ;;  %v8588_v17 = vcombine.high %v8562_v35, %v8570_v10  ;;  %v8503_v22 = vcombine.low %v8478_v1, %v8486_v2  ;;  %v8504_v31 = vcombine.high %v8478_v1, %v8486_v2  ;;  %v5748_v10 = vpop.permute.xlu0 %5747  ;;  %v5746_v1 = vpop.permute.xlu1 %5745 }
 0x401   : > { %v8519_v33 = vcombine.low %v8494_v29, %v8502_v58  ;;  %v8520_v26 = vcombine.high %v8494_v29, %v8502_v58  ;;  %v8579_v19 = vrot.slane %v8571_v9, %v20358_v60  ;;  %v8586_v8 = vrot.slane %v8572_v36, %v20358_v60 }
 0x402   : > { %v8595_v7 = vrot.slane %v8587_v30, %v20358_v60  ;;  %v8602_v45 = vrot.slane %v8588_v17, %v20358_v60  ;;  %v8511_v0 = vrot.slane %v8503_v22, %v20358_v60  ;;  %v8518_v44 = vrot.slane %v8504_v31, %v20358_v60  ;;  %v26233_v17 = vld [vmem:[#allocation64_spill] sm:$0xff] }
 0x403   : > { %v8527_v46 = vrot.slane %v8519_v33, %v20358_v60  ;;  %v8534_v20 = vrot.slane %v8520_v26, %v20358_v60  ;;  %v6515_v36 = vcombine.low %v21600_v18, %v5744_v49  ;;  %v6516_v30 = vcombine.high %v21600_v18, %v5744_v49 }
 0x404   : > { %v8603_v39 = vcombine.low %v8579_v19, %v8595_v7  ;;  %v8604_v23 = vcombine.high %v8579_v19, %v8595_v7  ;;  %v8605_v5 = vcombine.low %v8586_v8, %v8602_v45  ;;  %v8606_v35 = vcombine.high %v8586_v8, %v8602_v45 }
 0x405   : > { %v8535_v2 = vcombine.low %v8511_v0, %v8527_v46  ;;  %v8536_v29 = vcombine.high %v8511_v0, %v8527_v46  ;;  %v8537_v58 = vcombine.low %v8518_v44, %v8534_v20  ;;  %v8538_v9 = vcombine.high %v8518_v44, %v8534_v20 }
 0x406   : > { %10179 = vst.msk [vmem:[#allocation3 + $0x40] sm:$0xff] %vm5370_vm0, %v8603_v39  ;;  %10211 = vst.msk [vmem:[#allocation3 + $0x140] sm:$0xff] %vm5370_vm0, %v8604_v23  ;;  %v6447_v22 = vcombine.low %v26233_v17, %v5742_v4  ;;  %v6448_v31 = vcombine.high %v26233_v17, %v5742_v4  ;;  %v6651_v33 = vcombine.low %v21806_v54, %v5748_v10 }
 0x407   : > { %10243 = vst.msk [vmem:[#allocation3 + $0x240] sm:$0xff] %vm5370_vm0, %v8605_v5  ;;  %10275 = vst.msk [vmem:[#allocation3 + $0x340] sm:$0xff] %vm5370_vm0, %v8606_v35  ;;  %v6652_v26 = vcombine.high %v21806_v54, %v5748_v10  ;;  %v6583_v19 = vcombine.low %v21618_v52, %v5746_v1  ;;  %v6584_v18 = vcombine.high %v21618_v52, %v5746_v1 }
 0x408   : > { %10178 = vst.msk [vmem:[#allocation3 + $0x38] sm:$0xff] %vm5370_vm0, %v8535_v2  ;;  %10210 = vst.msk [vmem:[#allocation3 + $0x138] sm:$0xff] %vm5370_vm0, %v8536_v29  ;;  %v6523_v49 = vrot.slane %v6515_v36, %v20344_v6  ;;  %v6530_v4 = vrot.slane %v6516_v30, %v20344_v6  ;;  %v6455_v8 = vrot.slane %v6447_v22, %v20344_v6 }
 0x409   : > { %10242 = vst.msk [vmem:[#allocation3 + $0x238] sm:$0xff] %vm5370_vm0, %v8537_v58  ;;  %10274 = vst.msk [vmem:[#allocation3 + $0x338] sm:$0xff] %vm5370_vm0, %v8538_v9  ;;  %v6462_v7 = vrot.slane %v6448_v31, %v20344_v6  ;;  %v22445_v45 = vrot.slane %v6651_v33, %v20344_v6  ;;  %v22448_v0 = vrot.slane %v6652_v26, %v20344_v6 }
 0x40a   : > { %v22451_v54 = vrot.slane %v6583_v19, %v20344_v6  ;;  %v22454_v44 = vrot.slane %v6584_v18, %v20344_v6  ;;  %v6531_v52 = vcombine.low %v21766_v16, %v6523_v49  ;;  %v6532_v46 = vcombine.high %v21766_v16, %v6523_v49 }
 0x40b   : > { %v6547_v20 = vcombine.low %v21772_v55, %v6530_v4  ;;  %v6548_v39 = vcombine.high %v21772_v55, %v6530_v4  ;;  %v6463_v23 = vcombine.low %v21559_v42, %v6455_v8  ;;  %v6464_v5 = vcombine.high %v21559_v42, %v6455_v8 }
 0x40c   : > { %v6479_v35 = vcombine.low %v21562_v37, %v6462_v7  ;;  %v6480_v10 = vcombine.high %v21562_v37, %v6462_v7  ;;  %v6539_v1 = vrot.slane %v6531_v52, %v20358_v60  ;;  %v6546_v2 = vrot.slane %v6532_v46, %v20358_v60 }
 0x40d   : > { %v6555_v29 = vrot.slane %v6547_v20, %v20358_v60  ;;  %v6562_v16 = vrot.slane %v6548_v39, %v20358_v60  ;;  %v6471_v58 = vrot.slane %v6463_v23, %v20358_v60  ;;  %v6478_v55 = vrot.slane %v6464_v5, %v20358_v60 }
 0x40e   : > { %v6487_v9 = vrot.slane %v6479_v35, %v20358_v60  ;;  %v6494_v42 = vrot.slane %v6480_v10, %v20358_v60  ;;  %v8675_v36 = vcombine.low %v6539_v1, %v6546_v2  ;;  %v17111_v30 = vcombine.high %v6539_v1, %v6546_v2 }
 0x40f   : > { %v8691_v17 = vcombine.low %v6555_v29, %v6562_v16  ;;  %v17112_v37 = vcombine.high %v6555_v29, %v6562_v16  ;;  %v8607_v22 = vcombine.low %v6471_v58, %v6478_v55  ;;  %v17109_v31 = vcombine.high %v6471_v58, %v6478_v55 }
 0x410   : > { %v8623_v33 = vcombine.low %v6487_v9, %v6494_v42  ;;  %v17110_v26 = vcombine.high %v6487_v9, %v6494_v42  ;;  %v8682_v19 = vrot.slane %v8675_v36, %v20344_v6  ;;  %v8690_v18 = vrot.slane %v17111_v30, %v20344_v6 }
 0x411   : > { %v8698_v49 = vrot.slane %v8691_v17, %v20344_v6  ;;  %v8706_v4 = vrot.slane %v17112_v37, %v20344_v6  ;;  %v8614_v8 = vrot.slane %v8607_v22, %v20344_v6  ;;  %v8622_v7 = vrot.slane %v17109_v31, %v20344_v6 }
 0x412   : > { %v8630_v52 = vrot.slane %v8623_v33, %v20344_v6  ;;  %v8638_v46 = vrot.slane %v17110_v26, %v20344_v6  ;;  %v8707_v20 = vcombine.low %v8682_v19, %v8690_v18  ;;  %v8708_v39 = vcombine.high %v8682_v19, %v8690_v18 }
 0x413   : > { %v8723_v23 = vcombine.low %v8698_v49, %v8706_v4  ;;  %v8724_v5 = vcombine.high %v8698_v49, %v8706_v4  ;;  %v8639_v35 = vcombine.low %v8614_v8, %v8622_v7  ;;  %v8640_v10 = vcombine.high %v8614_v8, %v8622_v7 }
 0x414   : > { %v8655_v1 = vcombine.low %v8630_v52, %v8638_v46  ;;  %v8656_v2 = vcombine.high %v8630_v52, %v8638_v46  ;;  %v8715_v29 = vrot.slane %v8707_v20, %v20358_v60  ;;  %v8722_v16 = vrot.slane %v8708_v39, %v20358_v60 }
 0x415   : > { %v8731_v58 = vrot.slane %v8723_v23, %v20358_v60  ;;  %v8738_v55 = vrot.slane %v8724_v5, %v20358_v60  ;;  %v8647_v9 = vrot.slane %v8639_v35, %v20358_v60  ;;  %v8654_v42 = vrot.slane %v8640_v10, %v20358_v60 }
 0x416   : > { %v8663_v36 = vrot.slane %v8655_v1, %v20358_v60  ;;  %v8670_v30 = vrot.slane %v8656_v2, %v20358_v60  ;;  %v6667_v49 = vcombine.low %v21959_v27, %v22445_v45  ;;  %v6668_v4 = vcombine.high %v21959_v27, %v22445_v45 }
 0x417   : > { %v8739_v17 = vcombine.low %v8715_v29, %v8731_v58  ;;  %v8740_v37 = vcombine.high %v8715_v29, %v8731_v58  ;;  %v8741_v22 = vcombine.low %v8722_v16, %v8738_v55  ;;  %v8742_v31 = vcombine.high %v8722_v16, %v8738_v55 }
 0x418   : > { %v8671_v33 = vcombine.low %v8647_v9, %v8663_v36  ;;  %v8672_v26 = vcombine.high %v8647_v9, %v8663_v36  ;;  %v8673_v19 = vcombine.low %v8654_v42, %v8670_v30  ;;  %v8674_v18 = vcombine.high %v8654_v42, %v8670_v30  ;;  %v5752_v36 = vpop.permute.xlu0 %5751  ;;  %v5750_v30 = vpop.permute.xlu1 %5749 }
 0x419   : > { %10181 = vst.msk [vmem:[#allocation3 + $0x50] sm:$0xff] %vm5370_vm0, %v8739_v17  ;;  %10213 = vst.msk [vmem:[#allocation3 + $0x150] sm:$0xff] %vm5370_vm0, %v8740_v37  ;;  %v6683_v8 = vcombine.low %v21962_v43, %v22448_v0  ;;  %v6684_v7 = vcombine.high %v21962_v43, %v22448_v0  ;;  %v6599_v52 = vcombine.low %v21950_v56, %v22451_v54 }
 0x41a   : > { %10245 = vst.msk [vmem:[#allocation3 + $0x250] sm:$0xff] %vm5370_vm0, %v8741_v22  ;;  %10277 = vst.msk [vmem:[#allocation3 + $0x350] sm:$0xff] %vm5370_vm0, %v8742_v31  ;;  %v6600_v27 = vcombine.high %v21950_v56, %v22451_v54  ;;  %v6615_v45 = vcombine.low %v21956_v62, %v22454_v44  ;;  %v6616_v43 = vcombine.high %v21956_v62, %v22454_v44 }
 0x41b   : > { %10180 = vst.msk [vmem:[#allocation3 + $0x48] sm:$0xff] %vm5370_vm0, %v8671_v33  ;;  %10212 = vst.msk [vmem:[#allocation3 + $0x148] sm:$0xff] %vm5370_vm0, %v8672_v26  ;;  %v6675_v0 = vrot.slane %v6667_v49, %v20358_v60  ;;  %v6682_v46 = vrot.slane %v6668_v4, %v20358_v60  ;;  %v6691_v20 = vrot.slane %v6683_v8, %v20358_v60 }
 0x41c   : > { %10244 = vst.msk [vmem:[#allocation3 + $0x248] sm:$0xff] %vm5370_vm0, %v8673_v19  ;;  %10276 = vst.msk [vmem:[#allocation3 + $0x348] sm:$0xff] %vm5370_vm0, %v8674_v18  ;;  %v6698_v39 = vrot.slane %v6684_v7, %v20358_v60  ;;  %v6607_v23 = vrot.slane %v6599_v52, %v20358_v60  ;;  %v6614_v5 = vrot.slane %v6600_v27, %v20358_v60 }
 0x41d   : > { %v6623_v56 = vrot.slane %v6615_v45, %v20358_v60  ;;  %v6630_v54 = vrot.slane %v6616_v43, %v20358_v60  ;;  %v8811_v35 = vcombine.low %v6675_v0, %v6682_v46  ;;  %v17115_v10 = vcombine.high %v6675_v0, %v6682_v46 }
 0x41e   : > { %v8827_v1 = vcombine.low %v6691_v20, %v6698_v39  ;;  %v17116_v62 = vcombine.high %v6691_v20, %v6698_v39  ;;  %v8743_v44 = vcombine.low %v6607_v23, %v6614_v5  ;;  %v17113_v2 = vcombine.high %v6607_v23, %v6614_v5 }
 0x41f   : > { %v8759_v29 = vcombine.low %v6623_v56, %v6630_v54  ;;  %v17114_v16 = vcombine.high %v6623_v56, %v6630_v54  ;;  %v8818_v58 = vrot.slane %v8811_v35, %v20344_v6  ;;  %v8826_v55 = vrot.slane %v17115_v10, %v20344_v6  ;;  %v5756_v35 = vpop.permute.xlu0 %5755  ;;  %v5754_v10 = vpop.permute.xlu1 %5753 }
 0x420   : > { %v8834_v9 = vrot.slane %v8827_v1, %v20344_v6  ;;  %v8842_v42 = vrot.slane %v17116_v62, %v20344_v6  ;;  %v8750_v17 = vrot.slane %v8743_v44, %v20344_v6  ;;  %v8758_v37 = vrot.slane %v17113_v2, %v20344_v6 }
 0x421   : > { %v8766_v22 = vrot.slane %v8759_v29, %v20344_v6  ;;  %v8774_v31 = vrot.slane %v17114_v16, %v20344_v6  ;;  %v8843_v33 = vcombine.low %v8818_v58, %v8826_v55  ;;  %v8844_v26 = vcombine.high %v8818_v58, %v8826_v55 }
 0x422   : > { %v8859_v19 = vcombine.low %v8834_v9, %v8842_v42  ;;  %v8860_v18 = vcombine.high %v8834_v9, %v8842_v42  ;;  %v8775_v49 = vcombine.low %v8750_v17, %v8758_v37  ;;  %v8776_v4 = vcombine.high %v8750_v17, %v8758_v37  ;;  %v26234_v9 = vld [vmem:[#allocation55_spill] sm:$0xff] }
 0x423   : > { %v8791_v8 = vcombine.low %v8766_v22, %v8774_v31  ;;  %v8792_v7 = vcombine.high %v8766_v22, %v8774_v31  ;;  %v8851_v52 = vrot.slane %v8843_v33, %v20358_v60  ;;  %v8858_v27 = vrot.slane %v8844_v26, %v20358_v60 }
 0x424   : > { %v8867_v45 = vrot.slane %v8859_v19, %v20358_v60  ;;  %v8874_v43 = vrot.slane %v8860_v18, %v20358_v60  ;;  %v8783_v0 = vrot.slane %v8775_v49, %v20358_v60  ;;  %v8790_v46 = vrot.slane %v8776_v4, %v20358_v60 }
 0x425   : > { %v8799_v20 = vrot.slane %v8791_v8, %v20358_v60  ;;  %v8806_v39 = vrot.slane %v8792_v7, %v20358_v60  ;;  %v6787_v29 = vcombine.low %v21986_v47, %v5752_v36  ;;  %v6788_v16 = vcombine.high %v21986_v47, %v5752_v36 }
 0x426   : > { %v8875_v23 = vcombine.low %v8851_v52, %v8867_v45  ;;  %v8876_v5 = vcombine.high %v8851_v52, %v8867_v45  ;;  %v8877_v56 = vcombine.low %v8858_v27, %v8874_v43  ;;  %v8878_v54 = vcombine.high %v8858_v27, %v8874_v43 }
 0x427   : > { %v8807_v1 = vcombine.low %v8783_v0, %v8799_v20  ;;  %v8808_v62 = vcombine.high %v8783_v0, %v8799_v20  ;;  %v8809_v44 = vcombine.low %v8790_v46, %v8806_v39  ;;  %v8810_v2 = vcombine.high %v8790_v46, %v8806_v39 }
 0x428   : > { %10183 = vst.msk [vmem:[#allocation3 + $0x60] sm:$0xff] %vm5370_vm0, %v8875_v23  ;;  %10215 = vst.msk [vmem:[#allocation3 + $0x160] sm:$0xff] %vm5370_vm0, %v8876_v5  ;;  %v6719_v58 = vcombine.low %v21832_v53, %v5750_v30  ;;  %v6720_v55 = vcombine.high %v21832_v53, %v5750_v30  ;;  %v6923_v42 = vcombine.low %v26234_v9, %v5756_v35 }
 0x429   : > { %10247 = vst.msk [vmem:[#allocation3 + $0x260] sm:$0xff] %vm5370_vm0, %v8877_v56  ;;  %10279 = vst.msk [vmem:[#allocation3 + $0x360] sm:$0xff] %vm5370_vm0, %v8878_v54  ;;  %v6924_v17 = vcombine.high %v26234_v9, %v5756_v35  ;;  %v6855_v37 = vcombine.low %v22030_v51, %v5754_v10  ;;  %v6856_v47 = vcombine.high %v22030_v51, %v5754_v10 }
 0x42a   : > { %10182 = vst.msk [vmem:[#allocation3 + $0x58] sm:$0xff] %vm5370_vm0, %v8807_v1  ;;  %10214 = vst.msk [vmem:[#allocation3 + $0x158] sm:$0xff] %vm5370_vm0, %v8808_v62  ;;  %v6795_v36 = vrot.slane %v6787_v29, %v20344_v6  ;;  %v6802_v53 = vrot.slane %v6788_v16, %v20344_v6  ;;  %v6727_v30 = vrot.slane %v6719_v58, %v20344_v6 }
 0x42b   : > { %10246 = vst.msk [vmem:[#allocation3 + $0x258] sm:$0xff] %vm5370_vm0, %v8809_v44  ;;  %10278 = vst.msk [vmem:[#allocation3 + $0x358] sm:$0xff] %vm5370_vm0, %v8810_v2  ;;  %v6734_v22 = vrot.slane %v6720_v55, %v20344_v6  ;;  %v22557_v31 = vrot.slane %v6923_v42, %v20344_v6  ;;  %v22560_v33 = vrot.slane %v6924_v17, %v20344_v6 }
 0x42c   : > { %v22563_v26 = vrot.slane %v6855_v37, %v20344_v6  ;;  %v22566_v19 = vrot.slane %v6856_v47, %v20344_v6  ;;  %v6803_v51 = vcombine.low %v22166_v14, %v6795_v36  ;;  %v6804_v18 = vcombine.high %v22166_v14, %v6795_v36 }
 0x42d   : > { %v6819_v49 = vcombine.low %v22172_v41, %v6802_v53  ;;  %v6820_v4 = vcombine.high %v22172_v41, %v6802_v53  ;;  %v6735_v8 = vcombine.low %v21979_v11, %v6727_v30  ;;  %v6736_v7 = vcombine.high %v21979_v11, %v6727_v30 }
 0x42e   : > { %v6751_v52 = vcombine.low %v21982_v38, %v6734_v22  ;;  %v6752_v27 = vcombine.high %v21982_v38, %v6734_v22  ;;  %v6811_v45 = vrot.slane %v6803_v51, %v20358_v60  ;;  %v6818_v43 = vrot.slane %v6804_v18, %v20358_v60 }
 0x42f   : > { %v6827_v0 = vrot.slane %v6819_v49, %v20358_v60  ;;  %v6834_v14 = vrot.slane %v6820_v4, %v20358_v60  ;;  %v6743_v46 = vrot.slane %v6735_v8, %v20358_v60  ;;  %v6750_v41 = vrot.slane %v6736_v7, %v20358_v60 }
 0x430   : > { %v6759_v20 = vrot.slane %v6751_v52, %v20358_v60  ;;  %v6766_v11 = vrot.slane %v6752_v27, %v20358_v60  ;;  %v8947_v39 = vcombine.low %v6811_v45, %v6818_v43  ;;  %v17119_v23 = vcombine.high %v6811_v45, %v6818_v43 }
 0x431   : > { %v8963_v5 = vcombine.low %v6827_v0, %v6834_v14  ;;  %v17120_v38 = vcombine.high %v6827_v0, %v6834_v14  ;;  %v8879_v56 = vcombine.low %v6743_v46, %v6750_v41  ;;  %v17117_v54 = vcombine.high %v6743_v46, %v6750_v41 }
 0x432   : > { %v8895_v35 = vcombine.low %v6759_v20, %v6766_v11  ;;  %v17118_v10 = vcombine.high %v6759_v20, %v6766_v11  ;;  %v8954_v1 = vrot.slane %v8947_v39, %v20344_v6  ;;  %v8962_v62 = vrot.slane %v17119_v23, %v20344_v6  ;;  %v26235_v11 = vld [vmem:[#allocation61_spill] sm:$0xff] }
 0x433   : > { %v8970_v44 = vrot.slane %v8963_v5, %v20344_v6  ;;  %v8978_v2 = vrot.slane %v17120_v38, %v20344_v6  ;;  %v8886_v29 = vrot.slane %v8879_v56, %v20344_v6  ;;  %v8894_v16 = vrot.slane %v17117_v54, %v20344_v6  ;;  %v26236_v5 = vld [vmem:[#allocation62_spill] sm:$0xff] }
 0x434   : > { %v8902_v58 = vrot.slane %v8895_v35, %v20344_v6  ;;  %v8910_v55 = vrot.slane %v17118_v10, %v20344_v6  ;;  %v8979_v9 = vcombine.low %v8954_v1, %v8962_v62  ;;  %v8980_v42 = vcombine.high %v8954_v1, %v8962_v62 }
 0x435   : > { %v8995_v17 = vcombine.low %v8970_v44, %v8978_v2  ;;  %v8996_v37 = vcombine.high %v8970_v44, %v8978_v2  ;;  %v8911_v47 = vcombine.low %v8886_v29, %v8894_v16  ;;  %v8912_v36 = vcombine.high %v8886_v29, %v8894_v16 }
 0x436   : > { %v8927_v53 = vcombine.low %v8902_v58, %v8910_v55  ;;  %v8928_v30 = vcombine.high %v8902_v58, %v8910_v55  ;;  %v8987_v22 = vrot.slane %v8979_v9, %v20358_v60  ;;  %v8994_v51 = vrot.slane %v8980_v42, %v20358_v60 }
 0x437   : > { %v9003_v18 = vrot.slane %v8995_v17, %v20358_v60  ;;  %v9010_v49 = vrot.slane %v8996_v37, %v20358_v60  ;;  %v8919_v4 = vrot.slane %v8911_v47, %v20358_v60  ;;  %v8926_v8 = vrot.slane %v8912_v36, %v20358_v60 }
 0x438   : > { %v8935_v7 = vrot.slane %v8927_v53, %v20358_v60  ;;  %v8942_v52 = vrot.slane %v8928_v30, %v20358_v60  ;;  %v6939_v39 = vcombine.low %v26235_v11, %v22557_v31  ;;  %v6940_v23 = vcombine.high %v26235_v11, %v22557_v31  ;;  %v5760_v30 = vpop.permute.xlu0 %5759 }
 0x439   : > { %v9011_v27 = vcombine.low %v8987_v22, %v9003_v18  ;;  %v9012_v45 = vcombine.high %v8987_v22, %v9003_v18  ;;  %v9013_v43 = vcombine.low %v8994_v51, %v9010_v49  ;;  %v9014_v0 = vcombine.high %v8994_v51, %v9010_v49  ;;  %v5758_v22 = vpop.permute.xlu1 %5757 }
 0x43a   : > { %v8943_v14 = vcombine.low %v8919_v4, %v8935_v7  ;;  %v8944_v46 = vcombine.high %v8919_v4, %v8935_v7  ;;  %v8945_v41 = vcombine.low %v8926_v8, %v8942_v52  ;;  %v8946_v20 = vcombine.high %v8926_v8, %v8942_v52 }
 0x43b   : > { %10185 = vst.msk [vmem:[#allocation3 + $0x70] sm:$0xff] %vm5370_vm0, %v9011_v27  ;;  %10217 = vst.msk [vmem:[#allocation3 + $0x170] sm:$0xff] %vm5370_vm0, %v9012_v45  ;;  %v6955_v38 = vcombine.low %v26236_v5, %v22560_v33  ;;  %v6956_v56 = vcombine.high %v26236_v5, %v22560_v33  ;;  %v6871_v54 = vcombine.low %v22193_v28, %v22563_v26 }
 0x43c   : > { %10249 = vst.msk [vmem:[#allocation3 + $0x270] sm:$0xff] %vm5370_vm0, %v9013_v43  ;;  %10281 = vst.msk [vmem:[#allocation3 + $0x370] sm:$0xff] %vm5370_vm0, %v9014_v0  ;;  %v6872_v31 = vcombine.high %v22193_v28, %v22563_v26  ;;  %v6887_v35 = vcombine.low %v22196_v3, %v22566_v19  ;;  %v6888_v33 = vcombine.high %v22196_v3, %v22566_v19 }
 0x43d   : > { %10184 = vst.msk [vmem:[#allocation3 + $0x68] sm:$0xff] %vm5370_vm0, %v8943_v14  ;;  %10216 = vst.msk [vmem:[#allocation3 + $0x168] sm:$0xff] %vm5370_vm0, %v8944_v46  ;;  %v6947_v10 = vrot.slane %v6939_v39, %v20358_v60  ;;  %v6954_v1 = vrot.slane %v6940_v23, %v20358_v60  ;;  %v6963_v62 = vrot.slane %v6955_v38, %v20358_v60 }
 0x43e   : > { %10248 = vst.msk [vmem:[#allocation3 + $0x268] sm:$0xff] %vm5370_vm0, %v8945_v41  ;;  %10280 = vst.msk [vmem:[#allocation3 + $0x368] sm:$0xff] %vm5370_vm0, %v8946_v20  ;;  %v6970_v44 = vrot.slane %v6956_v56, %v20358_v60  ;;  %v6879_v2 = vrot.slane %v6871_v54, %v20358_v60  ;;  %v6886_v29 = vrot.slane %v6872_v31, %v20358_v60 }
 0x43f   : > { %v6895_v28 = vrot.slane %v6887_v35, %v20358_v60  ;;  %v6902_v26 = vrot.slane %v6888_v33, %v20358_v60  ;;  %v9083_v16 = vcombine.low %v6947_v10, %v6954_v1  ;;  %v17123_v58 = vcombine.high %v6947_v10, %v6954_v1  ;;  %v5764_v33 = vpop.permute.xlu0 %5763  ;;  %v5762_v10 = vpop.permute.xlu1 %5761 }
 0x440   : > { %v9099_v55 = vcombine.low %v6963_v62, %v6970_v44  ;;  %v17124_v3 = vcombine.high %v6963_v62, %v6970_v44  ;;  %v9015_v19 = vcombine.low %v6879_v2, %v6886_v29  ;;  %v17121_v9 = vcombine.high %v6879_v2, %v6886_v29  ;;  %v26237_v29 = vld [vmem:[#allocation69_spill] sm:$0xff] }
 0x441   : > { %v9031_v42 = vcombine.low %v6895_v28, %v6902_v26  ;;  %v17122_v17 = vcombine.high %v6895_v28, %v6902_v26  ;;  %v9090_v37 = vrot.slane %v9083_v16, %v20344_v6  ;;  %v9098_v47 = vrot.slane %v17123_v58, %v20344_v6  ;;  %v26238_v16 = vld [vmem:[#allocation56_spill] sm:$0xff] }
 0x442   : > { %v9106_v36 = vrot.slane %v9099_v55, %v20344_v6  ;;  %v9114_v53 = vrot.slane %v17124_v3, %v20344_v6  ;;  %v9022_v51 = vrot.slane %v9015_v19, %v20344_v6  ;;  %v9030_v18 = vrot.slane %v17121_v9, %v20344_v6  ;;  %v26239_v3 = vld [vmem:[#allocation80_spill] sm:$0xff] }
 0x443   : > { %v9038_v49 = vrot.slane %v9031_v42, %v20344_v6  ;;  %v9046_v4 = vrot.slane %v17122_v17, %v20344_v6  ;;  %v9115_v8 = vcombine.low %v9090_v37, %v9098_v47  ;;  %v9116_v7 = vcombine.high %v9090_v37, %v9098_v47  ;;  %v26240_v42 = vld [vmem:[#allocation71_spill] sm:$0xff] }
 0x444   : > { %v9131_v52 = vcombine.low %v9106_v36, %v9114_v53  ;;  %v9132_v27 = vcombine.high %v9106_v36, %v9114_v53  ;;  %v9047_v45 = vcombine.low %v9022_v51, %v9030_v18  ;;  %v9048_v43 = vcombine.high %v9022_v51, %v9030_v18 }
 0x445   : > { %v9063_v0 = vcombine.low %v9038_v49, %v9046_v4  ;;  %v9064_v14 = vcombine.high %v9038_v49, %v9046_v4  ;;  %v9123_v46 = vrot.slane %v9115_v8, %v20358_v60  ;;  %v9130_v41 = vrot.slane %v9116_v7, %v20358_v60  ;;  %v26241_v4 = vld [vmem:[#allocation76_spill] sm:$0xff] }
 0x446   : > { %v9139_v20 = vrot.slane %v9131_v52, %v20358_v60  ;;  %v9146_v11 = vrot.slane %v9132_v27, %v20358_v60  ;;  %v9055_v39 = vrot.slane %v9047_v45, %v20358_v60  ;;  %v9062_v23 = vrot.slane %v9048_v43, %v20358_v60  ;;  %v26242_v52 = vld [vmem:[#allocation77_spill] sm:$0xff]  ;;  %v26243_v43 = vld [vmem:[#allocation72_spill] sm:$0xff] }
 0x447   : > { %v9071_v5 = vrot.slane %v9063_v0, %v20358_v60  ;;  %v9078_v38 = vrot.slane %v9064_v14, %v20358_v60  ;;  %v7059_v28 = vcombine.low %v26237_v29, %v5760_v30  ;;  %v7060_v26 = vcombine.high %v26237_v29, %v5760_v30 }
 0x448   : > { %v9147_v56 = vcombine.low %v9123_v46, %v9139_v20  ;;  %v9148_v54 = vcombine.high %v9123_v46, %v9139_v20  ;;  %v9149_v31 = vcombine.low %v9130_v41, %v9146_v11  ;;  %v9150_v35 = vcombine.high %v9130_v41, %v9146_v11  ;;  %v26244_v46 = vld [vmem:[#allocation73_spill] sm:$0xff] }
 0x449   : > { %v9079_v1 = vcombine.low %v9055_v39, %v9071_v5  ;;  %v9080_v62 = vcombine.high %v9055_v39, %v9071_v5  ;;  %v9081_v44 = vcombine.low %v9062_v23, %v9078_v38  ;;  %v9082_v2 = vcombine.high %v9062_v23, %v9078_v38 }
 0x44a   : > { %10187 = vst.msk [vmem:[#allocation3 + $0x80] sm:$0xff] %vm5370_vm0, %v9147_v56  ;;  %10219 = vst.msk [vmem:[#allocation3 + $0x180] sm:$0xff] %vm5370_vm0, %v9148_v54  ;;  %v6991_v58 = vcombine.low %v26238_v16, %v5758_v22  ;;  %v6992_v55 = vcombine.high %v26238_v16, %v5758_v22  ;;  %v7195_v19 = vcombine.low %v26239_v3, %v5764_v33 }
 0x44b   : > { %10251 = vst.msk [vmem:[#allocation3 + $0x280] sm:$0xff] %vm5370_vm0, %v9149_v31  ;;  %10283 = vst.msk [vmem:[#allocation3 + $0x380] sm:$0xff] %vm5370_vm0, %v9150_v35  ;;  %v7196_v9 = vcombine.high %v26239_v3, %v5764_v33  ;;  %v7127_v17 = vcombine.low %v26240_v42, %v5762_v10  ;;  %v7128_v37 = vcombine.high %v26240_v42, %v5762_v10 }
 0x44c   : > { %10186 = vst.msk [vmem:[#allocation3 + $0x78] sm:$0xff] %vm5370_vm0, %v9079_v1  ;;  %10218 = vst.msk [vmem:[#allocation3 + $0x178] sm:$0xff] %vm5370_vm0, %v9080_v62  ;;  %v7067_v47 = vrot.slane %v7059_v28, %v20344_v6  ;;  %v7074_v36 = vrot.slane %v7060_v26, %v20344_v6  ;;  %v6999_v53 = vrot.slane %v6991_v58, %v20344_v6 }
 0x44d   : > { %10250 = vst.msk [vmem:[#allocation3 + $0x278] sm:$0xff] %vm5370_vm0, %v9081_v44  ;;  %10282 = vst.msk [vmem:[#allocation3 + $0x378] sm:$0xff] %vm5370_vm0, %v9082_v2  ;;  %v7006_v30 = vrot.slane %v6992_v55, %v20344_v6  ;;  %v22669_v22 = vrot.slane %v7195_v19, %v20344_v6  ;;  %v22672_v51 = vrot.slane %v7196_v9, %v20344_v6 }
 0x44e   : > { %v22675_v18 = vrot.slane %v7127_v17, %v20344_v6  ;;  %v22678_v49 = vrot.slane %v7128_v37, %v20344_v6  ;;  %v7075_v8 = vcombine.low %v26241_v4, %v7067_v47  ;;  %v7076_v7 = vcombine.high %v26241_v4, %v7067_v47 }
 0x44f   : > { %v7091_v27 = vcombine.low %v26242_v52, %v7074_v36  ;;  %v7092_v45 = vcombine.high %v26242_v52, %v7074_v36  ;;  %v7007_v0 = vcombine.low %v26243_v43, %v6999_v53  ;;  %v7008_v14 = vcombine.high %v26243_v43, %v6999_v53 }
 0x450   : > { %v7023_v41 = vcombine.low %v26244_v46, %v7006_v30  ;;  %v7024_v20 = vcombine.high %v26244_v46, %v7006_v30  ;;  %v7083_v11 = vrot.slane %v7075_v8, %v20358_v60  ;;  %v7090_v39 = vrot.slane %v7076_v7, %v20358_v60 }
 0x451   : > { %v7099_v23 = vrot.slane %v7091_v27, %v20358_v60  ;;  %v7106_v5 = vrot.slane %v7092_v45, %v20358_v60  ;;  %v7015_v38 = vrot.slane %v7007_v0, %v20358_v60  ;;  %v7022_v56 = vrot.slane %v7008_v14, %v20358_v60 }
 0x452   : > { %v7031_v54 = vrot.slane %v7023_v41, %v20358_v60  ;;  %v7038_v31 = vrot.slane %v7024_v20, %v20358_v60  ;;  %v9219_v35 = vcombine.low %v7083_v11, %v7090_v39  ;;  %v17127_v33 = vcombine.high %v7083_v11, %v7090_v39 }
 0x453   : > { %v9235_v10 = vcombine.low %v7099_v23, %v7106_v5  ;;  %v17128_v1 = vcombine.high %v7099_v23, %v7106_v5  ;;  %v9151_v62 = vcombine.low %v7015_v38, %v7022_v56  ;;  %v17125_v44 = vcombine.high %v7015_v38, %v7022_v56  ;;  %v26245_v56 = vld [vmem:[#allocation36_spill] sm:$0xff] }
 0x454   : > { %v9167_v2 = vcombine.low %v7031_v54, %v7038_v31  ;;  %v17126_v29 = vcombine.high %v7031_v54, %v7038_v31  ;;  %v9226_v28 = vrot.slane %v9219_v35, %v20344_v6  ;;  %v9234_v26 = vrot.slane %v17127_v33, %v20344_v6  ;;  %v26246_v35 = vld [vmem:[#allocation83_spill] sm:$0xff] }
 0x455   : > { %v9242_v16 = vrot.slane %v9235_v10, %v20344_v6  ;;  %v9250_v58 = vrot.slane %v17128_v1, %v20344_v6  ;;  %v9158_v55 = vrot.slane %v9151_v62, %v20344_v6  ;;  %v9166_v3 = vrot.slane %v17125_v44, %v20344_v6  ;;  %v26247_v1 = vld [vmem:[#allocation42_spill] sm:$0xff]  ;;  %v26248_v44 = vld [vmem:[#allocation44_spill] sm:$0xff] }
 0x456   : > { %v9174_v19 = vrot.slane %v9167_v2, %v20344_v6  ;;  %v9182_v9 = vrot.slane %v17126_v29, %v20344_v6  ;;  %v9251_v42 = vcombine.low %v9226_v28, %v9234_v26  ;;  %v9252_v17 = vcombine.high %v9226_v28, %v9234_v26 }
 0x457   : > { %v9267_v37 = vcombine.low %v9242_v16, %v9250_v58  ;;  %v9268_v47 = vcombine.high %v9242_v16, %v9250_v58  ;;  %v9183_v36 = vcombine.low %v9158_v55, %v9166_v3  ;;  %v9184_v53 = vcombine.high %v9158_v55, %v9166_v3 }
 0x458   : > { %v9199_v30 = vcombine.low %v9174_v19, %v9182_v9  ;;  %v9200_v4 = vcombine.high %v9174_v19, %v9182_v9  ;;  %v9259_v8 = vrot.slane %v9251_v42, %v20358_v60  ;;  %v9266_v7 = vrot.slane %v9252_v17, %v20358_v60 }
 0x459   : > { %v9275_v52 = vrot.slane %v9267_v37, %v20358_v60  ;;  %v9282_v27 = vrot.slane %v9268_v47, %v20358_v60  ;;  %v9191_v45 = vrot.slane %v9183_v36, %v20358_v60  ;;  %v9198_v43 = vrot.slane %v9184_v53, %v20358_v60 }
 0x45a   : > { %v9207_v0 = vrot.slane %v9199_v30, %v20358_v60  ;;  %v9214_v14 = vrot.slane %v9200_v4, %v20358_v60  ;;  %v7211_v54 = vcombine.low %v26245_v56, %v22669_v22  ;;  %v7212_v31 = vcombine.high %v26245_v56, %v22669_v22 }
 0x45b   : > { %v9283_v46 = vcombine.low %v9259_v8, %v9275_v52  ;;  %v9284_v41 = vcombine.high %v9259_v8, %v9275_v52  ;;  %v9285_v20 = vcombine.low %v9266_v7, %v9282_v27  ;;  %v9286_v11 = vcombine.high %v9266_v7, %v9282_v27  ;;  %v5768_v7 = vpop.permute.xlu0 %5767  ;;  %v5766_v52 = vpop.permute.xlu1 %5765 }
 0x45c   : > { %v9215_v39 = vcombine.low %v9191_v45, %v9207_v0  ;;  %v9216_v23 = vcombine.high %v9191_v45, %v9207_v0  ;;  %v9217_v5 = vcombine.low %v9198_v43, %v9214_v14  ;;  %v9218_v38 = vcombine.high %v9198_v43, %v9214_v14 }
 0x45d   : > { %10189 = vst.msk [vmem:[#allocation3 + $0x90] sm:$0xff] %vm5370_vm0, %v9283_v46  ;;  %10221 = vst.msk [vmem:[#allocation3 + $0x190] sm:$0xff] %vm5370_vm0, %v9284_v41  ;;  %v7227_v33 = vcombine.low %v26246_v35, %v22672_v51  ;;  %v7228_v10 = vcombine.high %v26246_v35, %v22672_v51  ;;  %v7143_v62 = vcombine.low %v26247_v1, %v22675_v18 }
 0x45e   : > { %10253 = vst.msk [vmem:[#allocation3 + $0x290] sm:$0xff] %vm5370_vm0, %v9285_v20  ;;  %10285 = vst.msk [vmem:[#allocation3 + $0x390] sm:$0xff] %vm5370_vm0, %v9286_v11  ;;  %v7144_v22 = vcombine.high %v26247_v1, %v22675_v18  ;;  %v7159_v2 = vcombine.low %v26248_v44, %v22678_v49  ;;  %v7160_v51 = vcombine.high %v26248_v44, %v22678_v49 }
 0x45f   : > { %10188 = vst.msk [vmem:[#allocation3 + $0x88] sm:$0xff] %vm5370_vm0, %v9215_v39  ;;  %10220 = vst.msk [vmem:[#allocation3 + $0x188] sm:$0xff] %vm5370_vm0, %v9216_v23  ;;  %v7219_v29 = vrot.slane %v7211_v54, %v20358_v60  ;;  %v7226_v28 = vrot.slane %v7212_v31, %v20358_v60  ;;  %v7235_v26 = vrot.slane %v7227_v33, %v20358_v60 }
 0x460   : > { %10252 = vst.msk [vmem:[#allocation3 + $0x288] sm:$0xff] %vm5370_vm0, %v9217_v5  ;;  %10284 = vst.msk [vmem:[#allocation3 + $0x388] sm:$0xff] %vm5370_vm0, %v9218_v38  ;;  %v7242_v16 = vrot.slane %v7228_v10, %v20358_v60  ;;  %v7151_v58 = vrot.slane %v7143_v62, %v20358_v60  ;;  %v7158_v55 = vrot.slane %v7144_v22, %v20358_v60 }
 0x461   : > { %v7167_v18 = vrot.slane %v7159_v2, %v20358_v60  ;;  %v7174_v3 = vrot.slane %v7160_v51, %v20358_v60  ;;  %v9355_v19 = vcombine.low %v7219_v29, %v7226_v28  ;;  %v17131_v9 = vcombine.high %v7219_v29, %v7226_v28  ;;  %v5772_v51 = vpop.permute.xlu0 %5771  ;;  %v5770_v29 = vpop.permute.xlu1 %5769 }
 0x462   : > { %v9371_v42 = vcombine.low %v7235_v26, %v7242_v16  ;;  %v17132_v49 = vcombine.high %v7235_v26, %v7242_v16  ;;  %v9287_v17 = vcombine.low %v7151_v58, %v7158_v55  ;;  %v17129_v37 = vcombine.high %v7151_v58, %v7158_v55  ;;  %v26249_v55 = vld [vmem:[#allocation84_spill] sm:$0xff] }
 0x463   : > { %v9303_v47 = vcombine.low %v7167_v18, %v7174_v3  ;;  %v17130_v36 = vcombine.high %v7167_v18, %v7174_v3  ;;  %v9362_v53 = vrot.slane %v9355_v19, %v20344_v6  ;;  %v9370_v30 = vrot.slane %v17131_v9, %v20344_v6  ;;  %v26250_v19 = vld [vmem:[#allocation41_spill] sm:$0xff] }
 0x464   : > { %v9378_v4 = vrot.slane %v9371_v42, %v20344_v6  ;;  %v9386_v8 = vrot.slane %v17132_v49, %v20344_v6  ;;  %v9294_v27 = vrot.slane %v9287_v17, %v20344_v6  ;;  %v9302_v45 = vrot.slane %v17129_v37, %v20344_v6  ;;  %v26251_v49 = vld [vmem:[#allocation63_spill] sm:$0xff] }
 0x465   : > { %v9310_v43 = vrot.slane %v9303_v47, %v20344_v6  ;;  %v9318_v0 = vrot.slane %v17130_v36, %v20344_v6  ;;  %v9387_v14 = vcombine.low %v9362_v53, %v9370_v30  ;;  %v9388_v46 = vcombine.high %v9362_v53, %v9370_v30  ;;  %v26252_v47 = vld [vmem:[#allocation48_spill] sm:$0xff] }
 0x466   : > { %v9403_v41 = vcombine.low %v9378_v4, %v9386_v8  ;;  %v9404_v20 = vcombine.high %v9378_v4, %v9386_v8  ;;  %v9319_v11 = vcombine.low %v9294_v27, %v9302_v45  ;;  %v9320_v39 = vcombine.high %v9294_v27, %v9302_v45 }
 0x467   : > { %v9335_v23 = vcombine.low %v9310_v43, %v9318_v0  ;;  %v9336_v5 = vcombine.high %v9310_v43, %v9318_v0  ;;  %v9395_v38 = vrot.slane %v9387_v14, %v20358_v60  ;;  %v9402_v56 = vrot.slane %v9388_v46, %v20358_v60  ;;  %v26253_v0 = vld [vmem:[#allocation88_spill] sm:$0xff] }
 0x468   : > { %v9411_v54 = vrot.slane %v9403_v41, %v20358_v60  ;;  %v9418_v31 = vrot.slane %v9404_v20, %v20358_v60  ;;  %v9327_v35 = vrot.slane %v9319_v11, %v20358_v60  ;;  %v9334_v33 = vrot.slane %v9320_v39, %v20358_v60  ;;  %v26254_v41 = vld [vmem:[#allocation89_spill] sm:$0xff]  ;;  %v26255_v39 = vld [vmem:[#allocation51_spill] sm:$0xff] }
 0x469   : > { %v9343_v10 = vrot.slane %v9335_v23, %v20358_v60  ;;  %v9350_v1 = vrot.slane %v9336_v5, %v20358_v60  ;;  %v7331_v18 = vcombine.low %v26249_v55, %v5768_v7  ;;  %v7332_v3 = vcombine.high %v26249_v55, %v5768_v7 }
 0x46a   : > { %v9419_v62 = vcombine.low %v9395_v38, %v9411_v54  ;;  %v9420_v22 = vcombine.high %v9395_v38, %v9411_v54  ;;  %v9421_v44 = vcombine.low %v9402_v56, %v9418_v31  ;;  %v9422_v2 = vcombine.high %v9402_v56, %v9418_v31  ;;  %v26256_v38 = vld [vmem:[#allocation52_spill] sm:$0xff] }
 0x46b   : > { %v9351_v28 = vcombine.low %v9327_v35, %v9343_v10  ;;  %v9352_v26 = vcombine.high %v9327_v35, %v9343_v10  ;;  %v9353_v16 = vcombine.low %v9334_v33, %v9350_v1  ;;  %v9354_v58 = vcombine.high %v9334_v33, %v9350_v1 }
 0x46c   : > { %10191 = vst.msk [vmem:[#allocation3 + $0xa0] sm:$0xff] %vm5370_vm0, %v9419_v62  ;;  %10223 = vst.msk [vmem:[#allocation3 + $0x1a0] sm:$0xff] %vm5370_vm0, %v9420_v22  ;;  %v7263_v9 = vcombine.low %v26250_v19, %v5766_v52  ;;  %v7264_v42 = vcombine.high %v26250_v19, %v5766_v52  ;;  %v7467_v17 = vcombine.low %v26251_v49, %v5772_v51 }
 0x46d   : > { %10255 = vst.msk [vmem:[#allocation3 + $0x2a0] sm:$0xff] %vm5370_vm0, %v9421_v44  ;;  %10287 = vst.msk [vmem:[#allocation3 + $0x3a0] sm:$0xff] %vm5370_vm0, %v9422_v2  ;;  %v7468_v37 = vcombine.high %v26251_v49, %v5772_v51  ;;  %v7399_v36 = vcombine.low %v26252_v47, %v5770_v29  ;;  %v7400_v53 = vcombine.high %v26252_v47, %v5770_v29 }
 0x46e   : > { %10190 = vst.msk [vmem:[#allocation3 + $0x98] sm:$0xff] %vm5370_vm0, %v9351_v28  ;;  %10222 = vst.msk [vmem:[#allocation3 + $0x198] sm:$0xff] %vm5370_vm0, %v9352_v26  ;;  %v7339_v30 = vrot.slane %v7331_v18, %v20344_v6  ;;  %v7346_v4 = vrot.slane %v7332_v3, %v20344_v6  ;;  %v7271_v8 = vrot.slane %v7263_v9, %v20344_v6 }
 0x46f   : > { %10254 = vst.msk [vmem:[#allocation3 + $0x298] sm:$0xff] %vm5370_vm0, %v9353_v16  ;;  %10286 = vst.msk [vmem:[#allocation3 + $0x398] sm:$0xff] %vm5370_vm0, %v9354_v58  ;;  %v7278_v7 = vrot.slane %v7264_v42, %v20344_v6  ;;  %v22781_v52 = vrot.slane %v7467_v17, %v20344_v6  ;;  %v22784_v27 = vrot.slane %v7468_v37, %v20344_v6 }
 0x470   : > { %v22787_v45 = vrot.slane %v7399_v36, %v20344_v6  ;;  %v22790_v43 = vrot.slane %v7400_v53, %v20344_v6  ;;  %v7347_v14 = vcombine.low %v26253_v0, %v7339_v30  ;;  %v7348_v46 = vcombine.high %v26253_v0, %v7339_v30 }
 0x471   : > { %v7363_v20 = vcombine.low %v26254_v41, %v7346_v4  ;;  %v7364_v11 = vcombine.high %v26254_v41, %v7346_v4  ;;  %v7279_v23 = vcombine.low %v26255_v39, %v7271_v8  ;;  %v7280_v5 = vcombine.high %v26255_v39, %v7271_v8 }
 0x472   : > { %v7295_v56 = vcombine.low %v26256_v38, %v7278_v7  ;;  %v7296_v54 = vcombine.high %v26256_v38, %v7278_v7  ;;  %v7355_v31 = vrot.slane %v7347_v14, %v20358_v60  ;;  %v7362_v35 = vrot.slane %v7348_v46, %v20358_v60 }
 0x473   : > { %v7371_v33 = vrot.slane %v7363_v20, %v20358_v60  ;;  %v7378_v10 = vrot.slane %v7364_v11, %v20358_v60  ;;  %v7287_v1 = vrot.slane %v7279_v23, %v20358_v60  ;;  %v7294_v62 = vrot.slane %v7280_v5, %v20358_v60 }
 0x474   : > { %v7303_v22 = vrot.slane %v7295_v56, %v20358_v60  ;;  %v7310_v44 = vrot.slane %v7296_v54, %v20358_v60  ;;  %v9491_v2 = vcombine.low %v7355_v31, %v7362_v35  ;;  %v17135_v51 = vcombine.high %v7355_v31, %v7362_v35 }
 0x475   : > { %v9507_v29 = vcombine.low %v7371_v33, %v7378_v10  ;;  %v17136_v28 = vcombine.high %v7371_v33, %v7378_v10  ;;  %v9423_v26 = vcombine.low %v7287_v1, %v7294_v62  ;;  %v17133_v16 = vcombine.high %v7287_v1, %v7294_v62 }
 0x476   : > { %v9439_v58 = vcombine.low %v7303_v22, %v7310_v44  ;;  %v17134_v55 = vcombine.high %v7303_v22, %v7310_v44  ;;  %v9498_v18 = vrot.slane %v9491_v2, %v20344_v6  ;;  %v9506_v3 = vrot.slane %v17135_v51, %v20344_v6 }
 0x477   : > { %v9514_v19 = vrot.slane %v9507_v29, %v20344_v6  ;;  %v9522_v9 = vrot.slane %v17136_v28, %v20344_v6  ;;  %v9430_v42 = vrot.slane %v9423_v26, %v20344_v6  ;;  %v9438_v49 = vrot.slane %v17133_v16, %v20344_v6 }
 0x478   : > { %v9446_v17 = vrot.slane %v9439_v58, %v20344_v6  ;;  %v9454_v37 = vrot.slane %v17134_v55, %v20344_v6  ;;  %v9523_v47 = vcombine.low %v9498_v18, %v9506_v3  ;;  %v9524_v36 = vcombine.high %v9498_v18, %v9506_v3 }
 0x479   : > { %v9539_v53 = vcombine.low %v9514_v19, %v9522_v9  ;;  %v9540_v30 = vcombine.high %v9514_v19, %v9522_v9  ;;  %v9455_v4 = vcombine.low %v9430_v42, %v9438_v49  ;;  %v9456_v8 = vcombine.high %v9430_v42, %v9438_v49 }
 0x47a   : > { %v9471_v7 = vcombine.low %v9446_v17, %v9454_v37  ;;  %v9472_v0 = vcombine.high %v9446_v17, %v9454_v37  ;;  %v9531_v14 = vrot.slane %v9523_v47, %v20358_v60  ;;  %v9538_v46 = vrot.slane %v9524_v36, %v20358_v60 }
 0x47b   : > { %v9547_v41 = vrot.slane %v9539_v53, %v20358_v60  ;;  %v9554_v20 = vrot.slane %v9540_v30, %v20358_v60  ;;  %v9463_v11 = vrot.slane %v9455_v4, %v20358_v60  ;;  %v9470_v39 = vrot.slane %v9456_v8, %v20358_v60  ;;  %v5776_v30 = vpop.permute.xlu0 %5775  ;;  %v5774_v4 = vpop.permute.xlu1 %5773 }
 0x47c   : > { %v9479_v23 = vrot.slane %v9471_v7, %v20358_v60  ;;  %v9486_v5 = vrot.slane %v9472_v0, %v20358_v60  ;;  %v7483_v62 = vcombine.low %v21553_v57, %v22781_v52  ;;  %v7484_v22 = vcombine.high %v21553_v57, %v22781_v52  ;;  %v26257_v52 = vld [vmem:[#allocation67_spill] sm:$0xff] }
 0x47d   : > { %v9555_v38 = vcombine.low %v9531_v14, %v9547_v41  ;;  %v9556_v56 = vcombine.high %v9531_v14, %v9547_v41  ;;  %v9557_v54 = vcombine.low %v9538_v46, %v9554_v20  ;;  %v9558_v31 = vcombine.high %v9538_v46, %v9554_v20 }
 0x47e   : > { %v9487_v35 = vcombine.low %v9463_v11, %v9479_v23  ;;  %v9488_v33 = vcombine.high %v9463_v11, %v9479_v23  ;;  %v9489_v10 = vcombine.low %v9470_v39, %v9486_v5  ;;  %v9490_v1 = vcombine.high %v9470_v39, %v9486_v5 }
 0x47f   : > { %10193 = vst.msk [vmem:[#allocation3 + $0xb0] sm:$0xff] %vm5370_vm0, %v9555_v38  ;;  %10225 = vst.msk [vmem:[#allocation3 + $0x1b0] sm:$0xff] %vm5370_vm0, %v9556_v56  ;;  %v7499_v44 = vcombine.low %v21556_v12, %v22784_v27  ;;  %v7500_v2 = vcombine.high %v21556_v12, %v22784_v27  ;;  %v7415_v51 = vcombine.low %v21510_v15, %v22787_v45 }
 0x480   : > { %10257 = vst.msk [vmem:[#allocation3 + $0x2b0] sm:$0xff] %vm5370_vm0, %v9557_v54  ;;  %10289 = vst.msk [vmem:[#allocation3 + $0x3b0] sm:$0xff] %vm5370_vm0, %v9558_v31  ;;  %v7416_v57 = vcombine.high %v21510_v15, %v22787_v45  ;;  %v7431_v29 = vcombine.low %v26257_v52, %v22790_v43  ;;  %v7432_v12 = vcombine.high %v26257_v52, %v22790_v43  ;;  %v5778_v52 = vpop.permute.xlu1 %5777 }
 0x481   : > { %10192 = vst.msk [vmem:[#allocation3 + $0xa8] sm:$0xff] %vm5370_vm0, %v9487_v35  ;;  %10224 = vst.msk [vmem:[#allocation3 + $0x1a8] sm:$0xff] %vm5370_vm0, %v9488_v33  ;;  %v7491_v27 = vrot.slane %v7483_v62, %v20358_v60  ;;  %v7498_v28 = vrot.slane %v7484_v22, %v20358_v60  ;;  %v7507_v26 = vrot.slane %v7499_v44, %v20358_v60 }
 0x482   : > { %10256 = vst.msk [vmem:[#allocation3 + $0x2a8] sm:$0xff] %vm5370_vm0, %v9489_v10  ;;  %10288 = vst.msk [vmem:[#allocation3 + $0x3a8] sm:$0xff] %vm5370_vm0, %v9490_v1  ;;  %v7514_v16 = vrot.slane %v7500_v2, %v20358_v60  ;;  %v7423_v58 = vrot.slane %v7415_v51, %v20358_v60  ;;  %v7430_v55 = vrot.slane %v7416_v57, %v20358_v60  ;;  %v5780_v57 = vpop.permute.xlu0 %5779 }
 0x483   : > { %v7439_v15 = vrot.slane %v7431_v29, %v20358_v60  ;;  %v7446_v45 = vrot.slane %v7432_v12, %v20358_v60  ;;  %v9627_v18 = vcombine.low %v7491_v27, %v7498_v28  ;;  %v17139_v3 = vcombine.high %v7491_v27, %v7498_v28 }
 0x484   : > { %v9643_v19 = vcombine.low %v7507_v26, %v7514_v16  ;;  %v17140_v43 = vcombine.high %v7507_v26, %v7514_v16  ;;  %v9559_v9 = vcombine.low %v7423_v58, %v7430_v55  ;;  %v17137_v42 = vcombine.high %v7423_v58, %v7430_v55  ;;  %v26258_v26 = vld [vmem:[#allocation28_spill] sm:$0xff]  ;;  %v26259_v55 = vld [vmem:[#allocation65_spill] sm:$0xff] }
 0x485   : > { %v9575_v49 = vcombine.low %v7439_v15, %v7446_v45  ;;  %v17138_v17 = vcombine.high %v7439_v15, %v7446_v45  ;;  %v9634_v37 = vrot.slane %v9627_v18, %v20344_v6  ;;  %v9642_v47 = vrot.slane %v17139_v3, %v20344_v6  ;;  %v26260_v18 = vld [vmem:[#allocation27_spill] sm:$0xff] }
 0x486   : > { %v9650_v36 = vrot.slane %v9643_v19, %v20344_v6  ;;  %v9658_v53 = vrot.slane %v17140_v43, %v20344_v6  ;;  %v9566_v8 = vrot.slane %v9559_v9, %v20344_v6  ;;  %v9574_v7 = vrot.slane %v17137_v42, %v20344_v6  ;;  %v26261_v43 = vld [vmem:[#allocation30_spill] sm:$0xff] }
 0x487   : > { %v9582_v0 = vrot.slane %v9575_v49, %v20344_v6  ;;  %v9590_v14 = vrot.slane %v17138_v17, %v20344_v6  ;;  %v9659_v46 = vcombine.low %v9634_v37, %v9642_v47  ;;  %v9660_v41 = vcombine.high %v9634_v37, %v9642_v47 }
 0x488   : > { %v9675_v20 = vcombine.low %v9650_v36, %v9658_v53  ;;  %v9676_v11 = vcombine.high %v9650_v36, %v9658_v53  ;;  %v9591_v39 = vcombine.low %v9566_v8, %v9574_v7  ;;  %v9592_v23 = vcombine.high %v9566_v8, %v9574_v7 }
 0x489   : > { %v9607_v5 = vcombine.low %v9582_v0, %v9590_v14  ;;  %v9608_v38 = vcombine.high %v9582_v0, %v9590_v14  ;;  %v9667_v56 = vrot.slane %v9659_v46, %v20358_v60  ;;  %v9674_v54 = vrot.slane %v9660_v41, %v20358_v60  ;;  %v26262_v46 = vld [vmem:[#allocation47_spill] sm:$0xff] }
 0x48a   : > { %v9683_v31 = vrot.slane %v9675_v20, %v20358_v60  ;;  %v9690_v35 = vrot.slane %v9676_v11, %v20358_v60  ;;  %v9599_v33 = vrot.slane %v9591_v39, %v20358_v60  ;;  %v9606_v10 = vrot.slane %v9592_v23, %v20358_v60  ;;  %v26263_v11 = vld [vmem:[#allocation43_spill] sm:$0xff] }
 0x48b   : > { %v9615_v1 = vrot.slane %v9607_v5, %v20358_v60  ;;  %v9622_v62 = vrot.slane %v9608_v38, %v20358_v60  ;;  %v7603_v16 = vcombine.low %v26258_v26, %v5776_v30  ;;  %v7604_v58 = vcombine.high %v26258_v26, %v5776_v30 }
 0x48c   : > { %v9691_v22 = vcombine.low %v9667_v56, %v9683_v31  ;;  %v9692_v44 = vcombine.high %v9667_v56, %v9683_v31  ;;  %v9693_v2 = vcombine.low %v9674_v54, %v9690_v35  ;;  %v9694_v51 = vcombine.high %v9674_v54, %v9690_v35 }
 0x48d   : > { %v9623_v29 = vcombine.low %v9599_v33, %v9615_v1  ;;  %v9624_v12 = vcombine.high %v9599_v33, %v9615_v1  ;;  %v9625_v27 = vcombine.low %v9606_v10, %v9622_v62  ;;  %v9626_v28 = vcombine.high %v9606_v10, %v9622_v62 }
 0x48e   : > { %10195 = vst.msk [vmem:[#allocation3 + $0xc0] sm:$0xff] %vm5370_vm0, %v9691_v22  ;;  %10227 = vst.msk [vmem:[#allocation3 + $0x1c0] sm:$0xff] %vm5370_vm0, %v9692_v44  ;;  %v7535_v15 = vcombine.low %v26259_v55, %v5774_v4  ;;  %v7536_v45 = vcombine.high %v26259_v55, %v5774_v4  ;;  %v7739_v3 = vcombine.low %v26260_v18, %v5780_v57 }
 0x48f   : > { %10259 = vst.msk [vmem:[#allocation3 + $0x2c0] sm:$0xff] %vm5370_vm0, %v9693_v2  ;;  %10291 = vst.msk [vmem:[#allocation3 + $0x3c0] sm:$0xff] %vm5370_vm0, %v9694_v51  ;;  %v7740_v19 = vcombine.high %v26260_v18, %v5780_v57  ;;  %v7671_v9 = vcombine.low %v26261_v43, %v5778_v52  ;;  %v7672_v42 = vcombine.high %v26261_v43, %v5778_v52 }
 0x490   : > { %10194 = vst.msk [vmem:[#allocation3 + $0xb8] sm:$0xff] %vm5370_vm0, %v9623_v29  ;;  %10226 = vst.msk [vmem:[#allocation3 + $0x1b8] sm:$0xff] %vm5370_vm0, %v9624_v12  ;;  %v7611_v49 = vrot.slane %v7603_v16, %v20344_v6  ;;  %v7618_v17 = vrot.slane %v7604_v58, %v20344_v6  ;;  %v7543_v37 = vrot.slane %v7535_v15, %v20344_v6 }
 0x491   : > { %10258 = vst.msk [vmem:[#allocation3 + $0x2b8] sm:$0xff] %vm5370_vm0, %v9625_v27  ;;  %10290 = vst.msk [vmem:[#allocation3 + $0x3b8] sm:$0xff] %vm5370_vm0, %v9626_v28  ;;  %v7550_v47 = vrot.slane %v7536_v45, %v20344_v6  ;;  %v22893_v36 = vrot.slane %v7739_v3, %v20344_v6  ;;  %v22896_v53 = vrot.slane %v7740_v19, %v20344_v6 }
 0x492   : > { %v22899_v30 = vrot.slane %v7671_v9, %v20344_v6  ;;  %v22902_v4 = vrot.slane %v7672_v42, %v20344_v6  ;;  %v7619_v8 = vcombine.low %v22178_v24, %v7611_v49  ;;  %v7620_v7 = vcombine.high %v22178_v24, %v7611_v49 }
 0x493   : > { %v7635_v0 = vcombine.low %v22184_v48, %v7618_v17  ;;  %v7636_v14 = vcombine.high %v22184_v48, %v7618_v17  ;;  %v7551_v41 = vcombine.low %v26262_v46, %v7543_v37  ;;  %v7552_v20 = vcombine.high %v26262_v46, %v7543_v37 }
 0x494   : > { %v7567_v39 = vcombine.low %v26263_v11, %v7550_v47  ;;  %v7568_v23 = vcombine.high %v26263_v11, %v7550_v47  ;;  %v7627_v5 = vrot.slane %v7619_v8, %v20358_v60  ;;  %v7634_v38 = vrot.slane %v7620_v7, %v20358_v60 }
 0x495   : > { %v7643_v56 = vrot.slane %v7635_v0, %v20358_v60  ;;  %v7650_v24 = vrot.slane %v7636_v14, %v20358_v60  ;;  %v7559_v54 = vrot.slane %v7551_v41, %v20358_v60  ;;  %v7566_v48 = vrot.slane %v7552_v20, %v20358_v60 }
 0x496   : > { %v7575_v31 = vrot.slane %v7567_v39, %v20358_v60  ;;  %v7582_v35 = vrot.slane %v7568_v23, %v20358_v60  ;;  %v9763_v33 = vcombine.low %v7627_v5, %v7634_v38  ;;  %v17143_v10 = vcombine.high %v7627_v5, %v7634_v38 }
 0x497   : > { %v9779_v1 = vcombine.low %v7643_v56, %v7650_v24  ;;  %v17144_v62 = vcombine.high %v7643_v56, %v7650_v24  ;;  %v9695_v22 = vcombine.low %v7559_v54, %v7566_v48  ;;  %v17141_v44 = vcombine.high %v7559_v54, %v7566_v48 }
 0x498   : > { %v9711_v2 = vcombine.low %v7575_v31, %v7582_v35  ;;  %v17142_v51 = vcombine.high %v7575_v31, %v7582_v35  ;;  %v9770_v57 = vrot.slane %v9763_v33, %v20344_v6  ;;  %v9778_v52 = vrot.slane %v17143_v10, %v20344_v6 }
 0x499   : > { %v9786_v29 = vrot.slane %v9779_v1, %v20344_v6  ;;  %v9794_v12 = vrot.slane %v17144_v62, %v20344_v6  ;;  %v9702_v27 = vrot.slane %v9695_v22, %v20344_v6  ;;  %v9710_v28 = vrot.slane %v17141_v44, %v20344_v6 }
 0x49a   : > { %v9718_v26 = vrot.slane %v9711_v2, %v20344_v6  ;;  %v9726_v16 = vrot.slane %v17142_v51, %v20344_v6  ;;  %v9795_v58 = vcombine.low %v9770_v57, %v9778_v52  ;;  %v9796_v55 = vcombine.high %v9770_v57, %v9778_v52 }
 0x49b   : > { %v9811_v15 = vcombine.low %v9786_v29, %v9794_v12  ;;  %v9812_v45 = vcombine.high %v9786_v29, %v9794_v12  ;;  %v9727_v18 = vcombine.low %v9702_v27, %v9710_v28  ;;  %v9728_v3 = vcombine.high %v9702_v27, %v9710_v28  ;;  %v5782_v27 = vpop.permute.xlu1 %5781 }
 0x49c   : > { %v9743_v19 = vcombine.low %v9718_v26, %v9726_v16  ;;  %v9744_v43 = vcombine.high %v9718_v26, %v9726_v16  ;;  %v9803_v9 = vrot.slane %v9795_v58, %v20358_v60  ;;  %v9810_v42 = vrot.slane %v9796_v55, %v20358_v60 }
 0x49d   : > { %v9819_v49 = vrot.slane %v9811_v15, %v20358_v60  ;;  %v9826_v17 = vrot.slane %v9812_v45, %v20358_v60  ;;  %v9735_v37 = vrot.slane %v9727_v18, %v20358_v60  ;;  %v9742_v47 = vrot.slane %v9728_v3, %v20358_v60 }
 0x49e   : > { %v9751_v8 = vrot.slane %v9743_v19, %v20358_v60  ;;  %v9758_v7 = vrot.slane %v9744_v43, %v20358_v60  ;;  %v7755_v5 = vcombine.low %v22187_v32, %v22893_v36  ;;  %v7756_v38 = vcombine.high %v22187_v32, %v22893_v36 }
 0x49f   : > { %v9827_v0 = vcombine.low %v9803_v9, %v9819_v49  ;;  %v9828_v14 = vcombine.high %v9803_v9, %v9819_v49  ;;  %v9829_v46 = vcombine.low %v9810_v42, %v9826_v17  ;;  %v9830_v41 = vcombine.high %v9810_v42, %v9826_v17 }
 0x4a0   : > { %v9759_v20 = vcombine.low %v9735_v37, %v9751_v8  ;;  %v9760_v11 = vcombine.high %v9735_v37, %v9751_v8  ;;  %v9761_v39 = vcombine.low %v9742_v47, %v9758_v7  ;;  %v9762_v23 = vcombine.high %v9742_v47, %v9758_v7 }
 0x4a1   : > { %10197 = vst.msk [vmem:[#allocation3 + $0xd0] sm:$0xff] %vm5370_vm0, %v9827_v0  ;;  %10229 = vst.msk [vmem:[#allocation3 + $0x1d0] sm:$0xff] %vm5370_vm0, %v9828_v14  ;;  %v7771_v56 = vcombine.low %v22190_v25, %v22896_v53  ;;  %v7772_v24 = vcombine.high %v22190_v25, %v22896_v53  ;;  %v7687_v54 = vcombine.low %v22088_v34, %v22899_v30  ;;  %v5784_v14 = vpop.permute.xlu0 %5783 }
 0x4a2   : > { %10261 = vst.msk [vmem:[#allocation3 + $0x2d0] sm:$0xff] %vm5370_vm0, %v9829_v46  ;;  %10293 = vst.msk [vmem:[#allocation3 + $0x3d0] sm:$0xff] %vm5370_vm0, %v9830_v41  ;;  %v7688_v32 = vcombine.high %v22088_v34, %v22899_v30  ;;  %v7703_v36 = vcombine.low %v22094_v61, %v22902_v4  ;;  %v7704_v25 = vcombine.high %v22094_v61, %v22902_v4 }
 0x4a3   : > { %10196 = vst.msk [vmem:[#allocation3 + $0xc8] sm:$0xff] %vm5370_vm0, %v9759_v20  ;;  %10228 = vst.msk [vmem:[#allocation3 + $0x1c8] sm:$0xff] %vm5370_vm0, %v9760_v11  ;;  %v7763_v53 = vrot.slane %v7755_v5, %v20358_v60  ;;  %v7770_v48 = vrot.slane %v7756_v38, %v20358_v60  ;;  %v7779_v31 = vrot.slane %v7771_v56, %v20358_v60 }
 0x4a4   : > { %10260 = vst.msk [vmem:[#allocation3 + $0x2c8] sm:$0xff] %vm5370_vm0, %v9761_v39  ;;  %10292 = vst.msk [vmem:[#allocation3 + $0x3c8] sm:$0xff] %vm5370_vm0, %v9762_v23  ;;  %v7786_v35 = vrot.slane %v7772_v24, %v20358_v60  ;;  %v7695_v33 = vrot.slane %v7687_v54, %v20358_v60  ;;  %v7702_v10 = vrot.slane %v7688_v32, %v20358_v60  ;;  %v5786_v39 = vpop.permute.xlu1 %5785  ;;  %v26264_v24 = vld [vmem:[#allocation29_spill] sm:$0xff] }
 0x4a5   : > { %v7711_v34 = vrot.slane %v7703_v36, %v20358_v60  ;;  %v7718_v30 = vrot.slane %v7704_v25, %v20358_v60  ;;  %v9899_v1 = vcombine.low %v7763_v53, %v7770_v48  ;;  %v17147_v62 = vcombine.high %v7763_v53, %v7770_v48  ;;  %v26265_v36 = vld [vmem:[#allocation31_spill] sm:$0xff] }
 0x4a6   : > { %v9915_v22 = vcombine.low %v7779_v31, %v7786_v35  ;;  %v17148_v61 = vcombine.high %v7779_v31, %v7786_v35  ;;  %v9831_v4 = vcombine.low %v7695_v33, %v7702_v10  ;;  %v17145_v44 = vcombine.high %v7695_v33, %v7702_v10 }
 0x4a7   : > { %v9847_v2 = vcombine.low %v7711_v34, %v7718_v30  ;;  %v17146_v51 = vcombine.high %v7711_v34, %v7718_v30  ;;  %v9906_v57 = vrot.slane %v9899_v1, %v20344_v6  ;;  %v9914_v52 = vrot.slane %v17147_v62, %v20344_v6 }
 0x4a8   : > { %v9922_v29 = vrot.slane %v9915_v22, %v20344_v6  ;;  %v9930_v12 = vrot.slane %v17148_v61, %v20344_v6  ;;  %v9838_v28 = vrot.slane %v9831_v4, %v20344_v6  ;;  %v9846_v26 = vrot.slane %v17145_v44, %v20344_v6 }
 0x4a9   : > { %v9854_v16 = vrot.slane %v9847_v2, %v20344_v6  ;;  %v9862_v58 = vrot.slane %v17146_v51, %v20344_v6  ;;  %v9931_v55 = vcombine.low %v9906_v57, %v9914_v52  ;;  %v9932_v15 = vcombine.high %v9906_v57, %v9914_v52  ;;  %v26270_v57 = vld [vmem:[#allocation34_spill] sm:$0xff] }
 0x4aa   : > { %v9947_v45 = vcombine.low %v9922_v29, %v9930_v12  ;;  %v9948_v18 = vcombine.high %v9922_v29, %v9930_v12  ;;  %v9863_v3 = vcombine.low %v9838_v28, %v9846_v26  ;;  %v9864_v19 = vcombine.high %v9838_v28, %v9846_v26 }
 0x4ab   : > { %v9879_v43 = vcombine.low %v9854_v16, %v9862_v58  ;;  %v9880_v9 = vcombine.high %v9854_v16, %v9862_v58  ;;  %v9939_v42 = vrot.slane %v9931_v55, %v20358_v60  ;;  %v9946_v49 = vrot.slane %v9932_v15, %v20358_v60 }
 0x4ac   : > { %v9955_v17 = vrot.slane %v9947_v45, %v20358_v60  ;;  %v9962_v37 = vrot.slane %v9948_v18, %v20358_v60  ;;  %v9871_v47 = vrot.slane %v9863_v3, %v20358_v60  ;;  %v9878_v8 = vrot.slane %v9864_v19, %v20358_v60 }
 0x4ad   : > { %v9887_v7 = vrot.slane %v9879_v43, %v20358_v60  ;;  %v9894_v0 = vrot.slane %v9880_v9, %v20358_v60  ;;  %v7875_v54 = vcombine.low %v26264_v24, %v5784_v14  ;;  %v7876_v32 = vcombine.high %v26264_v24, %v5784_v14 }
 0x4ae   : > { %v9963_v46 = vcombine.low %v9939_v42, %v9955_v17  ;;  %v9964_v41 = vcombine.high %v9939_v42, %v9955_v17  ;;  %v9965_v20 = vcombine.low %v9946_v49, %v9962_v37  ;;  %v9966_v11 = vcombine.high %v9946_v49, %v9962_v37 }
 0x4af   : > { %v9895_v23 = vcombine.low %v9871_v47, %v9887_v7  ;;  %v9896_v5 = vcombine.high %v9871_v47, %v9887_v7  ;;  %v9897_v38 = vcombine.low %v9878_v8, %v9894_v0  ;;  %v9898_v56 = vcombine.high %v9878_v8, %v9894_v0 }
 0x4b0   : > { %10199 = vst.msk [vmem:[#allocation3 + $0xe0] sm:$0xff] %vm5370_vm0, %v9963_v46  ;;  %10231 = vst.msk [vmem:[#allocation3 + $0x1e0] sm:$0xff] %vm5370_vm0, %v9964_v41  ;;  %v7807_v25 = vcombine.low %v26265_v36, %v5782_v27  ;;  %v7808_v53 = vcombine.high %v26265_v36, %v5782_v27  ;;  %v26266_v48 = vcombine.low %v26143_v63, %v22118_v40 }
 0x4b1   : > { %10263 = vst.msk [vmem:[#allocation3 + $0x2e0] sm:$0xff] %vm5370_vm0, %v9965_v20  ;;  %10295 = vst.msk [vmem:[#allocation3 + $0x3e0] sm:$0xff] %vm5370_vm0, %v9966_v11  ;;  %v26267_v35 = vcombine.high %v26143_v63, %v22118_v40  ;;  %v7943_v10 = vcombine.low %v22046_v59, %v5786_v39  ;;  %v7944_v34 = vcombine.high %v22046_v59, %v5786_v39 }
 0x4b2   : > { %v7799_v31 = vrot.slane %v26266_v48, %v20344_v6  ;;  %10198 = vst.msk [vmem:[#allocation3 + $0xd8] sm:$0xff] %vm5370_vm0, %v9895_v23  ;;  %10230 = vst.msk [vmem:[#allocation3 + $0x1d8] sm:$0xff] %vm5370_vm0, %v9896_v5  ;;  %v7883_v30 = vrot.slane %v7875_v54, %v20344_v6  ;;  %v7890_v1 = vrot.slane %v7876_v32, %v20344_v6 }
 0x4b3   : > { %v7806_v33 = vrot.slane %v26267_v35, %v20344_v6  ;;  %10262 = vst.msk [vmem:[#allocation3 + $0x2d8] sm:$0xff] %vm5370_vm0, %v9897_v38  ;;  %10294 = vst.msk [vmem:[#allocation3 + $0x3d8] sm:$0xff] %vm5370_vm0, %v9898_v56  ;;  %v7815_v62 = vrot.slane %v7807_v25, %v20344_v6  ;;  %v7822_v63 = vrot.slane %v7808_v53, %v20344_v6 }
 0x4b4   : > { %v26268_v40 = vcombine.low %v26164_v21, %v22132_v13  ;;  %v26269_v61 = vcombine.high %v26164_v21, %v22132_v13  ;;  %v23023_v59 = vrot.slane %v7943_v10, %v20344_v6  ;;  %v23026_v44 = vrot.slane %v7944_v34, %v20344_v6 }
 0x4b5   : > { %v7891_v2 = vcombine.low %v22209_v50, %v7883_v30  ;;  %v7892_v51 = vcombine.high %v22209_v50, %v7883_v30  ;;  %v7907_v52 = vcombine.low %v26270_v57, %v7890_v1  ;;  %v7908_v29 = vcombine.high %v26270_v57, %v7890_v1 }
 0x4b6   : > { %v23014_v22 = vrot.slane %v26268_v40, %v20344_v6  ;;  %v23020_v4 = vrot.slane %v26269_v61, %v20344_v6  ;;  %v7823_v12 = vcombine.low %v7799_v31, %v7815_v62  ;;  %v7824_v27 = vcombine.high %v7799_v31, %v7815_v62 }
 0x4b7   : > { %v7839_v28 = vcombine.low %v7806_v33, %v7822_v63  ;;  %v7840_v21 = vcombine.high %v7806_v33, %v7822_v63  ;;  %v7899_v13 = vrot.slane %v7891_v2, %v20358_v60  ;;  %v7906_v26 = vrot.slane %v7892_v51, %v20358_v60 }
 0x4b8   : > { %v7915_v16 = vrot.slane %v7907_v52, %v20358_v60  ;;  %v7922_v58 = vrot.slane %v7908_v29, %v20358_v60  ;;  %v7831_v55 = vrot.slane %v7823_v12, %v20358_v60  ;;  %v7838_v50 = vrot.slane %v7824_v27, %v20358_v60 }
 0x4b9   : > { %v7847_v15 = vrot.slane %v7839_v28, %v20358_v60  ;;  %v7854_v45 = vrot.slane %v7840_v21, %v20358_v60  ;;  %v10035_v18 = vcombine.low %v7899_v13, %v7906_v26  ;;  %v17151_v3 = vcombine.high %v7899_v13, %v7906_v26 }
 0x4ba   : > { %v10051_v19 = vcombine.low %v7915_v16, %v7922_v58  ;;  %v17152_v43 = vcombine.high %v7915_v16, %v7922_v58  ;;  %v9967_v9 = vcombine.low %v7831_v55, %v7838_v50  ;;  %v17149_v42 = vcombine.high %v7831_v55, %v7838_v50 }
 0x4bb   : > { %v9983_v49 = vcombine.low %v7847_v15, %v7854_v45  ;;  %v17150_v17 = vcombine.high %v7847_v15, %v7854_v45  ;;  %v10042_v37 = vrot.slane %v10035_v18, %v20344_v6  ;;  %v10050_v47 = vrot.slane %v17151_v3, %v20344_v6 }
 0x4bc   : > { %v10058_v8 = vrot.slane %v10051_v19, %v20344_v6  ;;  %v10066_v7 = vrot.slane %v17152_v43, %v20344_v6  ;;  %v9974_v0 = vrot.slane %v9967_v9, %v20344_v6  ;;  %v9982_v14 = vrot.slane %v17149_v42, %v20344_v6 }
 0x4bd   : > { %v9990_v46 = vrot.slane %v9983_v49, %v20344_v6  ;;  %v9998_v41 = vrot.slane %v17150_v17, %v20344_v6  ;;  %v10067_v20 = vcombine.low %v10042_v37, %v10050_v47  ;;  %v10068_v11 = vcombine.high %v10042_v37, %v10050_v47 }
 0x4be   : > { %v10083_v39 = vcombine.low %v10058_v8, %v10066_v7  ;;  %v10084_v23 = vcombine.high %v10058_v8, %v10066_v7  ;;  %v9999_v5 = vcombine.low %v9974_v0, %v9982_v14  ;;  %v10000_v38 = vcombine.high %v9974_v0, %v9982_v14 }
 0x4bf   : > { %v10015_v56 = vcombine.low %v9990_v46, %v9998_v41  ;;  %v10016_v24 = vcombine.high %v9990_v46, %v9998_v41  ;;  %v10075_v54 = vrot.slane %v10067_v20, %v20358_v60  ;;  %v10082_v32 = vrot.slane %v10068_v11, %v20358_v60 }
 0x4c0   : > { %v10091_v36 = vrot.slane %v10083_v39, %v20358_v60  ;;  %v10098_v25 = vrot.slane %v10084_v23, %v20358_v60  ;;  %v10007_v53 = vrot.slane %v9999_v5, %v20358_v60  ;;  %v10014_v48 = vrot.slane %v10000_v38, %v20358_v60 }
 0x4c1   : > { %v10023_v31 = vrot.slane %v10015_v56, %v20358_v60  ;;  %v10030_v35 = vrot.slane %v10016_v24, %v20358_v60  ;;  %v7959_v61 = vcombine.low %v23014_v22, %v23023_v59  ;;  %v7960_v2 = vcombine.high %v23014_v22, %v23023_v59 }
 0x4c2   : > { %v10099_v33 = vcombine.low %v10075_v54, %v10091_v36  ;;  %v10100_v10 = vcombine.high %v10075_v54, %v10091_v36  ;;  %v10101_v34 = vcombine.low %v10082_v32, %v10098_v25  ;;  %v10102_v30 = vcombine.high %v10082_v32, %v10098_v25 }
 0x4c3   : > { %v10031_v1 = vcombine.low %v10007_v53, %v10023_v31  ;;  %v10032_v62 = vcombine.high %v10007_v53, %v10023_v31  ;;  %v10033_v63 = vcombine.low %v10014_v48, %v10030_v35  ;;  %v10034_v40 = vcombine.high %v10014_v48, %v10030_v35 }
 0x4c4   : > { %10201 = vst.msk [vmem:[#allocation3 + $0xf0] sm:$0xff] %vm5370_vm0, %v10099_v33  ;;  %10233 = vst.msk [vmem:[#allocation3 + $0x1f0] sm:$0xff] %vm5370_vm0, %v10100_v10  ;;  %v7975_v51 = vcombine.low %v23020_v4, %v23026_v44  ;;  %v7976_v57 = vcombine.high %v23020_v4, %v23026_v44  ;;  %v7967_v52 = vrot.slane %v7959_v61, %v20358_v60 }
 0x4c5   : > { %10265 = vst.msk [vmem:[#allocation3 + $0x2f0] sm:$0xff] %vm5370_vm0, %v10101_v34  ;;  %10297 = vst.msk [vmem:[#allocation3 + $0x3f0] sm:$0xff] %vm5370_vm0, %v10102_v30  ;;  %v7974_v29 = vrot.slane %v7960_v2, %v20358_v60 }
 0x4c6   : > { %10200 = vst.msk [vmem:[#allocation3 + $0xe8] sm:$0xff] %vm5370_vm0, %v10031_v1  ;;  %10232 = vst.msk [vmem:[#allocation3 + $0x1e8] sm:$0xff] %vm5370_vm0, %v10032_v62  ;;  %v7983_v22 = vrot.slane %v7975_v51, %v20358_v60  ;;  %v7990_v59 = vrot.slane %v7976_v57, %v20358_v60 }
 0x4c7   : > { %10264 = vst.msk [vmem:[#allocation3 + $0x2e8] sm:$0xff] %vm5370_vm0, %v10033_v63  ;;  %10296 = vst.msk [vmem:[#allocation3 + $0x3e8] sm:$0xff] %vm5370_vm0, %v10034_v40  ;;  %v10103_v12 = vcombine.low %v7967_v52, %v7974_v29  ;;  %v17153_v27 = vcombine.high %v7967_v52, %v7974_v29 }
 0x4c8   : > { %v10119_v28 = vcombine.low %v7983_v22, %v7990_v59  ;;  %v17154_v4 = vcombine.high %v7983_v22, %v7990_v59 }
 0x4c9   : > { %v10110_v44 = vrot.slane %v10103_v12, %v20344_v6  ;;  %v10118_v21 = vrot.slane %v17153_v27, %v20344_v6 }
 0x4ca   : > { %v10126_v13 = vrot.slane %v10119_v28, %v20344_v6  ;;  %v10134_v26 = vrot.slane %v17154_v4, %v20344_v6 }
 0x4cb   : > { %v10135_v16 = vcombine.low %v10110_v44, %v10118_v21  ;;  %v10136_v58 = vcombine.high %v10110_v44, %v10118_v21 }
 0x4cc   : > { %v10151_v55 = vcombine.low %v10126_v13, %v10134_v26  ;;  %v10152_v50 = vcombine.high %v10126_v13, %v10134_v26 }
 0x4cd   : > { %v10143_v15 = vrot.slane %v10135_v16, %v20358_v60  ;;  %v10150_v45 = vrot.slane %v10136_v58, %v20358_v60 }
 0x4ce   : > { %v10159_v18 = vrot.slane %v10151_v55, %v20358_v60  ;;  %v10166_v3 = vrot.slane %v10152_v50, %v20358_v60 }
 0x4d0   : > { %v10167_v19 = vcombine.low %v10143_v15, %v10159_v18  ;;  %v10168_v43 = vcombine.high %v10143_v15, %v10159_v18  ;;  %v10169_v9 = vcombine.low %v10150_v45, %v10166_v3  ;;  %v10170_v42 = vcombine.high %v10150_v45, %v10166_v3 }
 0x4d2   : > { %10202 = vst.msk [vmem:[#allocation3 + $0xf8] sm:$0xff] %vm5370_vm0, %v10167_v19  ;;  %10234 = vst.msk [vmem:[#allocation3 + $0x1f8] sm:$0xff] %vm5370_vm0, %v10168_v43 }
 0x4d3   : > { %10266 = vst.msk [vmem:[#allocation3 + $0x2f8] sm:$0xff] %vm5370_vm0, %v10169_v9  ;;  %10298 = vst.msk [vmem:[#allocation3 + $0x3f8] sm:$0xff] %vm5370_vm0, %v10170_v42 }
 0x4d4 PF: > { %v10315_v6 = vld [vmem:[#allocation9] sm:$0xff]  ;;  %v10316_v49 = vld [vmem:[#allocation9 + $0x8] sm:$0xff]  ;;  %v10317_v17 = vld [vmem:[#allocation9 + $0x10] sm:$0xff]  ;;  %vm12956_vm1 = vcmask 261120   ;;  %s19653_s16 = smov 64   ;;  %s19654_s3 = smov 96  }
 0x4d5   : > { %v18355_v37 = vpack.c.bf16 %v10316_v49, %v10315_v6  ;;  %v10318_v47 = vld [vmem:[#allocation9 + $0x18] sm:$0xff]  ;;  %v10319_v8 = vld [vmem:[#allocation9 + $0x20] sm:$0xff]  ;;  %v10320_v7 = vld [vmem:[#allocation9 + $0x28] sm:$0xff]  ;;  %s19655_s27 = smov 32   ;;  %s26608_s15 = sld [smem:[#allocation173_spill]] }
 0x4d6   : > { %v18359_v60 = vpack.c.bf16 %v10318_v47, %v10317_v17  ;;  %v18363_v0 = vpack.c.bf16 %v10320_v7, %v10319_v8  ;;  %v10299_v14 = vld [vmem:[%s20011_s20] sm:$0xff]  ;;  %v10321_v46 = vld [vmem:[#allocation9 + $0x30] sm:$0xff]  ;;  %v10322_v41 = vld [vmem:[#allocation9 + $0x38] sm:$0xff]  ;;  %s26609_s18 = sld [smem:[#allocation20_spill]]  ;;  %s16864_s4 = sshll.u32 %s20033_s10, 4  ;;  %s25660_s4 = int_to_ptr.vmem [resolvable:$true] %s16864_s4 }
 0x4d7   : > { %18356 = vmatprep.subr.bf16.mxu0 %v18355_v37  ;;  %18171 = vmatprep.mubr.f32.mxu0 %v10299_v14  ;;  %v18367_v20 = vpack.c.bf16 %v10322_v41, %v10321_v46  ;;  %v10323_v11 = vld [vmem:[#allocation9 + $0x40] sm:$0xff]  ;;  %v10324_v39 = vld [vmem:[#allocation9 + $0x48] sm:$0xff]  ;;  %v10325_v5 = vld [vmem:[#allocation9 + $0x50] sm:$0xff]  ;;  %s26612_s9 = sld [smem:[#allocation174_spill]] }
 0x4d8   : > { %18358 = vmatpush3.bf16.msra.mxu0 %v18355_v37  ;;  %v18371_v23 = vpack.c.bf16 %v10324_v39, %v10323_v11  ;;  %v10326_v38 = vld [vmem:[#allocation9 + $0x58] sm:$0xff]  ;;  %v10327_v24 = vld [vmem:[#allocation9 + $0x60] sm:$0xff]  ;;  %v10328_v54 = vld [vmem:[#allocation9 + $0x68] sm:$0xff] }
 0x4d9   : > { %18360 = vmatprep.subr.bf16.mxu0 %v18359_v60  ;;  %v18375_v56 = vpack.c.bf16 %v10326_v38, %v10325_v5  ;;  %v18379_v32 = vpack.c.bf16 %v10328_v54, %v10327_v24  ;;  %v10329_v36 = vld [vmem:[#allocation9 + $0x70] sm:$0xff]  ;;  %v10330_v25 = vld [vmem:[#allocation9 + $0x78] sm:$0xff]  ;;  %v10300_v48 = vld [vmem:[%s20011_s20 + $0x8] sm:$0xff] }
 0x4da   : > { %v18383_v53 = vpack.c.bf16 %v10330_v25, %v10329_v36  ;;  %v10301_v31 = vld [vmem:[%s20011_s20 + $0x10] sm:$0xff]  ;;  %v10302_v35 = vld [vmem:[%s20011_s20 + $0x18] sm:$0xff]  ;;  %v10303_v33 = vld [vmem:[%s20011_s20 + $0x20] sm:$0xff] }
 0x4db   : > { %v10304_v10 = vld [vmem:[%s20011_s20 + $0x28] sm:$0xff]  ;;  %v10305_v34 = vld [vmem:[%s20011_s20 + $0x30] sm:$0xff]  ;;  %v10306_v30 = vld [vmem:[%s20011_s20 + $0x38] sm:$0xff] }
 0x4dc   : > { %18362 = vmatpush3.bf16.msra.mxu0 %v18359_v60  ;;  %v10307_v1 = vld [vmem:[%s20011_s20 + $0x40] sm:$0xff]  ;;  %v10308_v62 = vld [vmem:[%s20011_s20 + $0x48] sm:$0xff]  ;;  %v10309_v63 = vld [vmem:[%s20011_s20 + $0x50] sm:$0xff]  ;;  %s17445_s12 = sshll.u32 %s26609_s18, 4 }
 0x4dd   : > { %18364 = vmatprep.subr.bf16.mxu0 %v18363_v0  ;;  %v10310_v40 = vld [vmem:[%s20011_s20 + $0x58] sm:$0xff]  ;;  %v10311_v61 = vld [vmem:[%s20011_s20 + $0x60] sm:$0xff]  ;;  %v10312_v2 = vld [vmem:[%s20011_s20 + $0x68] sm:$0xff] }
 0x4de   : > { %v10313_v51 = vld [vmem:[%s20011_s20 + $0x70] sm:$0xff]  ;;  %v10314_v57 = vld [vmem:[%s20011_s20 + $0x78] sm:$0xff]  ;;  %v12844_v52 = vld [vmem:[#allocation2 + $0x80] sm:$0xff]  ;;  %s26610_s20 = sld [smem:[#allocation21_spill]] }
 0x4df   : > { %v12845_v29 = vld [vmem:[#allocation2 + $0x88] sm:$0xff]  ;;  %v12876_v22 = vld [vmem:[#allocation2 + $0x180] sm:$0xff]  ;;  %vm23106_vm2 = vmpackc.low %vm12956_vm1, %vm12956_vm1 }
 0x4e0   : > { %18366 = vmatpush3.bf16.msra.mxu0 %v18363_v0  ;;  %v18387_v59 = vpack.c.bf16 %v12845_v29, %v12844_v52  ;;  %v12877_v12 = vld [vmem:[#allocation2 + $0x188] sm:$0xff]  ;;  %v12828_v27 = vld [vmem:[#allocation2] sm:$0xff]  ;;  %v12846_v58 = vld [vmem:[#allocation2 + $0x90] sm:$0xff] }
 0x4e1   : > { %18368 = vmatprep.subr.bf16.mxu0 %v18367_v20  ;;  %v12829_v28 = vld [vmem:[#allocation2 + $0x8] sm:$0xff]  ;;  %v18435_v44 = vpack.c.bf16 %v12877_v12, %v12876_v22  ;;  %v12860_v13 = vld [vmem:[#allocation2 + $0x100] sm:$0xff]  ;;  %v12847_v55 = vld [vmem:[#allocation2 + $0x98] sm:$0xff] }
 0x4e2   : > { %v18390_v21 = vpack.c.bf16 %v12829_v28, %v12828_v27  ;;  %v12861_v26 = vld [vmem:[#allocation2 + $0x108] sm:$0xff]  ;;  %18389 = vmatprep.subr.msk.bf16.mxu1 %vm23106_vm2, %v18387_v59  ;;  %v12878_v50 = vld [vmem:[#allocation2 + $0x190] sm:$0xff]  ;;  %v18393_v15 = vpack.c.bf16 %v12847_v55, %v12846_v58  ;;  %v12879_v45 = vld [vmem:[#allocation2 + $0x198] sm:$0xff] }
 0x4e3   : > { %v18438_v16 = vpack.c.bf16 %v12861_v26, %v12860_v13  ;;  %v12830_v18 = vld [vmem:[#allocation2 + $0x10] sm:$0xff]  ;;  %v12831_v3 = vld [vmem:[#allocation2 + $0x18] sm:$0xff]  ;;  %v18441_v19 = vpack.c.bf16 %v12879_v45, %v12878_v50  ;;  %v12848_v49 = vld [vmem:[#allocation2 + $0xa0] sm:$0xff] }
 0x4e4   : > { %18370 = vmatpush3.bf16.msra.mxu0 %v18367_v20  ;;  %18392 = vmatpush3.bf16.xpose.msk.msra.mxu1 %vm23106_vm2, %v18390_v21  ;;  %v18396_v43 = vpack.c.bf16 %v12831_v3, %v12830_v18  ;;  %v12862_v9 = vld [vmem:[#allocation2 + $0x110] sm:$0xff]  ;;  %v12863_v42 = vld [vmem:[#allocation2 + $0x118] sm:$0xff]  ;;  %v12849_v17 = vld [vmem:[#allocation2 + $0xa8] sm:$0xff]  ;;  %s17446_s13 = sshll.u32 %s26610_s20, 5 }
 0x4e5   : > { %18372 = vmatprep.subr.bf16.mxu0 %v18371_v23  ;;  %18395 = vmatprep.subr.msk.bf16.mxu1 %vm23106_vm2, %v18393_v15  ;;  %v18444_v6 = vpack.c.bf16 %v12863_v42, %v12862_v9  ;;  %v12880_v37 = vld [vmem:[#allocation2 + $0x1a0] sm:$0xff]  ;;  %v18399_v47 = vpack.c.bf16 %v12849_v17, %v12848_v49  ;;  %v12881_v60 = vld [vmem:[#allocation2 + $0x1a8] sm:$0xff]  ;;  %v12850_v20 = vld [vmem:[#allocation2 + $0xb0] sm:$0xff]  ;;  %s16861_s21 = sadd.s32 %s17446_s13, %s17445_s12 }
 0x4e6   : > { %v12832_v8 = vld [vmem:[#allocation2 + $0x20] sm:$0xff]  ;;  %v12833_v7 = vld [vmem:[#allocation2 + $0x28] sm:$0xff]  ;;  %v18447_v0 = vpack.c.bf16 %v12881_v60, %v12880_v37  ;;  %v12851_v39 = vld [vmem:[#allocation2 + $0xb8] sm:$0xff]  ;;  %s17447_s17 = sshll.u32 %s16861_s21, 7 }
 0x4e7   : > { %v18402_v14 = vpack.c.bf16 %v12833_v7, %v12832_v8  ;;  %v12864_v46 = vld [vmem:[#allocation2 + $0x120] sm:$0xff]  ;;  %v12865_v41 = vld [vmem:[#allocation2 + $0x128] sm:$0xff]  ;;  %v12883_v5 = vld [vmem:[#allocation2 + $0x1b8] sm:$0xff]  ;;  %v18405_v38 = vpack.c.bf16 %v12851_v39, %v12850_v20  ;;  %s25665_s11 = scalar_lea.hbm %s26612_s9, %s17447_s17 }
 0x4e8   : > { %18374 = vmatpush3.bf16.msra.mxu0 %v18371_v23  ;;  %v18450_v11 = vpack.c.bf16 %v12865_v41, %v12864_v46  ;;  %v12882_v23 = vld [vmem:[#allocation2 + $0x1b0] sm:$0xff]  ;;  %v12835_v54 = vld [vmem:[#allocation2 + $0x38] sm:$0xff]  ;;  %v12852_v25 = vld [vmem:[#allocation2 + $0xc0] sm:$0xff] }
 0x4e9   : > { %18376 = vmatprep.subr.bf16.mxu0 %v18375_v56  ;;  %v12834_v24 = vld [vmem:[#allocation2 + $0x30] sm:$0xff]  ;;  %v12867_v36 = vld [vmem:[#allocation2 + $0x138] sm:$0xff]  ;;  %v12856_v13 = vld [vmem:[#allocation2 + $0xe0] sm:$0xff] }
 0x4ea   : > { %v12887_v29 = vld [vmem:[#allocation2 + $0x1d8] sm:$0xff]  ;;  %v12838_v22 = vld [vmem:[#allocation2 + $0x50] sm:$0xff]  ;;  %v12857_v26 = vld [vmem:[#allocation2 + $0xe8] sm:$0xff] }
 0x4eb   : > { %v12839_v59 = vld [vmem:[#allocation2 + $0x58] sm:$0xff]  ;;  %v12870_v28 = vld [vmem:[#allocation2 + $0x150] sm:$0xff]  ;;  %v18423_v55 = vpack.c.bf16 %v12857_v26, %v12856_v13  ;;  %v12889_v50 = vld [vmem:[#allocation2 + $0x1e8] sm:$0xff]  ;;  %v10657_v26 = vlaneseq }
 0x4ec   : > { %18378 = vmatpush3.bf16.msra.mxu0 %v18375_v56  ;;  %18398 = vmatpush3.bf16.xpose.msk.msra.mxu1 %vm23106_vm2, %v18396_v43  ;;  %v18453_v56 = vpack.c.bf16 %v12883_v5, %v12882_v23  ;;  %v18420_v27 = vpack.c.bf16 %v12839_v59, %v12838_v22  ;;  %v12840_v3 = vld [vmem:[#allocation2 + $0x60] sm:$0xff]  ;;  %v12873_v42 = vld [vmem:[#allocation2 + $0x168] sm:$0xff]  ;;  %v12858_v60 = vld [vmem:[#allocation2 + $0xf0] sm:$0xff] }
 0x4ed   : > { %18380 = vmatprep.subr.bf16.mxu0 %v18379_v32  ;;  %18401 = vmatprep.subr.msk.bf16.mxu1 %vm23106_vm2, %v18399_v47  ;;  %v12872_v43 = vld [vmem:[#allocation2 + $0x160] sm:$0xff]  ;;  %v12859_v8 = vld [vmem:[#allocation2 + $0xf8] sm:$0xff]  ;;  %v12890_v7 = vld [vmem:[#allocation2 + $0x1f0] sm:$0xff] }
 0x4ee   : > { %v12891_v46 = vld [vmem:[#allocation2 + $0x1f8] sm:$0xff]  ;;  %v12842_v41 = vld [vmem:[#allocation2 + $0x70] sm:$0xff] }
 0x4ef   : > { %v12843_v20 = vld [vmem:[#allocation2 + $0x78] sm:$0xff]  ;;  %v12874_v23 = vld [vmem:[#allocation2 + $0x170] sm:$0xff] }
 0x4f0   : > { %18382 = vmatpush3.bf16.msra.mxu0 %v18379_v32  ;;  %v12866_v32 = vld [vmem:[#allocation2 + $0x130] sm:$0xff]  ;;  %v18432_v39 = vpack.c.bf16 %v12843_v20, %v12842_v41  ;;  %v12875_v5 = vld [vmem:[#allocation2 + $0x178] sm:$0xff]  ;;  %v23338_v41 = vld [vmem:[#allocation2 + $0x3a0] sm:$0xff] }
 0x4f1   : > { %18384 = vmatprep.subr.bf16.mxu0 %v18383_v53  ;;  %v23340_v20 = vld [vmem:[#allocation2 + $0x3a8] sm:$0xff] }
 0x4f4   : > { %18386 = vmatpush3.bf16.msra.mxu0 %v18383_v53  ;;  %18404 = vmatpush3.bf16.xpose.msk.msra.mxu1 %vm23106_vm2, %v18402_v14  ;;  %v12853_v53 = vld [vmem:[#allocation2 + $0xc8] sm:$0xff]  ;;  %v18429_v14 = vpack.c.bf16 %v12859_v8, %v12858_v60  ;;  %v23326_v60 = vld [vmem:[#allocation2 + $0x310] sm:$0xff]  ;;  %v23328_v8 = vld [vmem:[#allocation2 + $0x318] sm:$0xff] }
 0x4f5   : > { %18437 = vmatprep.subr.msk.bf16.mxu0 %vm23106_vm2, %v18435_v44  ;;  %18407 = vmatprep.subr.msk.bf16.mxu1 %vm23106_vm2, %v18405_v38  ;;  %v12871_v44 = vld [vmem:[#allocation2 + $0x158] sm:$0xff] }
 0x4f6   : > { %v18468_v21 = vpack.c.bf16 %v12871_v44, %v12870_v28 }
 0x4f7   : > { %18172 = vmatmul.mubr.f32.vlgmr.msra.gmra.mrb[0].mxu0 %v10300_v48  ;;  %v12884_v48 = vld [vmem:[#allocation2 + $0x1c0] sm:$0xff] }
 0x4f8   : > { %18174 = vmatprep.mubr.f32.mxu0 %v10301_v31  ;;  %v12885_v31 = vld [vmem:[#allocation2 + $0x1c8] sm:$0xff] }
 0x4fb   : > { %18175 = vmatmul.mubr.f32.gmra.mrb[2].mxu0 %v10302_v35  ;;  %v18408_v35 = vpack.c.bf16 %v12835_v54, %v12834_v24 }
 0x4fc   : > { %18177 = vmatprep.mubr.f32.mxu0 %v10303_v33  ;;  %v18456_v33 = vpack.c.bf16 %v12867_v36, %v12866_v32 }
 0x4fd   : > { %18440 = vmatpush3.bf16.xpose.msk.msra.mxu0 %vm23106_vm2, %v18438_v16  ;;  %18410 = vmatpush3.bf16.xpose.msk.msra.mxu1 %vm23106_vm2, %v18408_v35  ;;  %v12888_v16 = vld [vmem:[#allocation2 + $0x1e0] sm:$0xff] }
 0x4fe   : > { %18443 = vmatprep.subr.msk.bf16.mxu0 %vm23106_vm2, %v18441_v19  ;;  %v18471_v18 = vpack.c.bf16 %v12889_v50, %v12888_v16  ;;  %v12841_v19 = vld [vmem:[#allocation2 + $0x68] sm:$0xff]  ;;  %v19657_v16 = vmov 1934713408  }
 0x4ff   : > { %18178 = vmatmul.mubr.f32.gmra.mrb[4].mxu0 %v10304_v10  ;;  %v18411_v10 = vpack.c.bf16 %v12853_v53, %v12852_v25  ;;  %v18426_v9 = vpack.c.bf16 %v12841_v19, %v12840_v3  ;;  %v23308_v50 = vld [vmem:[#allocation2 + $0x208] sm:$0xff]  ;;  %v10658_v19 = vshrl.u32 %v10657_v26, 7 }
 0x500   : > { %18180 = vmatprep.mubr.f32.mxu0 %v10305_v34  ;;  %v18459_v34 = vpack.c.bf16 %v12885_v31, %v12884_v48  ;;  %v23384_v26 = vld [vmem:[#allocation2 + $0x348] sm:$0xff] }
 0x501   : > { %18413 = vmatprep.subr.msk.bf16.mxu1 %vm23106_vm2, %v18411_v10  ;;  %26293 = vst [vmem:[#allocation112_spill] sm:$0xff] %v23384_v26 }
 0x503   : > { %18181 = vmatmul.mubr.f32.gmra.mrb[6].mxu0 %v10306_v30  ;;  %v12836_v30 = vld [vmem:[#allocation2 + $0x40] sm:$0xff] }
 0x504   : > { %18183 = vmatprep.mubr.f32.mxu0 %v10307_v1  ;;  %v12837_v1 = vld [vmem:[#allocation2 + $0x48] sm:$0xff] }
 0x505   : > { %18446 = vmatpush3.bf16.xpose.msk.msra.mxu0 %vm23106_vm2, %v18444_v6  ;;  %v18474_v6 = vpack.c.bf16 %v12873_v42, %v12872_v43  ;;  %v23316_v42 = vld [vmem:[#allocation2 + $0x298] sm:$0xff] }
 0x506   : > { %18449 = vmatprep.subr.msk.bf16.mxu0 %vm23106_vm2, %v18447_v0 }
 0x507   : > { %18184 = vmatmul.mubr.f32.gmra.mrb[8].mxu0 %v10308_v62  ;;  %v12868_v62 = vld [vmem:[#allocation2 + $0x140] sm:$0xff] }
 0x508   : > { %18186 = vmatprep.mubr.f32.mxu0 %v10309_v63  ;;  %v12869_v63 = vld [vmem:[#allocation2 + $0x148] sm:$0xff] }
 0x50b   : > { %18187 = vmatmul.mubr.f32.gmra.mrb[10].mxu0 %v10310_v40  ;;  %v18414_v40 = vpack.c.bf16 %v12837_v1, %v12836_v30 }
 0x50c   : > { %18189 = vmatprep.mubr.f32.mxu0 %v10311_v61  ;;  %v18462_v61 = vpack.c.bf16 %v12869_v63, %v12868_v62 }
 0x50d   : > { %18452 = vmatpush3.bf16.xpose.msk.msra.mxu0 %vm23106_vm2, %v18450_v11  ;;  %18416 = vmatpush3.bf16.xpose.msk.msra.mxu1 %vm23106_vm2, %v18414_v40  ;;  %v18477_v11 = vpack.c.bf16 %v12891_v46, %v12890_v7  ;;  %v23330_v7 = vld [vmem:[#allocation2 + $0x2a0] sm:$0xff]  ;;  %v23336_v46 = vld [vmem:[#allocation2 + $0x228] sm:$0xff] }
 0x50e   : > { %18455 = vmatprep.subr.msk.bf16.mxu0 %vm23106_vm2, %v18453_v56  ;;  %v18480_v56 = vpack.c.bf16 %v12875_v5, %v12874_v23  ;;  %v23346_v23 = vld [vmem:[#allocation2 + $0x2b0] sm:$0xff]  ;;  %v23348_v5 = vld [vmem:[#allocation2 + $0x2b8] sm:$0xff] }
 0x50f   : > { %18190 = vmatmul.mubr.f32.gmra.mrb[12].mxu0 %v10312_v2  ;;  %v12854_v2 = vld [vmem:[#allocation2 + $0xd0] sm:$0xff]  ;;  %26283 = vst [vmem:[#allocation102_spill] sm:$0xff] %v23346_v23  ;;  %26284 = vst [vmem:[#allocation103_spill] sm:$0xff] %v23348_v5 }
 0x510   : > { %18192 = vmatprep.mubr.f32.mxu0 %v10313_v51  ;;  %v12855_v51 = vld [vmem:[#allocation2 + $0xd8] sm:$0xff] }
 0x511   : > { %v18417_v52 = vpack.c.bf16 %v12855_v51, %v12854_v2  ;;  %v12909_v2 = vld [vmem:[#allocation2 + $0x288] sm:$0xff] }
 0x513   : > { %18193 = vmatmul.mubr.f32.gmra.mrb[14].mxu0 %v10314_v57  ;;  %v12886_v57 = vld [vmem:[#allocation2 + $0x1d0] sm:$0xff]  ;;  %18419 = vmatprep.subr.msk.bf16.mxu1 %vm23106_vm2, %v18417_v52  ;;  %v12941_v52 = vld [vmem:[#allocation2 + $0x388] sm:$0xff] }
 0x514   : > { %v18465_v12 = vpack.c.bf16 %v12887_v29, %v12886_v57  ;;  %v12940_v57 = vld [vmem:[#allocation2 + $0x380] sm:$0xff] }
 0x515   : > { %18458 = vmatpush3.bf16.xpose.msk.msra.mxu0 %vm23106_vm2, %v18456_v33  ;;  %18422 = vmatpush3.bf16.xpose.msk.msra.mxu1 %vm23106_vm2, %v18420_v27  ;;  %v18531_v29 = vpack.c.bf16 %v12941_v52, %v12940_v57  ;;  %v23396_v52 = vld [vmem:[#allocation2 + $0x2d8] sm:$0xff]  ;;  %v23398_v57 = vld [vmem:[#allocation2 + $0x250] sm:$0xff] }
 0x516   : > { %18461 = vmatprep.subr.msk.bf16.mxu0 %vm23106_vm2, %v18459_v34  ;;  %18425 = vmatprep.subr.msk.bf16.mxu1 %vm23106_vm2, %v18423_v55  ;;  %v23306_v55 = vld [vmem:[#allocation2 + $0x200] sm:$0xff]  ;;  %26294 = vst [vmem:[#allocation113_spill] sm:$0xff] %v23398_v57 }
 0x51d   : > { %18464 = vmatpush3.bf16.xpose.msk.msra.mxu0 %vm23106_vm2, %v18462_v61  ;;  %18428 = vmatpush3.bf16.xpose.msk.msra.mxu1 %vm23106_vm2, %v18426_v9  ;;  %v12908_v61 = vld [vmem:[#allocation2 + $0x280] sm:$0xff]  ;;  %v23314_v9 = vld [vmem:[#allocation2 + $0x290] sm:$0xff] }
 0x51e   : > { %18467 = vmatprep.subr.msk.bf16.mxu0 %vm23106_vm2, %v18465_v12  ;;  %18431 = vmatprep.subr.msk.bf16.mxu1 %vm23106_vm2, %v18429_v14  ;;  %v18483_v51 = vpack.c.bf16 %v12909_v2, %v12908_v61  ;;  %v23334_v14 = vld [vmem:[#allocation2 + $0x220] sm:$0xff] }
 0x525   : > { %18470 = vmatpush3.bf16.xpose.msk.msra.mxu0 %vm23106_vm2, %v18468_v21  ;;  %18434 = vmatpush3.bf16.xpose.msk.msra.mxu1 %vm23106_vm2, %v18432_v39  ;;  %v19656_v21 = vmov 1983009808   ;;  %v23344_v39 = vld [vmem:[#allocation2 + $0x328] sm:$0xff] }
 0x526   : > { %18473 = vmatprep.subr.msk.bf16.mxu0 %vm23106_vm2, %v18471_v18  ;;  %18485 = vmatprep.subr.msk.bf16.mxu1 %vm23106_vm2, %v18483_v51  ;;  %v10655_v13 = vunpack.c.l.s4 %v19656_v21  ;;  %v23312_v18 = vld [vmem:[#allocation2 + $0x308] sm:$0xff]  ;;  %26282 = vst [vmem:[#allocation101_spill] sm:$0xff] %v23344_v39 }
 0x527   : > { %v23380_v21 = vld [vmem:[#allocation2 + $0x3c8] sm:$0xff] }
 0x528   : > { %v10656_v3 = vunpack.c.0.s8 %v10655_v13  ;;  %v23382_v13 = vld [vmem:[#allocation2 + $0x340] sm:$0xff] }
 0x529   : > { %26292 = vst [vmem:[#allocation111_spill] sm:$0xff] %v23382_v13 }
 0x52d   : > { %18476 = vmatpush3.bf16.xpose.msk.msra.mxu0 %vm23106_vm2, %v18474_v6  ;;  %v23318_v6 = vld [vmem:[#allocation2 + $0x210] sm:$0xff] }
 0x52e   : > { %18479 = vmatprep.subr.msk.bf16.mxu0 %vm23106_vm2, %v18477_v11  ;;  %v23342_v11 = vld [vmem:[#allocation2 + $0x320] sm:$0xff] }
 0x52f   : > { %26281 = vst [vmem:[#allocation100_spill] sm:$0xff] %v23342_v11 }
 0x535   : > { %18482 = vmatpush3.bf16.xpose.msk.msra.mxu0 %vm23106_vm2, %v18480_v56  ;;  %v23350_v56 = vld [vmem:[#allocation2 + $0x230] sm:$0xff] }
 0x536   : > { %18533 = vmatprep.subr.msk.bf16.mxu0 %vm23106_vm2, %v18531_v29  ;;  %26285 = vst [vmem:[#allocation104_spill] sm:$0xff] %v23350_v56  ;;  %v23378_v29 = vld [vmem:[#allocation2 + $0x3c0] sm:$0xff]  ;;  %v23438_v56 = vld [vmem:[#allocation2 + $0x268] sm:$0xff] }
 0x537   : > { %26291 = vst [vmem:[#allocation110_spill] sm:$0xff] %v23378_v29  ;;  %26302 = vst [vmem:[#allocation121_spill] sm:$0xff] %v23438_v56 }
 0x5ca   : > { %v18173_v58 = vpop.f32.mrb[0].mxu0 }
 0x5cb   : > { %v23158_v15 = vmul.f32 0.17677669, %v18173_v58  ;;  %v10397_v45 = vpop.f32.mrb[1].mxu0  ;;  %v10687_v58 = vunpack.c.l.s4 %v19657_v16  ;;  %v23436_v16 = vld [vmem:[#allocation2 + $0x260] sm:$0xff] }
 0x5cc   : > { %v23170_v17 = vmul.f32 0.17677669, %v10397_v45  ;;  %v23310_v45 = vld [vmem:[#allocation2 + $0x300] sm:$0xff]  ;;  %26301 = vst [vmem:[#allocation120_spill] sm:$0xff] %v23436_v16 }
 0x5cd   : > { %10558 = vrot.lane.b32.xlu0 %v23158_v15, %s19653_s16  ;;  %10510 = vrot.lane.b32.xlu1 %v23158_v15, %s19654_s3  ;;  %v10688_v43 = vunpack.c.0.s8 %v10687_v58 }
 0x5ce   : > { %v18176_v49 = vpop.f32.mrb[2].mxu0 }
 0x5cf   : > { %v10407_v37 = vpop.f32.mrb[3].mxu0  ;;  %v23182_v38 = vmul.f32 0.17677669, %v18176_v49  ;;  %v23320_v49 = vld [vmem:[#allocation2 + $0x218] sm:$0xff]  ;;  %v23372_v51 = vsub.s32 %v10688_v43, %v10658_v19  ;;  %v23394_v43 = vld [vmem:[#allocation2 + $0x2d0] sm:$0xff] }
 0x5d0   : > { %v23196_v36 = vmul.f32 0.17677669, %v10407_v37  ;;  %v23322_v37 = vld [vmem:[#allocation2 + $0x390] sm:$0xff] }
 0x5d1   : > { %10606 = vrot.lane.b32.xlu1 %v23158_v15, %s19655_s27  ;;  %10508 = vrot.lane.b32.xlu0 %v23170_v17, %s19654_s3 }
 0x5d2   : > { %v18179_v47 = vpop.f32.mrb[4].mxu0 }
 0x5d3   : > { %v10417_v0 = vpop.f32.mrb[5].mxu0  ;;  %v23206_v31 = vmul.f32 0.17677669, %v18179_v47  ;;  %v23324_v47 = vld [vmem:[#allocation2 + $0x398] sm:$0xff] }
 0x5d4   : > { %v23212_v34 = vmul.f32 0.17677669, %v10417_v0  ;;  %v23332_v0 = vld [vmem:[#allocation2 + $0x2a8] sm:$0xff] }
 0x5d5   : > { %10604 = vrot.lane.b32.xlu1 %v23170_v17, %s19655_s27  ;;  %10556 = vrot.lane.b32.xlu0 %v23170_v17, %s19653_s16 }
 0x5d6   : > { %v18182_v24 = vpop.f32.mrb[6].mxu0 }
 0x5d7   : > { %v10427_v54 = vpop.f32.mrb[7].mxu0  ;;  %v23222_v1 = vmul.f32 0.17677669, %v18182_v24  ;;  %v23352_v24 = vld [vmem:[#allocation2 + $0x238] sm:$0xff] }
 0x5d8   : > { %v23228_v62 = vmul.f32 0.17677669, %v10427_v54  ;;  %26286 = vst [vmem:[#allocation105_spill] sm:$0xff] %v23352_v24  ;;  %v23354_v54 = vld [vmem:[#allocation2 + $0x3b0] sm:$0xff]  ;;  %v23440_v24 = vld [vmem:[#allocation2 + $0x3e0] sm:$0xff] }
 0x5d9   : > { %10562 = vrot.lane.b32.xlu0 %v23182_v38, %s19653_s16  ;;  %10514 = vrot.lane.b32.xlu1 %v23182_v38, %s19654_s3  ;;  %26303 = vst [vmem:[#allocation122_spill] sm:$0xff] %v23440_v24 }
 0x5da   : > { %v18185_v32 = vpop.f32.mrb[8].mxu0 }
 0x5db   : > { %v10437_v25 = vpop.f32.mrb[9].mxu0  ;;  %v23238_v63 = vmul.f32 0.17677669, %v18185_v32  ;;  %v23356_v32 = vld [vmem:[#allocation2 + $0x3b8] sm:$0xff] }
 0x5dc   : > { %v23244_v40 = vmul.f32 0.17677669, %v10437_v25  ;;  %v23358_v25 = vld [vmem:[#allocation2 + $0x330] sm:$0xff] }
 0x5dd   : > { %10610 = vrot.lane.b32.xlu1 %v23182_v38, %s19655_s27  ;;  %10512 = vrot.lane.b32.xlu0 %v23196_v36, %s19654_s3  ;;  %26273 = vst [vmem:[#allocation92_spill] sm:$0xff] %v23238_v63  ;;  %26287 = vst [vmem:[#allocation106_spill] sm:$0xff] %v23358_v25  ;;  %v23446_v25 = vld [vmem:[#allocation2 + $0x3e8] sm:$0xff] }
 0x5de   : > { %v18188_v53 = vpop.f32.mrb[10].mxu0  ;;  %26274 = vst [vmem:[#allocation93_spill] sm:$0xff] %v23244_v40  ;;  %26304 = vst [vmem:[#allocation123_spill] sm:$0xff] %v23446_v25 }
 0x5df   : > { %v10447_v48 = vpop.f32.mrb[11].mxu0  ;;  %v23256_v22 = vmul.f32 0.17677669, %v18188_v53  ;;  %v23360_v53 = vld [vmem:[#allocation2 + $0x338] sm:$0xff] }
 0x5e0   : > { %v23264_v59 = vmul.f32 0.17677669, %v10447_v48  ;;  %26288 = vst [vmem:[#allocation107_spill] sm:$0xff] %v23360_v53  ;;  %v23362_v48 = vld [vmem:[#allocation2 + $0x2c0] sm:$0xff]  ;;  %v23450_v53 = vld [vmem:[#allocation2 + $0x368] sm:$0xff] }
 0x5e1   : > { %10560 = vrot.lane.b32.xlu1 %v23196_v36, %s19653_s16  ;;  %10608 = vrot.lane.b32.xlu0 %v23196_v36, %s19655_s27  ;;  %26275 = vst [vmem:[#allocation94_spill] sm:$0xff] %v23256_v22  ;;  %26306 = vst [vmem:[#allocation125_spill] sm:$0xff] %v23450_v53 }
 0x5e2   : > { %v18191_v35 = vpop.f32.mrb[12].mxu0  ;;  %26276 = vst [vmem:[#allocation95_spill] sm:$0xff] %v23264_v59 }
 0x5e3   : > { %v10457_v33 = vpop.f32.mrb[13].mxu0  ;;  %v23274_v12 = vmul.f32 0.17677669, %v18191_v35  ;;  %v23364_v35 = vld [vmem:[#allocation2 + $0x2c8] sm:$0xff] }
 0x5e4   : > { %v23280_v27 = vmul.f32 0.17677669, %v10457_v33  ;;  %v23366_v33 = vld [vmem:[#allocation2 + $0x240] sm:$0xff] }
 0x5e5   : > { %10566 = vrot.lane.b32.xlu0 %v23206_v31, %s19653_s16  ;;  %10518 = vrot.lane.b32.xlu1 %v23206_v31, %s19654_s3  ;;  %26277 = vst [vmem:[#allocation96_spill] sm:$0xff] %v23274_v12  ;;  %26289 = vst [vmem:[#allocation108_spill] sm:$0xff] %v23366_v33 }
 0x5e6   : > { %v18194_v10 = vpop.f32.mrb[14].mxu0  ;;  %26278 = vst [vmem:[#allocation97_spill] sm:$0xff] %v23280_v27 }
 0x5e7   : > { %v10467_v30 = vpop.f32.mrb[15].mxu0  ;;  %v23286_v28 = vmul.f32 0.17677669, %v18194_v10  ;;  %v23368_v10 = vld [vmem:[#allocation2 + $0x248] sm:$0xff] }
 0x5e8   : > { %v23292_v44 = vmul.f32 0.17677669, %v10467_v30  ;;  %26290 = vst [vmem:[#allocation109_spill] sm:$0xff] %v23368_v10  ;;  %v23370_v30 = vsub.s32 %v10656_v3, %v10658_v19  ;;  %v23422_v3 = vld [vmem:[#allocation2 + $0x358] sm:$0xff]  ;;  %v23426_v19 = vld [vmem:[#allocation2 + $0x2e8] sm:$0xff] }
 0x5e9   : > { %10614 = vrot.lane.b32.xlu1 %v23206_v31, %s19655_s27  ;;  %10516 = vrot.lane.b32.xlu0 %v23212_v34, %s19654_s3  ;;  %26279 = vst [vmem:[#allocation98_spill] sm:$0xff] %v23286_v28  ;;  %26298 = vst [vmem:[#allocation117_spill] sm:$0xff] %v23422_v3 }
 0x5ea   : > { %26280 = vst [vmem:[#allocation99_spill] sm:$0xff] %v23292_v44  ;;  %26300 = vst [vmem:[#allocation119_spill] sm:$0xff] %v23426_v19 }
 0x5ed   : > { %10564 = vrot.lane.b32.xlu1 %v23212_v34, %s19653_s16  ;;  %10612 = vrot.lane.b32.xlu0 %v23212_v34, %s19655_s27 }
 0x5f1   : > { %10570 = vrot.lane.b32.xlu0 %v23222_v1, %s19653_s16  ;;  %10522 = vrot.lane.b32.xlu1 %v23222_v1, %s19654_s3 }
 0x5f5   : > { %10618 = vrot.lane.b32.xlu1 %v23222_v1, %s19655_s27  ;;  %10520 = vrot.lane.b32.xlu0 %v23228_v62, %s19654_s3 }
 0x5f9   : > { %10568 = vrot.lane.b32.xlu1 %v23228_v62, %s19653_s16  ;;  %10616 = vrot.lane.b32.xlu0 %v23228_v62, %s19655_s27 }
 0x5fd   : > { %10574 = vrot.lane.b32.xlu0 %v23238_v63, %s19653_s16  ;;  %10526 = vrot.lane.b32.xlu1 %v23238_v63, %s19654_s3 }
 0x601   : > { %10622 = vrot.lane.b32.xlu1 %v23238_v63, %s19655_s27  ;;  %10524 = vrot.lane.b32.xlu0 %v23244_v40, %s19654_s3 }
 0x605   : > { %10572 = vrot.lane.b32.xlu1 %v23244_v40, %s19653_s16  ;;  %10620 = vrot.lane.b32.xlu0 %v23244_v40, %s19655_s27  ;;  %v23424_v40 = vld [vmem:[#allocation2 + $0x2e0] sm:$0xff] }
 0x606   : > { %26299 = vst [vmem:[#allocation118_spill] sm:$0xff] %v23424_v40 }
 0x609   : > { %10578 = vrot.lane.b32.xlu0 %v23256_v22, %s19653_s16  ;;  %10530 = vrot.lane.b32.xlu1 %v23256_v22, %s19654_s3 }
 0x60d   : > { %10626 = vrot.lane.b32.xlu1 %v23256_v22, %s19655_s27  ;;  %10528 = vrot.lane.b32.xlu0 %v23264_v59, %s19654_s3 }
 0x611   : > { %10576 = vrot.lane.b32.xlu1 %v23264_v59, %s19653_s16  ;;  %10624 = vrot.lane.b32.xlu0 %v23264_v59, %s19655_s27 }
 0x615   : > { %10582 = vrot.lane.b32.xlu0 %v23274_v12, %s19653_s16  ;;  %10534 = vrot.lane.b32.xlu1 %v23274_v12, %s19654_s3 }
 0x619   : > { %10630 = vrot.lane.b32.xlu1 %v23274_v12, %s19655_s27  ;;  %10532 = vrot.lane.b32.xlu0 %v23280_v27, %s19654_s3  ;;  %v23414_v12 = vld [vmem:[#allocation2 + $0x350] sm:$0xff] }
 0x61a   : > { %26297 = vst [vmem:[#allocation116_spill] sm:$0xff] %v23414_v12 }
 0x61d   : > { %10580 = vrot.lane.b32.xlu1 %v23280_v27, %s19653_s16  ;;  %10628 = vrot.lane.b32.xlu0 %v23280_v27, %s19655_s27  ;;  %v23412_v27 = vld [vmem:[#allocation2 + $0x3d8] sm:$0xff] }
 0x621   : > { %10538 = vrot.lane.b32.xlu1 %v23286_v28, %s19654_s3  ;;  %10536 = vrot.lane.b32.xlu0 %v23292_v44, %s19654_s3  ;;  %s19502_s3 = scalar_lea.vmem %s25660_s4, 2048 }
 0x622   : > { %p19503_p12 = scmp.ne.s32.totalorder %s25660_s4, %s19502_s3 }
 0x624   : > { %p19504_p7 = pnand %p19503_p12, %p19874_p8 }
 0x625   : > { %10584 = vrot.lane.b32.xlu1 %v23292_v44, %s19653_s16  ;;  %10632 = vrot.lane.b32.xlu0 %v23292_v44, %s19655_s27  ;;  %v23410_v44 = vld [vmem:[#allocation2 + $0x3d0] sm:$0xff] }
 0x626   : > { %26296 = vst [vmem:[#allocation115_spill] sm:$0xff] %v23410_v44  ;;  %p19505_p1 = pneg %p19504_p7 }
 0x629   : > { %10634 = vrot.lane.b32.xlu1 %v23286_v28, %s19655_s27  ;;  %10586 = vrot.lane.b32.xlu0 %v23286_v28, %s19653_s16  ;;  %v23400_v28 = vld [vmem:[#allocation2 + $0x258] sm:$0xff]  ;;  %s16849_s16 = scalar_lea.sflag [#allocation6], %s20007_s14  ;;  %s19658_s27 = smov [#allocation13]  }
 0x62a   : > { %26295 = vst [vmem:[#allocation114_spill] sm:$0xff] %v23400_v28  ;;  %s19506_s24 = sshll.u32 %s19658_s27, 4  ;;  %s19507_s24 = int_to_ptr.vmem [resolvable:$false] %s19506_s24 }
 0x62b   : > { %s19508_s19 = scalar_lea.vmem %s19507_s24, 4096  ;;  %p19509_p4 = scmp.lt.s32.totalorder %s25660_s4, %s19507_s24 }
 0x62c   : > { %p19510_p6 = scmp.lt.s32.totalorder %s19508_s19, %s19502_s3 }
 0x62e   : > { %p19511_p2 = por %p19510_p6, %p19509_p4 }
 0x630   : > { %p19512_p11 = pnand %p19511_p2, %p19505_p1 }
 0x63f   : > { %v10559_v61 = vpop.permute.xlu0 %10558  ;;  %v10511_v2 = vpop.permute.xlu1 %10510 }
 0x640   : > { %v10720_v59 = vcombine.low %v23158_v15, %v10559_v61  ;;  %v10721_v22 = vcombine.high %v23158_v15, %v10559_v61  ;;  %v23448_v61 = vld [vmem:[#allocation2 + $0x360] sm:$0xff] }
 0x641   : > { %26305 = vst [vmem:[#allocation124_spill] sm:$0xff] %v23448_v61 }
 0x642   : > { %v10728_v15 = vrot.slane %v10720_v59, %v23370_v30  ;;  %v10735_v63 = vrot.slane %v10721_v22, %v23370_v30 }
 0x643   : > { %v10607_v11 = vpop.permute.xlu1 %10606  ;;  %v10509_v39 = vpop.permute.xlu0 %10508 }
 0x644   : > { %v10736_v23 = vcombine.low %v10511_v2, %v10607_v11  ;;  %v10737_v5 = vcombine.high %v10511_v2, %v10607_v11 }
 0x646   : > { %v10744_v13 = vrot.slane %v10736_v23, %v23370_v30  ;;  %v10751_v26 = vrot.slane %v10737_v5, %v23370_v30 }
 0x647   : > { %v10605_v10 = vpop.permute.xlu1 %10604  ;;  %v10557_v29 = vpop.permute.xlu0 %10556 }
 0x648   : > { %v10752_v2 = vcombine.low %v10728_v15, %v10744_v13  ;;  %v10753_v22 = vcombine.high %v10728_v15, %v10744_v13  ;;  %v10768_v12 = vcombine.low %v10735_v63, %v10751_v26  ;;  %v10769_v23 = vcombine.high %v10735_v63, %v10751_v26 }
 0x649   : > { %v10668_v3 = vcombine.low %v10509_v39, %v10605_v10  ;;  %v10669_v5 = vcombine.high %v10509_v39, %v10605_v10  ;;  %v10652_v57 = vcombine.low %v23170_v17, %v10557_v29  ;;  %v10653_v28 = vcombine.high %v23170_v17, %v10557_v29 }
 0x64a   : > { %v10760_v58 = vrot.slane %v10752_v2, %v23372_v51  ;;  %v10767_v33 = vrot.slane %v10753_v22, %v23372_v51  ;;  %v10776_v16 = vrot.slane %v10768_v12, %v23372_v51  ;;  %v10783_v11 = vrot.slane %v10769_v23, %v23372_v51 }
 0x64b   : > { %v10676_v59 = vrot.slane %v10668_v3, %v23370_v30  ;;  %v10683_v13 = vrot.slane %v10669_v5, %v23370_v30  ;;  %v10660_v63 = vrot.slane %v10652_v57, %v23370_v30  ;;  %v10667_v39 = vrot.slane %v10653_v28, %v23370_v30  ;;  %v10563_v10 = vpop.permute.xlu0 %10562  ;;  %v10515_v26 = vpop.permute.xlu1 %10514 }
 0x64c   : > { %v11808_v15 = vcombine.low %v10760_v58, %v10767_v33  ;;  %v17157_v17 = vcombine.high %v10760_v58, %v10767_v33  ;;  %v11824_v29 = vcombine.low %v10776_v16, %v10783_v11  ;;  %v17158_v2 = vcombine.high %v10776_v16, %v10783_v11 }
 0x64d   : > { %v10684_v61 = vcombine.low %v10660_v63, %v10676_v59  ;;  %v10685_v22 = vcombine.high %v10660_v63, %v10676_v59  ;;  %v10700_v53 = vcombine.low %v10667_v39, %v10683_v13  ;;  %v10701_v12 = vcombine.high %v10667_v39, %v10683_v13 }
 0x64e   : > { %v10856_v23 = vcombine.low %v23182_v38, %v10563_v10  ;;  %v10857_v3 = vcombine.high %v23182_v38, %v10563_v10  ;;  %v23485_v5 = vrot.slane %v11808_v15, %v23370_v30  ;;  %v23488_v57 = vrot.slane %v17157_v17, %v23370_v30 }
 0x64f   : > { %v10692_v28 = vrot.slane %v10684_v61, %v23372_v51  ;;  %v10699_v33 = vrot.slane %v10685_v22, %v23372_v51  ;;  %v10708_v16 = vrot.slane %v10700_v53, %v23372_v51  ;;  %v10715_v58 = vrot.slane %v10701_v12, %v23372_v51  ;;  %v10611_v11 = vpop.permute.xlu1 %10610  ;;  %v10513_v59 = vpop.permute.xlu0 %10512 }
 0x650   : > { %26307 = vst [vmem:[#allocation126_spill] sm:$0xff] %v23485_v5  ;;  %26308 = vst [vmem:[#allocation127_spill] sm:$0xff] %v23488_v57  ;;  %v10864_v13 = vrot.slane %v10856_v23, %v23370_v30  ;;  %v10871_v38 = vrot.slane %v10857_v3, %v23370_v30  ;;  %v10872_v63 = vcombine.low %v10515_v26, %v10611_v11 }
 0x651   : > { %v10873_v39 = vcombine.high %v10515_v26, %v10611_v11  ;;  %v11740_v10 = vcombine.low %v10692_v28, %v10699_v33  ;;  %v17155_v15 = vcombine.high %v10692_v28, %v10699_v33  ;;  %v11756_v17 = vcombine.low %v10708_v16, %v10715_v58 }
 0x652   : > { %v17156_v56 = vcombine.high %v10708_v16, %v10715_v58  ;;  %v10880_v61 = vrot.slane %v10872_v63, %v23370_v30  ;;  %v23499_v53 = vrot.slane %v11824_v29, %v23370_v30  ;;  %v23502_v12 = vrot.slane %v17158_v2, %v23370_v30 }
 0x653   : > { %v10887_v22 = vrot.slane %v10873_v39, %v23370_v30  ;;  %v10561_v24 = vpop.permute.xlu1 %10560  ;;  %v10609_v23 = vpop.permute.xlu0 %10608  ;;  %v23505_v3 = vrot.slane %v11740_v10, %v23370_v30  ;;  %v23508_v26 = vrot.slane %v17155_v15, %v23370_v30  ;;  %v23511_v28 = vrot.slane %v11756_v17, %v23370_v30 }
 0x654   : > { %26309 = vst [vmem:[#allocation128_spill] sm:$0xff] %v23499_v53  ;;  %26310 = vst [vmem:[#allocation129_spill] sm:$0xff] %v23502_v12  ;;  %v23514_v33 = vrot.slane %v17156_v56, %v23370_v30  ;;  %v10888_v16 = vcombine.low %v10864_v13, %v10880_v61  ;;  %v10889_v29 = vcombine.high %v10864_v13, %v10880_v61 }
 0x655   : > { %26311 = vst [vmem:[#allocation130_spill] sm:$0xff] %v23505_v3  ;;  %26312 = vst [vmem:[#allocation131_spill] sm:$0xff] %v23508_v26  ;;  %v10904_v58 = vcombine.low %v10871_v38, %v10887_v22  ;;  %v10905_v11 = vcombine.high %v10871_v38, %v10887_v22  ;;  %v10788_v2 = vcombine.low %v23196_v36, %v10561_v24 }
 0x656   : > { %v10789_v63 = vcombine.high %v23196_v36, %v10561_v24  ;;  %v10804_v39 = vcombine.low %v10513_v59, %v10609_v23  ;;  %v10805_v10 = vcombine.high %v10513_v59, %v10609_v23  ;;  %v23519_v25 = vrot.slane %v10888_v16, %v23372_v51 }
 0x657   : > { %v23522_v15 = vrot.slane %v10889_v29, %v23372_v51  ;;  %v23525_v17 = vrot.slane %v10904_v58, %v23372_v51  ;;  %v23528_v56 = vrot.slane %v10905_v11, %v23372_v51  ;;  %v10796_v13 = vrot.slane %v10788_v2, %v23370_v30  ;;  %v10567_v59 = vpop.permute.xlu0 %10566  ;;  %v10519_v61 = vpop.permute.xlu1 %10518 }
 0x658   : > { %v10803_v38 = vrot.slane %v10789_v63, %v23370_v30  ;;  %v10812_v36 = vrot.slane %v10804_v39, %v23370_v30  ;;  %v10819_v24 = vrot.slane %v10805_v10, %v23370_v30  ;;  %v10992_v39 = vcombine.low %v23206_v31, %v10567_v59 }
 0x659   : > { %v10993_v10 = vcombine.high %v23206_v31, %v10567_v59  ;;  %v11772_v22 = vcombine.low %v23505_v3, %v23508_v26  ;;  %v11788_v23 = vcombine.low %v23511_v28, %v23514_v33  ;;  %v11856_v19 = vcombine.low %v23499_v53, %v23502_v12 }
 0x65a   : > { %v10820_v58 = vcombine.low %v10796_v13, %v10812_v36  ;;  %v10821_v11 = vcombine.high %v10796_v13, %v10812_v36  ;;  %v10836_v2 = vcombine.low %v10803_v38, %v10819_v24  ;;  %v10837_v63 = vcombine.high %v10803_v38, %v10819_v24 }
 0x65b   : > { %v10615_v38 = vpop.permute.xlu1 %10614  ;;  %v10517_v36 = vpop.permute.xlu0 %10516  ;;  %v11000_v31 = vrot.slane %v10992_v39, %v23370_v30  ;;  %v11007_v24 = vrot.slane %v10993_v10, %v23370_v30  ;;  %v11780_v59 = vrot.slane %v11772_v22, %v23372_v51  ;;  %v11796_v39 = vrot.slane %v11788_v23, %v23372_v51 }
 0x65c   : > { %v10828_v40 = vrot.slane %v10820_v58, %v23372_v51  ;;  %v10835_v16 = vrot.slane %v10821_v11, %v23372_v51  ;;  %v23551_v29 = vrot.slane %v10836_v2, %v23372_v51  ;;  %v23554_v13 = vrot.slane %v10837_v63, %v23372_v51 }
 0x65d   : > { %v11008_v3 = vcombine.low %v10519_v61, %v10615_v38  ;;  %v11009_v10 = vcombine.high %v10519_v61, %v10615_v38  ;;  %v11840_v22 = vcombine.low %v23485_v5, %v23488_v57  ;;  %v11805_v63 = vcombine.high %v11780_v59, %v11796_v39 }
 0x65e   : > { %v11876_v58 = vcombine.low %v10828_v40, %v10835_v16  ;;  %v17159_v26 = vcombine.high %v10828_v40, %v10835_v16  ;;  %v11892_v11 = vcombine.low %v23551_v29, %v23554_v13  ;;  %v17160_v2 = vcombine.high %v23551_v29, %v23554_v13 }
 0x65f   : > { %v10565_v40 = vpop.permute.xlu1 %10564  ;;  %v10613_v16 = vpop.permute.xlu0 %10612  ;;  %v11804_v13 = vcombine.low %v11780_v59, %v11796_v39  ;;  %v11016_v23 = vrot.slane %v11008_v3, %v23370_v30  ;;  %v11023_v61 = vrot.slane %v11009_v10, %v23370_v30  ;;  %v11848_v38 = vrot.slane %v11840_v22, %v23372_v51  ;;  %17579 = vmatprep.mubr.msk.f32.mxu0 %vm12956_vm1, %v11805_v63 }
 0x660   : > { %v23573_v44 = vrot.slane %v11876_v58, %v23370_v30  ;;  %v23576_v29 = vrot.slane %v17159_v26, %v23370_v30  ;;  %v11864_v5 = vrot.slane %v11856_v19, %v23372_v51  ;;  %v10924_v53 = vcombine.low %v23212_v34, %v10565_v40  ;;  %17580 = vmatmul.mubr.msk.f32.vlgmr.msra.gmra.mrb[16].mxu0 %vm12956_vm1, %v11805_v63 }
 0x661   : > { %v10925_v12 = vcombine.high %v23212_v34, %v10565_v40  ;;  %17515 = vmatprep.mubr.msk.f32.mxu1 %vm12956_vm1, %v11804_v13  ;;  %v11024_v26 = vcombine.low %v11000_v31, %v11016_v23  ;;  %v11025_v58 = vcombine.high %v11000_v31, %v11016_v23  ;;  %v11040_v57 = vcombine.low %v11007_v24, %v11023_v61 }
 0x662   : > { %17516 = vmatmul.mubr.msk.f32.vlgmr.msra.gmra.mrb[0].mxu1 %vm12956_vm1, %v11804_v13  ;;  %v11041_v3 = vcombine.high %v11007_v24, %v11023_v61  ;;  %v11872_v59 = vcombine.low %v11848_v38, %v11864_v5  ;;  %v11873_v39 = vcombine.high %v11848_v38, %v11864_v5  ;;  %v10932_v31 = vrot.slane %v10924_v53, %v23370_v30 }
 0x663   : > { %v10571_v10 = vpop.permute.xlu0 %10570  ;;  %v10523_v19 = vpop.permute.xlu1 %10522  ;;  %v23589_v22 = vrot.slane %v11024_v26, %v23372_v51  ;;  %v23592_v34 = vrot.slane %v11025_v58, %v23372_v51  ;;  %v23595_v40 = vrot.slane %v11040_v57, %v23372_v51  ;;  %v26313_v13 = vpack.c.bf16 %v23308_v50, %v23306_v55 }
 0x664   : > { %v23604_v5 = vrot.slane %v11041_v3, %v23372_v51  ;;  %17517 = vmatprep.mubr.msk.f32.mxu1 %vm12956_vm1, %v11872_v59  ;;  %17581 = vmatprep.mubr.msk.f32.mxu0 %vm12956_vm1, %v11873_v39  ;;  %v10939_v24 = vrot.slane %v10925_v12, %v23370_v30  ;;  %v10940_v63 = vcombine.low %v10517_v36, %v10613_v16 }
 0x665   : > { %18488 = vmatpush3.bf16.xpose.msk.msra.mxu1 %vm23106_vm2, %v26313_v13  ;;  %v12080_v57 = vcombine.low %v23589_v22, %v23592_v34  ;;  %v17165_v53 = vcombine.high %v23589_v22, %v23592_v34  ;;  %v10941_v55 = vcombine.high %v10517_v36, %v10613_v16  ;;  %v11128_v50 = vcombine.low %v23222_v1, %v10571_v10 }
 0x666   : > { %v26314_v23 = vpack.c.bf16 %v23312_v18, %v23310_v45  ;;  %v12096_v61 = vcombine.low %v23595_v40, %v23604_v5  ;;  %v17166_v12 = vcombine.high %v23595_v40, %v23604_v5  ;;  %17518 = vmatmul.mubr.msk.f32.gmra.mrb[2].mxu1 %vm12956_vm1, %v11872_v59  ;;  %17582 = vmatmul.mubr.msk.f32.gmra.mrb[18].mxu0 %vm12956_vm1, %v11873_v39 }
 0x667   : > { %v10948_v36 = vrot.slane %v10940_v63, %v23370_v30  ;;  %v10619_v16 = vpop.permute.xlu1 %10618  ;;  %v23626_v38 = vpop.permute.xlu0 %10520  ;;  %v10955_v45 = vrot.slane %v10941_v55, %v23370_v30  ;;  %v11129_v18 = vcombine.high %v23222_v1, %v10571_v10  ;;  %v11136_v26 = vrot.slane %v11128_v50, %v23370_v30 }
 0x668   : > { %18536 = vmatpush3.bf16.xpose.msk.msra.mxu0 %vm23106_vm2, %v26314_v23  ;;  %v23632_v58 = vrot.slane %v11892_v11, %v23370_v30  ;;  %v26315_v3 = vpack.c.bf16 %v23316_v42, %v23314_v9  ;;  %v23640_v13 = vrot.slane %v17160_v2, %v23370_v30  ;;  %v11908_v63 = vcombine.low %v23573_v44, %v23576_v29 }
 0x669   : > { %v10956_v59 = vcombine.low %v10932_v31, %v10948_v36  ;;  %v10957_v39 = vcombine.high %v10932_v31, %v10948_v36  ;;  %v26316_v1 = vpack.c.bf16 %v23324_v47, %v23322_v37  ;;  %v10972_v11 = vcombine.low %v10939_v24, %v10955_v45 }
 0x66a   : > { %18491 = vmatprep.subr.msk.bf16.mxu1 %vm23106_vm2, %v26315_v3  ;;  %v10973_v10 = vcombine.high %v10939_v24, %v10955_v45  ;;  %v11143_v9 = vrot.slane %v11129_v18, %v23370_v30  ;;  %v11144_v42 = vcombine.low %v10523_v19, %v10619_v16  ;;  %v11916_v2 = vrot.slane %v11908_v63, %v23372_v51 }
 0x66b   : > { %18539 = vmatprep.subr.msk.bf16.mxu0 %vm23106_vm2, %v26316_v1  ;;  %v10964_v55 = vrot.slane %v10956_v59, %v23372_v51  ;;  %v10971_v31 = vrot.slane %v10957_v39, %v23372_v51  ;;  %v11924_v50 = vcombine.low %v23632_v58, %v23640_v13  ;;  %v10569_v23 = vpop.permute.xlu1 %10568  ;;  %v10617_v36 = vpop.permute.xlu0 %10616  ;;  %v23656_v37 = vrot.slane %v10972_v11, %v23372_v51 }
 0x66c   : > { %v23659_v47 = vrot.slane %v10973_v10, %v23372_v51  ;;  %v11145_v24 = vcombine.high %v10523_v19, %v10619_v16  ;;  %v11152_v45 = vrot.slane %v11144_v42, %v23370_v30  ;;  %v26317_v18 = vpack.c.bf16 %v23320_v49, %v23318_v6 }
 0x66d   : > { %v12012_v3 = vcombine.low %v10964_v55, %v10971_v31  ;;  %v17163_v59 = vcombine.high %v10964_v55, %v10971_v31  ;;  %v11932_v39 = vrot.slane %v11924_v50, %v23372_v51  ;;  %v26318_v63 = vcombine.low %v23519_v25, %v23522_v15 }
 0x66e   : > { %18494 = vmatpush3.bf16.xpose.msk.msra.mxu1 %vm23106_vm2, %v26317_v18  ;;  %v26319_v19 = vpack.c.bf16 %v23332_v0, %v23330_v7  ;;  %v12028_v6 = vcombine.low %v23656_v37, %v23659_v47  ;;  %v17164_v49 = vcombine.high %v23656_v37, %v23659_v47  ;;  %v11159_v16 = vrot.slane %v11145_v24, %v23370_v30 }
 0x66f   : > { %v23672_v1 = vrot.slane %v26318_v63, %v23370_v30  ;;  %v11160_v11 = vcombine.low %v11136_v26, %v11152_v45  ;;  %v26320_v10 = vpack.c.bf16 %v23328_v8, %v23326_v60  ;;  %v11940_v42 = vcombine.low %v11916_v2, %v11932_v39  ;;  %v10575_v50 = vpop.permute.xlu0 %10574  ;;  %v23695_v37 = vpop.permute.xlu1 %10526 }
 0x670   : > { %18497 = vmatprep.subr.msk.bf16.mxu1 %vm23106_vm2, %v26319_v19  ;;  %v11941_v7 = vcombine.high %v11916_v2, %v11932_v39  ;;  %v11161_v0 = vcombine.high %v11136_v26, %v11152_v45  ;;  %v26321_v55 = vcombine.high %v23519_v25, %v23522_v15  ;;  %v26322_v47 = vpack.c.bf16 %v23340_v20, %v23338_v41 }
 0x671   : > { %18542 = vmatpush3.bf16.xpose.msk.msra.mxu0 %vm23106_vm2, %v26320_v10  ;;  %v23703_v60 = vrot.slane %v11160_v11, %v23372_v51  ;;  %v11176_v8 = vcombine.low %v11143_v9, %v11159_v16  ;;  %v11177_v26 = vcombine.high %v11143_v9, %v11159_v16  ;;  %v26323_v25 = vcombine.low %v23525_v17, %v23528_v56 }
 0x672   : > { %v23693_v31 = vrot.slane %v26321_v55, %v23370_v30  ;;  %18545 = vmatprep.subr.msk.bf16.mxu0 %vm23106_vm2, %v26322_v47  ;;  %17519 = vmatprep.mubr.msk.f32.mxu1 %vm12956_vm1, %v11940_v42  ;;  %v23714_v41 = vrot.slane %v11161_v0, %v23372_v51  ;;  %v26324_v20 = vcombine.high %v23525_v17, %v23528_v56 }
 0x673   : > { %v23709_v15 = vrot.slane %v26323_v25, %v23370_v30  ;;  %17583 = vmatprep.mubr.msk.f32.mxu0 %vm12956_vm1, %v11941_v7  ;;  %17520 = vmatmul.mubr.msk.f32.gmra.mrb[4].mxu1 %vm12956_vm1, %v11940_v42  ;;  %v23727_v24 = vrot.slane %v11176_v8, %v23372_v51  ;;  %v23730_v45 = vrot.slane %v11177_v26, %v23372_v51  ;;  %v10623_v19 = vpop.permute.xlu1 %10622  ;;  %v23740_v16 = vpop.permute.xlu0 %10524  ;;  %v26326_v26 = vld [vmem:[#allocation92_spill] sm:$0xff] }
 0x674   : > { %v23720_v2 = vrot.slane %v26324_v20, %v23370_v30  ;;  %v11976_v9 = vcombine.low %v23672_v1, %v23693_v31  ;;  %17584 = vmatmul.mubr.msk.f32.gmra.mrb[20].mxu0 %vm12956_vm1, %v11941_v7  ;;  %v11060_v18 = vcombine.low %v23228_v62, %v10569_v23  ;;  %v12216_v17 = vcombine.low %v23703_v60, %v23714_v41  ;;  %v26327_v20 = vld [vmem:[#allocation103_spill] sm:$0xff] }
 0x675   : > { %v17169_v56 = vcombine.high %v23703_v60, %v23714_v41  ;;  %v12232_v11 = vcombine.low %v23727_v24, %v23730_v45  ;;  %v11061_v42 = vcombine.high %v23228_v62, %v10569_v23  ;;  %v26325_v0 = vpack.c.bf16 %v23336_v46, %v23334_v14 }
 0x676   : > { %v11984_v39 = vrot.slane %v11976_v9, %v23372_v51  ;;  %v11992_v63 = vcombine.low %v23709_v15, %v23720_v2  ;;  %v11068_v7 = vrot.slane %v11060_v18, %v23370_v30  ;;  %v11076_v47 = vcombine.low %v23626_v38, %v10617_v36  ;;  %v26328_v9 = vld [vmem:[#allocation102_spill] sm:$0xff]  ;;  %v26330_v18 = vld [vmem:[#allocation101_spill] sm:$0xff] }
 0x677   : > { %18500 = vmatpush3.bf16.xpose.msk.msra.mxu1 %vm23106_vm2, %v26325_v0  ;;  %v11077_v8 = vcombine.high %v23626_v38, %v10617_v36  ;;  %v11264_v25 = vcombine.low %v26326_v26, %v10575_v50  ;;  %v26329_v10 = vpack.c.bf16 %v26327_v20, %v26328_v9  ;;  %v11075_v62 = vrot.slane %v11061_v42, %v23370_v30  ;;  %v26331_v38 = vld [vmem:[#allocation100_spill] sm:$0xff]  ;;  %v23777_v20 = vpop.permute.xlu1 %10572 }
 0x678   : > { %v12000_v55 = vrot.slane %v11992_v63, %v23372_v51  ;;  %v11265_v14 = vcombine.high %v26326_v26, %v10575_v50  ;;  %v23765_v46 = vrot.slane %v12012_v3, %v23370_v30  ;;  %v23768_v23 = vrot.slane %v17163_v59, %v23370_v30 }
 0x679   : > { %18503 = vmatprep.subr.msk.bf16.mxu1 %vm23106_vm2, %v26329_v10  ;;  %v26332_v36 = vpack.c.bf16 %v26330_v18, %v26331_v38  ;;  %v11084_v10 = vrot.slane %v11076_v47, %v23370_v30  ;;  %v11091_v42 = vrot.slane %v11077_v8, %v23370_v30  ;;  %v26333_v3 = vpack.c.bf16 %v23356_v32, %v23354_v54  ;;  %v23794_v32 = vpop.permute.xlu0 %10620 }
 0x67a   : > { %v12008_v63 = vcombine.low %v11984_v39, %v12000_v55  ;;  %v12009_v0 = vcombine.high %v11984_v39, %v12000_v55  ;;  %v11272_v59 = vrot.slane %v11264_v25, %v23370_v30  ;;  %v11279_v50 = vrot.slane %v11265_v14, %v23370_v30 }
 0x67b   : > { %18548 = vmatpush3.bf16.xpose.msk.msra.mxu0 %vm23106_vm2, %v26332_v36  ;;  %v23787_v26 = vrot.slane %v12028_v6, %v23370_v30  ;;  %v23790_v39 = vrot.slane %v17164_v49, %v23370_v30  ;;  %v11092_v55 = vcombine.low %v11068_v7, %v11084_v10  ;;  %v11093_v47 = vcombine.high %v11068_v7, %v11084_v10  ;;  %v23812_v18 = vpop.permute.xlu1 %10530  ;;  %v26335_v10 = vld [vmem:[#allocation104_spill] sm:$0xff] }
 0x67c   : > { %18551 = vmatprep.subr.msk.bf16.mxu0 %vm23106_vm2, %v26333_v3  ;;  %17521 = vmatprep.mubr.msk.f32.mxu1 %vm12956_vm1, %v12008_v63  ;;  %v11108_v54 = vcombine.low %v11075_v62, %v11091_v42  ;;  %v11109_v8 = vcombine.high %v11075_v62, %v11091_v42  ;;  %v12044_v6 = vcombine.low %v23765_v46, %v23768_v23 }
 0x67d   : > { %17585 = vmatprep.mubr.msk.f32.mxu0 %vm12956_vm1, %v12009_v0  ;;  %17522 = vmatmul.mubr.msk.f32.gmra.mrb[6].mxu1 %vm12956_vm1, %v12008_v63  ;;  %v12060_v49 = vcombine.low %v23787_v26, %v23790_v39  ;;  %v23803_v25 = vrot.slane %v11092_v55, %v23372_v51  ;;  %v23806_v9 = vrot.slane %v11093_v47, %v23372_v51 }
 0x67e   : > { %17586 = vmatmul.mubr.msk.f32.gmra.mrb[22].mxu0 %vm12956_vm1, %v12009_v0  ;;  %v23809_v7 = vrot.slane %v11108_v54, %v23372_v51  ;;  %v11280_v14 = vcombine.low %v23695_v37, %v10623_v19  ;;  %v23815_v62 = vrot.slane %v11109_v8, %v23372_v51  ;;  %v12052_v38 = vrot.slane %v12044_v6, %v23372_v51  ;;  %v26334_v0 = vld [vmem:[#allocation105_spill] sm:$0xff] }
 0x67f   : > { %v12068_v36 = vrot.slane %v12060_v49, %v23372_v51  ;;  %v11281_v63 = vcombine.high %v23695_v37, %v10623_v19  ;;  %v26336_v42 = vpack.c.bf16 %v26334_v0, %v26335_v10  ;;  %v12148_v3 = vcombine.low %v23803_v25, %v23806_v9  ;;  %v10579_v10 = vpop.permute.xlu0 %10578 }
 0x680   : > { %v17167_v55 = vcombine.high %v23803_v25, %v23806_v9  ;;  %v11288_v47 = vrot.slane %v11280_v14, %v23370_v30  ;;  %v23834_v54 = vrot.slane %v12080_v57, %v23370_v30  ;;  %v26337_v37 = vpack.c.bf16 %v23364_v35, %v23362_v48  ;;  %v26338_v25 = vld [vmem:[#allocation107_spill] sm:$0xff]  ;;  %v26339_v9 = vld [vmem:[#allocation106_spill] sm:$0xff] }
 0x681   : > { %18506 = vmatpush3.bf16.xpose.msk.msra.mxu1 %vm23106_vm2, %v26336_v42  ;;  %v12164_v19 = vcombine.low %v23809_v7, %v23815_v62  ;;  %v17168_v8 = vcombine.high %v23809_v7, %v23815_v62  ;;  %v12076_v6 = vcombine.low %v12052_v38, %v12068_v36  ;;  %v12077_v49 = vcombine.high %v12052_v38, %v12068_v36  ;;  %v26341_v7 = vld [vmem:[#allocation110_spill] sm:$0xff]  ;;  %v10627_v36 = vpop.permute.xlu1 %10626 }
 0x682   : > { %18509 = vmatprep.subr.msk.bf16.mxu1 %vm23106_vm2, %v26337_v37  ;;  %v26340_v14 = vpack.c.bf16 %v26338_v25, %v26339_v9  ;;  %v11295_v57 = vrot.slane %v11281_v63, %v23370_v30  ;;  %v11296_v48 = vcombine.low %v11272_v59, %v11288_v47  ;;  %v11297_v35 = vcombine.high %v11272_v59, %v11288_v47  ;;  %v26344_v9 = vld [vmem:[#allocation109_spill] sm:$0xff] }
 0x683   : > { %v23855_v0 = vrot.slane %v17165_v53, %v23370_v30  ;;  %v26342_v62 = vpack.c.bf16 %v23380_v21, %v26341_v7  ;;  %17523 = vmatprep.mubr.msk.f32.mxu1 %vm12956_vm1, %v12076_v6  ;;  %17587 = vmatprep.mubr.msk.f32.mxu0 %vm12956_vm1, %v12077_v49  ;;  %v23868_v59 = vrot.slane %v12096_v61, %v23370_v30  ;;  %v26343_v21 = vld [vmem:[#allocation93_spill] sm:$0xff]  ;;  %v26347_v7 = vld [vmem:[#allocation94_spill] sm:$0xff] }
 0x684   : > { %18554 = vmatpush3.bf16.xpose.msk.msra.mxu0 %vm23106_vm2, %v26340_v14  ;;  %v23874_v22 = vrot.slane %v17166_v12, %v23370_v30  ;;  %v11196_v34 = vcombine.low %v26343_v21, %v23777_v20  ;;  %17524 = vmatmul.mubr.msk.f32.gmra.mrb[8].mxu1 %vm12956_vm1, %v12076_v6  ;;  %v23881_v53 = vrot.slane %v11296_v48, %v23372_v51  ;;  %v26345_v14 = vld [vmem:[#allocation108_spill] sm:$0xff] }
 0x685   : > { %18557 = vmatprep.subr.msk.bf16.mxu0 %vm23106_vm2, %v26342_v62  ;;  %17588 = vmatmul.mubr.msk.f32.gmra.mrb[24].mxu0 %vm12956_vm1, %v12077_v49  ;;  %v23884_v38 = vrot.slane %v11297_v35, %v23372_v51  ;;  %v11312_v61 = vcombine.low %v11279_v50, %v11295_v57  ;;  %v11313_v63 = vcombine.high %v11279_v50, %v11295_v57 }
 0x686   : > { %v12112_v40 = vcombine.low %v23834_v54, %v23855_v0  ;;  %v12128_v5 = vcombine.low %v23868_v59, %v23874_v22  ;;  %v11197_v12 = vcombine.high %v26343_v21, %v23777_v20  ;;  %v11204_v50 = vrot.slane %v11196_v34, %v23370_v30  ;;  %v23917_v34 = vpop.permute.xlu0 %10528 }
 0x687   : > { %v23893_v42 = vrot.slane %v11312_v61, %v23372_v51  ;;  %v23901_v6 = vrot.slane %v11313_v63, %v23372_v51  ;;  %v26346_v57 = vpack.c.bf16 %v26344_v9, %v26345_v14  ;;  %v11212_v48 = vcombine.low %v23740_v16, %v23794_v32  ;;  %v26363_v63 = vld [vmem:[#allocation123_spill] sm:$0xff] }
 0x688   : > { %v12120_v49 = vrot.slane %v12112_v40, %v23372_v51  ;;  %v12136_v25 = vrot.slane %v12128_v5, %v23372_v51  ;;  %v11211_v20 = vrot.slane %v11197_v12, %v23370_v30  ;;  %v11213_v35 = vcombine.high %v23740_v16, %v23794_v32  ;;  %v26349_v32 = vld [vmem:[#allocation112_spill] sm:$0xff]  ;;  %v26350_v12 = vld [vmem:[#allocation111_spill] sm:$0xff] }
 0x689   : > { %18512 = vmatpush3.bf16.xpose.msk.msra.mxu1 %vm23106_vm2, %v26346_v57  ;;  %v11400_v62 = vcombine.low %v26347_v7, %v10579_v10  ;;  %v11401_v21 = vcombine.high %v26347_v7, %v10579_v10  ;;  %v26348_v61 = vpack.c.bf16 %v23396_v52, %v23394_v43  ;;  %v26351_v9 = vpack.c.bf16 %v26349_v32, %v26350_v12  ;;  %v23937_v57 = vpop.permute.xlu1 %10576  ;;  %v26352_v7 = vld [vmem:[#allocation115_spill] sm:$0xff] }
 0x68a   : > { %v12144_v5 = vcombine.low %v12120_v49, %v12136_v25  ;;  %v12145_v16 = vcombine.high %v12120_v49, %v12136_v25  ;;  %v11220_v10 = vrot.slane %v11212_v48, %v23370_v30  ;;  %v11227_v52 = vrot.slane %v11213_v35, %v23370_v30 }
 0x68b   : > { %18515 = vmatprep.subr.msk.bf16.mxu1 %vm23106_vm2, %v26348_v61  ;;  %v11408_v43 = vrot.slane %v11400_v62, %v23370_v30  ;;  %v11415_v14 = vrot.slane %v11401_v21, %v23370_v30  ;;  %v26353_v61 = vpack.c.bf16 %v23412_v27, %v26352_v7  ;;  %v23947_v49 = vrot.slane %v12148_v3, %v23370_v30  ;;  %v26355_v7 = vld [vmem:[#allocation113_spill] sm:$0xff] }
 0x68c   : > { %18560 = vmatpush3.bf16.xpose.msk.msra.mxu0 %vm23106_vm2, %v26351_v9  ;;  %17525 = vmatprep.mubr.msk.f32.mxu1 %vm12956_vm1, %v12144_v5  ;;  %v23950_v25 = vrot.slane %v17167_v55, %v23370_v30  ;;  %v23953_v48 = vrot.slane %v12164_v19, %v23370_v30  ;;  %v11228_v27 = vcombine.low %v11204_v50, %v11220_v10 }
 0x68d   : > { %18563 = vmatprep.subr.msk.bf16.mxu0 %vm23106_vm2, %v26353_v61  ;;  %17589 = vmatprep.mubr.msk.f32.mxu0 %vm12956_vm1, %v12145_v16  ;;  %v11229_v35 = vcombine.high %v11204_v50, %v11220_v10  ;;  %v11244_v62 = vcombine.low %v11211_v20, %v11227_v52  ;;  %v11245_v21 = vcombine.high %v11211_v20, %v11227_v52  ;;  %v10625_v50 = vpop.permute.xlu0 %10624  ;;  %v26354_v52 = vld [vmem:[#allocation114_spill] sm:$0xff] }
 0x68e   : > { %17526 = vmatmul.mubr.msk.f32.gmra.mrb[10].mxu1 %vm12956_vm1, %v12144_v5  ;;  %17590 = vmatmul.mubr.msk.f32.gmra.mrb[26].mxu0 %vm12956_vm1, %v12145_v16  ;;  %v23958_v32 = vrot.slane %v17168_v8, %v23370_v30  ;;  %v12180_v3 = vcombine.low %v23947_v49, %v23950_v25  ;;  %v11416_v55 = vcombine.low %v23812_v18, %v10627_v36 }
 0x68f   : > { %v11236_v12 = vrot.slane %v11228_v27, %v23372_v51  ;;  %v11243_v19 = vrot.slane %v11229_v35, %v23372_v51  ;;  %v23966_v5 = vrot.slane %v11244_v62, %v23372_v51  ;;  %v11417_v16 = vcombine.high %v23812_v18, %v10627_v36  ;;  %v23988_v62 = vpop.permute.xlu1 %10534 }
 0x690   : > { %v23970_v20 = vrot.slane %v11245_v21, %v23372_v51  ;;  %v12188_v8 = vrot.slane %v12180_v3, %v23372_v51  ;;  %v12196_v9 = vcombine.low %v23953_v48, %v23958_v32  ;;  %v11424_v10 = vrot.slane %v11416_v55, %v23370_v30  ;;  %v26357_v21 = vld [vmem:[#allocation119_spill] sm:$0xff]  ;;  %v26358_v3 = vld [vmem:[#allocation118_spill] sm:$0xff] }
 0x691   : > { %v26356_v61 = vpack.c.bf16 %v26354_v52, %v26355_v7  ;;  %v12284_v27 = vcombine.low %v11236_v12, %v11243_v19  ;;  %v17171_v35 = vcombine.high %v11236_v12, %v11243_v19  ;;  %v11431_v18 = vrot.slane %v11417_v16, %v23370_v30  ;;  %v26360_v7 = vld [vmem:[#allocation117_spill] sm:$0xff] }
 0x692   : > { %v23986_v36 = vrot.slane %v12216_v17, %v23370_v30  ;;  %v26359_v55 = vpack.c.bf16 %v26357_v21, %v26358_v3  ;;  %v12300_v52 = vcombine.low %v23966_v5, %v23970_v20  ;;  %v17172_v12 = vcombine.high %v23966_v5, %v23970_v20  ;;  %v26361_v17 = vld [vmem:[#allocation116_spill] sm:$0xff]  ;;  %v26364_v5 = vld [vmem:[#allocation122_spill] sm:$0xff] }
 0x693   : > { %18518 = vmatpush3.bf16.xpose.msk.msra.mxu1 %vm23106_vm2, %v26356_v61  ;;  %v12204_v19 = vrot.slane %v12196_v9, %v23372_v51  ;;  %v11432_v16 = vcombine.low %v11408_v43, %v11424_v10  ;;  %v26362_v61 = vpack.c.bf16 %v26360_v7, %v26361_v17  ;;  %v11433_v40 = vcombine.high %v11408_v43, %v11424_v10 }
 0x694   : > { %18521 = vmatprep.subr.msk.bf16.mxu1 %vm23106_vm2, %v26359_v55  ;;  %v11448_v21 = vcombine.low %v11415_v14, %v11431_v18  ;;  %v11449_v3 = vcombine.high %v11415_v14, %v11431_v18  ;;  %v24009_v55 = vrot.slane %v17169_v56, %v23370_v30  ;;  %v26365_v20 = vpack.c.bf16 %v26363_v63, %v26364_v5  ;;  %v26368_v5 = vld [vmem:[#allocation121_spill] sm:$0xff] }
 0x695   : > { %18566 = vmatpush3.bf16.xpose.msk.msra.mxu0 %vm23106_vm2, %v26362_v61  ;;  %v12212_v9 = vcombine.low %v12188_v8, %v12204_v19  ;;  %v12213_v7 = vcombine.high %v12188_v8, %v12204_v19  ;;  %v24017_v17 = vrot.slane %v11432_v16, %v23372_v51  ;;  %v24023_v43 = vrot.slane %v12232_v11, %v23370_v30  ;;  %v10583_v8 = vpop.permute.xlu0 %10582  ;;  %v10631_v16 = vpop.permute.xlu1 %10630  ;;  %v26371_v61 = vld [vmem:[#allocation96_spill] sm:$0xff] }
 0x696   : > { %18569 = vmatprep.subr.msk.bf16.mxu0 %vm23106_vm2, %v26365_v20  ;;  %v24026_v60 = vrot.slane %v11433_v40, %v23372_v51  ;;  %v24029_v41 = vrot.slane %v11448_v21, %v23372_v51  ;;  %v24032_v56 = vrot.slane %v11449_v3, %v23372_v51  ;;  %v26366_v63 = vcombine.high %v23727_v24, %v23730_v45  ;;  %v26367_v40 = vld [vmem:[#allocation95_spill] sm:$0xff]  ;;  %v26369_v20 = vld [vmem:[#allocation120_spill] sm:$0xff] }
 0x697   : > { %17527 = vmatprep.mubr.msk.f32.mxu1 %vm12956_vm1, %v12212_v9  ;;  %17591 = vmatprep.mubr.msk.f32.mxu0 %vm12956_vm1, %v12213_v7  ;;  %v12248_v11 = vcombine.low %v23986_v36, %v24009_v55  ;;  %v11332_v10 = vcombine.low %v26367_v40, %v23937_v57  ;;  %v11333_v18 = vcombine.high %v26367_v40, %v23937_v57 }
 0x698   : > { %v24038_v14 = vrot.slane %v26366_v63, %v23370_v30  ;;  %17528 = vmatmul.mubr.msk.f32.gmra.mrb[12].mxu1 %vm12956_vm1, %v12212_v9  ;;  %17592 = vmatmul.mubr.msk.f32.gmra.mrb[28].mxu0 %vm12956_vm1, %v12213_v7  ;;  %v26370_v9 = vpack.c.bf16 %v26368_v5, %v26369_v20  ;;  %v11348_v63 = vcombine.low %v23917_v34, %v10625_v50  ;;  %v26374_v20 = vld [vmem:[#allocation125_spill] sm:$0xff] }
 0x699   : > { %v12256_v21 = vrot.slane %v12248_v11, %v23372_v51  ;;  %v11340_v3 = vrot.slane %v11332_v10, %v23370_v30  ;;  %v11347_v7 = vrot.slane %v11333_v18, %v23370_v30  ;;  %v11349_v40 = vcombine.high %v23917_v34, %v10625_v50  ;;  %v10581_v47 = vpop.permute.xlu1 %10580 }
 0x69a   : > { %v12264_v57 = vcombine.low %v24023_v43, %v24038_v14  ;;  %v11536_v19 = vcombine.low %v26371_v61, %v10583_v8  ;;  %v11537_v45 = vcombine.high %v26371_v61, %v10583_v8  ;;  %v24074_v10 = vrot.slane %v12284_v27, %v23370_v30  ;;  %v24090_v27 = vpop.permute.xlu0 %10532 }
 0x69b   : > { %18524 = vmatpush3.bf16.xpose.msk.msra.mxu1 %vm23106_vm2, %v26370_v9  ;;  %v24077_v5 = vrot.slane %v17171_v35, %v23370_v30  ;;  %v26375_v9 = vld [vmem:[#allocation124_spill] sm:$0xff]  ;;  %v11356_v34 = vrot.slane %v11348_v63, %v23370_v30  ;;  %v11363_v50 = vrot.slane %v11349_v40, %v23370_v30  ;;  %v24088_v8 = vrot.slane %v12300_v52, %v23370_v30 }
 0x69c   : > { %v12272_v11 = vrot.slane %v12264_v57, %v23372_v51  ;;  %26372 = vst [vmem:[#allocation92_spill] sm:$0xff] %v24074_v10  ;;  %v26376_v24 = vpack.c.bf16 %v26374_v20, %v26375_v9  ;;  %v11544_v18 = vrot.slane %v11536_v19, %v23370_v30  ;;  %v11551_v57 = vrot.slane %v11537_v45, %v23370_v30 }
 0x69d   : > { %26373 = vst [vmem:[#allocation103_spill] sm:$0xff] %v24077_v5  ;;  %26377 = vst [vmem:[#allocation102_spill] sm:$0xff] %v24088_v8  ;;  %v24094_v20 = vrot.slane %v17172_v12, %v23370_v30  ;;  %v11364_v9 = vcombine.low %v11340_v3, %v11356_v34  ;;  %v11380_v37 = vcombine.low %v11347_v7, %v11363_v50 }
 0x69e   : > { %18572 = vmatpush3.bf16.xpose.msk.msra.mxu0 %vm23106_vm2, %v26376_v24  ;;  %v12280_v61 = vcombine.low %v12256_v21, %v12272_v11  ;;  %v12281_v35 = vcombine.high %v12256_v21, %v12272_v11  ;;  %v11365_v24 = vcombine.high %v11340_v3, %v11356_v34  ;;  %v11381_v63 = vcombine.high %v11347_v7, %v11363_v50 }
 0x69f   : > { %26378 = vst [vmem:[#allocation101_spill] sm:$0xff] %v24094_v20  ;;  %v12316_v52 = vcombine.low %v24074_v10, %v24077_v5  ;;  %v12332_v19 = vcombine.low %v24088_v8, %v24094_v20  ;;  %v11552_v45 = vcombine.low %v23988_v62, %v10631_v16  ;;  %v11372_v12 = vrot.slane %v11364_v9, %v23372_v51 }
 0x6a0   : > { %17529 = vmatprep.mubr.msk.f32.mxu1 %vm12956_vm1, %v12280_v61  ;;  %17593 = vmatprep.mubr.msk.f32.mxu0 %vm12956_vm1, %v12281_v35  ;;  %v11379_v21 = vrot.slane %v11365_v24, %v23372_v51  ;;  %v11388_v3 = vrot.slane %v11380_v37, %v23372_v51  ;;  %v11395_v7 = vrot.slane %v11381_v63, %v23372_v51  ;;  %v10629_v24 = vpop.permute.xlu0 %10628 }
 0x6a1   : > { %17530 = vmatmul.mubr.msk.f32.gmra.mrb[14].mxu1 %vm12956_vm1, %v12280_v61  ;;  %17594 = vmatmul.mubr.msk.f32.gmra.mrb[30].mxu0 %vm12956_vm1, %v12281_v35  ;;  %v12324_v40 = vrot.slane %v12316_v52, %v23372_v51  ;;  %v12340_v11 = vrot.slane %v12332_v19, %v23372_v51  ;;  %v11553_v34 = vcombine.high %v23988_v62, %v10631_v16 }
 0x6a2   : > { %v12420_v50 = vcombine.low %v11372_v12, %v11379_v21  ;;  %v17175_v8 = vcombine.high %v11372_v12, %v11379_v21  ;;  %v11560_v61 = vrot.slane %v11552_v45, %v23370_v30  ;;  %v26379_v35 = vcombine.low %v23881_v53, %v23884_v38  ;;  %v24126_v45 = vpop.permute.xlu1 %10538 }
 0x6a3   : > { %v12436_v37 = vcombine.low %v11388_v3, %v11395_v7  ;;  %v17176_v20 = vcombine.high %v11388_v3, %v11395_v7  ;;  %v12348_v63 = vcombine.low %v12324_v40, %v12340_v11  ;;  %v12349_v10 = vcombine.high %v12324_v40, %v12340_v11 }
 0x6a4   : > { %v24117_v9 = vrot.slane %v26379_v35, %v23370_v30  ;;  %v11567_v52 = vrot.slane %v11553_v34, %v23370_v30  ;;  %v11568_v19 = vcombine.low %v11544_v18, %v11560_v61  ;;  %v11569_v5 = vcombine.high %v11544_v18, %v11560_v61 }
 0x6a5   : > { %v26380_v62 = vcombine.high %v23881_v53, %v23884_v38  ;;  %17531 = vmatprep.mubr.msk.f32.mxu1 %vm12956_vm1, %v12348_v63  ;;  %17595 = vmatprep.mubr.msk.f32.mxu0 %vm12956_vm1, %v12349_v10  ;;  %v26381_v12 = vcombine.low %v23893_v42, %v23901_v6  ;;  %v26383_v18 = vcombine.high %v23893_v42, %v23901_v6  ;;  %v26384_v53 = vld [vmem:[#allocation97_spill] sm:$0xff] }
 0x6a6   : > { %v11468_v38 = vcombine.low %v26384_v53, %v10581_v47  ;;  %17532 = vmatmul.mubr.msk.f32.gmra.mrb[16].mxu1 %vm12956_vm1, %v12348_v63  ;;  %17596 = vmatmul.mubr.msk.f32.gmra.mrb[32].mxu0 %vm12956_vm1, %v12349_v10  ;;  %v24146_v7 = vrot.slane %v11568_v19, %v23372_v51  ;;  %v24149_v40 = vrot.slane %v11569_v5, %v23372_v51 }
 0x6a7   : > { %v24124_v16 = vrot.slane %v26380_v62, %v23370_v30  ;;  %v24134_v21 = vrot.slane %v26381_v12, %v23370_v30  ;;  %v24140_v3 = vrot.slane %v26383_v18, %v23370_v30  ;;  %v11584_v11 = vcombine.low %v11551_v57, %v11567_v52 }
 0x6a8   : > { %v11585_v34 = vcombine.high %v11551_v57, %v11567_v52  ;;  %v11469_v6 = vcombine.high %v26384_v53, %v10581_v47  ;;  %v11476_v63 = vrot.slane %v11468_v38, %v23370_v30  ;;  %v10537_v57 = vpop.permute.xlu0 %10536  ;;  %v11484_v12 = vcombine.low %v24090_v27, %v10629_v24  ;;  %v10585_v38 = vpop.permute.xlu1 %10584 }
 0x6a9   : > { %26382 = vst [vmem:[#allocation100_spill] sm:$0xff] %v24134_v21  ;;  %v12384_v61 = vcombine.low %v24117_v9, %v24124_v16  ;;  %v12400_v42 = vcombine.low %v24134_v21, %v24140_v3  ;;  %v24157_v35 = vrot.slane %v11584_v11, %v23372_v51  ;;  %v11485_v18 = vcombine.high %v24090_v27, %v10629_v24  ;;  %v26389_v24 = vld [vmem:[#allocation99_spill] sm:$0xff] }
 0x6aa   : > { %v24165_v52 = vrot.slane %v11585_v34, %v23372_v51  ;;  %v11483_v47 = vrot.slane %v11469_v6, %v23370_v30  ;;  %v24173_v53 = vrot.slane %v12420_v50, %v23370_v30  ;;  %v24176_v11 = vrot.slane %v17175_v8, %v23370_v30 }
 0x6ab   : > { %v12392_v19 = vrot.slane %v12384_v61, %v23372_v51  ;;  %v12408_v62 = vrot.slane %v12400_v42, %v23372_v51  ;;  %v11492_v6 = vrot.slane %v11484_v12, %v23370_v30  ;;  %v11499_v10 = vrot.slane %v11485_v18, %v23370_v30 }
 0x6ac   : > { %26385 = vst [vmem:[#allocation105_spill] sm:$0xff] %v24173_v53  ;;  %26386 = vst [vmem:[#allocation104_spill] sm:$0xff] %v24176_v11  ;;  %v24185_v27 = vrot.slane %v12436_v37, %v23370_v30  ;;  %v24188_v50 = vrot.slane %v17176_v20, %v23370_v30  ;;  %v12452_v8 = vcombine.low %v24173_v53, %v24176_v11  ;;  %v10633_v20 = vpop.permute.xlu0 %10632 }
 0x6ad   : > { %v12416_v42 = vcombine.low %v12392_v19, %v12408_v62  ;;  %v12417_v5 = vcombine.high %v12392_v19, %v12408_v62  ;;  %v11604_v61 = vcombine.low %v26389_v24, %v10585_v38  ;;  %v11605_v19 = vcombine.high %v26389_v24, %v10585_v38 }
 0x6ae   : > { %26387 = vst [vmem:[#allocation107_spill] sm:$0xff] %v24185_v27  ;;  %26388 = vst [vmem:[#allocation106_spill] sm:$0xff] %v24188_v50  ;;  %v11500_v37 = vcombine.low %v11476_v63, %v11492_v6  ;;  %v11501_v62 = vcombine.high %v11476_v63, %v11492_v6  ;;  %v11516_v12 = vcombine.low %v11483_v47, %v11499_v10 }
 0x6af   : > { %17533 = vmatprep.mubr.msk.f32.mxu1 %vm12956_vm1, %v12416_v42  ;;  %17597 = vmatprep.mubr.msk.f32.mxu0 %vm12956_vm1, %v12417_v5  ;;  %v11517_v18 = vcombine.high %v11483_v47, %v11499_v10  ;;  %v12460_v34 = vrot.slane %v12452_v8, %v23372_v51  ;;  %v12468_v21 = vcombine.low %v24185_v27, %v24188_v50 }
 0x6b0   : > { %17534 = vmatmul.mubr.msk.f32.gmra.mrb[18].mxu1 %vm12956_vm1, %v12416_v42  ;;  %17598 = vmatmul.mubr.msk.f32.gmra.mrb[34].mxu0 %vm12956_vm1, %v12417_v5  ;;  %v11612_v53 = vrot.slane %v11604_v61, %v23370_v30  ;;  %v11508_v11 = vrot.slane %v11500_v37, %v23372_v51  ;;  %v11515_v38 = vrot.slane %v11501_v62, %v23372_v51 }
 0x6b1   : > { %v11524_v42 = vrot.slane %v11516_v12, %v23372_v51  ;;  %v11619_v5 = vrot.slane %v11605_v19, %v23370_v30  ;;  %v11531_v63 = vrot.slane %v11517_v18, %v23372_v51  ;;  %v12476_v6 = vrot.slane %v12468_v21, %v23372_v51  ;;  %v10635_v19 = vpop.permute.xlu1 %10634 }
 0x6b2   : > { %v11620_v10 = vcombine.low %v10537_v57, %v10633_v20  ;;  %v11621_v47 = vcombine.high %v10537_v57, %v10633_v20  ;;  %v12556_v8 = vcombine.low %v11508_v11, %v11515_v38  ;;  %v17179_v24 = vcombine.high %v11508_v11, %v11515_v38 }
 0x6b3   : > { %v26390_v61 = vcombine.low %v24017_v17, %v24026_v60  ;;  %v26392_v37 = vcombine.high %v24017_v17, %v24026_v60  ;;  %v12572_v12 = vcombine.low %v11524_v42, %v11531_v63  ;;  %v17180_v18 = vcombine.high %v11524_v42, %v11531_v63 }
 0x6b4   : > { %v12484_v21 = vcombine.low %v12460_v34, %v12476_v6  ;;  %v12485_v50 = vcombine.high %v12460_v34, %v12476_v6  ;;  %v11628_v57 = vrot.slane %v11620_v10, %v23370_v30  ;;  %v11635_v11 = vrot.slane %v11621_v47, %v23370_v30 }
 0x6b5   : > { %v24212_v27 = vrot.slane %v26390_v61, %v23370_v30  ;;  %v24218_v62 = vrot.slane %v26392_v37, %v23370_v30  ;;  %v26393_v20 = vcombine.low %v24029_v41, %v24032_v56  ;;  %v26395_v17 = vcombine.high %v24029_v41, %v24032_v56  ;;  %v10587_v56 = vpop.permute.xlu0 %10586 }
 0x6b6   : > { %17535 = vmatprep.mubr.msk.f32.mxu1 %vm12956_vm1, %v12484_v21  ;;  %17599 = vmatprep.mubr.msk.f32.mxu0 %vm12956_vm1, %v12485_v50  ;;  %v11688_v42 = vcombine.low %v24126_v45, %v10635_v19  ;;  %v11689_v63 = vcombine.high %v24126_v45, %v10635_v19  ;;  %v11636_v6 = vcombine.low %v11612_v53, %v11628_v57 }
 0x6b7   : > { %26391 = vst [vmem:[#allocation110_spill] sm:$0xff] %v24212_v27  ;;  %v24226_v38 = vrot.slane %v26393_v20, %v23370_v30  ;;  %v24232_v60 = vrot.slane %v26395_v17, %v23370_v30  ;;  %v12520_v34 = vcombine.low %v24212_v27, %v24218_v62  ;;  %17536 = vmatmul.mubr.msk.f32.gmra.mrb[20].mxu1 %vm12956_vm1, %v12484_v21 }
 0x6b8   : > { %17600 = vmatmul.mubr.msk.f32.gmra.mrb[36].mxu0 %vm12956_vm1, %v12485_v50  ;;  %v11637_v10 = vcombine.high %v11612_v53, %v11628_v57  ;;  %v11652_v41 = vcombine.low %v11619_v5, %v11635_v11  ;;  %v11653_v47 = vcombine.high %v11619_v5, %v11635_v11  ;;  %v11696_v20 = vrot.slane %v11688_v42, %v23370_v30  ;;  %v26397_v5 = vld [vmem:[#allocation98_spill] sm:$0xff] }
 0x6b9   : > { %26394 = vst [vmem:[#allocation93_spill] sm:$0xff] %v24226_v38  ;;  %26396 = vst [vmem:[#allocation109_spill] sm:$0xff] %v24232_v60  ;;  %v12528_v61 = vrot.slane %v12520_v34, %v23372_v51  ;;  %v12536_v37 = vcombine.low %v24226_v38, %v24232_v60  ;;  %v11644_v17 = vrot.slane %v11636_v6, %v23372_v51 }
 0x6ba   : > { %v11651_v45 = vrot.slane %v11637_v10, %v23372_v51  ;;  %v11660_v19 = vrot.slane %v11652_v41, %v23372_v51  ;;  %v11703_v50 = vrot.slane %v11689_v63, %v23370_v30  ;;  %v11667_v53 = vrot.slane %v11653_v47, %v23372_v51 }
 0x6bb   : > { %v12544_v21 = vrot.slane %v12536_v37, %v23372_v51  ;;  %v11672_v57 = vcombine.low %v26397_v5, %v10587_v56  ;;  %v11673_v11 = vcombine.high %v26397_v5, %v10587_v56  ;;  %v24255_v42 = vrot.slane %v12556_v8, %v23370_v30 }
 0x6bc   : > { %v12692_v34 = vcombine.low %v11644_v17, %v11651_v45  ;;  %v17183_v38 = vcombine.high %v11644_v17, %v11651_v45  ;;  %v24258_v6 = vrot.slane %v17179_v24, %v23370_v30  ;;  %v12708_v10 = vcombine.low %v11660_v19, %v11667_v53 }
 0x6bd   : > { %26398 = vst [vmem:[#allocation108_spill] sm:$0xff] %v24255_v42  ;;  %v17184_v41 = vcombine.high %v11660_v19, %v11667_v53  ;;  %v12552_v60 = vcombine.low %v12528_v61, %v12544_v21  ;;  %v12553_v63 = vcombine.high %v12528_v61, %v12544_v21  ;;  %v11680_v47 = vrot.slane %v11672_v57, %v23370_v30 }
 0x6be   : > { %26399 = vst [vmem:[#allocation94_spill] sm:$0xff] %v24258_v6  ;;  %v11687_v37 = vrot.slane %v11673_v11, %v23370_v30  ;;  %v24263_v27 = vrot.slane %v12572_v12, %v23370_v30  ;;  %v24266_v56 = vrot.slane %v17180_v18, %v23370_v30  ;;  %v12588_v8 = vcombine.low %v24255_v42, %v24258_v6  ;;  %v12938_v6 = vld [vmem:[#allocation2 + $0x370] sm:$0xff] }
 0x6bf   : > { %17537 = vmatprep.mubr.msk.f32.mxu1 %vm12956_vm1, %v12552_v60  ;;  %17601 = vmatprep.mubr.msk.f32.mxu0 %vm12956_vm1, %v12553_v63  ;;  %v26402_v24 = vcombine.low %v24146_v7, %v24149_v40  ;;  %v26403_v12 = vcombine.high %v24146_v7, %v24149_v40  ;;  %v11704_v18 = vcombine.low %v11680_v47, %v11696_v20 }
 0x6c0   : > { %26400 = vst [vmem:[#allocation112_spill] sm:$0xff] %v24263_v27  ;;  %26401 = vst [vmem:[#allocation111_spill] sm:$0xff] %v24266_v56  ;;  %17538 = vmatmul.mubr.msk.f32.gmra.mrb[22].mxu1 %vm12956_vm1, %v12552_v60  ;;  %17602 = vmatmul.mubr.msk.f32.gmra.mrb[38].mxu0 %vm12956_vm1, %v12553_v63  ;;  %v11705_v45 = vcombine.high %v11680_v47, %v11696_v20  ;;  %v11720_v19 = vcombine.low %v11687_v37, %v11703_v50 }
 0x6c1   : > { %v24276_v61 = vrot.slane %v26402_v24, %v23370_v30  ;;  %v24282_v17 = vrot.slane %v26403_v12, %v23370_v30  ;;  %v11721_v53 = vcombine.high %v11687_v37, %v11703_v50  ;;  %v12596_v21 = vrot.slane %v12588_v8, %v23372_v51  ;;  %v12922_v24 = vld [vmem:[#allocation2 + $0x2f0] sm:$0xff] }
 0x6c2   : > { %v12604_v5 = vcombine.low %v24263_v27, %v24266_v56  ;;  %v26404_v57 = vcombine.low %v24157_v35, %v24165_v52  ;;  %v11712_v40 = vrot.slane %v11704_v18, %v23372_v51  ;;  %v11719_v60 = vrot.slane %v11705_v45, %v23372_v51  ;;  %v12954_v56 = vld [vmem:[#allocation2 + $0x3f0] sm:$0xff] }
 0x6c3   : > { %v11728_v11 = vrot.slane %v11720_v19, %v23372_v51  ;;  %v26406_v20 = vcombine.high %v24157_v35, %v24165_v52  ;;  %v11735_v63 = vrot.slane %v11721_v53, %v23372_v51  ;;  %v12656_v37 = vcombine.low %v24276_v61, %v24282_v17  ;;  %v12923_v52 = vld [vmem:[#allocation2 + $0x2f8] sm:$0xff]  ;;  %v12906_v19 = vld [vmem:[#allocation2 + $0x270] sm:$0xff] }
 0x6c4   : > { %v24293_v7 = vrot.slane %v26404_v57, %v23370_v30  ;;  %v12612_v47 = vrot.slane %v12604_v5, %v23372_v51  ;;  %v24309_v8 = vrot.slane %v12692_v34, %v23370_v30  ;;  %v12760_v12 = vcombine.low %v11712_v40, %v11719_v60  ;;  %v12907_v53 = vld [vmem:[#allocation2 + $0x278] sm:$0xff] }
 0x6c5   : > { %v24302_v50 = vrot.slane %v26406_v20, %v23370_v30  ;;  %v17185_v18 = vcombine.high %v11712_v40, %v11719_v60  ;;  %v24314_v35 = vrot.slane %v17183_v38, %v23370_v30  ;;  %v12776_v57 = vcombine.low %v11728_v11, %v11735_v63  ;;  %v12955_v38 = vld [vmem:[#allocation2 + $0x3f8] sm:$0xff] }
 0x6c6   : > { %26405 = vst [vmem:[#allocation115_spill] sm:$0xff] %v24293_v7  ;;  %26408 = vst [vmem:[#allocation113_spill] sm:$0xff] %v24309_v8  ;;  %v17186_v5 = vcombine.high %v11728_v11, %v11735_v63  ;;  %v12620_v20 = vcombine.low %v12596_v21, %v12612_v47  ;;  %v12621_v27 = vcombine.high %v12596_v21, %v12612_v47 }
 0x6c7   : > { %26407 = vst [vmem:[#allocation114_spill] sm:$0xff] %v24302_v50  ;;  %v12672_v45 = vcombine.low %v24293_v7, %v24302_v50  ;;  %v12664_v34 = vrot.slane %v12656_v37, %v23372_v51  ;;  %v24319_v40 = vrot.slane %v12708_v10, %v23370_v30  ;;  %v24322_v60 = vrot.slane %v17184_v41, %v23370_v30  ;;  %v12939_v7 = vld [vmem:[#allocation2 + $0x378] sm:$0xff] }
 0x6c8   : > { %17539 = vmatprep.mubr.msk.f32.mxu1 %vm12956_vm1, %v12620_v20  ;;  %17603 = vmatprep.mubr.msk.f32.mxu0 %vm12956_vm1, %v12621_v27  ;;  %v12724_v21 = vcombine.low %v24309_v8, %v24314_v35  ;;  %v18525_v11 = vpack.c.bf16 %v12923_v52, %v12922_v24  ;;  %v18528_v63 = vpack.c.bf16 %v12907_v53, %v12906_v19 }
 0x6c9   : > { %v12680_v42 = vrot.slane %v12672_v45, %v23372_v51  ;;  %17540 = vmatmul.mubr.msk.f32.gmra.mrb[24].mxu1 %vm12956_vm1, %v12620_v20  ;;  %17604 = vmatmul.mubr.msk.f32.gmra.mrb[40].mxu0 %vm12956_vm1, %v12621_v27  ;;  %v12740_v41 = vcombine.low %v24319_v40, %v24322_v60  ;;  %v18573_v45 = vpack.c.bf16 %v12955_v38, %v12954_v56  ;;  %v26409_v56 = vld [vmem:[#allocation130_spill] sm:$0xff]  ;;  %v26413_v38 = vld [vmem:[#allocation127_spill] sm:$0xff] }
 0x6ca   : > { %v12732_v37 = vrot.slane %v12724_v21, %v23372_v51  ;;  %18527 = vmatprep.subr.msk.bf16.mxu1 %vm23106_vm2, %v18525_v11  ;;  %v18576_v50 = vpack.c.bf16 %v12939_v7, %v12938_v6  ;;  %v24336_v8 = vrot.slane %v12760_v12, %v23370_v30  ;;  %v24345_v24 = vrot.slane %v12776_v57, %v23370_v30  ;;  %v26410_v7 = vld [vmem:[#allocation131_spill] sm:$0xff]  ;;  %v26415_v11 = vld [vmem:[#allocation129_spill] sm:$0xff] }
 0x6cb   : > { %v12688_v10 = vcombine.low %v12664_v34, %v12680_v42  ;;  %v12689_v47 = vcombine.high %v12664_v34, %v12680_v42  ;;  %v12748_v27 = vrot.slane %v12740_v41, %v23372_v51  ;;  %v24342_v42 = vrot.slane %v17185_v18, %v23370_v30  ;;  %18530 = vmatpush3.bf16.xpose.msk.msra.mxu1 %vm23106_vm2, %v18528_v63  ;;  %v26416_v63 = vld [vmem:[#allocation128_spill] sm:$0xff] }
 0x6cc   : > { %18575 = vmatprep.subr.msk.bf16.mxu0 %vm23106_vm2, %v18573_v45  ;;  %v24352_v6 = vrot.slane %v17186_v5, %v23370_v30  ;;  %v26411_v12 = vcombine.high %v26409_v56, %v26410_v7  ;;  %v26412_v18 = vcombine.high %v23511_v28, %v23514_v33  ;;  %v26414_v28 = vld [vmem:[#allocation126_spill] sm:$0xff]  ;;  %v11909_v4 = vcombine.high %v23573_v44, %v23576_v29 }
 0x6cd   : > { %17541 = vmatprep.mubr.msk.f32.mxu1 %vm12956_vm1, %v12688_v10  ;;  %17605 = vmatprep.mubr.msk.f32.mxu0 %vm12956_vm1, %v12689_v47  ;;  %v12756_v53 = vcombine.low %v12732_v37, %v12748_v27  ;;  %v12757_v57 = vcombine.high %v12732_v37, %v12748_v27  ;;  %v12792_v30 = vcombine.low %v24336_v8, %v24342_v42 }
 0x6ce   : > { %v11787_v52 = vrot.slane %v26411_v12, %v23372_v51  ;;  %v11803_v19 = vrot.slane %v26412_v18, %v23372_v51  ;;  %17542 = vmatmul.mubr.msk.f32.gmra.mrb[26].mxu1 %vm12956_vm1, %v12688_v10  ;;  %17606 = vmatmul.mubr.msk.f32.gmra.mrb[42].mxu0 %vm12956_vm1, %v12689_v47  ;;  %v12808_v5 = vcombine.low %v24345_v24, %v24352_v6 }
 0x6cf   : > { %18578 = vmatpush3.bf16.xpose.msk.msra.mxu0 %vm23106_vm2, %v18576_v50  ;;  %v11841_v33 = vcombine.high %v26414_v28, %v26413_v38  ;;  %17543 = vmatprep.mubr.msk.f32.mxu1 %vm12956_vm1, %v12756_v53  ;;  %v12800_v21 = vrot.slane %v12792_v30, %v23372_v51  ;;  %v11857_v10 = vcombine.high %v26416_v63, %v26415_v11  ;;  %v26417_v30 = vld [vmem:[#allocation103_spill] sm:$0xff]  ;;  %v26420_v38 = vld [vmem:[#allocation102_spill] sm:$0xff] }
 0x6d0   : > { %v11806_v20 = vcombine.low %v11787_v52, %v11803_v19  ;;  %v11807_v34 = vcombine.high %v11787_v52, %v11803_v19  ;;  %17607 = vmatprep.mubr.msk.f32.mxu0 %vm12956_vm1, %v12757_v57  ;;  %v12816_v50 = vrot.slane %v12808_v5, %v23372_v51  ;;  %v11925_v47 = vcombine.high %v23632_v58, %v23640_v13  ;;  %v26418_v5 = vld [vmem:[#allocation92_spill] sm:$0xff]  ;;  %v26425_v11 = vld [vmem:[#allocation107_spill] sm:$0xff] }
 0x6d1   : > { %v11977_v41 = vcombine.high %v23672_v1, %v23693_v31  ;;  %v11993_v37 = vcombine.high %v23709_v15, %v23720_v2  ;;  %v11855_v56 = vrot.slane %v11841_v33, %v23372_v51  ;;  %v11871_v44 = vrot.slane %v11857_v10, %v23372_v51 }
 0x6d2   : > { %17544 = vmatmul.mubr.msk.f32.gmra.mrb[28].mxu1 %vm12956_vm1, %v12756_v53  ;;  %17608 = vmatmul.mubr.msk.f32.gmra.mrb[44].mxu0 %vm12956_vm1, %v12757_v57  ;;  %v12824_v45 = vcombine.low %v12800_v21, %v12816_v50  ;;  %v12825_v27 = vcombine.high %v12800_v21, %v12816_v50  ;;  %v11923_v29 = vrot.slane %v11909_v4, %v23372_v51 }
 0x6d3   : > { %v11939_v58 = vrot.slane %v11925_v47, %v23372_v51  ;;  %v11991_v13 = vrot.slane %v11977_v41, %v23372_v51  ;;  %v12007_v1 = vrot.slane %v11993_v37, %v23372_v51  ;;  %v12045_v31 = vcombine.high %v23765_v46, %v23768_v23  ;;  %v26426_v47 = vld [vmem:[#allocation110_spill] sm:$0xff] }
 0x6d4   : > { %17545 = vmatprep.mubr.msk.f32.mxu1 %vm12956_vm1, %v12824_v45  ;;  %17609 = vmatprep.mubr.msk.f32.mxu0 %vm12956_vm1, %v12825_v27  ;;  %v12061_v15 = vcombine.high %v23787_v26, %v23790_v39  ;;  %v11874_v2 = vcombine.low %v11855_v56, %v11871_v44  ;;  %v11875_v7 = vcombine.high %v11855_v56, %v11871_v44  ;;  %v26427_v56 = vld [vmem:[#allocation109_spill] sm:$0xff] }
 0x6d5   : > { %v12249_v12 = vcombine.high %v23986_v36, %v24009_v55  ;;  %v12265_v52 = vcombine.high %v24023_v43, %v24038_v14  ;;  %v11942_v18 = vcombine.low %v11923_v29, %v11939_v58  ;;  %v11943_v19 = vcombine.high %v11923_v29, %v11939_v58  ;;  %v26428_v44 = vld [vmem:[#allocation93_spill] sm:$0xff] }
 0x6d6   : > { %17546 = vmatmul.mubr.msk.f32.gmra.mrb[30].mxu1 %vm12956_vm1, %v12824_v45  ;;  %17610 = vmatmul.mubr.msk.f32.gmra.mrb[46].mxu0 %vm12956_vm1, %v12825_v27  ;;  %v12010_v53 = vcombine.low %v11991_v13, %v12007_v1  ;;  %v12011_v57 = vcombine.high %v11991_v13, %v12007_v1  ;;  %v12059_v46 = vrot.slane %v12045_v31, %v23372_v51 }
 0x6d7   : > { %17643 = vmatprep.mubr.msk.f32.mxu1 %vm12956_vm1, %v11806_v20  ;;  %17707 = vmatprep.mubr.msk.f32.mxu0 %vm12956_vm1, %v11807_v34  ;;  %v12075_v23 = vrot.slane %v12061_v15, %v23372_v51  ;;  %v12263_v26 = vrot.slane %v12249_v12, %v23372_v51  ;;  %v12113_v39 = vcombine.high %v23834_v54, %v23855_v0 }
 0x6d8   : > { %v12129_v36 = vcombine.high %v23868_v59, %v23874_v22  ;;  %v12279_v55 = vrot.slane %v12265_v52, %v23372_v51  ;;  %v12181_v43 = vcombine.high %v23947_v49, %v23950_v25  ;;  %v12197_v14 = vcombine.high %v23953_v48, %v23958_v32  ;;  %v26421_v59 = vld [vmem:[#allocation100_spill] sm:$0xff]  ;;  %v26423_v32 = vld [vmem:[#allocation105_spill] sm:$0xff]  ;;  %v26429_v52 = vld [vmem:[#allocation114_spill] sm:$0xff] }
 0x6d9   : > { %v12385_v0 = vcombine.high %v24117_v9, %v24124_v16  ;;  %v12401_v22 = vcombine.high %v26421_v59, %v24140_v3  ;;  %v26422_v48 = vld [vmem:[#allocation104_spill] sm:$0xff]  ;;  %v26424_v3 = vld [vmem:[#allocation106_spill] sm:$0xff]  ;;  %v12521_v41 = vcombine.high %v26426_v47, %v24218_v62  ;;  %v12537_v29 = vcombine.high %v26428_v44, %v26427_v56  ;;  %v26434_v59 = vld [vmem:[#allocation111_spill] sm:$0xff] }
 0x6da   : > { %17644 = vmatmul.mubr.msk.f32.vlgmr.msra.gmra.mrb[32].mxu1 %vm12956_vm1, %v11806_v20  ;;  %17708 = vmatmul.mubr.msk.f32.vlgmr.msra.gmra.mrb[48].mxu0 %vm12956_vm1, %v11807_v34  ;;  %v12317_v20 = vcombine.high %v26418_v5, %v26417_v30  ;;  %v26419_v34 = vld [vmem:[#allocation101_spill] sm:$0xff]  ;;  %v24428_v33 = vcombine.low %v12263_v26, %v12279_v55  ;;  %v24430_v54 = vcombine.high %v12263_v26, %v12279_v55 }
 0x6db   : > { %17645 = vmatprep.mubr.msk.f32.mxu1 %vm12956_vm1, %v11874_v2  ;;  %17709 = vmatprep.mubr.msk.f32.mxu0 %vm12956_vm1, %v11875_v7  ;;  %v12333_v28 = vcombine.high %v26420_v38, %v26419_v34  ;;  %v12453_v21 = vcombine.high %v26423_v32, %v26422_v48  ;;  %v12399_v9 = vrot.slane %v12385_v0, %v23372_v51  ;;  %v26431_v26 = vld [vmem:[#allocation113_spill] sm:$0xff] }
 0x6dc   : > { %v12331_v49 = vrot.slane %v12317_v20, %v23372_v51  ;;  %v12415_v16 = vrot.slane %v12401_v22, %v23372_v51  ;;  %v12469_v63 = vcombine.high %v26425_v11, %v26424_v3  ;;  %v12078_v58 = vcombine.low %v12059_v46, %v12075_v23 }
 0x6dd   : > { %v12347_v25 = vrot.slane %v12333_v28, %v23372_v51  ;;  %v12467_v50 = vrot.slane %v12453_v21, %v23372_v51  ;;  %v12079_v13 = vcombine.high %v12059_v46, %v12075_v23  ;;  %v12535_v1 = vrot.slane %v12521_v41, %v23372_v51 }
 0x6de   : > { %17646 = vmatmul.mubr.msk.f32.gmra.mrb[34].mxu1 %vm12956_vm1, %v11874_v2  ;;  %17710 = vmatmul.mubr.msk.f32.gmra.mrb[50].mxu0 %vm12956_vm1, %v11875_v7  ;;  %v12418_v37 = vcombine.low %v12399_v9, %v12415_v16  ;;  %v12419_v45 = vcombine.high %v12399_v9, %v12415_v16  ;;  %v12483_v27 = vrot.slane %v12469_v63, %v23372_v51 }
 0x6df   : > { %17647 = vmatprep.mubr.msk.f32.mxu1 %vm12956_vm1, %v11942_v18  ;;  %17711 = vmatprep.mubr.msk.f32.mxu0 %vm12956_vm1, %v11943_v19  ;;  %v12350_v10 = vcombine.low %v12331_v49, %v12347_v25  ;;  %v12351_v4 = vcombine.high %v12331_v49, %v12347_v25  ;;  %v12551_v15 = vrot.slane %v12537_v29, %v23372_v51  ;;  %v14993_v29 = vld [vmem:[#allocation3 + $0x180] sm:$0xff] }
 0x6e0   : > { %v12486_v62 = vcombine.low %v12467_v50, %v12483_v27  ;;  %v12487_v31 = vcombine.high %v12467_v50, %v12483_v27  ;;  %v12127_v2 = vrot.slane %v12113_v39, %v23372_v51  ;;  %v12143_v7 = vrot.slane %v12129_v36, %v23372_v51 }
 0x6e1   : > { %v12657_v12 = vcombine.high %v24276_v61, %v24282_v17  ;;  %v12554_v46 = vcombine.low %v12535_v1, %v12551_v15  ;;  %v12555_v23 = vcombine.high %v12535_v1, %v12551_v15  ;;  %v12725_v55 = vcombine.high %v26431_v26, %v24314_v35  ;;  %v14978_v15 = vld [vmem:[#allocation3 + $0x108] sm:$0xff] }
 0x6e2   : > { %17648 = vmatmul.mubr.msk.f32.gmra.mrb[36].mxu1 %vm12956_vm1, %v11942_v18  ;;  %17712 = vmatmul.mubr.msk.f32.gmra.mrb[52].mxu0 %vm12956_vm1, %v11943_v19  ;;  %v26430_v18 = vld [vmem:[#allocation115_spill] sm:$0xff]  ;;  %v12741_v30 = vcombine.high %v24319_v40, %v24322_v60  ;;  %v12146_v35 = vcombine.low %v12127_v2, %v12143_v7  ;;  %v12147_v5 = vcombine.high %v12127_v2, %v12143_v7 }
 0x6e3   : > { %17649 = vmatprep.mubr.msk.f32.mxu1 %vm12956_vm1, %v12010_v53  ;;  %17713 = vmatprep.mubr.msk.f32.mxu0 %vm12956_vm1, %v12011_v57  ;;  %v12673_v19 = vcombine.high %v26430_v18, %v26429_v52  ;;  %v12671_v39 = vrot.slane %v12657_v12, %v23372_v51  ;;  %v12739_v17 = vrot.slane %v12725_v55, %v23372_v51 }
 0x6e4   : > { %v12755_v36 = vrot.slane %v12741_v30, %v23372_v51  ;;  %v12195_v40 = vrot.slane %v12181_v43, %v23372_v51  ;;  %v12211_v60 = vrot.slane %v12197_v14, %v23372_v51  ;;  %v26432_v43 = vld [vmem:[#allocation94_spill] sm:$0xff]  ;;  %v26433_v14 = vld [vmem:[#allocation108_spill] sm:$0xff]  ;;  %v12793_v32 = vcombine.high %v24336_v8, %v24342_v42 }
 0x6e5   : > { %v12687_v61 = vrot.slane %v12673_v19, %v23372_v51  ;;  %v12589_v0 = vcombine.high %v26433_v14, %v26432_v43  ;;  %v12809_v21 = vcombine.high %v24345_v24, %v24352_v6  ;;  %v14995_v19 = vld [vmem:[#allocation3 + $0x190] sm:$0xff]  ;;  %v14946_v43 = vld [vmem:[#allocation3 + $0x8] sm:$0xff] }
 0x6e6   : > { %17650 = vmatmul.mubr.msk.f32.gmra.mrb[38].mxu1 %vm12956_vm1, %v12010_v53  ;;  %17714 = vmatmul.mubr.msk.f32.gmra.mrb[54].mxu0 %vm12956_vm1, %v12011_v57  ;;  %v12758_v20 = vcombine.low %v12739_v17, %v12755_v36  ;;  %v12759_v34 = vcombine.high %v12739_v17, %v12755_v36  ;;  %v12214_v38 = vcombine.low %v12195_v40, %v12211_v60 }
 0x6e7   : > { %17651 = vmatprep.mubr.msk.f32.mxu1 %vm12956_vm1, %v12078_v58  ;;  %17715 = vmatprep.mubr.msk.f32.mxu0 %vm12956_vm1, %v12079_v13  ;;  %v12690_v53 = vcombine.low %v12671_v39, %v12687_v61  ;;  %v12691_v57 = vcombine.high %v12671_v39, %v12687_v61  ;;  %v12215_v28 = vcombine.high %v12195_v40, %v12211_v60  ;;  %v14980_v39 = vld [vmem:[#allocation3 + $0x118] sm:$0xff] }
 0x6e8   : > { %v12807_v9 = vrot.slane %v12793_v32, %v23372_v51  ;;  %v12823_v16 = vrot.slane %v12809_v21, %v23372_v51  ;;  %v15000_v32 = vld [vmem:[#allocation3 + $0x1b8] sm:$0xff]  ;;  %v14947_v21 = vld [vmem:[#allocation3 + $0x10] sm:$0xff] }
 0x6ea   : > { %17652 = vmatmul.mubr.msk.f32.gmra.mrb[40].mxu1 %vm12956_vm1, %v12078_v58  ;;  %17716 = vmatmul.mubr.msk.f32.gmra.mrb[56].mxu0 %vm12956_vm1, %v12079_v13  ;;  %v12826_v8 = vcombine.low %v12807_v9, %v12823_v16  ;;  %v12827_v42 = vcombine.high %v12807_v9, %v12823_v16  ;;  %v14994_v58 = vld [vmem:[#allocation3 + $0x188] sm:$0xff]  ;;  %v14977_v13 = vld [vmem:[#allocation3 + $0x100] sm:$0xff]  ;;  %v14948_v9 = vld [vmem:[#allocation3 + $0x18] sm:$0xff] }
 0x6eb   : > { %17653 = vmatprep.mubr.msk.f32.mxu1 %vm12956_vm1, %v12146_v35  ;;  %17717 = vmatprep.mubr.msk.f32.mxu0 %vm12956_vm1, %v12147_v5  ;;  %v18613_v2 = vpack.c.bf16 %v14978_v15, %v14977_v13  ;;  %v15001_v15 = vld [vmem:[#allocation3 + $0x1c0] sm:$0xff] }
 0x6ee   : > { %17654 = vmatmul.mubr.msk.f32.gmra.mrb[42].mxu1 %vm12956_vm1, %v12146_v35  ;;  %17718 = vmatmul.mubr.msk.f32.gmra.mrb[58].mxu0 %vm12956_vm1, %v12147_v5 }
 0x6ef   : > { %17655 = vmatprep.mubr.msk.f32.mxu1 %vm12956_vm1, %v12214_v38  ;;  %17719 = vmatprep.mubr.msk.f32.mxu0 %vm12956_vm1, %v12215_v28 }
 0x6f2   : > { %17656 = vmatmul.mubr.msk.f32.gmra.mrb[44].mxu1 %vm12956_vm1, %v12214_v38  ;;  %17720 = vmatmul.mubr.msk.f32.gmra.mrb[60].mxu0 %vm12956_vm1, %v12215_v28  ;;  %v14998_v38 = vld [vmem:[#allocation3 + $0x1a8] sm:$0xff]  ;;  %v14945_v28 = vld [vmem:[#allocation3] sm:$0xff] }
 0x6f3   : > { %17657 = vmatprep.mubr.msk.f32.mxu1 %vm12956_vm1, %v24428_v33  ;;  %17721 = vmatprep.mubr.msk.f32.mxu0 %vm12956_vm1, %v24430_v54 }
 0x6f6   : > { %17658 = vmatmul.mubr.msk.f32.gmra.mrb[46].mxu1 %vm12956_vm1, %v24428_v33  ;;  %17722 = vmatmul.mubr.msk.f32.gmra.mrb[62].mxu0 %vm12956_vm1, %v24430_v54  ;;  %v26435_v33 = vld [vmem:[#allocation112_spill] sm:$0xff]  ;;  %v12603_v54 = vrot.slane %v12589_v0, %v23372_v51  ;;  %v18581_v0 = vpack.c.bf16 %v14946_v43, %v14945_v28 }
 0x6f7   : > { %17659 = vmatprep.mubr.msk.f32.mxu1 %vm12956_vm1, %v12350_v10  ;;  %17723 = vmatprep.mubr.msk.f32.mxu0 %vm12956_vm1, %v12351_v4  ;;  %v12605_v22 = vcombine.high %v26435_v33, %v26434_v59  ;;  %v14981_v59 = vld [vmem:[#allocation3 + $0x120] sm:$0xff]  ;;  %v14982_v33 = vld [vmem:[#allocation3 + $0x128] sm:$0xff] }
 0x6f9   : > { %v12619_v49 = vrot.slane %v12605_v22, %v23372_v51  ;;  %v18621_v22 = vpack.c.bf16 %v14982_v33, %v14981_v59  ;;  %v14969_v59 = vld [vmem:[#allocation3 + $0xc0] sm:$0xff] }
 0x6fa   : > { %17660 = vmatmul.mubr.msk.f32.gmra.mrb[48].mxu1 %vm12956_vm1, %v12350_v10  ;;  %17724 = vmatmul.mubr.msk.f32.gmra.mrb[64].mxu0 %vm12956_vm1, %v12351_v4 }
 0x6fb   : > { %17661 = vmatprep.mubr.msk.f32.mxu1 %vm12956_vm1, %v12418_v37  ;;  %17725 = vmatprep.mubr.msk.f32.mxu0 %vm12956_vm1, %v12419_v45  ;;  %v12622_v25 = vcombine.low %v12603_v54, %v12619_v49  ;;  %v12623_v48 = vcombine.high %v12603_v54, %v12619_v49  ;;  %v14963_v54 = vld [vmem:[#allocation3 + $0x90] sm:$0xff]  ;;  %v14964_v49 = vld [vmem:[#allocation3 + $0x98] sm:$0xff] }
 0x6fe   : > { %17662 = vmatmul.mubr.msk.f32.gmra.mrb[50].mxu1 %vm12956_vm1, %v12418_v37  ;;  %17726 = vmatmul.mubr.msk.f32.gmra.mrb[66].mxu0 %vm12956_vm1, %v12419_v45 }
 0x6ff   : > { %17663 = vmatprep.mubr.msk.f32.mxu1 %vm12956_vm1, %v12486_v62  ;;  %17727 = vmatprep.mubr.msk.f32.mxu0 %vm12956_vm1, %v12487_v31 }
 0x702   : > { %17664 = vmatmul.mubr.msk.f32.gmra.mrb[52].mxu1 %vm12956_vm1, %v12486_v62  ;;  %17728 = vmatmul.mubr.msk.f32.gmra.mrb[68].mxu0 %vm12956_vm1, %v12487_v31  ;;  %v18611_v31 = vpack.c.bf16 %v14994_v58, %v14993_v29 }
 0x703   : > { %17665 = vmatprep.mubr.msk.f32.mxu1 %vm12956_vm1, %v12554_v46  ;;  %17729 = vmatprep.mubr.msk.f32.mxu0 %vm12956_vm1, %v12555_v23 }
 0x704   : > { %18612 = vmatprep.subr.bf16.mxu0 %v18611_v31  ;;  %v14966_v31 = vld [vmem:[#allocation3 + $0xa8] sm:$0xff] }
 0x705   : > { %18614 = vmatpush3.bf16.msra.mxu0 %v18613_v2 }
 0x706   : > { %17666 = vmatmul.mubr.msk.f32.gmra.mrb[54].mxu1 %vm12956_vm1, %v12554_v46  ;;  %17730 = vmatmul.mubr.msk.f32.gmra.mrb[70].mxu0 %vm12956_vm1, %v12555_v23  ;;  %v14996_v46 = vld [vmem:[#allocation3 + $0x198] sm:$0xff]  ;;  %v14979_v23 = vld [vmem:[#allocation3 + $0x110] sm:$0xff] }
 0x707   : > { %17667 = vmatprep.mubr.msk.f32.mxu1 %vm12956_vm1, %v12622_v25  ;;  %17731 = vmatprep.mubr.msk.f32.mxu0 %vm12956_vm1, %v12623_v48  ;;  %v18615_v30 = vpack.c.bf16 %v14996_v46, %v14995_v19  ;;  %v18617_v61 = vpack.c.bf16 %v14980_v39, %v14979_v23  ;;  %v15002_v19 = vld [vmem:[#allocation3 + $0x1c8] sm:$0xff]  ;;  %v14949_v46 = vld [vmem:[#allocation3 + $0x20] sm:$0xff] }
 0x708   : > { %v14950_v23 = vld [vmem:[#allocation3 + $0x28] sm:$0xff] }
 0x709   : > { %18616 = vmatprep.subr.bf16.mxu0 %v18615_v30  ;;  %v14985_v30 = vld [vmem:[#allocation3 + $0x140] sm:$0xff]  ;;  %v14986_v39 = vld [vmem:[#allocation3 + $0x148] sm:$0xff] }
 0x70a   : > { %17668 = vmatmul.mubr.msk.f32.gmra.mrb[56].mxu1 %vm12956_vm1, %v12622_v25  ;;  %17732 = vmatmul.mubr.msk.f32.gmra.mrb[72].mxu0 %vm12956_vm1, %v12623_v48  ;;  %v14999_v25 = vld [vmem:[#allocation3 + $0x1b0] sm:$0xff]  ;;  %v18583_v48 = vpack.c.bf16 %v14964_v49, %v14963_v54  ;;  %v15005_v54 = vld [vmem:[#allocation3 + $0x1e0] sm:$0xff]  ;;  %v15006_v49 = vld [vmem:[#allocation3 + $0x1e8] sm:$0xff] }
 0x70b   : > { %17669 = vmatprep.mubr.msk.f32.mxu1 %vm12956_vm1, %v12690_v53  ;;  %17733 = vmatprep.mubr.msk.f32.mxu0 %vm12956_vm1, %v12691_v57 }
 0x70c   : > { %18618 = vmatpush3.bf16.msra.mxu0 %v18617_v61  ;;  %v18629_v61 = vpack.c.bf16 %v14986_v39, %v14985_v30  ;;  %v14991_v39 = vld [vmem:[#allocation3 + $0x170] sm:$0xff] }
 0x70e   : > { %17670 = vmatmul.mubr.msk.f32.gmra.mrb[58].mxu1 %vm12956_vm1, %v12690_v53  ;;  %17734 = vmatmul.mubr.msk.f32.gmra.mrb[74].mxu0 %vm12956_vm1, %v12691_v57  ;;  %v14961_v53 = vld [vmem:[#allocation3 + $0x80] sm:$0xff]  ;;  %v14962_v57 = vld [vmem:[#allocation3 + $0x88] sm:$0xff] }
 0x70f   : > { %17671 = vmatprep.mubr.msk.f32.mxu1 %vm12956_vm1, %v12758_v20  ;;  %17735 = vmatprep.mubr.msk.f32.mxu0 %vm12956_vm1, %v12759_v34 }
 0x712   : > { %17672 = vmatmul.mubr.msk.f32.gmra.mrb[60].mxu1 %vm12956_vm1, %v12758_v20  ;;  %17736 = vmatmul.mubr.msk.f32.gmra.mrb[76].mxu0 %vm12956_vm1, %v12759_v34  ;;  %v14997_v20 = vld [vmem:[#allocation3 + $0x1a0] sm:$0xff]  ;;  %v18579_v34 = vpack.c.bf16 %v14962_v57, %v14961_v53  ;;  %v15003_v53 = vld [vmem:[#allocation3 + $0x1d0] sm:$0xff] }
 0x713   : > { %17673 = vmatprep.mubr.msk.f32.mxu1 %vm12956_vm1, %v12826_v8  ;;  %17737 = vmatprep.mubr.msk.f32.mxu0 %vm12956_vm1, %v12827_v42  ;;  %v18619_v14 = vpack.c.bf16 %v14998_v38, %v14997_v20  ;;  %v15004_v20 = vld [vmem:[#allocation3 + $0x1d8] sm:$0xff] }
 0x714   : > { %18580 = vmatprep.subr.bf16.mxu1 %v18579_v34  ;;  %v14951_v34 = vld [vmem:[#allocation3 + $0x30] sm:$0xff]  ;;  %v14952_v38 = vld [vmem:[#allocation3 + $0x38] sm:$0xff]  ;;  %v18631_v28 = vpack.c.bf16 %v15004_v20, %v15003_v53  ;;  %v14973_v53 = vld [vmem:[#allocation3 + $0xe0] sm:$0xff] }
 0x715   : > { %18620 = vmatprep.subr.bf16.mxu0 %v18619_v14  ;;  %18582 = vmatpush3.bf16.msra.mxu1 %v18581_v0  ;;  %v18593_v43 = vpack.c.bf16 %v14952_v38, %v14951_v34  ;;  %v14987_v14 = vld [vmem:[#allocation3 + $0x150] sm:$0xff]  ;;  %v14988_v0 = vld [vmem:[#allocation3 + $0x158] sm:$0xff]  ;;  %v14957_v20 = vld [vmem:[#allocation3 + $0x60] sm:$0xff] }
 0x716   : > { %17674 = vmatmul.mubr.msk.f32.gmra.mrb[62].mxu1 %vm12956_vm1, %v12826_v8  ;;  %17738 = vmatmul.mubr.msk.f32.gmra.mrb[78].mxu0 %vm12956_vm1, %v12827_v42  ;;  %v18623_v42 = vpack.c.bf16 %v15000_v32, %v14999_v25  ;;  %v18633_v33 = vpack.c.bf16 %v14988_v0, %v14987_v14  ;;  %v14958_v38 = vld [vmem:[#allocation3 + $0x68] sm:$0xff] }
 0x717   : > { %18622 = vmatpush3.bf16.msra.mxu0 %v18621_v22  ;;  %18584 = vmatprep.subr.bf16.mxu1 %v18583_v48  ;;  %v14970_v22 = vld [vmem:[#allocation3 + $0xc8] sm:$0xff] }
 0x718   : > { %18624 = vmatprep.subr.bf16.mxu0 %v18623_v42  ;;  %v18595_v32 = vpack.c.bf16 %v14970_v22, %v14969_v59  ;;  %v14954_v42 = vld [vmem:[#allocation3 + $0x48] sm:$0xff]  ;;  %v18605_v59 = vpack.c.bf16 %v14958_v38, %v14957_v20 }
 0x733   : > { %v24544_v24 = vpop.f32.mrb[16].mxu0 }
 0x734   : > { %v24548_v3 = vpop.f32.mrb[17].mxu0 }
 0x735   : > { %v24542_v51 = vpop.f32.mrb[0].mxu1  ;;  %v14225_v11 = vmax.f32 %v24544_v24, %v24548_v3 }
 0x736   : > { %v24546_v6 = vpop.f32.mrb[1].mxu1 }
 0x737   : > { %v14177_v63 = vmax.f32 %v24542_v51, %v24546_v6  ;;  %14226 = vmax.xlane.f32.xlu0 %v14225_v11  ;;  %v18585_v11 = vpack.c.bf16 %v14948_v9, %v14947_v21  ;;  %v18635_v21 = vpack.c.bf16 %v15006_v49, %v15005_v54  ;;  %v14953_v9 = vld [vmem:[#allocation3 + $0x40] sm:$0xff]  ;;  %v14975_v54 = vld [vmem:[#allocation3 + $0xf0] sm:$0xff]  ;;  %v14976_v49 = vld [vmem:[#allocation3 + $0xf8] sm:$0xff] }
 0x739   : > { %v24554_v10 = vpop.f32.mrb[2].mxu1  ;;  %v24556_v4 = vpop.f32.mrb[18].mxu0  ;;  %18586 = vmatpush3.bf16.msra.mxu1 %v18585_v11  ;;  %v14989_v11 = vld [vmem:[#allocation3 + $0x160] sm:$0xff] }
 0x73a   : > { %v24558_v50 = vpop.f32.mrb[3].mxu1  ;;  %v24560_v47 = vpop.f32.mrb[19].mxu0 }
 0x73b   : > { %v14228_v41 = vmax.f32 %v24556_v4, %v24560_v47  ;;  %v14180_v37 = vmax.f32 %v24554_v10, %v24558_v50 }
 0x73d   : > { %14229 = vmax.xlane.f32.xlu1 %v14228_v41  ;;  %v14984_v41 = vld [vmem:[#allocation3 + $0x138] sm:$0xff] }
 0x741   : > { %14178 = vmax.xlane.f32.xlu1 %v14177_v63  ;;  %v14983_v63 = vld [vmem:[#allocation3 + $0x130] sm:$0xff] }
 0x742   : > { %v18625_v58 = vpack.c.bf16 %v14984_v41, %v14983_v63 }
 0x744   : > { %18626 = vmatpush3.bf16.msra.mxu0 %v18625_v58  ;;  %v18597_v58 = vpack.c.bf16 %v14954_v42, %v14953_v9  ;;  %v14960_v9 = vld [vmem:[#allocation3 + $0x78] sm:$0xff] }
 0x745   : > { %14181 = vmax.xlane.f32.xlu1 %v14180_v37 }
 0x746   : > { %v24566_v45 = vpop.f32.mrb[4].mxu1 }
 0x747   : > { %v24568_v27 = vpop.f32.mrb[20].mxu0  ;;  %v24570_v56 = vpop.f32.mrb[5].mxu1 }
 0x748   : > { %v24572_v44 = vpop.f32.mrb[21].mxu0  ;;  %v14183_v62 = vmax.f32 %v24566_v45, %v24570_v56 }
 0x749   : > { %v14231_v1 = vmax.f32 %v24568_v27, %v24572_v44 }
 0x74a   : > { %14184 = vmax.xlane.f32.xlu1 %v14183_v62  ;;  %v14965_v62 = vld [vmem:[#allocation3 + $0xa0] sm:$0xff] }
 0x74b   : > { %14232 = vmax.xlane.f32.xlu0 %v14231_v1  ;;  %v18587_v2 = vpack.c.bf16 %v14966_v31, %v14965_v62 }
 0x74d   : > { %18588 = vmatprep.subr.bf16.mxu1 %v18587_v2  ;;  %v14972_v2 = vld [vmem:[#allocation3 + $0xd8] sm:$0xff] }
 0x750   : > { %v24578_v7 = vpop.f32.mrb[6].mxu1 }
 0x751   : > { %v24580_v12 = vpop.f32.mrb[22].mxu0  ;;  %v24582_v52 = vpop.f32.mrb[7].mxu1 }
 0x752   : > { %v24584_v18 = vpop.f32.mrb[23].mxu0  ;;  %v14186_v55 = vmax.f32 %v24578_v7, %v24582_v52 }
 0x753   : > { %v14234_v26 = vmax.f32 %v24580_v12, %v24584_v18 }
 0x754   : > { %14187 = vmax.xlane.f32.xlu1 %v14186_v55  ;;  %v18589_v55 = vpack.c.bf16 %v14950_v23, %v14949_v46  ;;  %v15008_v23 = vld [vmem:[#allocation3 + $0x1f8] sm:$0xff] }
 0x755   : > { %14235 = vmax.xlane.f32.xlu0 %v14234_v26  ;;  %v18627_v26 = vpack.c.bf16 %v15002_v19, %v15001_v15  ;;  %v14971_v15 = vld [vmem:[#allocation3 + $0xd0] sm:$0xff] }
 0x756   : > { %18590 = vmatpush3.bf16.msra.mxu1 %v18589_v55  ;;  %v15007_v19 = vld [vmem:[#allocation3 + $0x1f0] sm:$0xff]  ;;  %v18599_v46 = vpack.c.bf16 %v14972_v2, %v14971_v15  ;;  %v14956_v55 = vld [vmem:[#allocation3 + $0x58] sm:$0xff] }
 0x757   : > { %v24590_v17 = vpop.f32.mrb[8].mxu1  ;;  %18628 = vmatprep.subr.bf16.mxu0 %v18627_v26  ;;  %v14955_v26 = vld [vmem:[#allocation3 + $0x50] sm:$0xff]  ;;  %v18639_v30 = vpack.c.bf16 %v15008_v23, %v15007_v19 }
 0x758   : > { %v24592_v36 = vpop.f32.mrb[24].mxu0  ;;  %v24594_v35 = vpop.f32.mrb[9].mxu1  ;;  %18630 = vmatpush3.bf16.msra.mxu0 %v18629_v61  ;;  %v14992_v61 = vld [vmem:[#allocation3 + $0x178] sm:$0xff] }
 0x759   : > { %v24596_v5 = vpop.f32.mrb[25].mxu0  ;;  %v14189_v40 = vmax.f32 %v24590_v17, %v24594_v35  ;;  %18632 = vmatprep.subr.bf16.mxu0 %v18631_v28 }
 0x75a   : > { %v14237_v60 = vmax.f32 %v24592_v36, %v24596_v5 }
 0x75b   : > { %14190 = vmax.xlane.f32.xlu1 %v14189_v40  ;;  %v14967_v40 = vld [vmem:[#allocation3 + $0xb0] sm:$0xff] }
 0x75c   : > { %14238 = vmax.xlane.f32.xlu0 %v14237_v60  ;;  %v14968_v60 = vld [vmem:[#allocation3 + $0xb8] sm:$0xff]  ;;  %18634 = vmatpush3.bf16.msra.mxu0 %v18633_v33 }
 0x75d   : > { %v18591_v57 = vpack.c.bf16 %v14968_v60, %v14967_v40  ;;  %18636 = vmatprep.subr.bf16.mxu0 %v18635_v21  ;;  %v18601_v40 = vpack.c.bf16 %v14956_v55, %v14955_v26  ;;  %v18641_v60 = vpack.c.bf16 %v14992_v61, %v14991_v39  ;;  %v18607_v21 = vpack.c.bf16 %v14976_v49, %v14975_v54 }
 0x75f   : > { %18592 = vmatprep.subr.bf16.mxu1 %v18591_v57  ;;  %v14974_v57 = vld [vmem:[#allocation3 + $0xe8] sm:$0xff] }
 0x760   : > { %18594 = vmatpush3.bf16.msra.mxu1 %v18593_v43  ;;  %v18603_v34 = vpack.c.bf16 %v14974_v57, %v14973_v53 }
 0x761   : > { %v24602_v16 = vpop.f32.mrb[10].mxu1  ;;  %v24604_v8 = vpop.f32.mrb[26].mxu0  ;;  %18596 = vmatprep.subr.bf16.mxu1 %v18595_v32  ;;  %v14959_v32 = vld [vmem:[#allocation3 + $0x70] sm:$0xff] }
 0x762   : > { %v24606_v37 = vpop.f32.mrb[11].mxu1  ;;  %v24608_v29 = vpop.f32.mrb[27].mxu0  ;;  %v18609_v42 = vpack.c.bf16 %v14960_v9, %v14959_v32 }
 0x763   : > { %v14192_v13 = vmax.f32 %v24602_v16, %v24606_v37  ;;  %v14240_v1 = vmax.f32 %v24604_v8, %v24608_v29 }
 0x764   : > { %18598 = vmatpush3.bf16.msra.mxu1 %v18597_v58 }
 0x765   : > { %14193 = vmax.xlane.f32.xlu1 %v14192_v13  ;;  %14241 = vmax.xlane.f32.xlu0 %v14240_v1  ;;  %v14990_v13 = vld [vmem:[#allocation3 + $0x168] sm:$0xff] }
 0x766   : > { %v18637_v31 = vpack.c.bf16 %v14990_v13, %v14989_v11  ;;  %18600 = vmatprep.subr.bf16.mxu1 %v18599_v46 }
 0x768   : > { %18638 = vmatpush3.bf16.msra.mxu0 %v18637_v31  ;;  %18602 = vmatpush3.bf16.msra.mxu1 %v18601_v40  ;;  %v15025_v40 = vld [vmem:[#allocation3 + $0x280] sm:$0xff] }
 0x769   : > { %18640 = vmatprep.subr.bf16.mxu0 %v18639_v30  ;;  %18604 = vmatprep.subr.bf16.mxu1 %v18603_v34 }
 0x76b   : > { %v24614_v25 = vpop.f32.mrb[12].mxu1  ;;  %v24616_v48 = vpop.f32.mrb[28].mxu0 }
 0x76c   : > { %v24618_v63 = vpop.f32.mrb[13].mxu1  ;;  %v24620_v41 = vpop.f32.mrb[29].mxu0  ;;  %18642 = vmatpush3.bf16.msra.mxu0 %v18641_v60  ;;  %18606 = vmatpush3.bf16.msra.mxu1 %v18605_v59  ;;  %v15026_v60 = vld [vmem:[#allocation3 + $0x288] sm:$0xff] }
 0x76d   : > { %v14195_v1 = vmax.f32 %v24614_v25, %v24618_v63  ;;  %v14243_v62 = vmax.f32 %v24616_v48, %v24620_v41  ;;  %18608 = vmatprep.subr.bf16.mxu1 %v18607_v21  ;;  %v18643_v20 = vpack.c.bf16 %v15026_v60, %v15025_v40 }
 0x76f   : > { %14196 = vmax.xlane.f32.xlu1 %v14195_v1  ;;  %14244 = vmax.xlane.f32.xlu0 %v14243_v62 }
 0x770   : > { %18610 = vmatpush3.bf16.msra.mxu1 %v18609_v42  ;;  %18644 = vmatprep.subr.bf16.mxu0 %v18643_v20 }
 0x771   : > { %18755 = vmatprep.subr.bf16.mxu1 %v18643_v20 }
 0x774   : > { %v24626_v28 = vpop.f32.mrb[14].mxu1  ;;  %v24628_v43 = vpop.f32.mrb[30].mxu0 }
 0x775   : > { %26436 = vst [vmem:[#allocation119_spill] sm:$0xff] %v24626_v28  ;;  %26437 = vst [vmem:[#allocation118_spill] sm:$0xff] %v24628_v43  ;;  %v24630_v14 = vpop.f32.mrb[15].mxu1  ;;  %v24632_v0 = vpop.f32.mrb[31].mxu0 }
 0x776   : > { %26438 = vst [vmem:[#allocation117_spill] sm:$0xff] %v24630_v14  ;;  %26439 = vst [vmem:[#allocation116_spill] sm:$0xff] %v24632_v0  ;;  %v14198_v33 = vmax.f32 %v24626_v28, %v24630_v14  ;;  %v14246_v22 = vmax.f32 %v24628_v43, %v24632_v0 }
 0x778   : > { %14199 = vmax.xlane.f32.xlu1 %v14198_v33  ;;  %14247 = vmax.xlane.f32.xlu0 %v14246_v22 }
 0x779   : > { %v24638_v11 = vpop.f32.mrb[16].mxu1  ;;  %v24640_v58 = vpop.f32.mrb[32].mxu0 }
 0x77a   : > { %26440 = vst [vmem:[#allocation123_spill] sm:$0xff] %v24638_v11  ;;  %26441 = vst [vmem:[#allocation122_spill] sm:$0xff] %v24640_v58  ;;  %v24642_v13 = vpop.f32.mrb[17].mxu1  ;;  %v24644_v1 = vpop.f32.mrb[33].mxu0 }
 0x77b   : > { %26442 = vst [vmem:[#allocation95_spill] sm:$0xff] %v24642_v13  ;;  %26443 = vst [vmem:[#allocation121_spill] sm:$0xff] %v24644_v1  ;;  %v14201_v62 = vmax.f32 %v24638_v11, %v24642_v13  ;;  %v14249_v31 = vmax.f32 %v24640_v58, %v24644_v1 }
 0x77d   : > { %14202 = vmax.xlane.f32.xlu1 %v14201_v62  ;;  %14250 = vmax.xlane.f32.xlu0 %v14249_v31 }
 0x783   : > { %v24650_v15 = vpop.f32.mrb[18].mxu1  ;;  %v24652_v2 = vpop.f32.mrb[34].mxu0 }
 0x784   : > { %26444 = vst [vmem:[#allocation120_spill] sm:$0xff] %v24650_v15  ;;  %26445 = vst [vmem:[#allocation96_spill] sm:$0xff] %v24652_v2  ;;  %v24654_v19 = vpop.f32.mrb[19].mxu1  ;;  %v24656_v46 = vpop.f32.mrb[35].mxu0 }
 0x785   : > { %26446 = vst [vmem:[#allocation125_spill] sm:$0xff] %v24654_v19  ;;  %26447 = vst [vmem:[#allocation124_spill] sm:$0xff] %v24656_v46  ;;  %v14204_v23 = vmax.f32 %v24650_v15, %v24654_v19  ;;  %v14252_v26 = vmax.f32 %v24652_v2, %v24656_v46 }
 0x787   : > { %14205 = vmax.xlane.f32.xlu1 %v14204_v23  ;;  %14253 = vmax.xlane.f32.xlu0 %v14252_v26 }
 0x78a   : > { %v24662_v55 = vpop.f32.mrb[20].mxu1 }
 0x78b   : > { %26448 = vst [vmem:[#allocation97_spill] sm:$0xff] %v24662_v55  ;;  %v24664_v30 = vpop.f32.mrb[36].mxu0  ;;  %v24666_v39 = vpop.f32.mrb[21].mxu1 }
 0x78c   : > { %26449 = vst [vmem:[#allocation99_spill] sm:$0xff] %v24664_v30  ;;  %26450 = vst [vmem:[#allocation98_spill] sm:$0xff] %v24666_v39  ;;  %v24668_v61 = vpop.f32.mrb[37].mxu0  ;;  %v14207_v53 = vmax.f32 %v24662_v55, %v24666_v39 }
 0x78d   : > { %26451 = vst [vmem:[#allocation130_spill] sm:$0xff] %v24668_v61  ;;  %v14255_v57 = vmax.f32 %v24664_v30, %v24668_v61 }
 0x78e   : > { %14208 = vmax.xlane.f32.xlu1 %v14207_v53 }
 0x78f   : > { %14256 = vmax.xlane.f32.xlu0 %v14255_v57 }
 0x793   : > { %v24674_v34 = vpop.f32.mrb[22].mxu1  ;;  %v24676_v38 = vpop.f32.mrb[38].mxu0 }
 0x794   : > { %26452 = vst [vmem:[#allocation131_spill] sm:$0xff] %v24674_v34  ;;  %26453 = vst [vmem:[#allocation127_spill] sm:$0xff] %v24676_v38  ;;  %v24678_v59 = vpop.f32.mrb[23].mxu1  ;;  %v24680_v33 = vpop.f32.mrb[39].mxu0 }
 0x795   : > { %26454 = vst [vmem:[#allocation126_spill] sm:$0xff] %v24678_v59  ;;  %26455 = vst [vmem:[#allocation129_spill] sm:$0xff] %v24680_v33  ;;  %v14210_v22 = vmax.f32 %v24674_v34, %v24678_v59  ;;  %v14258_v54 = vmax.f32 %v24676_v38, %v24680_v33 }
 0x797   : > { %14211 = vmax.xlane.f32.xlu1 %v14210_v22  ;;  %14259 = vmax.xlane.f32.xlu0 %v14258_v54 }
 0x79c   : > { %v24686_v49 = vpop.f32.mrb[24].mxu1  ;;  %v24688_v32 = vpop.f32.mrb[40].mxu0 }
 0x79d   : > { %26456 = vst [vmem:[#allocation128_spill] sm:$0xff] %v24686_v49  ;;  %26457 = vst [vmem:[#allocation103_spill] sm:$0xff] %v24688_v32  ;;  %v24690_v21 = vpop.f32.mrb[25].mxu1  ;;  %v24692_v9 = vpop.f32.mrb[41].mxu0 }
 0x79e   : > { %26458 = vst [vmem:[#allocation92_spill] sm:$0xff] %v24690_v21  ;;  %26459 = vst [vmem:[#allocation101_spill] sm:$0xff] %v24692_v9  ;;  %v14213_v42 = vmax.f32 %v24686_v49, %v24690_v21  ;;  %v14261_v62 = vmax.f32 %v24688_v32, %v24692_v9 }
 0x7a0   : > { %14214 = vmax.xlane.f32.xlu1 %v14213_v42  ;;  %14262 = vmax.xlane.f32.xlu0 %v14261_v62 }
 0x7a1   : > { %v24698_v31 = vpop.f32.mrb[26].mxu1  ;;  %v24700_v23 = vpop.f32.mrb[42].mxu0 }
 0x7a2   : > { %26460 = vst [vmem:[#allocation102_spill] sm:$0xff] %v24698_v31  ;;  %26461 = vst [vmem:[#allocation100_spill] sm:$0xff] %v24700_v23  ;;  %v24702_v26 = vpop.f32.mrb[27].mxu1  ;;  %v24704_v40 = vpop.f32.mrb[43].mxu0 }
 0x7a3   : > { %26462 = vst [vmem:[#allocation104_spill] sm:$0xff] %v24702_v26  ;;  %26463 = vst [vmem:[#allocation105_spill] sm:$0xff] %v24704_v40  ;;  %v14216_v60 = vmax.f32 %v24698_v31, %v24702_v26  ;;  %v14264_v53 = vmax.f32 %v24700_v23, %v24704_v40 }
 0x7a5   : > { %14217 = vmax.xlane.f32.xlu1 %v14216_v60  ;;  %14265 = vmax.xlane.f32.xlu0 %v14264_v53  ;;  %v24710_v57 = vpop.f32.mrb[28].mxu1  ;;  %v24712_v20 = vpop.f32.mrb[44].mxu0 }
 0x7a6   : > { %26464 = vst [vmem:[#allocation106_spill] sm:$0xff] %v24710_v57  ;;  %26465 = vst [vmem:[#allocation107_spill] sm:$0xff] %v24712_v20  ;;  %v24714_v22 = vpop.f32.mrb[29].mxu1  ;;  %v24716_v54 = vpop.f32.mrb[45].mxu0 }
 0x7a7   : > { %26466 = vst [vmem:[#allocation110_spill] sm:$0xff] %v24714_v22  ;;  %26467 = vst [vmem:[#allocation109_spill] sm:$0xff] %v24716_v54  ;;  %v14267_v42 = vmax.f32 %v24712_v20, %v24716_v54  ;;  %v14219_v62 = vmax.f32 %v24710_v57, %v24714_v22 }
 0x7a9   : > { %14268 = vmax.xlane.f32.xlu0 %v14267_v42  ;;  %14220 = vmax.xlane.f32.xlu1 %v14219_v62  ;;  %v24722_v26 = vpop.f32.mrb[30].mxu1  ;;  %v24724_v60 = vpop.f32.mrb[46].mxu0 }
 0x7aa   : > { %26468 = vst [vmem:[#allocation93_spill] sm:$0xff] %v24722_v26  ;;  %26469 = vst [vmem:[#allocation114_spill] sm:$0xff] %v24724_v60  ;;  %v24726_v53 = vpop.f32.mrb[31].mxu1  ;;  %v24728_v40 = vpop.f32.mrb[47].mxu0 }
 0x7ab   : > { %26470 = vst [vmem:[#allocation115_spill] sm:$0xff] %v24726_v53  ;;  %26471 = vst [vmem:[#allocation113_spill] sm:$0xff] %v24728_v40  ;;  %v14270_v23 = vmax.f32 %v24724_v60, %v24728_v40  ;;  %v14222_v31 = vmax.f32 %v24722_v26, %v24726_v53 }
 0x7ad   : > { %14271 = vmax.xlane.f32.xlu0 %v14270_v23  ;;  %v24734_v54 = vpop.f32.mrb[48].mxu0  ;;  %14223 = vmax.xlane.f32.xlu1 %v14222_v31  ;;  %v24736_v42 = vpop.f32.mrb[32].mxu1 }
 0x7ae   : > { %26472 = vst [vmem:[#allocation94_spill] sm:$0xff] %v24734_v54  ;;  %26473 = vst [vmem:[#allocation108_spill] sm:$0xff] %v24736_v42  ;;  %v24738_v62 = vpop.f32.mrb[33].mxu1  ;;  %v24740_v20 = vpop.f32.mrb[49].mxu0 }
 0x7af   : > { %26474 = vst [vmem:[#allocation111_spill] sm:$0xff] %v24738_v62  ;;  %26475 = vst [vmem:[#allocation112_spill] sm:$0xff] %v24740_v20  ;;  %v14273_v22 = vmax.f32 %v24736_v42, %v24738_v62 }
 0x7b1   : > { %v24746_v40 = vpop.f32.mrb[50].mxu0  ;;  %14274 = vmax.xlane.f32.xlu0 %v14273_v22  ;;  %v24748_v60 = vpop.f32.mrb[34].mxu1 }
 0x7b2   : > { %26476 = vst [vmem:[#allocation132_spill] sm:$0xff] %v24746_v40  ;;  %26477 = vst [vmem:[#allocation133_spill] sm:$0xff] %v24748_v60  ;;  %v24750_v23 = vpop.f32.mrb[35].mxu1  ;;  %v24752_v31 = vpop.f32.mrb[51].mxu0 }
 0x7b3   : > { %26478 = vst [vmem:[#allocation134_spill] sm:$0xff] %v24750_v23  ;;  %26479 = vst [vmem:[#allocation135_spill] sm:$0xff] %v24752_v31  ;;  %v14276_v53 = vmax.f32 %v24748_v60, %v24750_v23 }
 0x7b5   : > { %v24758_v9 = vpop.f32.mrb[52].mxu0  ;;  %14277 = vmax.xlane.f32.xlu0 %v14276_v53  ;;  %v24760_v62 = vpop.f32.mrb[36].mxu1 }
 0x7b6   : > { %26480 = vst [vmem:[#allocation136_spill] sm:$0xff] %v24758_v9  ;;  %26481 = vst [vmem:[#allocation137_spill] sm:$0xff] %v24760_v62  ;;  %v24762_v57 = vpop.f32.mrb[37].mxu1  ;;  %v24764_v22 = vpop.f32.mrb[53].mxu0 }
 0x7b7   : > { %26482 = vst [vmem:[#allocation138_spill] sm:$0xff] %v24762_v57  ;;  %26483 = vst [vmem:[#allocation139_spill] sm:$0xff] %v24764_v22  ;;  %v14279_v42 = vmax.f32 %v24760_v62, %v24762_v57 }
 0x7b9   : > { %v24770_v21 = vpop.f32.mrb[54].mxu0  ;;  %14280 = vmax.xlane.f32.xlu0 %v14279_v42  ;;  %v24772_v23 = vpop.f32.mrb[38].mxu1 }
 0x7ba   : > { %26484 = vst [vmem:[#allocation140_spill] sm:$0xff] %v24770_v21  ;;  %26485 = vst [vmem:[#allocation141_spill] sm:$0xff] %v24772_v23  ;;  %v24774_v26 = vpop.f32.mrb[39].mxu1  ;;  %v24776_v53 = vpop.f32.mrb[55].mxu0 }
 0x7bb   : > { %26486 = vst [vmem:[#allocation142_spill] sm:$0xff] %v24774_v26  ;;  %26487 = vst [vmem:[#allocation143_spill] sm:$0xff] %v24776_v53  ;;  %v14282_v60 = vmax.f32 %v24772_v23, %v24774_v26 }
 0x7bd   : > { %v24782_v33 = vpop.f32.mrb[56].mxu0  ;;  %14283 = vmax.xlane.f32.xlu0 %v14282_v60  ;;  %v24784_v57 = vpop.f32.mrb[40].mxu1 }
 0x7be   : > { %26488 = vst [vmem:[#allocation144_spill] sm:$0xff] %v24782_v33  ;;  %26489 = vst [vmem:[#allocation145_spill] sm:$0xff] %v24784_v57  ;;  %v24786_v32 = vpop.f32.mrb[41].mxu1  ;;  %v24788_v42 = vpop.f32.mrb[57].mxu0 }
 0x7bf   : > { %26490 = vst [vmem:[#allocation146_spill] sm:$0xff] %v24786_v32  ;;  %26491 = vst [vmem:[#allocation147_spill] sm:$0xff] %v24788_v42  ;;  %v14285_v38 = vmax.f32 %v24784_v57, %v24786_v32 }
 0x7c1   : > { %v24794_v59 = vpop.f32.mrb[58].mxu0  ;;  %14286 = vmax.xlane.f32.xlu1 %v14285_v38  ;;  %v24796_v26 = vpop.f32.mrb[42].mxu1 }
 0x7c2   : > { %26492 = vst [vmem:[#allocation148_spill] sm:$0xff] %v24796_v26  ;;  %v24798_v49 = vpop.f32.mrb[43].mxu1  ;;  %v24800_v60 = vpop.f32.mrb[59].mxu0 }
 0x7c3   : > { %26493 = vst [vmem:[#allocation149_spill] sm:$0xff] %v24798_v49  ;;  %v14288_v34 = vmax.f32 %v24796_v26, %v24798_v49 }
 0x7c4   : > { %v14227_v19 = vpop.xlane.xlu0 %14226 }
 0x7c5   : > { %v24806_v61 = vpop.f32.mrb[60].mxu0  ;;  %14289 = vmax.xlane.f32.xlu0 %v14288_v34  ;;  %v24808_v62 = vpop.f32.mrb[44].mxu1 }
 0x7c6   : > { %26494 = vst [vmem:[#allocation150_spill] sm:$0xff] %v24808_v62  ;;  %v24810_v32 = vpop.f32.mrb[45].mxu1  ;;  %v24812_v38 = vpop.f32.mrb[61].mxu0 }
 0x7c7   : > { %26495 = vst [vmem:[#allocation151_spill] sm:$0xff] %v24810_v32  ;;  %v14291_v30 = vmax.f32 %v24808_v62, %v24810_v32 }
 0x7c9   : > { %v24818_v39 = vpop.f32.mrb[62].mxu0  ;;  %14292 = vmax.xlane.f32.xlu1 %v14291_v30  ;;  %v24820_v23 = vpop.f32.mrb[46].mxu1 }
 0x7ca   : > { %26496 = vst [vmem:[#allocation152_spill] sm:$0xff] %v24820_v23  ;;  %v24822_v49 = vpop.f32.mrb[47].mxu1  ;;  %v24824_v34 = vpop.f32.mrb[63].mxu0 }
 0x7cb   : > { %26497 = vst [vmem:[#allocation153_spill] sm:$0xff] %v24822_v49  ;;  %v14294_v55 = vmax.f32 %v24820_v23, %v24822_v49  ;;  %v14402_v23 = vsub.f32 %v24548_v3, %v14227_v19  ;;  %v14230_v13 = vpop.xlane.xlu1 %14229 }
 0x7cc   : > { %v14404_v3 = vsub.f32 %v24560_v47, %v14230_v13 }
 0x7cd   : > { %v24830_v46 = vpop.f32.mrb[64].mxu0  ;;  %14295 = vmax.xlane.f32.xlu0 %v14294_v55  ;;  %v24832_v57 = vpop.f32.mrb[48].mxu1  ;;  %v14401_v55 = vsub.f32 %v24544_v24, %v14227_v19  ;;  %v14563_v58 = vmul.f32 1.442695, %v14402_v23  ;;  %v14403_v24 = vsub.f32 %v24556_v4, %v14230_v13 }
 0x7ce   : > { %26498 = vst [vmem:[#allocation154_spill] sm:$0xff] %v24832_v57  ;;  %v24834_v32 = vpop.f32.mrb[49].mxu1  ;;  %v24836_v30 = vpop.f32.mrb[65].mxu0 }
 0x7cf   : > { %26499 = vst [vmem:[#allocation155_spill] sm:$0xff] %v24834_v32  ;;  %v14297_v2 = vmax.f32 %v24832_v57, %v24834_v32  ;;  %v14561_v57 = vmul.f32 1.442695, %v14401_v55  ;;  %v14565_v62 = vmul.f32 1.442695, %v14403_v24  ;;  %v15010_v24 = vld [vmem:[#allocation3 + $0x208] sm:$0xff] }
 0x7d1   : > { %v24842_v26 = vpop.f32.mrb[66].mxu0  ;;  %14298 = vmax.xlane.f32.xlu1 %v14297_v2  ;;  %v24844_v49 = vpop.f32.mrb[50].mxu1  ;;  %18974 = vpow2.f32 %v14561_v57 }
 0x7d2   : > { %26500 = vst [vmem:[#allocation156_spill] sm:$0xff] %v24844_v49  ;;  %v24848_v15 = vpop.f32.mrb[51].mxu1  ;;  %v24850_v1 = vpop.f32.mrb[67].mxu0  ;;  %18976 = vpow2.f32 %v14563_v58 }
 0x7d3   : > { %26501 = vst [vmem:[#allocation157_spill] sm:$0xff] %v24848_v15  ;;  %v14300_v32 = vmax.f32 %v24844_v49, %v24848_v15  ;;  %v14179_v15 = vpop.xlane.xlu1 %14178  ;;  %18978 = vpow2.f32 %v14565_v62 }
 0x7d4   : > { %v14369_v47 = vsub.f32 %v24542_v51, %v14179_v15  ;;  %v14370_v13 = vsub.f32 %v24546_v6, %v14179_v15  ;;  %v26506_v51 = vmax.f32 %v24734_v54, %v24740_v20  ;;  %v15028_v54 = vld [vmem:[#allocation3 + $0x298] sm:$0xff] }
 0x7d5   : > { %v24856_v2 = vpop.f32.mrb[68].mxu0  ;;  %14301 = vmax.xlane.f32.xlu0 %v14300_v32  ;;  %v24858_v11 = vpop.f32.mrb[52].mxu1  ;;  %v14567_v32 = vmul.f32 1.442695, %v14404_v3 }
 0x7d6   : > { %26502 = vst [vmem:[#allocation158_spill] sm:$0xff] %v24858_v11  ;;  %v24862_v19 = vpop.f32.mrb[53].mxu1  ;;  %v24864_v0 = vpop.f32.mrb[69].mxu0  ;;  %v14497_v55 = vmul.f32 1.442695, %v14369_v47 }
 0x7d7   : > { %26503 = vst [vmem:[#allocation159_spill] sm:$0xff] %v24862_v19  ;;  %v14303_v23 = vmax.f32 %v24858_v11, %v24862_v19  ;;  %18980 = vpow2.f32 %v14567_v32  ;;  %v14182_v19 = vpop.xlane.xlu1 %14181  ;;  %v15009_v32 = vld [vmem:[#allocation3 + $0x200] sm:$0xff] }
 0x7d8   : > { %18982 = vpow2.f32 %v14497_v55  ;;  %v14371_v15 = vsub.f32 %v24554_v10, %v14182_v19  ;;  %v14372_v62 = vsub.f32 %v24558_v50, %v14182_v19  ;;  %v14233_v20 = vpop.xlane.xlu0 %14232  ;;  %v15027_v10 = vld [vmem:[#allocation3 + $0x290] sm:$0xff]  ;;  %v24903_v28 = vpack.c.bf16 %v15010_v24, %v15009_v32  ;;  %v15012_v24 = vld [vmem:[#allocation3 + $0x218] sm:$0xff] }
 0x7d9   : > { %v24870_v49 = vpop.f32.mrb[70].mxu0  ;;  %14304 = vmax.xlane.f32.xlu1 %v14303_v23  ;;  %v24872_v4 = vpop.f32.mrb[54].mxu1  ;;  %v14499_v23 = vmul.f32 1.442695, %v14370_v13  ;;  %v14405_v19 = vsub.f32 %v24568_v27, %v14233_v20  ;;  %v14406_v43 = vsub.f32 %v24572_v44, %v14233_v20  ;;  %v15011_v20 = vld [vmem:[#allocation3 + $0x210] sm:$0xff] }
 0x7da   : > { %26504 = vst [vmem:[#allocation160_spill] sm:$0xff] %v24872_v4  ;;  %v24876_v58 = vpop.f32.mrb[55].mxu1  ;;  %v24878_v57 = vpop.f32.mrb[71].mxu0  ;;  %v14503_v55 = vmul.f32 1.442695, %v14372_v62 }
 0x7db   : > { %26505 = vst [vmem:[#allocation161_spill] sm:$0xff] %v24876_v58  ;;  %v14306_v3 = vmax.f32 %v24872_v4, %v24876_v58  ;;  %18984 = vpow2.f32 %v14499_v23  ;;  %v18975_v13 = vpop.eup %18974  ;;  %v14185_v14 = vpop.xlane.xlu1 %14184  ;;  %v26509_v4 = vmax.f32 %v24758_v9, %v24764_v22  ;;  %v14571_v22 = vmul.f32 1.442695, %v14406_v43  ;;  %v15030_v9 = vld [vmem:[#allocation3 + $0x2a8] sm:$0xff] }
 0x7dc   : > { %v18977_v50 = vpop.eup %18976  ;;  %v14373_v27 = vsub.f32 %v24566_v45, %v14185_v14  ;;  %v14374_v44 = vsub.f32 %v24570_v56, %v14185_v14  ;;  %v24930_v43 = vpack.c.bf16 %v15012_v24, %v15011_v20 }
 0x7dd   : > { %v24884_v11 = vpop.f32.mrb[72].mxu0  ;;  %14322 = vmax.xlane.f32.xlu1 %v26506_v51  ;;  %14307 = vmax.xlane.f32.xlu0 %v14306_v3  ;;  %v24889_v6 = vpop.f32.mrb[56].mxu1  ;;  %v14501_v51 = vmul.f32 1.442695, %v14371_v15  ;;  %v26510_v15 = vmax.f32 %v24746_v40, %v24752_v31  ;;  %v24917_v32 = vadd.f32 %v18977_v50, %v18975_v13  ;;  %v15029_v40 = vld [vmem:[#allocation3 + $0x2a0] sm:$0xff] }
 0x7de   : > { %26507 = vst [vmem:[#allocation162_spill] sm:$0xff] %v24889_v6  ;;  %v24893_v58 = vpop.f32.mrb[57].mxu1  ;;  %v24895_v47 = vpop.f32.mrb[73].mxu0  ;;  %15282 = vmatprep.mubr.f32.mxu0 %v18977_v50  ;;  %v14505_v14 = vmul.f32 1.442695, %v14373_v27  ;;  %v26514_v50 = vmax.f32 %v24770_v21, %v24776_v53  ;;  %v24946_v20 = vpack.c.bf16 %v15030_v9, %v15029_v40  ;;  %v15033_v53 = vld [vmem:[#allocation3 + $0x2c0] sm:$0xff] }
 0x7df   : > { %26508 = vst [vmem:[#allocation163_spill] sm:$0xff] %v24893_v58  ;;  %v14309_v3 = vmax.f32 %v24889_v6, %v24893_v58  ;;  %18986 = vpow2.f32 %v14501_v51  ;;  %26512 = vst [vmem:[#allocation165_spill] sm:$0xff] %v24917_v32  ;;  %v18979_v31 = vpop.eup %18978  ;;  %v14507_v51 = vmul.f32 1.442695, %v14374_v44  ;;  %15283 = vmatmul.mubr.f32.vlgmr.msra.gmra.mrb[80].mxu0 %v18975_v13  ;;  %v15034_v21 = vld [vmem:[#allocation3 + $0x2c8] sm:$0xff] }
 0x7e0   : > { %18988 = vpow2.f32 %v14503_v55  ;;  %18646 = vmatpush3.bf16.msra.mxu0 %v24903_v28  ;;  %v15014_v55 = vld [vmem:[#allocation3 + $0x228] sm:$0xff] }
 0x7e1   : > { %v24905_v23 = vpop.f32.mrb[74].mxu0  ;;  %14328 = vmax.xlane.f32.xlu1 %v26509_v4  ;;  %14325 = vmax.xlane.f32.xlu0 %v26510_v15  ;;  %v24913_v62 = vpop.f32.mrb[58].mxu1  ;;  %v14569_v4 = vmul.f32 1.442695, %v14405_v19  ;;  %v24923_v15 = vpack.c.bf16 %v15028_v54, %v15027_v10  ;;  %v15013_v54 = vld [vmem:[#allocation3 + $0x220] sm:$0xff] }
 0x7e2   : > { %26511 = vst [vmem:[#allocation164_spill] sm:$0xff] %v24913_v62  ;;  %v24919_v58 = vpop.f32.mrb[59].mxu1  ;;  %v24921_v6 = vpop.f32.mrb[75].mxu0  ;;  %v24952_v45 = vpack.c.bf16 %v15014_v55, %v15013_v54  ;;  %v15016_v55 = vld [vmem:[#allocation3 + $0x238] sm:$0xff] }
 0x7e3   : > { %26513 = vst [vmem:[#allocation166_spill] sm:$0xff] %v24919_v58  ;;  %v14312_v56 = vmax.f32 %v24913_v62, %v24919_v58  ;;  %v18981_v32 = vpop.eup %18980  ;;  %18990 = vpow2.f32 %v14569_v4  ;;  %18648 = vmatprep.subr.bf16.mxu0 %v24923_v15  ;;  %v15031_v58 = vld [vmem:[#allocation3 + $0x2b0] sm:$0xff] }
 0x7e4   : > { %18992 = vpow2.f32 %v14571_v22  ;;  %v24939_v13 = vadd.f32 %v18981_v32, %v18979_v31  ;;  %15287 = vmatprep.mubr.f32.mxu0 %v18981_v32  ;;  %v18983_v24 = vpop.eup %18982  ;;  %v14236_v22 = vpop.xlane.xlu0 %14235  ;;  %18650 = vmatpush3.bf16.msra.mxu0 %v24930_v43 }
 0x7e5   : > { %v24932_v10 = vpop.f32.mrb[76].mxu0  ;;  %14331 = vmax.xlane.f32.xlu0 %v26514_v50  ;;  %14310 = vmax.xlane.f32.xlu1 %v14309_v3  ;;  %v24937_v19 = vpop.f32.mrb[60].mxu1  ;;  %18994 = vpow2.f32 %v14505_v14  ;;  %v15032_v14 = vld [vmem:[#allocation3 + $0x2b8] sm:$0xff]  ;;  %v14407_v62 = vsub.f32 %v24580_v12, %v14236_v22  ;;  %v14408_v9 = vsub.f32 %v24584_v18, %v14236_v22  ;;  %v15015_v12 = vld [vmem:[#allocation3 + $0x230] sm:$0xff] }
 0x7e6   : > { %26515 = vst [vmem:[#allocation167_spill] sm:$0xff] %v24937_v19  ;;  %26516 = vst [vmem:[#allocation168_spill] sm:$0xff] %v24939_v13  ;;  %v24941_v27 = vpop.f32.mrb[61].mxu1  ;;  %v24943_v44 = vpop.f32.mrb[77].mxu0  ;;  %18996 = vpow2.f32 %v14507_v51  ;;  %15288 = vmatmul.mubr.f32.gmra.mrb[82].mxu0 %v18979_v31  ;;  %v26518_v31 = vmax.f32 %v24782_v33, %v24788_v42  ;;  %18652 = vmatprep.subr.bf16.mxu0 %v24946_v20 }
 0x7e7   : > { %26517 = vst [vmem:[#allocation169_spill] sm:$0xff] %v24941_v27  ;;  %v14315_v4 = vmax.f32 %v24937_v19, %v24941_v27  ;;  %v14188_v50 = vpop.xlane.xlu1 %14187  ;;  %v18985_v32 = vpop.eup %18984  ;;  %v14575_v22 = vmul.f32 1.442695, %v14408_v9 }
 0x7e8   : > { %v14375_v40 = vsub.f32 %v24578_v7, %v14188_v50  ;;  %v14376_v27 = vsub.f32 %v24582_v52, %v14188_v50  ;;  %v24966_v54 = vadd.f32 %v18985_v32, %v18983_v24  ;;  %v14573_v52 = vmul.f32 1.442695, %v14407_v62  ;;  %15137 = vmatprep.mubr.f32.mxu1 %v18985_v32  ;;  %18654 = vmatpush3.bf16.msra.mxu0 %v24952_v45 }
 0x7e9   : > { %v24959_v3 = vpop.f32.mrb[78].mxu0  ;;  %14334 = vmax.xlane.f32.xlu0 %v26518_v31  ;;  %14313 = vmax.xlane.f32.xlu1 %v14312_v56  ;;  %v24964_v51 = vpop.f32.mrb[62].mxu1  ;;  %v24973_v50 = vpack.c.bf16 %v15032_v14, %v15031_v58  ;;  %v24980_v62 = vpack.c.bf16 %v15016_v55, %v15015_v12  ;;  %v26519_v58 = vmax.f32 %v24794_v59, %v24800_v60 }
 0x7ea   : > { %v24968_v18 = vpop.f32.mrb[63].mxu1  ;;  %v24970_v7 = vpop.f32.mrb[79].mxu0  ;;  %v14509_v42 = vmul.f32 1.442695, %v14375_v40  ;;  %v14511_v33 = vmul.f32 1.442695, %v14376_v27  ;;  %15138 = vmatmul.mubr.f32.vlgmr.msra.gmra.mrb[64].mxu1 %v18983_v24  ;;  %18998 = vpow2.f32 %v14573_v52  ;;  %v24989_v12 = vpack.c.bf16 %v15034_v21, %v15033_v53 }
 0x7eb   : > { %v18987_v19 = vpop.eup %18986  ;;  %v14318_v56 = vmax.f32 %v24964_v51, %v24968_v18  ;;  %18763 = vmatpush3.bf16.msra.mxu1 %v24903_v28  ;;  %19000 = vpow2.f32 %v14575_v22  ;;  %v15017_v27 = vld [vmem:[#allocation3 + $0x240] sm:$0xff]  ;;  %v15018_v24 = vld [vmem:[#allocation3 + $0x248] sm:$0xff]  ;;  %v14191_v9 = vpop.xlane.xlu1 %14190  ;;  %18656 = vmatprep.subr.bf16.mxu0 %v24973_v50  ;;  %v15035_v22 = vld [vmem:[#allocation3 + $0x2d0] sm:$0xff] }
 0x7ec   : > { %v18989_v13 = vpop.eup %18988  ;;  %19002 = vpow2.f32 %v14509_v42  ;;  %v14239_v40 = vpop.xlane.xlu0 %14238  ;;  %v14377_v55 = vsub.f32 %v24590_v17, %v14191_v9  ;;  %18756 = vmatprep.subr.bf16.mxu1 %v24923_v15  ;;  %18658 = vmatpush3.bf16.msra.mxu0 %v24980_v62  ;;  %v24997_v21 = vpack.c.bf16 %v15018_v24, %v15017_v27  ;;  %v15020_v53 = vld [vmem:[#allocation3 + $0x258] sm:$0xff]  ;;  %v15037_v24 = vld [vmem:[#allocation3 + $0x2e0] sm:$0xff] }
 0x7ed   : > { %14337 = vmax.xlane.f32.xlu0 %v26519_v58  ;;  %14316 = vmax.xlane.f32.xlu1 %v14315_v4  ;;  %v24986_v14 = vadd.f32 %v18989_v13, %v18987_v19  ;;  %v18991_v32 = vpop.eup %18990  ;;  %19004 = vpow2.f32 %v14511_v33  ;;  %v14378_v4 = vsub.f32 %v24594_v35, %v14191_v9  ;;  %v14409_v52 = vsub.f32 %v24592_v36, %v14239_v40  ;;  %v15036_v58 = vld [vmem:[#allocation3 + $0x2d8] sm:$0xff]  ;;  %v15019_v33 = vld [vmem:[#allocation3 + $0x250] sm:$0xff] }
 0x7ee   : > { %15142 = vmatprep.mubr.f32.mxu1 %v18989_v13  ;;  %v18993_v28 = vpop.eup %18992  ;;  %v14410_v13 = vsub.f32 %v24596_v5, %v14239_v40  ;;  %v26520_v36 = vmax.f32 %v24806_v61, %v24812_v38  ;;  %v25006_v27 = vpack.c.bf16 %v15036_v58, %v15035_v22  ;;  %18660 = vmatprep.subr.bf16.mxu0 %v24989_v12  ;;  %v15038_v40 = vld [vmem:[#allocation3 + $0x2e8] sm:$0xff] }
 0x7ef   : > { %15143 = vmatmul.mubr.f32.gmra.mrb[66].mxu1 %v18987_v19  ;;  %v18995_v42 = vpop.eup %18994  ;;  %15292 = vmatprep.mubr.f32.mxu0 %v18993_v28  ;;  %v24999_v17 = vadd.f32 %v18993_v28, %v18991_v32  ;;  %v14513_v19 = vmul.f32 1.442695, %v14377_v55  ;;  %v14515_v15 = vmul.f32 1.442695, %v14378_v4  ;;  %v14577_v9 = vmul.f32 1.442695, %v14409_v52 }
 0x7f0   : > { %v18997_v35 = vpop.eup %18996  ;;  %v14579_v31 = vmul.f32 1.442695, %v14410_v13  ;;  %15293 = vmatmul.mubr.f32.gmra.mrb[84].mxu0 %v18991_v32  ;;  %18764 = vmatpush3.bf16.msra.mxu1 %v24930_v43  ;;  %v26521_v32 = vmax.f32 %v24818_v39, %v24824_v34  ;;  %v26522_v28 = vmax.f32 %v24830_v46, %v24836_v30  ;;  %v15021_v55 = vld [vmem:[#allocation3 + $0x260] sm:$0xff]  ;;  %v15022_v4 = vld [vmem:[#allocation3 + $0x268] sm:$0xff] }
 0x7f1   : > { %14340 = vmax.xlane.f32.xlu0 %v26520_v36  ;;  %14319 = vmax.xlane.f32.xlu1 %v14318_v56  ;;  %v25004_v5 = vadd.f32 %v18997_v35, %v18995_v42  ;;  %19006 = vpow2.f32 %v14513_v19  ;;  %v25010_v56 = vpack.c.bf16 %v15020_v53, %v15019_v33  ;;  %v15039_v36 = vld [vmem:[#allocation3 + $0x2f0] sm:$0xff]  ;;  %v15040_v19 = vld [vmem:[#allocation3 + $0x2f8] sm:$0xff] }
 0x7f2   : > { %15147 = vmatprep.mubr.f32.mxu1 %v18997_v35  ;;  %19008 = vpow2.f32 %v14515_v15  ;;  %18662 = vmatpush3.bf16.msra.mxu0 %v24997_v21  ;;  %v14194_v22 = vpop.xlane.xlu1 %14193  ;;  %v14242_v58 = vpop.xlane.xlu0 %14241  ;;  %v25028_v15 = vpack.c.bf16 %v15022_v4, %v15021_v55  ;;  %v25040_v4 = vpack.c.bf16 %v15040_v19, %v15039_v36 }
 0x7f3   : > { %15148 = vmatmul.mubr.f32.gmra.mrb[68].mxu1 %v18995_v42  ;;  %19010 = vpow2.f32 %v14577_v9  ;;  %18664 = vmatprep.subr.bf16.mxu0 %v25006_v27  ;;  %v25020_v42 = vpack.c.bf16 %v15038_v40, %v15037_v24  ;;  %v14379_v13 = vsub.f32 %v24602_v16, %v14194_v22  ;;  %v14380_v33 = vsub.f32 %v24606_v37, %v14194_v22  ;;  %v15023_v9 = vld [vmem:[#allocation3 + $0x270] sm:$0xff]  ;;  %v15024_v24 = vld [vmem:[#allocation3 + $0x278] sm:$0xff]  ;;  %v15057_v22 = vld [vmem:[#allocation3 + $0x380] sm:$0xff] }
 0x7f4   : > { %v18999_v52 = vpop.eup %18998  ;;  %19012 = vpow2.f32 %v14579_v31  ;;  %18757 = vmatprep.subr.bf16.mxu1 %v24946_v20  ;;  %v14411_v53 = vsub.f32 %v24604_v8, %v14242_v58  ;;  %v14412_v35 = vsub.f32 %v24608_v29, %v14242_v58  ;;  %v26523_v16 = vmax.f32 %v24842_v26, %v24850_v1  ;;  %v15058_v58 = vld [vmem:[#allocation3 + $0x388] sm:$0xff] }
 0x7f5   : > { %14343 = vmax.xlane.f32.xlu0 %v26521_v32  ;;  %14346 = vmax.xlane.f32.xlu1 %v26522_v28  ;;  %v19001_v43 = vpop.eup %19000  ;;  %v26524_v8 = vmax.f32 %v24856_v2, %v24864_v0  ;;  %v14517_v37 = vmul.f32 1.442695, %v14379_v13  ;;  %v14519_v29 = vmul.f32 1.442695, %v14380_v33  ;;  %v26526_v33 = vmax.f32 %v24884_v11, %v24895_v47 }
 0x7f6   : > { %v19003_v31 = vpop.eup %19002  ;;  %15297 = vmatprep.mubr.f32.mxu0 %v19001_v43  ;;  %18666 = vmatpush3.bf16.msra.mxu0 %v25010_v56  ;;  %v25030_v20 = vadd.f32 %v19001_v43, %v18999_v52  ;;  %v14581_v32 = vmul.f32 1.442695, %v14411_v53  ;;  %v14583_v28 = vmul.f32 1.442695, %v14412_v35  ;;  %v25044_v43 = vpack.c.bf16 %v15024_v24, %v15023_v9 }
 0x7f7   : > { %v19005_v40 = vpop.eup %19004  ;;  %15298 = vmatmul.mubr.f32.gmra.mrb[86].mxu0 %v18999_v52  ;;  %19014 = vpow2.f32 %v14517_v37  ;;  %18668 = vmatprep.subr.bf16.mxu0 %v25020_v42  ;;  %v26525_v52 = vmax.f32 %v24870_v49, %v24878_v57  ;;  %v18675_v35 = vpack.c.bf16 %v15058_v58, %v15057_v22  ;;  %v26527_v24 = vmax.f32 %v24905_v23, %v24921_v6 }
 0x7f8   : > { %15152 = vmatprep.mubr.f32.mxu1 %v19005_v40  ;;  %v25038_v55 = vadd.f32 %v19005_v40, %v19003_v31  ;;  %19016 = vpow2.f32 %v14519_v29  ;;  %18765 = vmatpush3.bf16.msra.mxu1 %v24952_v45  ;;  %v26528_v40 = vmax.f32 %v24932_v10, %v24943_v44 }
 0x7f9   : > { %14349 = vmax.xlane.f32.xlu0 %v26523_v16  ;;  %14352 = vmax.xlane.f32.xlu1 %v26524_v8  ;;  %19018 = vpow2.f32 %v14581_v32 }
 0x7fa   : > { %15153 = vmatmul.mubr.f32.gmra.mrb[70].mxu1 %v19003_v31  ;;  %18670 = vmatpush3.bf16.msra.mxu0 %v25028_v15  ;;  %19020 = vpow2.f32 %v14583_v28 }
 0x7fb   : > { %v19007_v13 = vpop.eup %19006  ;;  %18672 = vmatprep.subr.bf16.mxu0 %v25040_v4  ;;  %18758 = vmatprep.subr.bf16.mxu1 %v24973_v50 }
 0x7fc   : > { %v19009_v53 = vpop.eup %19008  ;;  %v14197_v31 = vpop.xlane.xlu1 %14196  ;;  %18766 = vmatpush3.bf16.msra.mxu1 %v24980_v62 }
 0x7fd   : > { %14355 = vmax.xlane.f32.xlu0 %v26525_v52  ;;  %14358 = vmax.xlane.f32.xlu1 %v26526_v33  ;;  %v19011_v36 = vpop.eup %19010  ;;  %v14765_v45 = vadd.f32 %v19009_v53, %v19007_v13  ;;  %v14245_v9 = vpop.xlane.xlu0 %14244  ;;  %v14381_v16 = vsub.f32 %v24614_v25, %v14197_v31  ;;  %v14382_v50 = vsub.f32 %v24618_v63, %v14197_v31  ;;  %v26533_v31 = vld [vmem:[#allocation116_spill] sm:$0xff] }
 0x7fe   : > { %15157 = vmatprep.mubr.f32.mxu1 %v19009_v53  ;;  %v19013_v19 = vpop.eup %19012  ;;  %18674 = vmatpush3.bf16.msra.mxu0 %v25044_v43  ;;  %v14413_v8 = vsub.f32 %v24616_v48, %v14245_v9  ;;  %v14414_v37 = vsub.f32 %v24620_v41, %v14245_v9  ;;  %v26529_v63 = vmax.f32 %v24959_v3, %v24970_v7  ;;  %v26531_v53 = vld [vmem:[#allocation117_spill] sm:$0xff] }
 0x7ff   : > { %15158 = vmatmul.mubr.f32.gmra.mrb[72].mxu1 %v19007_v13  ;;  %15302 = vmatprep.mubr.f32.mxu0 %v19013_v19  ;;  %v25066_v29 = vadd.f32 %v19013_v19, %v19011_v36  ;;  %v14521_v32 = vmul.f32 1.442695, %v14381_v16  ;;  %v14523_v28 = vmul.f32 1.442695, %v14382_v50 }
 0x800   : > { %18676 = vmatprep.subr.bf16.mxu0 %v18675_v35  ;;  %v14585_v22 = vmul.f32 1.442695, %v14413_v8  ;;  %15303 = vmatmul.mubr.f32.gmra.mrb[88].mxu0 %v19011_v36  ;;  %v14587_v58 = vmul.f32 1.442695, %v14414_v37  ;;  %v26532_v36 = vld [vmem:[#allocation118_spill] sm:$0xff]  ;;  %v26534_v8 = vld [vmem:[#allocation123_spill] sm:$0xff] }
 0x801   : > { %14361 = vmax.xlane.f32.xlu0 %v26527_v24  ;;  %14364 = vmax.xlane.f32.xlu1 %v26528_v40  ;;  %v19015_v25 = vpop.eup %19014  ;;  %19022 = vpow2.f32 %v14521_v32  ;;  %v26535_v32 = vld [vmem:[#allocation95_spill] sm:$0xff] }
 0x802   : > { %18759 = vmatprep.subr.bf16.mxu1 %v24989_v12  ;;  %v19017_v48 = vpop.eup %19016  ;;  %19024 = vpow2.f32 %v14523_v28 }
 0x803   : > { %v19019_v41 = vpop.eup %19018  ;;  %19026 = vpow2.f32 %v14585_v22  ;;  %15162 = vmatprep.mubr.f32.mxu1 %v19017_v48  ;;  %v14768_v13 = vadd.f32 %v19017_v48, %v19015_v25  ;;  %18767 = vmatpush3.bf16.msra.mxu1 %v24997_v21  ;;  %v26536_v22 = vld [vmem:[#allocation122_spill] sm:$0xff] }
 0x804   : > { %v19021_v62 = vpop.eup %19020  ;;  %19028 = vpow2.f32 %v14587_v58  ;;  %15163 = vmatmul.mubr.f32.gmra.mrb[74].mxu1 %v19015_v25  ;;  %18760 = vmatprep.subr.bf16.mxu1 %v25006_v27 }
 0x805   : > { %14367 = vmax.xlane.f32.xlu0 %v26529_v63  ;;  %14754 = vadd.xlane.f32.xlu1 %v24966_v54  ;;  %v14200_v52 = vpop.xlane.xlu1 %14199  ;;  %v14248_v12 = vpop.xlane.xlu0 %14247  ;;  %v26530_v54 = vld [vmem:[#allocation119_spill] sm:$0xff]  ;;  %v25082_v21 = vadd.f32 %v19021_v62, %v19019_v41 }
 0x806   : > { %v14383_v33 = vsub.f32 %v26530_v54, %v14200_v52  ;;  %v14384_v35 = vsub.f32 %v26531_v53, %v14200_v52  ;;  %v14415_v19 = vsub.f32 %v26532_v36, %v14248_v12  ;;  %v14416_v9 = vsub.f32 %v26533_v31, %v14248_v12  ;;  %15307 = vmatprep.mubr.f32.mxu0 %v19021_v62  ;;  %v26538_v54 = vld [vmem:[#allocation120_spill] sm:$0xff]  ;;  %v26539_v53 = vld [vmem:[#allocation125_spill] sm:$0xff] }
 0x807   : > { %15308 = vmatmul.mubr.f32.gmra.mrb[90].mxu0 %v19019_v41  ;;  %18768 = vmatpush3.bf16.msra.mxu1 %v25010_v56  ;;  %v26540_v36 = vld [vmem:[#allocation96_spill] sm:$0xff] }
 0x808   : > { %v14525_v24 = vmul.f32 1.442695, %v14383_v33  ;;  %v14527_v40 = vmul.f32 1.442695, %v14384_v35  ;;  %v14589_v16 = vmul.f32 1.442695, %v14415_v19  ;;  %18761 = vmatprep.subr.bf16.mxu1 %v25020_v42 }
 0x809   : > { %14757 = vadd.xlane.f32.xlu0 %v24986_v14  ;;  %14760 = vadd.xlane.f32.xlu1 %v25004_v5  ;;  %v14591_v14 = vmul.f32 1.442695, %v14416_v9  ;;  %v26537_v42 = vld [vmem:[#allocation121_spill] sm:$0xff]  ;;  %v26541_v31 = vld [vmem:[#allocation124_spill] sm:$0xff] }
 0x80a   : > { %19030 = vpow2.f32 %v14525_v24  ;;  %v14203_v5 = vpop.xlane.xlu1 %14202  ;;  %v14251_v27 = vpop.xlane.xlu0 %14250 }
 0x80b   : > { %19032 = vpow2.f32 %v14527_v40  ;;  %v19023_v50 = vpop.eup %19022  ;;  %v14385_v37 = vsub.f32 %v26534_v8, %v14203_v5  ;;  %v14386_v28 = vsub.f32 %v26535_v32, %v14203_v5  ;;  %v14417_v58 = vsub.f32 %v26536_v22, %v14251_v27  ;;  %18769 = vmatpush3.bf16.msra.mxu1 %v25028_v15 }
 0x80c   : > { %19034 = vpow2.f32 %v14589_v16  ;;  %v19025_v56 = vpop.eup %19024  ;;  %v14418_v25 = vsub.f32 %v26537_v42, %v14251_v27  ;;  %18762 = vmatprep.subr.bf16.mxu1 %v25040_v4 }
 0x80d   : > { %14763 = vadd.xlane.f32.xlu0 %v25038_v55  ;;  %14766 = vadd.xlane.f32.xlu1 %v14765_v45  ;;  %19036 = vpow2.f32 %v14591_v14  ;;  %v19027_v55 = vpop.eup %19026  ;;  %v14529_v45 = vmul.f32 1.442695, %v14385_v37  ;;  %v14531_v63 = vmul.f32 1.442695, %v14386_v28  ;;  %v14593_v48 = vmul.f32 1.442695, %v14417_v58 }
 0x80e   : > { %15167 = vmatprep.mubr.f32.mxu1 %v19025_v56  ;;  %v14771_v41 = vadd.f32 %v19025_v56, %v19023_v50  ;;  %v19029_v62 = vpop.eup %19028  ;;  %v14595_v52 = vmul.f32 1.442695, %v14418_v25  ;;  %v26542_v56 = vld [vmem:[#allocation97_spill] sm:$0xff]  ;;  %v26543_v25 = vld [vmem:[#allocation98_spill] sm:$0xff] }
 0x80f   : > { %15168 = vmatmul.mubr.f32.gmra.mrb[76].mxu1 %v19023_v50  ;;  %19038 = vpow2.f32 %v14529_v45  ;;  %15312 = vmatprep.mubr.f32.mxu0 %v19029_v62  ;;  %v25093_v15 = vadd.f32 %v19029_v62, %v19027_v55  ;;  %v26544_v45 = vld [vmem:[#allocation99_spill] sm:$0xff] }
 0x810   : > { %19040 = vpow2.f32 %v14531_v63  ;;  %15313 = vmatmul.mubr.f32.gmra.mrb[92].mxu0 %v19027_v55  ;;  %18770 = vmatpush3.bf16.msra.mxu1 %v25044_v43 }
 0x811   : > { %14769 = vadd.xlane.f32.xlu0 %v14768_v13  ;;  %14772 = vadd.xlane.f32.xlu1 %v14771_v41  ;;  %19042 = vpow2.f32 %v14593_v48  ;;  %v26545_v48 = vld [vmem:[#allocation130_spill] sm:$0xff] }
 0x812   : > { %19044 = vpow2.f32 %v14595_v52 }
 0x814   : > { %v14206_v4 = vpop.xlane.xlu1 %14205  ;;  %v14254_v13 = vpop.xlane.xlu0 %14253 }
 0x815   : > { %v19031_v12 = vpop.eup %19030  ;;  %v14387_v33 = vsub.f32 %v26538_v54, %v14206_v4  ;;  %v14388_v35 = vsub.f32 %v26539_v53, %v14206_v4  ;;  %v14419_v19 = vsub.f32 %v26540_v36, %v14254_v13  ;;  %v14420_v9 = vsub.f32 %v26541_v31, %v14254_v13 }
 0x816   : > { %v19033_v24 = vpop.eup %19032 }
 0x817   : > { %v19035_v40 = vpop.eup %19034  ;;  %v14533_v16 = vmul.f32 1.442695, %v14387_v33  ;;  %v14535_v14 = vmul.f32 1.442695, %v14388_v35  ;;  %v14597_v5 = vmul.f32 1.442695, %v14419_v19  ;;  %15172 = vmatprep.mubr.f32.mxu1 %v19033_v24  ;;  %v14774_v43 = vadd.f32 %v19033_v24, %v19031_v12 }
 0x818   : > { %v19037_v27 = vpop.eup %19036  ;;  %v14599_v50 = vmul.f32 1.442695, %v14420_v9  ;;  %15173 = vmatmul.mubr.f32.gmra.mrb[78].mxu1 %v19031_v12  ;;  %v26546_v9 = vld [vmem:[#allocation131_spill] sm:$0xff] }
 0x819   : > { %19046 = vpow2.f32 %v14533_v16  ;;  %15317 = vmatprep.mubr.f32.mxu0 %v19037_v27  ;;  %14775 = vadd.xlane.f32.xlu0 %v14774_v43  ;;  %v25100_v8 = vadd.f32 %v19037_v27, %v19035_v40  ;;  %v19039_v37 = vpop.eup %19038  ;;  %v26549_v43 = vld [vmem:[#allocation129_spill] sm:$0xff] }
 0x81a   : > { %19048 = vpow2.f32 %v14535_v14  ;;  %15318 = vmatmul.mubr.f32.gmra.mrb[94].mxu0 %v19035_v40  ;;  %v19041_v32 = vpop.eup %19040  ;;  %v26547_v40 = vld [vmem:[#allocation126_spill] sm:$0xff]  ;;  %v26548_v14 = vld [vmem:[#allocation127_spill] sm:$0xff] }
 0x81b   : > { %19050 = vpow2.f32 %v14597_v5  ;;  %v14209_v28 = vpop.xlane.xlu1 %14208  ;;  %v19043_v58 = vpop.eup %19042  ;;  %15177 = vmatprep.mubr.f32.mxu1 %v19041_v32  ;;  %v14777_v52 = vadd.f32 %v19041_v32, %v19039_v37 }
 0x81c   : > { %19052 = vpow2.f32 %v14599_v50  ;;  %v14257_v22 = vpop.xlane.xlu0 %14256  ;;  %v14389_v42 = vsub.f32 %v26542_v56, %v14209_v28  ;;  %v14390_v55 = vsub.f32 %v26543_v25, %v14209_v28  ;;  %v19045_v62 = vpop.eup %19044  ;;  %15178 = vmatmul.mubr.f32.gmra.mrb[80].mxu1 %v19039_v37 }
 0x81d   : > { %v14421_v63 = vsub.f32 %v26544_v45, %v14257_v22  ;;  %v14422_v41 = vsub.f32 %v26545_v48, %v14257_v22  ;;  %15322 = vmatprep.mubr.f32.mxu0 %v19045_v62  ;;  %v25106_v54 = vadd.f32 %v19045_v62, %v19043_v58  ;;  %14778 = vadd.xlane.f32.xlu1 %v14777_v52  ;;  %v26550_v48 = vld [vmem:[#allocation128_spill] sm:$0xff] }
 0x81e   : > { %v14537_v4 = vmul.f32 1.442695, %v14389_v42  ;;  %v14539_v13 = vmul.f32 1.442695, %v14390_v55  ;;  %15323 = vmatmul.mubr.f32.gmra.mrb[96].mxu0 %v19043_v58  ;;  %v26551_v62 = vld [vmem:[#allocation92_spill] sm:$0xff] }
 0x81f   : > { %v14601_v12 = vmul.f32 1.442695, %v14421_v63  ;;  %v14603_v33 = vmul.f32 1.442695, %v14422_v41 }
 0x820   : > { %19054 = vpow2.f32 %v14537_v4  ;;  %v26552_v4 = vld [vmem:[#allocation103_spill] sm:$0xff] }
 0x821   : > { %19056 = vpow2.f32 %v14539_v13 }
 0x822   : > { %19058 = vpow2.f32 %v14601_v12  ;;  %v26553_v12 = vld [vmem:[#allocation101_spill] sm:$0xff] }
 0x823   : > { %v19047_v53 = vpop.eup %19046  ;;  %19060 = vpow2.f32 %v14603_v33 }
 0x824   : > { %v19049_v35 = vpop.eup %19048  ;;  %v14212_v36 = vpop.xlane.xlu1 %14211 }
 0x825   : > { %v14260_v19 = vpop.xlane.xlu0 %14259  ;;  %v19051_v31 = vpop.eup %19050  ;;  %v14391_v24 = vsub.f32 %v26546_v9, %v14212_v36  ;;  %v14392_v16 = vsub.f32 %v26547_v40, %v14212_v36  ;;  %15182 = vmatprep.mubr.f32.mxu1 %v19049_v35  ;;  %v14780_v37 = vadd.f32 %v19049_v35, %v19047_v53 }
 0x826   : > { %v14423_v5 = vsub.f32 %v26548_v14, %v14260_v19  ;;  %v14424_v27 = vsub.f32 %v26549_v43, %v14260_v19  ;;  %v19053_v50 = vpop.eup %19052  ;;  %15183 = vmatmul.mubr.f32.gmra.mrb[82].mxu1 %v19047_v53  ;;  %v26554_v14 = vld [vmem:[#allocation102_spill] sm:$0xff]  ;;  %v26555_v43 = vld [vmem:[#allocation104_spill] sm:$0xff] }
 0x827   : > { %v14541_v32 = vmul.f32 1.442695, %v14391_v24  ;;  %v14543_v28 = vmul.f32 1.442695, %v14392_v16  ;;  %15327 = vmatprep.mubr.f32.mxu0 %v19053_v50  ;;  %v25112_v58 = vadd.f32 %v19053_v50, %v19051_v31  ;;  %14781 = vadd.xlane.f32.xlu0 %v14780_v37  ;;  %v26556_v50 = vld [vmem:[#allocation100_spill] sm:$0xff] }
 0x828   : > { %v14605_v22 = vmul.f32 1.442695, %v14423_v5  ;;  %v14607_v56 = vmul.f32 1.442695, %v14424_v27  ;;  %15328 = vmatmul.mubr.f32.gmra.mrb[98].mxu0 %v19051_v31 }
 0x829   : > { %19062 = vpow2.f32 %v14541_v32  ;;  %v26557_v32 = vld [vmem:[#allocation105_spill] sm:$0xff] }
 0x82a   : > { %19064 = vpow2.f32 %v14543_v28  ;;  %v19055_v42 = vpop.eup %19054 }
 0x82b   : > { %19066 = vpow2.f32 %v14605_v22  ;;  %v19057_v25 = vpop.eup %19056 }
 0x82c   : > { %19068 = vpow2.f32 %v14607_v56  ;;  %v19059_v63 = vpop.eup %19058  ;;  %15187 = vmatprep.mubr.f32.mxu1 %v19057_v25  ;;  %v14783_v35 = vadd.f32 %v19057_v25, %v19055_v42 }
 0x82d   : > { %v14215_v55 = vpop.xlane.xlu1 %14214  ;;  %v14263_v45 = vpop.xlane.xlu0 %14262  ;;  %15188 = vmatmul.mubr.f32.gmra.mrb[84].mxu1 %v19055_v42 }
 0x82e   : > { %v14393_v41 = vsub.f32 %v26550_v48, %v14215_v55  ;;  %v14394_v52 = vsub.f32 %v26551_v62, %v14215_v55  ;;  %v14425_v13 = vsub.f32 %v26552_v4, %v14263_v45  ;;  %v14426_v33 = vsub.f32 %v26553_v12, %v14263_v45  ;;  %v19061_v53 = vpop.eup %19060  ;;  %14784 = vadd.xlane.f32.xlu1 %v14783_v35  ;;  %v26558_v62 = vld [vmem:[#allocation106_spill] sm:$0xff]  ;;  %v26560_v12 = vld [vmem:[#allocation107_spill] sm:$0xff]  ;;  %v26561_v35 = vld [vmem:[#allocation109_spill] sm:$0xff] }
 0x82f   : > { %15332 = vmatprep.mubr.f32.mxu0 %v19061_v53  ;;  %v25118_v9 = vadd.f32 %v19061_v53, %v19059_v63  ;;  %v26559_v4 = vld [vmem:[#allocation110_spill] sm:$0xff] }
 0x830   : > { %v14545_v36 = vmul.f32 1.442695, %v14393_v41  ;;  %v14547_v19 = vmul.f32 1.442695, %v14394_v52  ;;  %v14609_v31 = vmul.f32 1.442695, %v14425_v13  ;;  %15333 = vmatmul.mubr.f32.gmra.mrb[100].mxu0 %v19059_v63 }
 0x831   : > { %v14611_v24 = vmul.f32 1.442695, %v14426_v33 }
 0x832   : > { %v14218_v40 = vpop.xlane.xlu1 %14217  ;;  %v14266_v16 = vpop.xlane.xlu0 %14265  ;;  %19070 = vpow2.f32 %v14545_v36 }
 0x833   : > { %v14395_v5 = vsub.f32 %v26554_v14, %v14218_v40  ;;  %v14396_v27 = vsub.f32 %v26555_v43, %v14218_v40  ;;  %v14427_v37 = vsub.f32 %v26556_v50, %v14266_v16  ;;  %19072 = vpow2.f32 %v14547_v19  ;;  %v19063_v22 = vpop.eup %19062 }
 0x834   : > { %v14428_v28 = vsub.f32 %v26557_v32, %v14266_v16  ;;  %19074 = vpow2.f32 %v14609_v31  ;;  %v19065_v55 = vpop.eup %19064 }
 0x835   : > { %v14549_v56 = vmul.f32 1.442695, %v14395_v5  ;;  %v14551_v42 = vmul.f32 1.442695, %v14396_v27  ;;  %v14613_v25 = vmul.f32 1.442695, %v14427_v37  ;;  %19076 = vpow2.f32 %v14611_v24  ;;  %v19067_v41 = vpop.eup %19066  ;;  %15192 = vmatprep.mubr.f32.mxu1 %v19065_v55 }
 0x836   : > { %v14615_v45 = vmul.f32 1.442695, %v14428_v28  ;;  %v14221_v63 = vpop.xlane.xlu1 %14220  ;;  %v14269_v48 = vpop.xlane.xlu0 %14268  ;;  %15193 = vmatmul.mubr.f32.gmra.mrb[86].mxu1 %v19063_v22  ;;  %v14786_v19 = vadd.f32 %v19065_v55, %v19063_v22  ;;  %v26562_v27 = vld [vmem:[#allocation93_spill] sm:$0xff]  ;;  %v26563_v37 = vld [vmem:[#allocation115_spill] sm:$0xff]  ;;  %v26564_v28 = vld [vmem:[#allocation114_spill] sm:$0xff] }
 0x837   : > { %19078 = vpow2.f32 %v14549_v56  ;;  %v14397_v52 = vsub.f32 %v26558_v62, %v14221_v63  ;;  %v14398_v13 = vsub.f32 %v26559_v4, %v14221_v63  ;;  %v14429_v33 = vsub.f32 %v26560_v12, %v14269_v48  ;;  %v19069_v53 = vpop.eup %19068  ;;  %v26565_v56 = vld [vmem:[#allocation113_spill] sm:$0xff]  ;;  %v26566_v4 = vld [vmem:[#allocation108_spill] sm:$0xff]  ;;  %v26567_v12 = vld [vmem:[#allocation111_spill] sm:$0xff] }
 0x838   : > { %19080 = vpow2.f32 %v14551_v42  ;;  %v14430_v36 = vsub.f32 %v26561_v35, %v14269_v48  ;;  %15337 = vmatprep.mubr.f32.mxu0 %v19069_v53  ;;  %14787 = vadd.xlane.f32.xlu0 %v14786_v19  ;;  %v25128_v43 = vadd.f32 %v19069_v53, %v19067_v41 }
 0x839   : > { %19082 = vpow2.f32 %v14613_v25  ;;  %v14553_v31 = vmul.f32 1.442695, %v14397_v52  ;;  %v14555_v24 = vmul.f32 1.442695, %v14398_v13  ;;  %v14617_v40 = vmul.f32 1.442695, %v14429_v33  ;;  %15338 = vmatmul.mubr.f32.gmra.mrb[102].mxu0 %v19067_v41 }
 0x83a   : > { %19084 = vpow2.f32 %v14615_v45  ;;  %v14619_v16 = vmul.f32 1.442695, %v14430_v36  ;;  %v14224_v14 = vpop.xlane.xlu1 %14223  ;;  %v14272_v5 = vpop.xlane.xlu0 %14271 }
 0x83b   : > { %19086 = vpow2.f32 %v14553_v31  ;;  %v14399_v50 = vsub.f32 %v26562_v27, %v14224_v14  ;;  %v14400_v32 = vsub.f32 %v26563_v37, %v14224_v14  ;;  %v14431_v22 = vsub.f32 %v26564_v28, %v14272_v5 }
 0x83c   : > { %19088 = vpow2.f32 %v14555_v24  ;;  %v14432_v42 = vsub.f32 %v26565_v56, %v14272_v5  ;;  %v19071_v25 = vpop.eup %19070  ;;  %v26568_v5 = vld [vmem:[#allocation133_spill] sm:$0xff] }
 0x83d   : > { %19090 = vpow2.f32 %v14617_v40  ;;  %v14557_v55 = vmul.f32 1.442695, %v14399_v50  ;;  %v14559_v45 = vmul.f32 1.442695, %v14400_v32  ;;  %v14621_v63 = vmul.f32 1.442695, %v14431_v22  ;;  %v19073_v48 = vpop.eup %19072 }
 0x83e   : > { %19092 = vpow2.f32 %v14619_v16  ;;  %v14623_v62 = vmul.f32 1.442695, %v14432_v42  ;;  %v14275_v41 = vpop.xlane.xlu0 %14274  ;;  %v19075_v52 = vpop.eup %19074  ;;  %15197 = vmatprep.mubr.f32.mxu1 %v19073_v48  ;;  %v14789_v53 = vadd.f32 %v19073_v48, %v19071_v25  ;;  %v26569_v50 = vld [vmem:[#allocation134_spill] sm:$0xff]  ;;  %v26570_v48 = vld [vmem:[#allocation137_spill] sm:$0xff] }
 0x83f   : > { %19094 = vpow2.f32 %v14557_v55  ;;  %v14433_v13 = vsub.f32 %v26566_v4, %v14275_v41  ;;  %v14434_v33 = vsub.f32 %v26567_v12, %v14275_v41  ;;  %v19077_v35 = vpop.eup %19076  ;;  %15198 = vmatmul.mubr.f32.gmra.mrb[88].mxu1 %v19071_v25  ;;  %v26571_v41 = vld [vmem:[#allocation138_spill] sm:$0xff] }
 0x840   : > { %19096 = vpow2.f32 %v14559_v45  ;;  %15342 = vmatprep.mubr.f32.mxu0 %v19077_v35  ;;  %14790 = vadd.xlane.f32.xlu1 %v14789_v53  ;;  %v25136_v24 = vadd.f32 %v19077_v35, %v19075_v52 }
 0x841   : > { %v19079_v36 = vpop.eup %19078  ;;  %19098 = vpow2.f32 %v14621_v63  ;;  %v14625_v19 = vmul.f32 1.442695, %v14433_v13  ;;  %v14627_v31 = vmul.f32 1.442695, %v14434_v33  ;;  %15343 = vmatmul.mubr.f32.gmra.mrb[104].mxu0 %v19075_v52 }
 0x842   : > { %v19081_v40 = vpop.eup %19080  ;;  %19100 = vpow2.f32 %v14623_v62  ;;  %v14278_v16 = vpop.xlane.xlu0 %14277 }
 0x843   : > { %v19083_v14 = vpop.eup %19082  ;;  %19102 = vpow2.f32 %v14625_v19  ;;  %15202 = vmatprep.mubr.f32.mxu1 %v19081_v40  ;;  %v14435_v27 = vsub.f32 %v26568_v5, %v14278_v16  ;;  %v14436_v37 = vsub.f32 %v26569_v50, %v14278_v16  ;;  %v14792_v32 = vadd.f32 %v19081_v40, %v19079_v36  ;;  %v26572_v40 = vld [vmem:[#allocation141_spill] sm:$0xff]  ;;  %v15041_v50 = vld [vmem:[#allocation3 + $0x300] sm:$0xff] }
 0x844   : > { %v19085_v28 = vpop.eup %19084  ;;  %19104 = vpow2.f32 %v14627_v31  ;;  %15203 = vmatmul.mubr.f32.gmra.mrb[90].mxu1 %v19079_v36 }
 0x845   : > { %v19087_v22 = vpop.eup %19086  ;;  %15347 = vmatprep.mubr.f32.mxu0 %v19085_v28  ;;  %v14629_v56 = vmul.f32 1.442695, %v14435_v27  ;;  %v14631_v42 = vmul.f32 1.442695, %v14436_v37  ;;  %14793 = vadd.xlane.f32.xlu0 %v14792_v32  ;;  %v25140_v25 = vadd.f32 %v19085_v28, %v19083_v14  ;;  %v15042_v37 = vld [vmem:[#allocation3 + $0x308] sm:$0xff] }
 0x846   : > { %v19089_v55 = vpop.eup %19088  ;;  %15348 = vmatmul.mubr.f32.gmra.mrb[106].mxu0 %v19083_v14  ;;  %v14281_v45 = vpop.xlane.xlu0 %14280  ;;  %v26573_v14 = vld [vmem:[#allocation142_spill] sm:$0xff] }
 0x847   : > { %v19091_v63 = vpop.eup %19090  ;;  %19106 = vpow2.f32 %v14629_v56  ;;  %15207 = vmatprep.mubr.f32.mxu1 %v19089_v55  ;;  %v14437_v62 = vsub.f32 %v26570_v48, %v14281_v45  ;;  %v14438_v52 = vsub.f32 %v26571_v41, %v14281_v45  ;;  %v14795_v4 = vadd.f32 %v19089_v55, %v19087_v22  ;;  %v15060_v55 = vld [vmem:[#allocation3 + $0x398] sm:$0xff]  ;;  %v26574_v48 = vld [vmem:[#allocation165_spill] sm:$0xff] }
 0x848   : > { %v19093_v13 = vpop.eup %19092  ;;  %19108 = vpow2.f32 %v14631_v42  ;;  %15208 = vmatmul.mubr.f32.gmra.mrb[92].mxu1 %v19087_v22  ;;  %v15059_v42 = vld [vmem:[#allocation3 + $0x390] sm:$0xff]  ;;  %v18677_v41 = vpack.c.bf16 %v15042_v37, %v15041_v50 }
 0x849   : > { %v19095_v12 = vpop.eup %19094  ;;  %15352 = vmatprep.mubr.f32.mxu0 %v19093_v13  ;;  %v14633_v33 = vmul.f32 1.442695, %v14437_v62  ;;  %v14635_v53 = vmul.f32 1.442695, %v14438_v52  ;;  %14796 = vadd.xlane.f32.xlu1 %v14795_v4  ;;  %v25144_v35 = vadd.f32 %v19093_v13, %v19091_v63  ;;  %v26575_v52 = vld [vmem:[#allocation145_spill] sm:$0xff]  ;;  %v26576_v13 = vld [vmem:[#allocation146_spill] sm:$0xff] }
 0x84a   : > { %v19097_v36 = vpop.eup %19096  ;;  %15353 = vmatmul.mubr.f32.gmra.mrb[108].mxu0 %v19091_v63  ;;  %v14284_v19 = vpop.xlane.xlu0 %14283 }
 0x84b   : > { %v19099_v31 = vpop.eup %19098  ;;  %19110 = vpow2.f32 %v14633_v33  ;;  %15212 = vmatprep.mubr.f32.mxu1 %v19097_v36  ;;  %v14439_v16 = vsub.f32 %v26572_v40, %v14284_v19  ;;  %v14440_v5 = vsub.f32 %v26573_v14, %v14284_v19  ;;  %v14798_v27 = vadd.f32 %v19097_v36, %v19095_v12  ;;  %v15043_v33 = vld [vmem:[#allocation3 + $0x310] sm:$0xff] }
 0x84c   : > { %v19101_v32 = vpop.eup %19100  ;;  %19112 = vpow2.f32 %v14635_v53  ;;  %15213 = vmatmul.mubr.f32.gmra.mrb[94].mxu1 %v19095_v12  ;;  %v15044_v53 = vld [vmem:[#allocation3 + $0x318] sm:$0xff]  ;;  %v18679_v19 = vpack.c.bf16 %v15060_v55, %v15059_v42  ;;  %v15045_v55 = vld [vmem:[#allocation3 + $0x320] sm:$0xff] }
 0x84d   : > { %v19103_v28 = vpop.eup %19102  ;;  %15357 = vmatprep.mubr.f32.mxu0 %v19101_v32  ;;  %v14637_v22 = vmul.f32 1.442695, %v14439_v16  ;;  %v14639_v56 = vmul.f32 1.442695, %v14440_v5  ;;  %14799 = vadd.xlane.f32.xlu0 %v14798_v27  ;;  %v25148_v45 = vadd.f32 %v19101_v32, %v19099_v31  ;;  %v15061_v5 = vld [vmem:[#allocation3 + $0x3a0] sm:$0xff]  ;;  %v15062_v27 = vld [vmem:[#allocation3 + $0x3a8] sm:$0xff]  ;;  %v18681_v32 = vpack.c.bf16 %v15044_v53, %v15043_v33 }
 0x84e   : > { %v19105_v63 = vpop.eup %19104  ;;  %15358 = vmatmul.mubr.f32.gmra.mrb[110].mxu0 %v19099_v31  ;;  %14802 = vadd.xlane.f32.xlu1 %v26574_v48  ;;  %v14287_v62 = vpop.xlane.xlu1 %14286  ;;  %v26577_v31 = vld [vmem:[#allocation168_spill] sm:$0xff]  ;;  %v15046_v48 = vld [vmem:[#allocation3 + $0x328] sm:$0xff] }
 0x84f   : > { %19114 = vpow2.f32 %v14637_v22  ;;  %v14441_v4 = vsub.f32 %v26575_v52, %v14287_v62  ;;  %v14442_v12 = vsub.f32 %v26576_v13, %v14287_v62  ;;  %15427 = vmatprep.mubr.f32.mxu0 %v19105_v63  ;;  %v25153_v36 = vadd.f32 %v19105_v63, %v19103_v28  ;;  %v26578_v22 = vld [vmem:[#allocation148_spill] sm:$0xff] }
 0x850   : > { %19116 = vpow2.f32 %v14639_v56  ;;  %v26579_v56 = vld [vmem:[#allocation149_spill] sm:$0xff]  ;;  %v18683_v52 = vpack.c.bf16 %v15062_v27, %v15061_v5  ;;  %v18685_v53 = vpack.c.bf16 %v15046_v48, %v15045_v55  ;;  %v15047_v5 = vld [vmem:[#allocation3 + $0x330] sm:$0xff]  ;;  %v15048_v27 = vld [vmem:[#allocation3 + $0x338] sm:$0xff] }
 0x851   : > { %v19107_v40 = vpop.eup %19106  ;;  %v14641_v16 = vmul.f32 1.442695, %v14441_v4  ;;  %v14643_v14 = vmul.f32 1.442695, %v14442_v12  ;;  %14805 = vadd.xlane.f32.xlu0 %v26577_v31  ;;  %v15064_v12 = vld [vmem:[#allocation3 + $0x3b8] sm:$0xff]  ;;  %v26582_v55 = vld [vmem:[#allocation152_spill] sm:$0xff] }
 0x852   : > { %v19109_v50 = vpop.eup %19108  ;;  %15428 = vmatmul.mubr.f32.vlgmr.msra.gmra.mrb[112].mxu0 %v19103_v28  ;;  %14808 = vadd.xlane.f32.xlu1 %v24999_v17  ;;  %v14290_v37 = vpop.xlane.xlu0 %14289  ;;  %v15063_v17 = vld [vmem:[#allocation3 + $0x3b0] sm:$0xff] }
 0x853   : > { %19118 = vpow2.f32 %v14641_v16  ;;  %18678 = vmatpush3.bf16.msra.mxu0 %v18677_v41  ;;  %15432 = vmatprep.mubr.f32.mxu0 %v19109_v50  ;;  %v14443_v63 = vsub.f32 %v26578_v22, %v14290_v37  ;;  %v14444_v42 = vsub.f32 %v26579_v56, %v14290_v37  ;;  %v25159_v62 = vadd.f32 %v19109_v50, %v19107_v40  ;;  %v26580_v16 = vld [vmem:[#allocation150_spill] sm:$0xff] }
 0x854   : > { %19120 = vpow2.f32 %v14643_v14  ;;  %18680 = vmatprep.subr.bf16.mxu0 %v18679_v19  ;;  %v26581_v14 = vld [vmem:[#allocation151_spill] sm:$0xff] }
 0x855   : > { %v19111_v4 = vpop.eup %19110  ;;  %v14645_v28 = vmul.f32 1.442695, %v14443_v63  ;;  %v14647_v13 = vmul.f32 1.442695, %v14444_v42  ;;  %14811 = vadd.xlane.f32.xlu0 %v25030_v20  ;;  %v18687_v20 = vpack.c.bf16 %v15064_v12, %v15063_v17  ;;  %v15066_v63 = vld [vmem:[#allocation3 + $0x3c8] sm:$0xff]  ;;  %v18689_v42 = vpack.c.bf16 %v15048_v27, %v15047_v5  ;;  %v26585_v27 = vld [vmem:[#allocation155_spill] sm:$0xff] }
 0x856   : > { %v19113_v41 = vpop.eup %19112  ;;  %15433 = vmatmul.mubr.f32.gmra.mrb[114].mxu0 %v19107_v40  ;;  %14814 = vadd.xlane.f32.xlu1 %v25066_v29  ;;  %v14293_v33 = vpop.xlane.xlu1 %14292  ;;  %v15065_v29 = vld [vmem:[#allocation3 + $0x3c0] sm:$0xff]  ;;  %v15050_v17 = vld [vmem:[#allocation3 + $0x348] sm:$0xff] }
 0x857   : > { %19122 = vpow2.f32 %v14645_v28  ;;  %18682 = vmatpush3.bf16.msra.mxu0 %v18681_v32  ;;  %v14445_v31 = vsub.f32 %v26580_v16, %v14293_v33  ;;  %v14446_v19 = vsub.f32 %v26581_v14, %v14293_v33  ;;  %15437 = vmatprep.mubr.f32.mxu0 %v19113_v41  ;;  %v25165_v50 = vadd.f32 %v19113_v41, %v19111_v4  ;;  %v26583_v28 = vld [vmem:[#allocation153_spill] sm:$0xff]  ;;  %v15068_v16 = vld [vmem:[#allocation3 + $0x3d8] sm:$0xff] }
 0x858   : > { %19124 = vpow2.f32 %v14647_v13  ;;  %18684 = vmatprep.subr.bf16.mxu0 %v18683_v52  ;;  %v15049_v13 = vld [vmem:[#allocation3 + $0x340] sm:$0xff] }
 0x859   : > { %v19115_v37 = vpop.eup %19114  ;;  %v14649_v40 = vmul.f32 1.442695, %v14445_v31  ;;  %v14651_v22 = vmul.f32 1.442695, %v14446_v19  ;;  %14817 = vadd.xlane.f32.xlu0 %v25082_v21  ;;  %v18691_v21 = vpack.c.bf16 %v15066_v63, %v15065_v29  ;;  %v26584_v19 = vld [vmem:[#allocation154_spill] sm:$0xff] }
 0x85a   : > { %v19117_v32 = vpop.eup %19116  ;;  %15438 = vmatmul.mubr.f32.gmra.mrb[116].mxu0 %v19111_v4  ;;  %14820 = vadd.xlane.f32.xlu1 %v25093_v15  ;;  %v14296_v56 = vpop.xlane.xlu0 %14295  ;;  %v15067_v15 = vld [vmem:[#allocation3 + $0x3d0] sm:$0xff] }
 0x85b   : > { %19126 = vpow2.f32 %v14649_v40  ;;  %15442 = vmatprep.mubr.f32.mxu0 %v19117_v32  ;;  %v14447_v48 = vsub.f32 %v26582_v55, %v14296_v56  ;;  %v14448_v52 = vsub.f32 %v26583_v28, %v14296_v56  ;;  %18686 = vmatpush3.bf16.msra.mxu0 %v18685_v53  ;;  %v25171_v12 = vadd.f32 %v19117_v32, %v19115_v37  ;;  %v15070_v56 = vld [vmem:[#allocation3 + $0x3e8] sm:$0xff]  ;;  %v15973_v28 = vld [vmem:[#allocation12] sm:$0xff] }
 0x85c   : > { %19128 = vpow2.f32 %v14651_v22  ;;  %18688 = vmatprep.subr.bf16.mxu0 %v18687_v20  ;;  %v18693_v53 = vpack.c.bf16 %v15050_v17, %v15049_v13  ;;  %v15051_v20 = vld [vmem:[#allocation3 + $0x350] sm:$0xff]  ;;  %v15052_v22 = vld [vmem:[#allocation3 + $0x358] sm:$0xff]  ;;  %v26586_v13 = vld [vmem:[#allocation156_spill] sm:$0xff] }
 0x85d   : > { %v19119_v41 = vpop.eup %19118  ;;  %v14653_v4 = vmul.f32 1.442695, %v14447_v48  ;;  %v14655_v33 = vmul.f32 1.442695, %v14448_v52  ;;  %14823 = vadd.xlane.f32.xlu0 %v25100_v8  ;;  %v18695_v8 = vpack.c.bf16 %v15068_v16, %v15067_v15  ;;  %v15974_v52 = vld [vmem:[#allocation12 + $0x8] sm:$0xff] }
 0x85e   : > { %v19121_v31 = vpop.eup %19120  ;;  %15443 = vmatmul.mubr.f32.gmra.mrb[118].mxu0 %v19115_v37  ;;  %14826 = vadd.xlane.f32.xlu1 %v25106_v54  ;;  %v14299_v14 = vpop.xlane.xlu1 %14298  ;;  %v15069_v54 = vld [vmem:[#allocation3 + $0x3e0] sm:$0xff]  ;;  %v15054_v15 = vld [vmem:[#allocation3 + $0x368] sm:$0xff]  ;;  %v25185_v16 = vpack.c.bf16 %v15974_v52, %v15973_v28 }
 0x85f   : > { %19130 = vpow2.f32 %v14653_v4  ;;  %v14449_v5 = vsub.f32 %v26584_v19, %v14299_v14  ;;  %v14450_v40 = vsub.f32 %v26585_v27, %v14299_v14  ;;  %15447 = vmatprep.mubr.f32.mxu0 %v19121_v31  ;;  %18690 = vmatpush3.bf16.msra.mxu0 %v18689_v42  ;;  %v25177_v29 = vadd.f32 %v19121_v31, %v19119_v41  ;;  %v15071_v19 = vld [vmem:[#allocation3 + $0x3f0] sm:$0xff] }
 0x860   : > { %19132 = vpow2.f32 %v14655_v33  ;;  %18692 = vmatprep.subr.bf16.mxu0 %v18691_v21  ;;  %v18697_v42 = vpack.c.bf16 %v15052_v22, %v15051_v20  ;;  %v26587_v21 = vld [vmem:[#allocation157_spill] sm:$0xff]  ;;  %v15053_v33 = vld [vmem:[#allocation3 + $0x360] sm:$0xff]  ;;  %v26588_v20 = vld [vmem:[#allocation158_spill] sm:$0xff]  ;;  %18708 = vmatprep.subr.bf16.mxu1 %v25185_v16 }
 0x861   : > { %v19123_v63 = vpop.eup %19122  ;;  %v14657_v37 = vmul.f32 1.442695, %v14449_v5  ;;  %v14659_v32 = vmul.f32 1.442695, %v14450_v40  ;;  %14829 = vadd.xlane.f32.xlu0 %v25112_v58  ;;  %v15072_v5 = vld [vmem:[#allocation3 + $0x3f8] sm:$0xff]  ;;  %v18701_v40 = vpack.c.bf16 %v15054_v15, %v15053_v33  ;;  %v26592_v33 = vld [vmem:[#allocation160_spill] sm:$0xff] }
 0x862   : > { %v19125_v55 = vpop.eup %19124  ;;  %15448 = vmatmul.mubr.f32.gmra.mrb[120].mxu0 %v19119_v41  ;;  %14832 = vadd.xlane.f32.xlu1 %v25118_v9  ;;  %v14302_v48 = vpop.xlane.xlu0 %14301  ;;  %v18699_v41 = vpack.c.bf16 %v15070_v56, %v15069_v54  ;;  %v15055_v54 = vld [vmem:[#allocation3 + $0x370] sm:$0xff]  ;;  %v15056_v56 = vld [vmem:[#allocation3 + $0x378] sm:$0xff] }
 0x863   : > { %19134 = vpow2.f32 %v14657_v37  ;;  %15452 = vmatprep.mubr.f32.mxu0 %v19125_v55  ;;  %v14451_v17 = vsub.f32 %v26586_v13, %v14302_v48  ;;  %v14452_v4 = vsub.f32 %v26587_v21, %v14302_v48  ;;  %18694 = vmatpush3.bf16.msra.mxu0 %v18693_v53  ;;  %v25183_v58 = vadd.f32 %v19125_v55, %v19123_v63  ;;  %v26590_v13 = vld [vmem:[#allocation94_spill] sm:$0xff]  ;;  %v26591_v21 = vld [vmem:[#allocation112_spill] sm:$0xff] }
 0x864   : > { %19136 = vpow2.f32 %v14659_v32  ;;  %18696 = vmatprep.subr.bf16.mxu0 %v18695_v8  ;;  %v26589_v8 = vld [vmem:[#allocation159_spill] sm:$0xff]  ;;  %v18705_v52 = vpack.c.bf16 %v15056_v56, %v15055_v54  ;;  %v26596_v54 = vld [vmem:[#allocation132_spill] sm:$0xff] }
 0x865   : > { %v19127_v9 = vpop.eup %19126  ;;  %v14661_v31 = vmul.f32 1.442695, %v14451_v17  ;;  %v14663_v14 = vmul.f32 1.442695, %v14452_v4  ;;  %14835 = vadd.xlane.f32.xlu0 %v25128_v43  ;;  %v18703_v43 = vpack.c.bf16 %v15072_v5, %v15071_v19 }
 0x866   : > { %v19129_v27 = vpop.eup %19128  ;;  %15453 = vmatmul.mubr.f32.gmra.mrb[122].mxu0 %v19123_v63  ;;  %14838 = vadd.xlane.f32.xlu1 %v25136_v24  ;;  %v14305_v53 = vpop.xlane.xlu1 %14304 }
 0x867   : > { %19138 = vpow2.f32 %v14661_v31  ;;  %v14453_v22 = vsub.f32 %v26588_v20, %v14305_v53  ;;  %v14454_v37 = vsub.f32 %v26589_v8, %v14305_v53  ;;  %15457 = vmatprep.mubr.f32.mxu0 %v19129_v27  ;;  %18698 = vmatpush3.bf16.msra.mxu0 %v18697_v42  ;;  %v25191_v32 = vadd.f32 %v19129_v27, %v19127_v9  ;;  %v26595_v8 = vld [vmem:[#allocation139_spill] sm:$0xff] }
 0x868   : > { %19140 = vpow2.f32 %v14663_v14  ;;  %18700 = vmatprep.subr.bf16.mxu0 %v18699_v41  ;;  %v26593_v41 = vld [vmem:[#allocation161_spill] sm:$0xff] }
 0x869   : > { %v19131_v63 = vpop.eup %19130  ;;  %v14665_v24 = vmul.f32 1.442695, %v14453_v22  ;;  %v14667_v55 = vmul.f32 1.442695, %v14454_v37  ;;  %14841 = vadd.xlane.f32.xlu0 %v25140_v25 }
 0x86a   : > { %v19133_v48 = vpop.eup %19132  ;;  %15458 = vmatmul.mubr.f32.gmra.mrb[124].mxu0 %v19127_v9  ;;  %14844 = vadd.xlane.f32.xlu1 %v25144_v35  ;;  %v14323_v28 = vpop.xlane.xlu1 %14322 }
 0x86b   : > { %v14308_v42 = vpop.xlane.xlu0 %14307  ;;  %19142 = vpow2.f32 %v14665_v24  ;;  %v14465_v17 = vsub.f32 %v26590_v13, %v14323_v28  ;;  %v14466_v4 = vsub.f32 %v26591_v21, %v14323_v28  ;;  %15462 = vmatprep.mubr.f32.mxu0 %v19133_v48  ;;  %18702 = vmatpush3.bf16.msra.mxu0 %v18701_v40  ;;  %v25200_v25 = vadd.f32 %v19133_v48, %v19131_v63  ;;  %v26594_v40 = vld [vmem:[#allocation136_spill] sm:$0xff] }
 0x86c   : > { %v14455_v15 = vsub.f32 %v26592_v33, %v14308_v42  ;;  %19144 = vpow2.f32 %v14667_v55  ;;  %v14456_v31 = vsub.f32 %v26593_v41, %v14308_v42  ;;  %18704 = vmatprep.subr.bf16.mxu0 %v18703_v43  ;;  %v26597_v43 = vld [vmem:[#allocation135_spill] sm:$0xff] }
 0x86d   : > { %v19135_v9 = vpop.eup %19134  ;;  %v14689_v35 = vmul.f32 1.442695, %v14465_v17  ;;  %v14691_v14 = vmul.f32 1.442695, %v14466_v4  ;;  %14847 = vadd.xlane.f32.xlu0 %v25148_v45  ;;  %v26598_v17 = vld [vmem:[#allocation162_spill] sm:$0xff]  ;;  %v26599_v4 = vld [vmem:[#allocation163_spill] sm:$0xff] }
 0x86e   : > { %v14669_v19 = vmul.f32 1.442695, %v14455_v15  ;;  %v19137_v5 = vpop.eup %19136  ;;  %v14671_v27 = vmul.f32 1.442695, %v14456_v31  ;;  %15463 = vmatmul.mubr.f32.gmra.mrb[126].mxu0 %v19131_v63  ;;  %14850 = vadd.xlane.f32.xlu1 %v25153_v36  ;;  %v14329_v53 = vpop.xlane.xlu1 %14328  ;;  %v26600_v15 = vld [vmem:[#allocation140_spill] sm:$0xff]  ;;  %v26601_v31 = vld [vmem:[#allocation143_spill] sm:$0xff] }
 0x86f   : > { %v14326_v20 = vpop.xlane.xlu0 %14325  ;;  %19146 = vpow2.f32 %v14689_v35  ;;  %v14469_v22 = vsub.f32 %v26594_v40, %v14329_v53  ;;  %v14470_v37 = vsub.f32 %v26595_v8, %v14329_v53  ;;  %15467 = vmatprep.mubr.f32.mxu0 %v19137_v5  ;;  %18706 = vmatpush3.bf16.msra.mxu0 %v18705_v52  ;;  %v25208_v45 = vadd.f32 %v19137_v5, %v19135_v9  ;;  %v26602_v40 = vld [vmem:[#allocation164_spill] sm:$0xff]  ;;  %v26603_v8 = vld [vmem:[#allocation166_spill] sm:$0xff] }
 0x870   : > { %v14467_v56 = vsub.f32 %v26596_v54, %v14326_v20  ;;  %19148 = vpow2.f32 %v14691_v14  ;;  %v14468_v24 = vsub.f32 %v26597_v43, %v14326_v20  ;;  %v26604_v54 = vld [vmem:[#allocation144_spill] sm:$0xff]  ;;  %v26605_v43 = vld [vmem:[#allocation147_spill] sm:$0xff] }
 0x871   : > { %v19139_v55 = vpop.eup %19138  ;;  %19150 = vpow2.f32 %v14669_v19  ;;  %v14697_v63 = vmul.f32 1.442695, %v14469_v22  ;;  %v14699_v36 = vmul.f32 1.442695, %v14470_v37  ;;  %14853 = vadd.xlane.f32.xlu0 %v25159_v62 }
 0x872   : > { %v14693_v48 = vmul.f32 1.442695, %v14467_v56  ;;  %v19141_v28 = vpop.eup %19140  ;;  %19152 = vpow2.f32 %v14671_v27  ;;  %v14695_v42 = vmul.f32 1.442695, %v14468_v24  ;;  %15468 = vmatmul.mubr.f32.gmra.mrb[128].mxu0 %v19135_v9  ;;  %14856 = vadd.xlane.f32.xlu1 %v25165_v50  ;;  %v14311_v13 = vpop.xlane.xlu1 %14310 }
 0x873   : > { %v14332_v52 = vpop.xlane.xlu0 %14331  ;;  %19154 = vpow2.f32 %v14697_v63  ;;  %v14457_v21 = vsub.f32 %v26598_v17, %v14311_v13  ;;  %v14458_v33 = vsub.f32 %v26599_v4, %v14311_v13  ;;  %15472 = vmatprep.mubr.f32.mxu0 %v19141_v28  ;;  %v25216_v62 = vadd.f32 %v19141_v28, %v19139_v55  ;;  %v26606_v17 = vld [vmem:[#allocation167_spill] sm:$0xff]  ;;  %v26607_v4 = vld [vmem:[#allocation169_spill] sm:$0xff] }
 0x874   : > { %v14471_v41 = vsub.f32 %v26600_v15, %v14332_v52  ;;  %19156 = vpow2.f32 %v14699_v36  ;;  %v14472_v35 = vsub.f32 %v26601_v31, %v14332_v52 }
 0x875   : > { %v19143_v14 = vpop.eup %19142  ;;  %19158 = vpow2.f32 %v14693_v48  ;;  %v14673_v9 = vmul.f32 1.442695, %v14457_v21  ;;  %v14675_v19 = vmul.f32 1.442695, %v14458_v33  ;;  %14859 = vadd.xlane.f32.xlu0 %v25171_v12 }
 0x876   : > { %v14701_v50 = vmul.f32 1.442695, %v14471_v41  ;;  %v19145_v5 = vpop.eup %19144  ;;  %19160 = vpow2.f32 %v14695_v42  ;;  %v14703_v27 = vmul.f32 1.442695, %v14472_v35  ;;  %15473 = vmatmul.mubr.f32.gmra.mrb[130].mxu0 %v19139_v55  ;;  %14862 = vadd.xlane.f32.xlu1 %v25177_v29  ;;  %v14314_v53 = vpop.xlane.xlu1 %14313 }
 0x877   : > { %v14335_v20 = vpop.xlane.xlu0 %14334  ;;  %19162 = vpow2.f32 %v14673_v9  ;;  %v14459_v22 = vsub.f32 %v26602_v40, %v14314_v53  ;;  %v14460_v37 = vsub.f32 %v26603_v8, %v14314_v53  ;;  %15477 = vmatprep.mubr.f32.mxu0 %v19145_v5  ;;  %v14879_v12 = vadd.f32 %v19145_v5, %v19143_v14 }
 0x878   : > { %v14473_v56 = vsub.f32 %v26604_v54, %v14335_v20  ;;  %19164 = vpow2.f32 %v14675_v19  ;;  %v14474_v24 = vsub.f32 %v26605_v43, %v14335_v20 }
 0x879   : > { %v19147_v63 = vpop.eup %19146  ;;  %19166 = vpow2.f32 %v14701_v50  ;;  %v14677_v36 = vmul.f32 1.442695, %v14459_v22  ;;  %v14679_v55 = vmul.f32 1.442695, %v14460_v37  ;;  %14865 = vadd.xlane.f32.xlu0 %v25183_v58  ;;  %v15976_v37 = vld [vmem:[#allocation12 + $0x18] sm:$0xff] }
 0x87a   : > { %v14705_v48 = vmul.f32 1.442695, %v14473_v56  ;;  %v19149_v29 = vpop.eup %19148  ;;  %19168 = vpow2.f32 %v14703_v27  ;;  %v14707_v28 = vmul.f32 1.442695, %v14474_v24  ;;  %15478 = vmatmul.mubr.f32.gmra.mrb[132].mxu0 %v19143_v14  ;;  %14868 = vadd.xlane.f32.xlu1 %v25191_v32  ;;  %v14317_v42 = vpop.xlane.xlu1 %14316 }
 0x87b   : > { %v14338_v13 = vpop.xlane.xlu0 %14337  ;;  %v19151_v52 = vpop.eup %19150  ;;  %19170 = vpow2.f32 %v14677_v36  ;;  %v14461_v21 = vsub.f32 %v26606_v17, %v14317_v42  ;;  %v14462_v33 = vsub.f32 %v26607_v4, %v14317_v42  ;;  %v25230_v31 = vadd.f32 %v19149_v29, %v19147_v63 }
 0x87c   : > { %v14475_v15 = vsub.f32 %v24794_v59, %v14338_v13  ;;  %v19153_v41 = vpop.eup %19152  ;;  %19172 = vpow2.f32 %v14679_v55  ;;  %v14476_v58 = vsub.f32 %v24800_v60, %v14338_v13 }
 0x87d   : > { %v25232_v35 = vpop.eup %19154  ;;  %19174 = vpow2.f32 %v14705_v48  ;;  %v14681_v32 = vmul.f32 1.442695, %v14461_v21  ;;  %v14683_v14 = vmul.f32 1.442695, %v14462_v33  ;;  %15482 = vmatprep.mubr.f32.mxu0 %v19153_v41  ;;  %14871 = vadd.xlane.f32.xlu0 %v25200_v25  ;;  %v14882_v5 = vadd.f32 %v19153_v41, %v19151_v52 }
 0x87e   : > { %v14709_v9 = vmul.f32 1.442695, %v14475_v15  ;;  %v25235_v19 = vpop.eup %19156  ;;  %19176 = vpow2.f32 %v14707_v28  ;;  %v14711_v50 = vmul.f32 1.442695, %v14476_v58  ;;  %15483 = vmatmul.mubr.f32.gmra.mrb[134].mxu0 %v19151_v52  ;;  %14874 = vadd.xlane.f32.xlu1 %v25208_v45  ;;  %v14320_v59 = vpop.xlane.xlu1 %14319  ;;  %v15975_v45 = vld [vmem:[#allocation12 + $0x10] sm:$0xff] }
 0x87f   : > { %v14341_v60 = vpop.xlane.xlu0 %14340  ;;  %v19159_v27 = vpop.eup %19158  ;;  %19178 = vpow2.f32 %v14681_v32  ;;  %15572 = vmatprep.mubr.f32.mxu0 %v19149_v29  ;;  %v14463_v53 = vsub.f32 %v24964_v51, %v14320_v59  ;;  %v14464_v20 = vsub.f32 %v24968_v18, %v14320_v59  ;;  %v25244_v8 = vadd.f32 %v25235_v19, %v25232_v35 }
 0x880   : > { %v14477_v40 = vsub.f32 %v24806_v61, %v14341_v60  ;;  %v19161_v25 = vpop.eup %19160  ;;  %19180 = vpow2.f32 %v14683_v14  ;;  %v14478_v22 = vsub.f32 %v24812_v38, %v14341_v60  ;;  %v18711_v42 = vpack.c.bf16 %v15976_v37, %v15975_v45 }
 0x881   : > { %v19163_v54 = vpop.eup %19162  ;;  %19182 = vpow2.f32 %v14709_v9  ;;  %v14685_v56 = vmul.f32 1.442695, %v14463_v53  ;;  %v14687_v43 = vmul.f32 1.442695, %v14464_v20  ;;  %14877 = vadd.xlane.f32.xlu0 %v25216_v62  ;;  %v25247_v36 = vadd.f32 %v19161_v25, %v19159_v27 }
 0x882   : > { %v14713_v24 = vmul.f32 1.442695, %v14477_v40  ;;  %v19165_v51 = vpop.eup %19164  ;;  %19184 = vpow2.f32 %v14711_v50  ;;  %v14715_v61 = vmul.f32 1.442695, %v14478_v22  ;;  %15573 = vmatmul.mubr.f32.vlgmr.msra.gmra.mrb[136].mxu0 %v19147_v63  ;;  %14880 = vadd.xlane.f32.xlu1 %v14879_v12  ;;  %v14347_v18 = vpop.xlane.xlu1 %14346 }
 0x883   : > { %v14344_v38 = vpop.xlane.xlu0 %14343  ;;  %v25249_v55 = vpop.eup %19166  ;;  %19186 = vpow2.f32 %v14685_v56  ;;  %15577 = vmatprep.mubr.f32.mxu0 %v19161_v25  ;;  %15487 = vmatprep.mubr.f32.mxu1 %v19165_v51  ;;  %v14481_v48 = vsub.f32 %v24830_v46, %v14347_v18  ;;  %v14482_v29 = vsub.f32 %v24836_v30, %v14347_v18  ;;  %v14885_v12 = vadd.f32 %v19165_v51, %v19163_v54 }
 0x884   : > { %v14479_v62 = vsub.f32 %v24818_v39, %v14344_v38  ;;  %v19169_v28 = vpop.eup %19168  ;;  %19188 = vpow2.f32 %v14687_v43  ;;  %v14480_v63 = vsub.f32 %v24824_v34, %v14344_v38  ;;  %15488 = vmatmul.mubr.f32.vlgmr.msra.gmra.mrb[96].mxu1 %v19163_v54 }
 0x885   : > { %v19171_v13 = vpop.eup %19170  ;;  %19190 = vpow2.f32 %v14713_v24  ;;  %v14721_v52 = vmul.f32 1.442695, %v14481_v48  ;;  %v14723_v17 = vmul.f32 1.442695, %v14482_v29  ;;  %14883 = vadd.xlane.f32.xlu0 %v14882_v5  ;;  %18710 = vmatpush3.bf16.msra.mxu1 %v25185_v16  ;;  %v25257_v34 = vadd.f32 %v19169_v28, %v25249_v55 }
 0x886   : > { %v14717_v21 = vmul.f32 1.442695, %v14479_v62  ;;  %v19173_v46 = vpop.eup %19172  ;;  %19192 = vpow2.f32 %v14715_v61  ;;  %v14719_v30 = vmul.f32 1.442695, %v14480_v63  ;;  %15578 = vmatmul.mubr.f32.gmra.mrb[138].mxu0 %v19159_v27  ;;  %14886 = vadd.xlane.f32.xlu1 %v14885_v12  ;;  %v14353_v39 = vpop.xlane.xlu1 %14352 }
 0x887   : > { %v14350_v4 = vpop.xlane.xlu0 %14349  ;;  %v25259_v33 = vpop.eup %19174  ;;  %19194 = vpow2.f32 %v14721_v52  ;;  %15582 = vmatprep.mubr.f32.mxu0 %v25235_v19  ;;  %15492 = vmatprep.mubr.f32.mxu1 %v19173_v46  ;;  %v14485_v15 = vsub.f32 %v24856_v2, %v14353_v39  ;;  %v14486_v16 = vsub.f32 %v24864_v0, %v14353_v39  ;;  %v14888_v14 = vadd.f32 %v19173_v46, %v19171_v13 }
 0x888   : > { %v14483_v41 = vsub.f32 %v24842_v26, %v14350_v4  ;;  %v19177_v58 = vpop.eup %19176  ;;  %19196 = vpow2.f32 %v14723_v17  ;;  %v14484_v32 = vsub.f32 %v24850_v1, %v14350_v4  ;;  %15493 = vmatmul.mubr.f32.gmra.mrb[98].mxu1 %v19171_v13  ;;  %18712 = vmatprep.subr.bf16.mxu1 %v18711_v42 }
 0x889   : > { %v19179_v9 = vpop.eup %19178  ;;  %19198 = vpow2.f32 %v14717_v21  ;;  %v14729_v50 = vmul.f32 1.442695, %v14485_v15  ;;  %v14731_v59 = vmul.f32 1.442695, %v14486_v16  ;;  %18714 = vmatpush3.bf16.msra.mxu1 %v18711_v42  ;;  %14889 = vadd.xlane.f32.xlu0 %v14888_v14  ;;  %v25268_v5 = vadd.f32 %v19177_v58, %v25259_v33 }
 0x88a   : > { %v14725_v60 = vmul.f32 1.442695, %v14483_v41  ;;  %v19181_v19 = vpop.eup %19180  ;;  %19200 = vpow2.f32 %v14719_v30  ;;  %v14727_v2 = vmul.f32 1.442695, %v14484_v32  ;;  %15583 = vmatmul.mubr.f32.gmra.mrb[140].mxu0 %v25232_v35  ;;  %v14359_v0 = vpop.xlane.xlu1 %14358 }
 0x88b   : > { %v14356_v26 = vpop.xlane.xlu0 %14355  ;;  %v25270_v1 = vpop.eup %19182  ;;  %19202 = vpow2.f32 %v14729_v50  ;;  %15587 = vmatprep.mubr.f32.mxu0 %v19169_v28  ;;  %15497 = vmatprep.mubr.f32.mxu1 %v19181_v19  ;;  %v14489_v27 = vsub.f32 %v24884_v11, %v14359_v0  ;;  %v14490_v53 = vsub.f32 %v24895_v47, %v14359_v0  ;;  %v14891_v25 = vadd.f32 %v19181_v19, %v19179_v9  ;;  %v15978_v0 = vld [vmem:[#allocation12 + $0x28] sm:$0xff] }
 0x88c   : > { %v14487_v20 = vsub.f32 %v24870_v49, %v14356_v26  ;;  %v19185_v40 = vpop.eup %19184  ;;  %19204 = vpow2.f32 %v14731_v59  ;;  %v14488_v35 = vsub.f32 %v24878_v57, %v14356_v26  ;;  %15498 = vmatmul.mubr.f32.gmra.mrb[100].mxu1 %v19179_v9 }
 0x88d   : > { %v19187_v22 = vpop.eup %19186  ;;  %19206 = vpow2.f32 %v14725_v60  ;;  %v14737_v45 = vmul.f32 1.442695, %v14489_v27  ;;  %v14739_v37 = vmul.f32 1.442695, %v14490_v53  ;;  %14892 = vadd.xlane.f32.xlu1 %v14891_v25  ;;  %v25278_v49 = vadd.f32 %v19185_v40, %v25270_v1 }
 0x88e   : > { %v14733_v54 = vmul.f32 1.442695, %v14487_v20  ;;  %v19189_v56 = vpop.eup %19188  ;;  %19208 = vpow2.f32 %v14727_v2  ;;  %v14735_v43 = vmul.f32 1.442695, %v14488_v35  ;;  %15588 = vmatmul.mubr.f32.gmra.mrb[142].mxu0 %v25249_v55  ;;  %v14365_v11 = vpop.xlane.xlu1 %14364  ;;  %v15977_v2 = vld [vmem:[#allocation12 + $0x20] sm:$0xff] }
 0x88f   : > { %v14362_v47 = vpop.xlane.xlu0 %14361  ;;  %v19191_v24 = vpop.eup %19190  ;;  %19210 = vpow2.f32 %v14737_v45  ;;  %15592 = vmatprep.mubr.f32.mxu0 %v19177_v58  ;;  %15502 = vmatprep.mubr.f32.mxu1 %v19189_v56  ;;  %v14493_v57 = vsub.f32 %v24932_v10, %v14365_v11  ;;  %v14494_v51 = vsub.f32 %v24943_v44, %v14365_v11  ;;  %v14894_v55 = vadd.f32 %v19189_v56, %v19187_v22 }
 0x890   : > { %v14491_v61 = vsub.f32 %v24905_v23, %v14362_v47  ;;  %v19193_v18 = vpop.eup %19192  ;;  %19212 = vpow2.f32 %v14739_v37  ;;  %v14492_v38 = vsub.f32 %v24921_v6, %v14362_v47  ;;  %15503 = vmatmul.mubr.f32.gmra.mrb[102].mxu1 %v19187_v22 }
 0x891   : > { %v19195_v48 = vpop.eup %19194  ;;  %19214 = vpow2.f32 %v14733_v54  ;;  %v14745_v29 = vmul.f32 1.442695, %v14493_v57  ;;  %v14747_v62 = vmul.f32 1.442695, %v14494_v51  ;;  %14898 = vadd.xlane.f32.xlu1 %v25230_v31  ;;  %v14915_v23 = vadd.f32 %v19193_v18, %v19191_v24  ;;  %14895 = vadd.xlane.f32.xlu0 %v14894_v55 }
 0x892   : > { %v14741_v28 = vmul.f32 1.442695, %v14491_v61  ;;  %v19197_v63 = vpop.eup %19196  ;;  %19216 = vpow2.f32 %v14735_v43  ;;  %v14743_v12 = vmul.f32 1.442695, %v14492_v38  ;;  %15593 = vmatmul.mubr.f32.gmra.mrb[144].mxu0 %v25259_v33  ;;  %v14755_v26 = vpop.xlane.xlu1 %14754 }
 0x893   : > { %v14368_v10 = vpop.xlane.xlu0 %14367  ;;  %v19199_v44 = vpop.eup %19198  ;;  %19218 = vpow2.f32 %v14745_v29  ;;  %15597 = vmatprep.mubr.f32.mxu0 %v19185_v40  ;;  %v14921_v13 = vadd.f32 %v19197_v63, %v19195_v48 }
 0x894   : > { %v14495_v6 = vsub.f32 %v24959_v3, %v14368_v10  ;;  %v14496_v42 = vsub.f32 %v24970_v7, %v14368_v10  ;;  %v19201_v52 = vpop.eup %19200  ;;  %19220 = vpow2.f32 %v14747_v62  ;;  %v15979_v62 = vld [vmem:[#allocation12 + $0x30] sm:$0xff] }
 0x895   : > { %v19203_v17 = vpop.eup %19202  ;;  %19222 = vpow2.f32 %v14741_v28  ;;  %v14918_v30 = vadd.f32 %v19201_v52, %v19199_v44  ;;  %14904 = vadd.xlane.f32.xlu1 %v25244_v8  ;;  %14901 = vadd.xlane.f32.xlu0 %v25247_v36  ;;  %v15980_v28 = vld [vmem:[#allocation12 + $0x38] sm:$0xff] }
 0x896   : > { %v14749_v21 = vmul.f32 1.442695, %v14495_v6  ;;  %v14751_v46 = vmul.f32 1.442695, %v14496_v42  ;;  %v19205_v39 = vpop.eup %19204  ;;  %19224 = vpow2.f32 %v14743_v12  ;;  %15598 = vmatmul.mubr.f32.gmra.mrb[146].mxu0 %v25270_v1  ;;  %v14761_v27 = vpop.xlane.xlu1 %14760 }
 0x897   : > { %v19207_v31 = vpop.eup %19206  ;;  %15602 = vmatprep.mubr.f32.mxu0 %v19193_v18  ;;  %v14927_v3 = vadd.f32 %v19205_v39, %v19203_v17  ;;  %v14758_v1 = vpop.xlane.xlu0 %14757 }
 0x898   : > { %v19209_v7 = vpop.eup %19208  ;;  %19226 = vpow2.f32 %v14749_v21 }
 0x899   : > { %v19211_v4 = vpop.eup %19210  ;;  %19228 = vpow2.f32 %v14751_v46  ;;  %v14924_v33 = vadd.f32 %v19209_v7, %v19207_v31  ;;  %14910 = vadd.xlane.f32.xlu1 %v25268_v5  ;;  %14907 = vadd.xlane.f32.xlu0 %v25257_v34  ;;  %v25294_v5 = vpack.c.bf16 %v15978_v0, %v15977_v2 }
 0x89a   : > { %v19213_v15 = vpop.eup %19212  ;;  %15603 = vmatmul.mubr.f32.gmra.mrb[148].mxu0 %v19191_v24  ;;  %19230 = vrcp.f32 %v14755_v26  ;;  %v14767_v11 = vpop.xlane.xlu1 %14766 }
 0x89b   : > { %v19215_v16 = vpop.eup %19214  ;;  %15607 = vmatprep.mubr.f32.mxu0 %v19201_v52  ;;  %v14933_v41 = vadd.f32 %v19213_v15, %v19211_v4  ;;  %18716 = vmatprep.subr.bf16.mxu1 %v25294_v5  ;;  %19232 = vrcp.f32 %v14758_v1  ;;  %v14764_v45 = vpop.xlane.xlu0 %14763 }
 0x89c   : > { %v19217_v8 = vpop.eup %19216  ;;  %19234 = vrcp.f32 %v14761_v27 }
 0x89d   : > { %v19219_v58 = vpop.eup %19218  ;;  %v14930_v32 = vadd.f32 %v19217_v8, %v19215_v16  ;;  %14916 = vadd.xlane.f32.xlu1 %v14915_v23  ;;  %14913 = vadd.xlane.f32.xlu0 %v25278_v49  ;;  %19236 = vrcp.f32 %v14764_v45 }
 0x89e   : > { %v19221_v36 = vpop.eup %19220  ;;  %15608 = vmatmul.mubr.f32.gmra.mrb[150].mxu0 %v19199_v44  ;;  %19238 = vrcp.f32 %v14767_v11 }
 0x89f   : > { %v19223_v14 = vpop.eup %19222  ;;  %15612 = vmatprep.mubr.f32.mxu0 %v19197_v63  ;;  %v14939_v9 = vadd.f32 %v19221_v36, %v19219_v58  ;;  %v14770_v23 = vpop.xlane.xlu0 %14769 }
 0x8a0   : > { %v19225_v50 = vpop.eup %19224  ;;  %19240 = vrcp.f32 %v14770_v23 }
 0x8a1   : > { %v14936_v59 = vadd.f32 %v19225_v50, %v19223_v14  ;;  %14922 = vadd.xlane.f32.xlu1 %v14921_v13  ;;  %14919 = vadd.xlane.f32.xlu0 %v14918_v30 }
 0x8a2   : > { %v19227_v60 = vpop.eup %19226  ;;  %15613 = vmatmul.mubr.f32.gmra.mrb[152].mxu0 %v19195_v48 }
 0x8a3   : > { %v19229_v19 = vpop.eup %19228  ;;  %15617 = vmatprep.mubr.f32.mxu0 %v19209_v7 }
 0x8a4   : > { %v14942_v34 = vadd.f32 %v19229_v19, %v19227_v60  ;;  %v19231_v53 = vpop.eup %19230 }
 0x8a5   : > { %14928 = vadd.xlane.f32.xlu1 %v14927_v3  ;;  %14925 = vadd.xlane.f32.xlu0 %v14924_v33  ;;  %v15717_v35 = vmul.f32 %v19231_v53, %v14755_v26  ;;  %v19233_v22 = vpop.eup %19232  ;;  %v15982_v3 = vld [vmem:[#allocation12 + $0x48] sm:$0xff] }
 0x8a6   : > { %15618 = vmatmul.mubr.f32.gmra.mrb[154].mxu0 %v19207_v31  ;;  %v15718_v43 = vmul.f32 %v19233_v22, %v14758_v1  ;;  %v19235_v49 = vpop.eup %19234  ;;  %v15981_v31 = vld [vmem:[#allocation12 + $0x40] sm:$0xff] }
 0x8a7   : > { %15622 = vmatprep.mubr.f32.mxu0 %v19205_v39  ;;  %v15781_v56 = vsub.f32 2.0, %v15717_v35  ;;  %v15719_v61 = vmul.f32 %v19235_v49, %v14761_v27  ;;  %v19237_v6 = vpop.eup %19236 }
 0x8a8   : > { %v15782_v18 = vsub.f32 2.0, %v15718_v43  ;;  %v19239_v7 = vpop.eup %19238 }
 0x8a9   : > { %14934 = vadd.xlane.f32.xlu1 %v14933_v41  ;;  %14931 = vadd.xlane.f32.xlu0 %v14930_v32  ;;  %v15845_v51 = vmul.f32 %v19231_v53, %v15781_v56  ;;  %v15783_v63 = vsub.f32 2.0, %v15719_v61  ;;  %v15721_v41 = vmul.f32 %v19239_v7, %v14767_v11  ;;  %v14773_v32 = vpop.xlane.xlu1 %14772 }
 0x8aa   : > { %15623 = vmatmul.mubr.f32.gmra.mrb[156].mxu0 %v19203_v17  ;;  %v15846_v12 = vmul.f32 %v19233_v22, %v15782_v18  ;;  %v18719_v17 = vpack.c.bf16 %v15980_v28, %v15979_v62  ;;  %19242 = vrcp.f32 %v14773_v32 }
 0x8ab   : > { %15627 = vmatprep.mubr.f32.mxu0 %v19217_v8  ;;  %v15847_v30 = vmul.f32 %v19235_v49, %v15783_v63 }
 0x8ad   : > { %14940 = vadd.xlane.f32.xlu1 %v14939_v9  ;;  %14937 = vadd.xlane.f32.xlu0 %v14936_v59  ;;  %v15785_v59 = vsub.f32 2.0, %v15721_v41  ;;  %v14779_v27 = vpop.xlane.xlu1 %14778 }
 0x8ae   : > { %15628 = vmatmul.mubr.f32.gmra.mrb[158].mxu0 %v19215_v16 }
 0x8af   : > { %15632 = vmatprep.mubr.f32.mxu0 %v19213_v15  ;;  %v25306_v15 = vpack.c.bf16 %v15982_v3, %v15981_v31  ;;  %v15849_v26 = vmul.f32 %v19239_v7, %v15785_v59 }
 0x8b1   : > { %14943 = vadd.xlane.f32.xlu0 %v14942_v34 }
 0x8b2   : > { %15633 = vmatmul.mubr.f32.gmra.mrb[160].mxu0 %v19211_v4  ;;  %v17851_v20 = vpop.f32.mrb[80].mxu0  ;;  %v15720_v4 = vmul.f32 %v19237_v6, %v14764_v45 }
 0x8b3   : > { %15637 = vmatprep.mubr.f32.mxu0 %v19225_v50  ;;  %v17852_v40 = vpop.f32.mrb[81].mxu0 }
 0x8b4   : > { %v25297_v25 = vadd.f32 %v17852_v40, %v17851_v20  ;;  %v15784_v16 = vsub.f32 2.0, %v15720_v4  ;;  %v14776_v20 = vpop.xlane.xlu0 %14775 }
 0x8b5   : > { %19244 = vrcp.f32 %v14776_v20 }
 0x8b6   : > { %15638 = vmatmul.mubr.f32.gmra.mrb[162].mxu0 %v19223_v14  ;;  %v15848_v50 = vmul.f32 %v19237_v6, %v15784_v16  ;;  %19246 = vrcp.f32 %v14779_v27 }
 0x8b7   : > { %15642 = vmatprep.mubr.f32.mxu0 %v19221_v36 }
 0x8b9   : > { %v17854_v37 = vpop.f32.mrb[82].mxu0 }
 0x8ba   : > { %15643 = vmatmul.mubr.f32.gmra.mrb[164].mxu0 %v19219_v58  ;;  %v17855_v54 = vpop.f32.mrb[83].mxu0 }
 0x8bb   : > { %15647 = vmatprep.mubr.f32.mxu0 %v19229_v19  ;;  %v25299_v47 = vadd.f32 %v17855_v54, %v17854_v37  ;;  %v19241_v19 = vpop.eup %19240  ;;  %v25316_v37 = vpop.xlane.xlu1 %14784 }
 0x8bc   : > { %v14782_v54 = vpop.xlane.xlu0 %14781  ;;  %v19243_v43 = vpop.eup %19242 }
 0x8bd   : > { %v17771_v24 = vpop.f32.mrb[64].mxu1  ;;  %v15723_v61 = vmul.f32 %v19243_v43, %v14773_v32  ;;  %19248 = vrcp.f32 %v14782_v54 }
 0x8be   : > { %15648 = vmatmul.mubr.f32.gmra.mrb[166].mxu0 %v19227_v60  ;;  %v17772_v57 = vpop.f32.mrb[65].mxu1  ;;  %19250 = vrcp.f32 %v25316_v37 }
 0x8bf   : > { %v17773_v38 = vadd.f32 %v17772_v57, %v17771_v24  ;;  %v15787_v62 = vsub.f32 2.0, %v15723_v61  ;;  %v19245_v63 = vpop.eup %19244 }
 0x8c1   : > { %v15909_v55 = vmul.f32 %v17773_v38, %v15845_v51 }
 0x8c2   : > { %v17774_v48 = vpop.f32.mrb[66].mxu1 }
 0x8c3   : > { %v17775_v29 = vpop.f32.mrb[67].mxu1  ;;  %18203 = vmatprep.mubr.msk.f32.mxu1 %vm12956_vm1, %v15909_v55  ;;  %v17857_v44 = vpop.f32.mrb[84].mxu0 }
 0x8c4   : > { %v17776_v10 = vadd.f32 %v17775_v29, %v17774_v48  ;;  %v17858_v13 = vpop.f32.mrb[85].mxu0 }
 0x8c5   : > { %v25302_v21 = vadd.f32 %v17858_v13, %v17857_v44  ;;  %v25320_v18 = vpop.xlane.xlu0 %14787  ;;  %v15724_v44 = vmul.f32 %v19245_v63, %v14776_v20 }
 0x8c6   : > { %v15910_v42 = vmul.f32 %v17776_v10, %v15846_v12  ;;  %v17777_v52 = vpop.f32.mrb[68].mxu1  ;;  %19252 = vrcp.f32 %v25320_v18 }
 0x8c7   : > { %v17778_v46 = vpop.f32.mrb[69].mxu1  ;;  %v15788_v31 = vsub.f32 2.0, %v15724_v44 }
 0x8c8   : > { %v17779_v39 = vadd.f32 %v17778_v46, %v17777_v52  ;;  %18204 = vmatmul.mubr.msk.f32.vlgmr.msra.gmra.mrb[104].mxu1 %vm12956_vm1, %v15910_v42 }
 0x8c9   : > { %18718 = vmatpush3.bf16.msra.mxu1 %v25294_v5  ;;  %v15722_v5 = vmul.f32 %v19241_v19, %v14770_v23  ;;  %v15851_v23 = vmul.f32 %v19243_v43, %v15787_v62  ;;  %v15852_v41 = vmul.f32 %v19245_v63, %v15788_v31 }
 0x8ca   : > { %v15911_v33 = vmul.f32 %v17779_v39, %v15847_v30  ;;  %18720 = vmatprep.subr.bf16.mxu1 %v18719_v17  ;;  %v17860_v8 = vpop.f32.mrb[86].mxu0  ;;  %v19247_v39 = vpop.eup %19246 }
 0x8cb   : > { %v17861_v58 = vpop.f32.mrb[87].mxu0  ;;  %v15786_v45 = vsub.f32 2.0, %v15722_v5  ;;  %v15725_v3 = vmul.f32 %v19247_v39, %v14779_v27  ;;  %v19249_v59 = vpop.eup %19248 }
 0x8cc   : > { %18206 = vmatprep.mubr.msk.f32.mxu1 %vm12956_vm1, %v15911_v33  ;;  %v25310_v36 = vadd.f32 %v17861_v58, %v17860_v8 }
 0x8cd   : > { %18722 = vmatpush3.bf16.msra.mxu1 %v18719_v17  ;;  %v17780_v14 = vpop.f32.mrb[70].mxu1  ;;  %v15850_v49 = vmul.f32 %v19241_v19, %v15786_v45  ;;  %v25318_v57 = vpop.xlane.xlu1 %14790 }
 0x8ce   : > { %18724 = vmatprep.subr.bf16.mxu1 %v25306_v15  ;;  %v17781_v9 = vpop.f32.mrb[71].mxu1  ;;  %v19251_v45 = vpop.eup %19250  ;;  %19254 = vrcp.f32 %v25318_v57 }
 0x8cf   : > { %v17782_v60 = vadd.f32 %v17781_v9, %v17780_v14  ;;  %v15789_v14 = vsub.f32 2.0, %v15725_v3 }
 0x8d1   : > { %v15912_v34 = vmul.f32 %v17782_v60, %v15848_v50 }
 0x8d2   : > { %v17783_v2 = vpop.f32.mrb[72].mxu1  ;;  %v25327_v28 = vpop.xlane.xlu0 %14793 }
 0x8d3   : > { %v17784_v0 = vpop.f32.mrb[73].mxu1  ;;  %18207 = vmatmul.mubr.msk.f32.gmra.mrb[106].mxu1 %vm12956_vm1, %v15912_v34  ;;  %v17863_v53 = vpop.f32.mrb[88].mxu0  ;;  %19256 = vrcp.f32 %v25327_v28 }
 0x8d4   : > { %v17785_v1 = vadd.f32 %v17784_v0, %v17783_v2  ;;  %v17864_v35 = vpop.f32.mrb[89].mxu0  ;;  %v15853_v0 = vmul.f32 %v19247_v39, %v15789_v14 }
 0x8d5   : > { %v25313_v22 = vadd.f32 %v17864_v35, %v17863_v53 }
 0x8d6   : > { %v15913_v40 = vmul.f32 %v17785_v1, %v15849_v26  ;;  %v25325_v29 = vpop.xlane.xlu1 %14796  ;;  %v15726_v26 = vmul.f32 %v19249_v59, %v14782_v54  ;;  %v15727_v54 = vmul.f32 %v19251_v45, %v25316_v37 }
 0x8d7   : > { %v17786_v56 = vpop.f32.mrb[74].mxu1  ;;  %19258 = vrcp.f32 %v25325_v29 }
 0x8d8   : > { %18209 = vmatprep.mubr.msk.f32.mxu1 %vm12956_vm1, %v15913_v40  ;;  %v17787_v11 = vpop.f32.mrb[75].mxu1  ;;  %v15790_v40 = vsub.f32 2.0, %v15726_v26 }
 0x8d9   : > { %v17788_v24 = vadd.f32 %v17787_v11, %v17786_v56 }
 0x8da   : > { %v17866_v51 = vpop.f32.mrb[90].mxu0  ;;  %v25329_v6 = vpop.xlane.xlu0 %14799 }
 0x8db   : > { %v15914_v38 = vmul.f32 %v17788_v24, %v15850_v49  ;;  %v17867_v55 = vpop.f32.mrb[91].mxu0  ;;  %v25331_v52 = vpop.xlane.xlu1 %14802  ;;  %v15854_v49 = vmul.f32 %v19249_v59, %v15790_v40 }
 0x8dc   : > { %v25322_v48 = vadd.f32 %v17867_v55, %v17866_v51  ;;  %19260 = vrcp.f32 %v25331_v52 }
 0x8dd   : > { %18210 = vmatmul.mubr.msk.f32.gmra.mrb[108].mxu1 %vm12956_vm1, %v15914_v38  ;;  %19262 = vrcp.f32 %v25329_v6 }
 0x8de   : > { %v25336_v7 = vpop.xlane.xlu0 %14805 }
 0x8df   : > { %v25338_v33 = vpop.xlane.xlu1 %14808  ;;  %19264 = vrcp.f32 %v25336_v7 }
 0x8e0   : > { %19266 = vrcp.f32 %v25338_v33 }
 0x8e2   : > { %v17789_v12 = vpop.f32.mrb[76].mxu1  ;;  %v25343_v60 = vpop.xlane.xlu0 %14811 }
 0x8e3   : > { %v17790_v10 = vpop.f32.mrb[77].mxu1  ;;  %v17869_v42 = vpop.f32.mrb[92].mxu0  ;;  %19268 = vrcp.f32 %v25343_v60 }
 0x8e4   : > { %v17791_v13 = vadd.f32 %v17790_v10, %v17789_v12  ;;  %v17870_v17 = vpop.f32.mrb[93].mxu0  ;;  %v25346_v34 = vpop.xlane.xlu1 %14814  ;;  %v15791_v12 = vsub.f32 2.0, %v15727_v54 }
 0x8e5   : > { %v25333_v30 = vadd.f32 %v17870_v17, %v17869_v42  ;;  %v19253_v10 = vpop.eup %19252  ;;  %19270 = vrcp.f32 %v25346_v34 }
 0x8e6   : > { %v15915_v46 = vmul.f32 %v17791_v13, %v15851_v23  ;;  %v25351_v35 = vpop.xlane.xlu0 %14817  ;;  %v15855_v44 = vmul.f32 %v19251_v45, %v15791_v12  ;;  %v15728_v42 = vmul.f32 %v19253_v10, %v25320_v18 }
 0x8e7   : > { %19272 = vrcp.f32 %v25351_v35 }
 0x8e8   : > { %18212 = vmatprep.mubr.msk.f32.mxu1 %vm12956_vm1, %v15915_v46  ;;  %v25354_v56 = vpop.xlane.xlu1 %14820 }
 0x8e9   : > { %19274 = vrcp.f32 %v25354_v56 }
 0x8ea   : > { %v25357_v38 = vpop.xlane.xlu0 %14823 }
 0x8eb   : > { %v17792_v4 = vpop.f32.mrb[78].mxu1  ;;  %19276 = vrcp.f32 %v25357_v38 }
 0x8ec   : > { %v17793_v16 = vpop.f32.mrb[79].mxu1  ;;  %v25360_v62 = vpop.xlane.xlu1 %14826 }
 0x8ed   : > { %v17872_v8 = vpop.f32.mrb[94].mxu0  ;;  %v17794_v58 = vadd.f32 %v17793_v16, %v17792_v4  ;;  %v15792_v16 = vsub.f32 2.0, %v15728_v42  ;;  %19278 = vrcp.f32 %v25360_v62 }
 0x8ee   : > { %v17873_v32 = vpop.f32.mrb[95].mxu0  ;;  %v25367_v13 = vpop.xlane.xlu0 %14829 }
 0x8ef   : > { %v15916_v9 = vmul.f32 %v17794_v58, %v15852_v41  ;;  %v25341_v50 = vadd.f32 %v17873_v32, %v17872_v8  ;;  %v17795_v19 = vpop.f32.mrb[80].mxu1  ;;  %v19255_v41 = vpop.eup %19254  ;;  %v15856_v14 = vmul.f32 %v19253_v10, %v15792_v16  ;;  %19280 = vrcp.f32 %v25367_v13 }
 0x8f0   : > { %v17796_v2 = vpop.f32.mrb[81].mxu1  ;;  %v25369_v39 = vpop.xlane.xlu1 %14832 }
 0x8f1   : > { %18213 = vmatmul.mubr.msk.f32.gmra.mrb[110].mxu1 %vm12956_vm1, %v15916_v9  ;;  %v17875_v5 = vpop.f32.mrb[96].mxu0  ;;  %v17797_v1 = vadd.f32 %v17796_v2, %v17795_v19  ;;  %v15729_v9 = vmul.f32 %v19255_v41, %v25318_v57  ;;  %v19257_v2 = vpop.eup %19256  ;;  %19282 = vrcp.f32 %v25369_v39 }
 0x8f2   : > { %v17876_v27 = vpop.f32.mrb[97].mxu0  ;;  %v25376_v8 = vpop.xlane.xlu0 %14835 }
 0x8f3   : > { %v15917_v53 = vmul.f32 %v17797_v1, %v15853_v0  ;;  %v25349_v20 = vadd.f32 %v17876_v27, %v17875_v5  ;;  %v15793_v1 = vsub.f32 2.0, %v15729_v9  ;;  %v15730_v27 = vmul.f32 %v19257_v2, %v25327_v28  ;;  %v19259_v40 = vpop.eup %19258 }
 0x8f4   : > { %v25379_v58 = vpop.xlane.xlu1 %14838  ;;  %v19261_v45 = vpop.eup %19260  ;;  %19284 = vrcp.f32 %v25376_v8 }
 0x8f5   : > { %18215 = vmatprep.mubr.msk.f32.mxu1 %vm12956_vm1, %v15917_v53  ;;  %v15794_v54 = vsub.f32 2.0, %v15730_v27  ;;  %19286 = vrcp.f32 %v25379_v58 }
 0x8f6   : > { %v25387_v53 = vpop.xlane.xlu0 %14841 }
 0x8f7   : > { %19288 = vrcp.f32 %v25387_v53 }
 0x8f8   : > { %v25391_v57 = vpop.xlane.xlu1 %14844 }
 0x8f9   : > { %v17798_v43 = vpop.f32.mrb[82].mxu1  ;;  %19290 = vrcp.f32 %v25391_v57 }
 0x8fa   : > { %v17799_v11 = vpop.f32.mrb[83].mxu1 }
 0x8fb   : > { %v17878_v24 = vpop.f32.mrb[98].mxu0  ;;  %v17800_v51 = vadd.f32 %v17799_v11, %v17798_v43 }
 0x8fc   : > { %v17879_v61 = vpop.f32.mrb[99].mxu0 }
 0x8fd   : > { %v15918_v55 = vmul.f32 %v17800_v51, %v15854_v49  ;;  %v25362_v63 = vadd.f32 %v17879_v61, %v17878_v24  ;;  %v15857_v49 = vmul.f32 %v19255_v41, %v15793_v1  ;;  %v15731_v24 = vmul.f32 %v19259_v40, %v25325_v29  ;;  %v19263_v61 = vpop.eup %19262 }
 0x8fe   : > { %v19265_v10 = vpop.eup %19264 }
 0x8ff   : > { %18216 = vmatmul.mubr.msk.f32.gmra.mrb[112].mxu1 %vm12956_vm1, %v15918_v55  ;;  %v15733_v55 = vmul.f32 %v19261_v45, %v25331_v52  ;;  %v15732_v52 = vmul.f32 %v19263_v61, %v25329_v6 }
 0x900   : > { %v17801_v23 = vpop.f32.mrb[84].mxu1 }
 0x901   : > { %v17802_v37 = vpop.f32.mrb[85].mxu1  ;;  %v15796_v27 = vsub.f32 2.0, %v15732_v52 }
 0x902   : > { %v17803_v46 = vadd.f32 %v17802_v37, %v17801_v23  ;;  %v25398_v23 = vpop.xlane.xlu0 %14847 }
 0x903   : > { %v17881_v17 = vpop.f32.mrb[100].mxu0  ;;  %19292 = vrcp.f32 %v25398_v23 }
 0x904   : > { %v17882_v31 = vpop.f32.mrb[101].mxu0  ;;  %v15919_v3 = vmul.f32 %v17803_v46, %v15855_v44  ;;  %v19267_v46 = vpop.eup %19266 }
 0x905   : > { %v25372_v4 = vadd.f32 %v17882_v31, %v17881_v17  ;;  %v25402_v17 = vpop.xlane.xlu1 %14850  ;;  %v15858_v31 = vmul.f32 %v19257_v2, %v15794_v54  ;;  %v15735_v2 = vmul.f32 %v19267_v46, %v25338_v33 }
 0x906   : > { %18218 = vmatprep.mubr.msk.f32.mxu1 %vm12956_vm1, %v15919_v3  ;;  %v15795_v3 = vsub.f32 2.0, %v15731_v24  ;;  %19294 = vrcp.f32 %v25402_v17 }
 0x908   : > { %v15859_v6 = vmul.f32 %v19259_v40, %v15795_v3  ;;  %v15860_v3 = vmul.f32 %v19263_v61, %v15796_v27  ;;  %v15984_v61 = vld [vmem:[#allocation12 + $0x58] sm:$0xff] }
 0x909   : > { %v17804_v18 = vpop.f32.mrb[86].mxu1  ;;  %v25415_v24 = vpop.xlane.xlu1 %14856 }
 0x90a   : > { %v17805_v32 = vpop.f32.mrb[87].mxu1 }
 0x90b   : > { %v17806_v19 = vadd.f32 %v17805_v32, %v17804_v18  ;;  %v15797_v18 = vsub.f32 2.0, %v15733_v55  ;;  %v15734_v32 = vmul.f32 %v19265_v10, %v25336_v7 }
 0x90c   : > { %v17884_v59 = vpop.f32.mrb[102].mxu0 }
 0x90d   : > { %v17885_v0 = vpop.f32.mrb[103].mxu0  ;;  %v15920_v26 = vmul.f32 %v17806_v19, %v15856_v14  ;;  %v15798_v54 = vsub.f32 2.0, %v15734_v32 }
 0x90e   : > { %v25384_v5 = vadd.f32 %v17885_v0, %v17884_v59  ;;  %v19269_v0 = vpop.eup %19268 }
 0x90f   : > { %18219 = vmatmul.mubr.msk.f32.gmra.mrb[114].mxu1 %vm12956_vm1, %v15920_v26  ;;  %v19271_v1 = vpop.eup %19270 }
 0x912   : > { %v17807_v43 = vpop.f32.mrb[88].mxu1 }
 0x913   : > { %v17808_v11 = vpop.f32.mrb[89].mxu1 }
 0x914   : > { %v17887_v51 = vpop.f32.mrb[104].mxu0  ;;  %v17809_v28 = vadd.f32 %v17808_v11, %v17807_v43  ;;  %v25412_v43 = vpop.xlane.xlu0 %14853 }
 0x915   : > { %v17888_v12 = vpop.f32.mrb[105].mxu0  ;;  %19296 = vrcp.f32 %v25412_v43 }
 0x916   : > { %v15921_v37 = vmul.f32 %v17809_v28, %v15857_v49  ;;  %v25400_v44 = vadd.f32 %v17888_v12, %v17887_v51  ;;  %v15861_v49 = vmul.f32 %v19261_v45, %v15797_v18  ;;  %v15736_v28 = vmul.f32 %v19269_v0, %v25343_v60  ;;  %v19273_v12 = vpop.eup %19272 }
 0x917   : > { %v17810_v42 = vpop.f32.mrb[90].mxu1  ;;  %v15738_v32 = vmul.f32 %v19273_v12, %v25351_v35  ;;  %19298 = vrcp.f32 %v25415_v24 }
 0x918   : > { %v17811_v29 = vpop.f32.mrb[91].mxu1  ;;  %18221 = vmatprep.mubr.msk.f32.mxu1 %vm12956_vm1, %v15921_v37  ;;  %v15799_v37 = vsub.f32 2.0, %v15735_v2  ;;  %v15925_v60 = vmul.f32 %v25297_v25, %v15861_v49  ;;  %v15800_v18 = vsub.f32 2.0, %v15736_v28  ;;  %v25432_v25 = vpop.xlane.xlu1 %14862  ;;  %v15985_v28 = vld [vmem:[#allocation12 + $0x60] sm:$0xff] }
 0x919   : > { %v17890_v16 = vpop.f32.mrb[106].mxu0  ;;  %v17812_v41 = vadd.f32 %v17811_v29, %v17810_v42  ;;  %v15737_v42 = vmul.f32 %v19271_v1, %v25346_v34 }
 0x91a   : > { %v17891_v14 = vpop.f32.mrb[107].mxu0 }
 0x91b   : > { %v15922_v9 = vmul.f32 %v17812_v41, %v15858_v31  ;;  %v25408_v59 = vadd.f32 %v17891_v14, %v17890_v16  ;;  %v17813_v19 = vpop.f32.mrb[92].mxu1  ;;  %v19275_v31 = vpop.eup %19274  ;;  %v15862_v16 = vmul.f32 %v19265_v10, %v15798_v54  ;;  %v15802_v54 = vsub.f32 2.0, %v15738_v32 }
 0x91c   : > { %v17814_v26 = vpop.f32.mrb[93].mxu1  ;;  %v25426_v14 = vpop.xlane.xlu0 %14859  ;;  %v15739_v27 = vmul.f32 %v19275_v31, %v25354_v56 }
 0x91d   : > { %v17893_v11 = vpop.f32.mrb[108].mxu0  ;;  %v17815_v7 = vadd.f32 %v17814_v26, %v17813_v19  ;;  %18222 = vmatmul.mubr.msk.f32.gmra.mrb[116].mxu1 %vm12956_vm1, %v15922_v9  ;;  %v15983_v19 = vld [vmem:[#allocation12 + $0x50] sm:$0xff]  ;;  %v19277_v2 = vpop.eup %19276  ;;  %v15863_v26 = vmul.f32 %v19267_v46, %v15799_v37  ;;  %v15926_v35 = vmul.f32 %v25299_v47, %v15862_v16  ;;  %v15864_v46 = vmul.f32 %v19269_v0, %v15800_v18 }
 0x91e   : > { %v17894_v51 = vpop.f32.mrb[109].mxu0  ;;  %v19279_v49 = vpop.eup %19278  ;;  %v15740_v56 = vmul.f32 %v19277_v2, %v25357_v38  ;;  %19300 = vrcp.f32 %v25426_v14 }
 0x91f   : > { %v15923_v33 = vmul.f32 %v17815_v7, %v15859_v6  ;;  %v25418_v55 = vadd.f32 %v17894_v51, %v17893_v11  ;;  %v17816_v40 = vpop.f32.mrb[94].mxu1  ;;  %v15801_v6 = vsub.f32 2.0, %v15737_v42  ;;  %v18727_v7 = vpack.c.bf16 %v15984_v61, %v15983_v19  ;;  %v19281_v0 = vpop.eup %19280 }
 0x920   : > { %v17817_v29 = vpop.f32.mrb[95].mxu1  ;;  %v15803_v42 = vsub.f32 2.0, %v15739_v27  ;;  %v25444_v47 = vpop.xlane.xlu0 %14865  ;;  %v15741_v38 = vmul.f32 %v19279_v49, %v25360_v62  ;;  %v15804_v16 = vsub.f32 2.0, %v15740_v56  ;;  %v15742_v32 = vmul.f32 %v19281_v0, %v25367_v13 }
 0x921   : > { %v17896_v45 = vpop.f32.mrb[110].mxu0  ;;  %v17818_v52 = vadd.f32 %v17817_v29, %v17816_v40  ;;  %18224 = vmatprep.mubr.msk.f32.mxu1 %vm12956_vm1, %v15923_v33  ;;  %v15986_v33 = vld [vmem:[#allocation12 + $0x68] sm:$0xff]  ;;  %v15927_v40 = vmul.f32 %v25302_v21, %v15863_v26  ;;  %v15865_v37 = vmul.f32 %v19271_v1, %v15801_v6  ;;  %v19283_v1 = vpop.eup %19282  ;;  %19302 = vrcp.f32 %v25432_v25 }
 0x922   : > { %v17897_v41 = vpop.f32.mrb[111].mxu0  ;;  %v25452_v21 = vpack.c.bf16 %v15986_v33, %v15985_v28  ;;  %v15867_v62 = vmul.f32 %v19275_v31, %v15803_v42  ;;  %v15805_v19 = vsub.f32 2.0, %v15741_v38  ;;  %v15868_v31 = vmul.f32 %v19277_v2, %v15804_v16 }
 0x923   : > { %v15924_v34 = vmul.f32 %v17818_v52, %v15860_v3  ;;  %v25428_v9 = vadd.f32 %v17897_v41, %v17896_v45  ;;  %v25448_v3 = vpop.xlane.xlu1 %14868  ;;  %v15928_v52 = vmul.f32 %v25310_v36, %v15864_v46  ;;  %v15929_v18 = vmul.f32 %v25313_v22, %v15865_v37 }
 0x924   : > { %v15743_v36 = vmul.f32 %v19283_v1, %v25369_v39  ;;  %v25465_v26 = vpop.xlane.xlu0 %14871  ;;  %v15931_v6 = vmul.f32 %v25333_v30, %v15867_v62  ;;  %v15806_v39 = vsub.f32 2.0, %v15742_v32  ;;  %v15869_v2 = vmul.f32 %v19279_v49, %v15805_v19 }
 0x925   : > { %v17931_v10 = vpop.f32.mrb[112].mxu0  ;;  %18225 = vmatmul.mubr.msk.f32.gmra.mrb[118].mxu1 %vm12956_vm1, %v15924_v34  ;;  %v19285_v34 = vpop.eup %19284  ;;  %19304 = vrcp.f32 %v25444_v47 }
 0x926   : > { %v17932_v11 = vpop.f32.mrb[113].mxu0  ;;  %18235 = vmatprep.mubr.msk.f32.mxu1 %vm12956_vm1, %v15925_v60  ;;  %v15866_v60 = vmul.f32 %v19273_v12, %v15802_v54  ;;  %v19287_v61 = vpop.eup %19286  ;;  %v15932_v54 = vmul.f32 %v25341_v50, %v15868_v31  ;;  %v15870_v28 = vmul.f32 %v19281_v0, %v15806_v39  ;;  %19306 = vrcp.f32 %v25448_v3 }
 0x927   : > { %v25439_v51 = vadd.f32 %v17932_v11, %v17931_v10  ;;  %v25472_v27 = vpop.xlane.xlu1 %14874  ;;  %v15744_v10 = vmul.f32 %v19285_v34, %v25376_v8  ;;  %v15807_v11 = vsub.f32 2.0, %v15743_v36  ;;  %v15933_v8 = vmul.f32 %v25349_v20, %v15869_v2 }
 0x928   : > { %v15930_v22 = vmul.f32 %v25322_v48, %v15866_v60  ;;  %v19289_v48 = vpop.eup %19288  ;;  %v25486_v49 = vpop.xlane.xlu0 %14877  ;;  %19308 = vrcp.f32 %v25465_v26 }
 0x929   : > { %v17934_v29 = vpop.f32.mrb[114].mxu0  ;;  %18236 = vmatmul.mubr.msk.f32.vlgmr.msra.gmra.mrb[104].mxu1 %vm12956_vm1, %v15926_v35  ;;  %v19291_v30 = vpop.eup %19290  ;;  %v15808_v33 = vsub.f32 2.0, %v15744_v10  ;;  %v15871_v42 = vmul.f32 %v19283_v1, %v15807_v11  ;;  %19310 = vrcp.f32 %v25472_v27 }
 0x92a   : > { %v17935_v45 = vpop.f32.mrb[115].mxu0  ;;  %18238 = vmatprep.mubr.msk.f32.mxu1 %vm12956_vm1, %v15927_v40  ;;  %18726 = vmatpush3.bf16.msra.mxu1 %v25306_v15  ;;  %v15746_v40 = vmul.f32 %v19289_v48, %v25387_v53  ;;  %v19293_v37 = vpop.eup %19292  ;;  %v15934_v53 = vmul.f32 %v25362_v63, %v15870_v28  ;;  %19312 = vrcp.f32 %v25486_v49 }
 0x92b   : > { %v25455_v41 = vadd.f32 %v17935_v45, %v17934_v29  ;;  %18728 = vmatprep.subr.bf16.mxu1 %v18727_v7  ;;  %v15747_v29 = vmul.f32 %v19291_v30, %v25391_v57  ;;  %v25490_v38 = vpop.xlane.xlu1 %14880  ;;  %v19295_v0 = vpop.eup %19294  ;;  %v15872_v60 = vmul.f32 %v19285_v34, %v15808_v33  ;;  %v15748_v1 = vmul.f32 %v19293_v37, %v25398_v23 }
 0x92c   : > { %v15810_v16 = vsub.f32 2.0, %v15746_v40  ;;  %v15749_v63 = vmul.f32 %v19295_v0, %v25402_v17  ;;  %v25504_v34 = vpop.xlane.xlu0 %14883  ;;  %19314 = vrcp.f32 %v25490_v38 }
 0x92d   : > { %v17937_v15 = vpop.f32.mrb[116].mxu0  ;;  %18239 = vmatmul.mubr.msk.f32.gmra.mrb[106].mxu1 %vm12956_vm1, %v15928_v52  ;;  %v15935_v52 = vmul.f32 %v25372_v4, %v15871_v42  ;;  %v15811_v32 = vsub.f32 2.0, %v15747_v29  ;;  %v15936_v4 = vmul.f32 %v25384_v5, %v15872_v60  ;;  %19316 = vrcp.f32 %v25504_v34  ;;  %v15987_v42 = vld [vmem:[#allocation12 + $0x70] sm:$0xff] }
 0x92e   : > { %v17938_v12 = vpop.f32.mrb[117].mxu0  ;;  %18241 = vmatprep.mubr.msk.f32.mxu1 %vm12956_vm1, %v15929_v18  ;;  %18730 = vmatpush3.bf16.msra.mxu1 %v18727_v7  ;;  %v15745_v7 = vmul.f32 %v19287_v61, %v25379_v58  ;;  %v19297_v18 = vpop.eup %19296  ;;  %v15813_v39 = vsub.f32 2.0, %v15749_v63 }
 0x92f   : > { %v25467_v13 = vadd.f32 %v17938_v12, %v17937_v15  ;;  %18732 = vmatprep.subr.bf16.mxu1 %v25452_v21  ;;  %v19299_v19 = vpop.eup %19298  ;;  %v25509_v23 = vpop.xlane.xlu1 %14886  ;;  %v15750_v17 = vmul.f32 %v19297_v18, %v25412_v43 }
 0x930   : > { %v15809_v50 = vsub.f32 2.0, %v15745_v7  ;;  %v19301_v5 = vpop.eup %19300  ;;  %v15751_v10 = vmul.f32 %v19299_v19, %v25415_v24  ;;  %v25526_v24 = vpop.xlane.xlu0 %14889  ;;  %19318 = vrcp.f32 %v25509_v23 }
 0x931   : > { %v17940_v35 = vpop.f32.mrb[118].mxu0  ;;  %18242 = vmatmul.mubr.msk.f32.gmra.mrb[108].mxu1 %vm12956_vm1, %v15930_v22  ;;  %v15812_v22 = vsub.f32 2.0, %v15748_v1  ;;  %v19303_v2 = vpop.eup %19302  ;;  %19320 = vrcp.f32 %v25526_v24 }
 0x932   : > { %v17941_v46 = vpop.f32.mrb[119].mxu0  ;;  %18244 = vmatprep.mubr.msk.f32.mxu1 %vm12956_vm1, %v15931_v6  ;;  %v15873_v62 = vmul.f32 %v19287_v61, %v15809_v50  ;;  %v15874_v61 = vmul.f32 %v19289_v48, %v15810_v16  ;;  %v15875_v6 = vmul.f32 %v19291_v30, %v15811_v32  ;;  %v15752_v30 = vmul.f32 %v19301_v5, %v25426_v14  ;;  %v15988_v50 = vld [vmem:[#allocation12 + $0x78] sm:$0xff] }
 0x933   : > { %v25480_v56 = vadd.f32 %v17941_v46, %v17940_v35  ;;  %v25521_v43 = vpop.xlane.xlu1 %14892  ;;  %v15876_v7 = vmul.f32 %v19293_v37, %v15812_v22  ;;  %v15814_v46 = vsub.f32 2.0, %v15750_v17  ;;  %v15815_v28 = vsub.f32 2.0, %v15751_v10 }
 0x934   : > { %v15937_v12 = vmul.f32 %v25400_v44, %v15873_v62  ;;  %v15938_v44 = vmul.f32 %v25408_v59, %v15874_v61  ;;  %v15939_v11 = vmul.f32 %v25418_v55, %v15875_v6  ;;  %v19305_v59 = vpop.eup %19304  ;;  %v15753_v33 = vmul.f32 %v19303_v2, %v25432_v25 }
 0x935   : > { %v17943_v58 = vpop.f32.mrb[120].mxu0  ;;  %18245 = vmatmul.mubr.msk.f32.gmra.mrb[110].mxu1 %vm12956_vm1, %v15932_v54  ;;  %v19307_v55 = vpop.eup %19306  ;;  %v15940_v14 = vmul.f32 %v25428_v9, %v15876_v7  ;;  %v15878_v29 = vmul.f32 %v19297_v18, %v15814_v46  ;;  %v15754_v25 = vmul.f32 %v19305_v59, %v25444_v47  ;;  %v15879_v60 = vmul.f32 %v19299_v19, %v15815_v28 }
 0x936   : > { %v17944_v20 = vpop.f32.mrb[121].mxu0  ;;  %18247 = vmatprep.mubr.msk.f32.mxu1 %vm12956_vm1, %v15933_v8  ;;  %v15877_v8 = vmul.f32 %v19295_v0, %v15813_v39  ;;  %v25538_v0 = vpop.xlane.xlu0 %14895  ;;  %v15817_v9 = vsub.f32 2.0, %v15753_v33  ;;  %v15755_v16 = vmul.f32 %v19307_v55, %v25448_v3  ;;  %v18735_v47 = vpack.c.bf16 %v15988_v50, %v15987_v42 }
 0x937   : > { %v25494_v45 = vadd.f32 %v17944_v20, %v17943_v58  ;;  %v15816_v20 = vsub.f32 2.0, %v15752_v30  ;;  %v25542_v1 = vpop.xlane.xlu1 %14898  ;;  %v15942_v18 = vmul.f32 %v25455_v41, %v15878_v29  ;;  %v15943_v32 = vmul.f32 %v25467_v13, %v15879_v60 }
 0x938   : > { %v15941_v37 = vmul.f32 %v25439_v51, %v15877_v8  ;;  %v15819_v61 = vsub.f32 2.0, %v15755_v16  ;;  %19322 = vrcp.f32 %v25521_v43 }
 0x939   : > { %v17946_v57 = vpop.f32.mrb[122].mxu0  ;;  %18248 = vmatmul.mubr.msk.f32.gmra.mrb[112].mxu1 %vm12956_vm1, %v15934_v53  ;;  %v15880_v63 = vmul.f32 %v19301_v5, %v15816_v20  ;;  %19324 = vrcp.f32 %v25538_v0 }
 0x93a   : > { %v17947_v15 = vpop.f32.mrb[123].mxu0  ;;  %18250 = vmatprep.mubr.msk.f32.mxu1 %vm12956_vm1, %v15935_v52  ;;  %v19309_v52 = vpop.eup %19308  ;;  %19326 = vrcp.f32 %v25542_v1 }
 0x93b   : > { %v25506_v36 = vadd.f32 %v17947_v15, %v17946_v57  ;;  %v19311_v51 = vpop.eup %19310  ;;  %v15818_v15 = vsub.f32 2.0, %v15754_v25  ;;  %v15756_v19 = vmul.f32 %v19309_v52, %v25465_v26  ;;  %v25554_v13 = vpop.xlane.xlu0 %14901  ;;  %v15944_v26 = vmul.f32 %v25480_v56, %v15880_v63 }
 0x93c   : > { %v19313_v3 = vpop.eup %19312  ;;  %v15757_v22 = vmul.f32 %v19311_v51, %v25472_v27  ;;  %v25557_v5 = vpop.xlane.xlu1 %14904  ;;  %19328 = vrcp.f32 %v25554_v13 }
 0x93d   : > { %v17949_v31 = vpop.f32.mrb[124].mxu0  ;;  %18251 = vmatmul.mubr.msk.f32.gmra.mrb[114].mxu1 %vm12956_vm1, %v15936_v4  ;;  %v19315_v41 = vpop.eup %19314  ;;  %v15882_v27 = vmul.f32 %v19305_v59, %v15818_v15  ;;  %v15820_v10 = vsub.f32 2.0, %v15756_v19  ;;  %19330 = vrcp.f32 %v25557_v5 }
 0x93e   : > { %v17950_v35 = vpop.f32.mrb[125].mxu0  ;;  %18253 = vmatprep.mubr.msk.f32.mxu1 %vm12956_vm1, %v15937_v12  ;;  %v15881_v12 = vmul.f32 %v19303_v2, %v15817_v9  ;;  %v19317_v39 = vpop.eup %19316  ;;  %v15759_v7 = vmul.f32 %v19315_v41, %v25490_v38 }
 0x93f   : > { %v25518_v48 = vadd.f32 %v17950_v35, %v17949_v31  ;;  %v15758_v35 = vmul.f32 %v19313_v3, %v25486_v49  ;;  %v15946_v46 = vmul.f32 %v25506_v36, %v15882_v27  ;;  %v15760_v30 = vmul.f32 %v19317_v39, %v25504_v34  ;;  %v25570_v38 = vpop.xlane.xlu0 %14907 }
 0x940   : > { %v15945_v6 = vmul.f32 %v25494_v45, %v15881_v12  ;;  %19332 = vrcp.f32 %v25570_v38 }
 0x941   : > { %v17952_v54 = vpop.f32.mrb[126].mxu0  ;;  %18254 = vmatmul.mubr.msk.f32.gmra.mrb[116].mxu1 %vm12956_vm1, %v15938_v44  ;;  %v15883_v44 = vmul.f32 %v19307_v55, %v15819_v61  ;;  %v15822_v59 = vsub.f32 2.0, %v15758_v35  ;;  %v25573_v55 = vpop.xlane.xlu1 %14910 }
 0x942   : > { %v17953_v40 = vpop.f32.mrb[127].mxu0  ;;  %18256 = vmatprep.mubr.msk.f32.mxu1 %vm12956_vm1, %v15939_v11  ;;  %v15821_v11 = vsub.f32 2.0, %v15757_v22  ;;  %19334 = vrcp.f32 %v25573_v55 }
 0x943   : > { %v25533_v58 = vadd.f32 %v17953_v40, %v17952_v54  ;;  %v15947_v49 = vmul.f32 %v25518_v48, %v15883_v44  ;;  %v15884_v54 = vmul.f32 %v19309_v52, %v15820_v10  ;;  %v15823_v40 = vsub.f32 2.0, %v15759_v7 }
 0x944   : > { %v15885_v36 = vmul.f32 %v19311_v51, %v15821_v11  ;;  %v15886_v50 = vmul.f32 %v19313_v3, %v15822_v59 }
 0x945   : > { %v17955_v53 = vpop.f32.mrb[128].mxu0  ;;  %18257 = vmatmul.mubr.msk.f32.gmra.mrb[118].mxu1 %vm12956_vm1, %v15940_v14  ;;  %v15948_v48 = vmul.f32 %v25533_v58, %v15884_v54  ;;  %v25582_v58 = vpop.xlane.xlu0 %14913 }
 0x946   : > { %v17956_v57 = vpop.f32.mrb[129].mxu0  ;;  %18267 = vmatprep.mubr.msk.f32.mxu1 %vm12956_vm1, %v15941_v37  ;;  %v15824_v37 = vsub.f32 2.0, %v15760_v30  ;;  %19336 = vrcp.f32 %v25582_v58 }
 0x947   : > { %v17957_v62 = vadd.f32 %v17956_v57, %v17955_v53  ;;  %v15887_v53 = vmul.f32 %v19315_v41, %v15823_v40 }
 0x948   : > { %v15888_v57 = vmul.f32 %v19317_v39, %v15824_v37 }
 0x949   : > { %v17958_v4 = vpop.f32.mrb[130].mxu0  ;;  %18268 = vmatmul.mubr.msk.f32.vlgmr.msra.gmra.mrb[104].mxu1 %vm12956_vm1, %v15942_v18 }
 0x94a   : > { %v17959_v17 = vpop.f32.mrb[131].mxu0  ;;  %18270 = vmatprep.mubr.msk.f32.mxu1 %vm12956_vm1, %v15943_v32  ;;  %18734 = vmatpush3.bf16.msra.mxu1 %v25452_v21  ;;  %v19319_v21 = vpop.eup %19318 }
 0x94b   : > { %v17960_v31 = vadd.f32 %v17959_v17, %v17958_v4  ;;  %18736 = vmatprep.subr.bf16.mxu1 %v18735_v47  ;;  %v15761_v8 = vmul.f32 %v19319_v21, %v25509_v23  ;;  %v19321_v33 = vpop.eup %19320  ;;  %v15949_v23 = vmul.f32 %v17957_v62, %v15885_v36 }
 0x94c   : > { %v19323_v42 = vpop.eup %19322  ;;  %v15762_v20 = vmul.f32 %v19321_v33, %v25526_v24  ;;  %v25588_v24 = vpop.xlane.xlu1 %14916 }
 0x94d   : > { %v17961_v2 = vpop.f32.mrb[132].mxu0  ;;  %18271 = vmatmul.mubr.msk.f32.gmra.mrb[106].mxu1 %vm12956_vm1, %v15944_v26  ;;  %v15825_v29 = vsub.f32 2.0, %v15761_v8  ;;  %v15950_v60 = vmul.f32 %v17960_v31, %v15886_v50  ;;  %v15763_v51 = vmul.f32 %v19323_v42, %v25521_v43  ;;  %v19325_v19 = vpop.eup %19324  ;;  %19338 = vrcp.f32 %v25588_v24 }
 0x94e   : > { %v17962_v56 = vpop.f32.mrb[133].mxu0  ;;  %18273 = vmatprep.mubr.msk.f32.mxu1 %vm12956_vm1, %v15945_v6  ;;  %18738 = vmatpush3.bf16.msra.mxu1 %v18735_v47  ;;  %v15826_v32 = vsub.f32 2.0, %v15762_v20  ;;  %v19327_v3 = vpop.eup %19326  ;;  %v15764_v31 = vmul.f32 %v19325_v19, %v25538_v0 }
 0x94f   : > { %v17963_v45 = vadd.f32 %v17962_v56, %v17961_v2  ;;  %v15889_v47 = vmul.f32 %v19319_v21, %v15825_v29  ;;  %v15827_v17 = vsub.f32 2.0, %v15763_v51  ;;  %v25598_v6 = vpop.xlane.xlu0 %14919  ;;  %v19329_v10 = vpop.eup %19328  ;;  %v15765_v35 = vmul.f32 %v19327_v3, %v25542_v1 }
 0x950   : > { %v15890_v26 = vmul.f32 %v19321_v33, %v15826_v32  ;;  %v25602_v2 = vpop.xlane.xlu1 %14922  ;;  %v19331_v44 = vpop.eup %19330  ;;  %19340 = vrcp.f32 %v25598_v6  ;;  %v15766_v30 = vmul.f32 %v19329_v10, %v25554_v13 }
 0x951   : > { %v17964_v28 = vpop.f32.mrb[134].mxu0  ;;  %18274 = vmatmul.mubr.msk.f32.gmra.mrb[108].mxu1 %vm12956_vm1, %v15946_v46  ;;  %v15951_v18 = vmul.f32 %v17963_v45, %v15887_v53  ;;  %v15891_v56 = vmul.f32 %v19323_v42, %v15827_v17  ;;  %v15828_v45 = vsub.f32 2.0, %v15764_v31  ;;  %19342 = vrcp.f32 %v25602_v2  ;;  %v19333_v54 = vpop.eup %19332 }
 0x952   : > { %v17965_v34 = vpop.f32.mrb[135].mxu0  ;;  %18276 = vmatprep.mubr.msk.f32.mxu1 %vm12956_vm1, %v15947_v49  ;;  %v15829_v59 = vsub.f32 2.0, %v15765_v35  ;;  %v15767_v8 = vmul.f32 %v19331_v44, %v25557_v5  ;;  %v19335_v33 = vpop.eup %19334  ;;  %v15830_v13 = vsub.f32 2.0, %v15766_v30 }
 0x953   : > { %v17966_v14 = vadd.f32 %v17965_v34, %v17964_v28  ;;  %v25610_v36 = vpop.xlane.xlu0 %14925  ;;  %v15892_v37 = vmul.f32 %v19325_v19, %v15828_v45  ;;  %v19337_v29 = vpop.eup %19336  ;;  %v15769_v5 = vmul.f32 %v19335_v33, %v25573_v55 }
 0x954   : > { %v15893_v20 = vmul.f32 %v19327_v3, %v15829_v59  ;;  %19344 = vrcp.f32 %v25610_v36 }
 0x955   : > { %v18011_v25 = vpop.f32.mrb[136].mxu0  ;;  %18277 = vmatmul.mubr.msk.f32.gmra.mrb[110].mxu1 %vm12956_vm1, %v15948_v48  ;;  %v15952_v43 = vmul.f32 %v17966_v14, %v15888_v57 }
 0x956   : > { %v18012_v52 = vpop.f32.mrb[137].mxu0  ;;  %18279 = vmatprep.mubr.msk.f32.mxu1 %vm12956_vm1, %v15949_v23  ;;  %v15768_v23 = vmul.f32 %v19333_v54, %v25570_v38 }
 0x957   : > { %v25584_v9 = vadd.f32 %v18012_v52, %v18011_v25  ;;  %v17967_v16 = vpop.f32.mrb[96].mxu1  ;;  %v15831_v25 = vsub.f32 2.0, %v15767_v8  ;;  %v19339_v52 = vpop.eup %19338 }
 0x958   : > { %v17968_v62 = vpop.f32.mrb[97].mxu1  ;;  %v15832_v38 = vsub.f32 2.0, %v15768_v23  ;;  %v15771_v55 = vmul.f32 %v19339_v52, %v25588_v24  ;;  %v14932_v3 = vpop.xlane.xlu0 %14931 }
 0x959   : > { %v18014_v63 = vpop.f32.mrb[138].mxu0  ;;  %v17969_v15 = vadd.f32 %v17968_v62, %v17967_v16  ;;  %18280 = vmatmul.mubr.msk.f32.gmra.mrb[112].mxu1 %vm12956_vm1, %v15950_v60  ;;  %v14929_v60 = vpop.xlane.xlu1 %14928  ;;  %v15957_v51 = vmul.f32 %v25584_v9, %v15893_v20  ;;  %v15770_v62 = vmul.f32 %v19337_v29, %v25582_v58 }
 0x95a   : > { %v18015_v4 = vpop.f32.mrb[139].mxu0  ;;  %18282 = vmatprep.mubr.msk.f32.mxu1 %vm12956_vm1, %v15951_v18  ;;  %v15894_v18 = vmul.f32 %v19329_v10, %v15830_v13  ;;  %v19341_v32 = vpop.eup %19340  ;;  %19346 = vrcp.f32 %v14929_v60  ;;  %v15835_v31 = vsub.f32 2.0, %v15771_v55 }
 0x95b   : > { %v15953_v12 = vmul.f32 %v17969_v15, %v15889_v47  ;;  %v25593_v61 = vadd.f32 %v18015_v4, %v18014_v63  ;;  %v17970_v22 = vpop.f32.mrb[98].mxu1  ;;  %v15895_v63 = vmul.f32 %v19331_v44, %v15831_v25  ;;  %v15833_v15 = vsub.f32 2.0, %v15769_v5  ;;  %v19343_v4 = vpop.eup %19342 }
 0x95c   : > { %v17971_v41 = vpop.f32.mrb[99].mxu1  ;;  %v15834_v58 = vsub.f32 2.0, %v15770_v62  ;;  %v15772_v17 = vmul.f32 %v19341_v32, %v25598_v6  ;;  %v15773_v24 = vmul.f32 %v19343_v4, %v25602_v2  ;;  %19348 = vrcp.f32 %v14932_v3 }
 0x95d   : > { %v18017_v39 = vpop.f32.mrb[140].mxu0  ;;  %v17972_v27 = vadd.f32 %v17971_v41, %v17970_v22  ;;  %18283 = vmatmul.mubr.msk.f32.gmra.mrb[114].mxu1 %vm12956_vm1, %v15952_v43  ;;  %v15958_v9 = vmul.f32 %v25593_v61, %v15894_v18  ;;  %v15896_v22 = vmul.f32 %v19333_v54, %v15832_v38  ;;  %v15899_v6 = vmul.f32 %v19339_v52, %v15835_v31 }
 0x95e   : > { %v18018_v21 = vpop.f32.mrb[141].mxu0  ;;  %18285 = vmatprep.mubr.msk.f32.mxu1 %vm12956_vm1, %v15953_v12  ;;  %v19345_v35 = vpop.eup %19344  ;;  %v15898_v44 = vmul.f32 %v19337_v29, %v15834_v58 }
 0x95f   : > { %v15954_v11 = vmul.f32 %v17972_v27, %v15890_v26  ;;  %v18019_v7 = vadd.f32 %v18018_v21, %v18017_v39  ;;  %v17973_v0 = vpop.f32.mrb[100].mxu1  ;;  %v15897_v26 = vmul.f32 %v19335_v33, %v15833_v15  ;;  %v14935_v27 = vpop.xlane.xlu1 %14934  ;;  %v15774_v2 = vmul.f32 %v19345_v35, %v25610_v36 }
 0x960   : > { %v17974_v46 = vpop.f32.mrb[101].mxu1  ;;  %19350 = vrcp.f32 %v14935_v27 }
 0x961   : > { %v18020_v49 = vpop.f32.mrb[142].mxu0  ;;  %v17975_v1 = vadd.f32 %v17974_v46, %v17973_v0  ;;  %18286 = vmatmul.mubr.msk.f32.gmra.mrb[116].mxu1 %vm12956_vm1, %v15954_v11  ;;  %v15959_v12 = vmul.f32 %v18019_v7, %v15895_v63  ;;  %v15836_v11 = vsub.f32 2.0, %v15772_v17  ;;  %v15837_v0 = vsub.f32 2.0, %v15773_v24  ;;  %v14938_v46 = vpop.xlane.xlu0 %14937 }
 0x962   : > { %v18021_v28 = vpop.f32.mrb[143].mxu0  ;;  %19352 = vrcp.f32 %v14938_v46 }
 0x963   : > { %v15955_v40 = vmul.f32 %v17975_v1, %v15891_v56  ;;  %v18022_v34 = vadd.f32 %v18021_v28, %v18020_v49  ;;  %v17976_v48 = vpop.f32.mrb[102].mxu1  ;;  %v15900_v54 = vmul.f32 %v19341_v32, %v15836_v11  ;;  %v15901_v8 = vmul.f32 %v19343_v4, %v15837_v0 }
 0x964   : > { %v17977_v14 = vpop.f32.mrb[103].mxu1  ;;  %v19347_v49 = vpop.eup %19346 }
 0x965   : > { %v18023_v42 = vpop.f32.mrb[144].mxu0  ;;  %v17978_v50 = vadd.f32 %v17977_v14, %v17976_v48  ;;  %18288 = vmatprep.mubr.msk.f32.mxu1 %vm12956_vm1, %v15955_v40  ;;  %v15960_v10 = vmul.f32 %v18022_v34, %v15896_v22  ;;  %v15775_v33 = vmul.f32 %v19347_v49, %v14929_v60  ;;  %v15838_v40 = vsub.f32 2.0, %v15774_v2  ;;  %v14941_v34 = vpop.xlane.xlu1 %14940 }
 0x966   : > { %v18024_v53 = vpop.f32.mrb[145].mxu0  ;;  %v19349_v36 = vpop.eup %19348  ;;  %19354 = vrcp.f32 %v14941_v34 }
 0x967   : > { %v15956_v16 = vmul.f32 %v17978_v50, %v15892_v37  ;;  %v18025_v57 = vadd.f32 %v18024_v53, %v18023_v42  ;;  %v15839_v42 = vsub.f32 2.0, %v15775_v33  ;;  %v15902_v50 = vmul.f32 %v19345_v35, %v15838_v40  ;;  %v14944_v20 = vpop.xlane.xlu0 %14943 }
 0x968   : > { %v15776_v29 = vmul.f32 %v19349_v36, %v14932_v3  ;;  %19356 = vrcp.f32 %v14944_v20 }
 0x969   : > { %v18026_v47 = vpop.f32.mrb[146].mxu0  ;;  %18289 = vmatmul.mubr.msk.f32.gmra.mrb[118].mxu1 %vm12956_vm1, %v15956_v16  ;;  %v15961_v21 = vmul.f32 %v18025_v57, %v15897_v26  ;;  %v15903_v16 = vmul.f32 %v19347_v49, %v15839_v42  ;;  %v17443_v49 = vld [vmem:[%s26608_s15] ss:$0 sm:$0xff] }
 0x96a   : > { %v18027_v19 = vpop.f32.mrb[147].mxu0  ;;  %18299 = vmatprep.mubr.msk.f32.mxu1 %vm12956_vm1, %v15957_v51  ;;  %v19351_v5 = vpop.eup %19350  ;;  %v15840_v51 = vsub.f32 2.0, %v15776_v29 }
 0x96b   : > { %v18028_v43 = vadd.f32 %v18027_v19, %v18026_v47  ;;  %v15777_v57 = vmul.f32 %v19351_v5, %v14935_v27 }
 0x96c   : > { %v19353_v38 = vpop.eup %19352  ;;  %v15904_v15 = vmul.f32 %v19349_v36, %v15840_v51 }
 0x96d   : > { %v18029_v41 = vpop.f32.mrb[148].mxu0  ;;  %18300 = vmatmul.mubr.msk.f32.vlgmr.msra.gmra.mrb[104].mxu1 %vm12956_vm1, %v15958_v9  ;;  %v15962_v45 = vmul.f32 %v18028_v43, %v15898_v44  ;;  %v15841_v63 = vsub.f32 2.0, %v15777_v57  ;;  %v15778_v55 = vmul.f32 %v19353_v38, %v14938_v46 }
 0x96e   : > { %v18030_v39 = vpop.f32.mrb[149].mxu0  ;;  %18302 = vmatprep.mubr.msk.f32.mxu1 %vm12956_vm1, %v15959_v12 }
 0x96f   : > { %v18031_v61 = vadd.f32 %v18030_v39, %v18029_v41  ;;  %v15905_v12 = vmul.f32 %v19351_v5, %v15841_v63  ;;  %v15842_v58 = vsub.f32 2.0, %v15778_v55 }
 0x970   : > { %v19355_v4 = vpop.eup %19354 }
 0x971   : > { %v18032_v7 = vpop.f32.mrb[150].mxu0  ;;  %18303 = vmatmul.mubr.msk.f32.gmra.mrb[106].mxu1 %vm12956_vm1, %v15960_v10  ;;  %v15963_v1 = vmul.f32 %v18031_v61, %v15899_v6  ;;  %v15779_v22 = vmul.f32 %v19355_v4, %v14941_v34  ;;  %v15906_v27 = vmul.f32 %v19353_v38, %v15842_v58 }
 0x972   : > { %v18033_v56 = vpop.f32.mrb[151].mxu0  ;;  %18305 = vmatprep.mubr.msk.f32.mxu1 %vm12956_vm1, %v15961_v21  ;;  %v19357_v41 = vpop.eup %19356 }
 0x973   : > { %v18034_v30 = vadd.f32 %v18033_v56, %v18032_v7  ;;  %v15843_v39 = vsub.f32 2.0, %v15779_v22  ;;  %v15780_v10 = vmul.f32 %v19357_v41, %v14944_v20 }
 0x975   : > { %v18035_v59 = vpop.f32.mrb[152].mxu0  ;;  %18306 = vmatmul.mubr.msk.f32.gmra.mrb[108].mxu1 %vm12956_vm1, %v15962_v45  ;;  %v15964_v48 = vmul.f32 %v18034_v30, %v15900_v54  ;;  %v15907_v11 = vmul.f32 %v19355_v4, %v15843_v39  ;;  %v15844_v7 = vsub.f32 2.0, %v15780_v10 }
 0x976   : > { %v18036_v28 = vpop.f32.mrb[153].mxu0  ;;  %18308 = vmatprep.mubr.msk.f32.mxu1 %vm12956_vm1, %v15963_v1 }
 0x977   : > { %v18037_v14 = vadd.f32 %v18036_v28, %v18035_v59  ;;  %v15908_v46 = vmul.f32 %v19357_v41, %v15844_v7 }
 0x979   : > { %v15965_v37 = vmul.f32 %v18037_v14, %v15901_v8  ;;  %v18038_v13 = vpop.f32.mrb[154].mxu0  ;;  %18309 = vmatmul.mubr.msk.f32.gmra.mrb[110].mxu1 %vm12956_vm1, %v15964_v48 }
 0x97a   : > { %v18039_v23 = vpop.f32.mrb[155].mxu0 }
 0x97b   : > { %v18040_v25 = vadd.f32 %v18039_v23, %v18038_v13  ;;  %18311 = vmatprep.mubr.msk.f32.mxu1 %vm12956_vm1, %v15965_v37 }
 0x97d   : > { %v15966_v53 = vmul.f32 %v18040_v25, %v15902_v50  ;;  %v18041_v52 = vpop.f32.mrb[156].mxu0 }
 0x97e   : > { %v18042_v60 = vpop.f32.mrb[157].mxu0 }
 0x97f   : > { %v18043_v18 = vadd.f32 %v18042_v60, %v18041_v52  ;;  %18312 = vmatmul.mubr.msk.f32.gmra.mrb[112].mxu1 %vm12956_vm1, %v15966_v53 }
 0x981   : > { %v15967_v62 = vmul.f32 %v18043_v18, %v15903_v16  ;;  %v18044_v47 = vpop.f32.mrb[158].mxu0 }
 0x982   : > { %v18045_v32 = vpop.f32.mrb[159].mxu0 }
 0x983   : > { %v18046_v19 = vadd.f32 %v18045_v32, %v18044_v47  ;;  %18314 = vmatprep.mubr.msk.f32.mxu1 %vm12956_vm1, %v15967_v62 }
 0x985   : > { %v15968_v3 = vmul.f32 %v18046_v19, %v15904_v15  ;;  %v18047_v9 = vpop.f32.mrb[160].mxu0 }
 0x986   : > { %v18048_v43 = vpop.f32.mrb[161].mxu0 }
 0x987   : > { %v18049_v17 = vadd.f32 %v18048_v43, %v18047_v9  ;;  %18315 = vmatmul.mubr.msk.f32.gmra.mrb[114].mxu1 %vm12956_vm1, %v15968_v3 }
 0x989   : > { %v15969_v26 = vmul.f32 %v18049_v17, %v15905_v12  ;;  %v18050_v31 = vpop.f32.mrb[162].mxu0 }
 0x98a   : > { %v18051_v24 = vpop.f32.mrb[163].mxu0 }
 0x98b   : > { %v18052_v61 = vadd.f32 %v18051_v24, %v18050_v31  ;;  %18317 = vmatprep.mubr.msk.f32.mxu1 %vm12956_vm1, %v15969_v26 }
 0x98d   : > { %v15970_v35 = vmul.f32 %v18052_v61, %v15906_v27  ;;  %v18053_v21 = vpop.f32.mrb[164].mxu0 }
 0x98e   : > { %v18054_v44 = vpop.f32.mrb[165].mxu0 }
 0x98f   : > { %v18055_v6 = vadd.f32 %v18054_v44, %v18053_v21  ;;  %18318 = vmatmul.mubr.msk.f32.gmra.mrb[116].mxu1 %vm12956_vm1, %v15970_v35 }
 0x991   : > { %v15971_v0 = vmul.f32 %v18055_v6, %v15907_v11  ;;  %v18056_v56 = vpop.f32.mrb[166].mxu0 }
 0x992   : > { %v18057_v2 = vpop.f32.mrb[167].mxu0 }
 0x993   : > { %v18058_v45 = vadd.f32 %v18057_v2, %v18056_v56  ;;  %18320 = vmatprep.mubr.msk.f32.mxu1 %vm12956_vm1, %v15971_v0 }
 0x995   : > { %v15972_v30 = vmul.f32 %v18058_v45, %v15908_v46 }
 0x997   : > { %18321 = vmatmul.mubr.msk.f32.gmra.mrb[118].mxu1 %vm12956_vm1, %v15972_v30 }
 0xa40   : > { %v18301_v1 = vpop.f32.mrb[104].mxu1 }
 0xa41   : > { %v16817_v54 = vadd.f32 %v18301_v1, %v17443_v49  ;;  %v16682_v59 = vpop.f32.mrb[105].mxu1 }
 0xa42   : > { %v16816_v8 = vadd.f32 %v17443_v49, %v16682_v59 }
 0xa43   : > { %16833 = vst [vmem:[%s20033_s10 + $0x8] sm:$0xff] %v16817_v54 }
 0xa44   : > { %16832 = vst [vmem:[%s20033_s10] sm:$0xff] %v16816_v8  ;;  %v18304_v28 = vpop.f32.mrb[106].mxu1 }
 0xa45   : > { %v16819_v33 = vadd.f32 %v18304_v28, %v17443_v49  ;;  %v16692_v40 = vpop.f32.mrb[107].mxu1 }
 0xa46   : > { %v16818_v34 = vadd.f32 %v17443_v49, %v16692_v40 }
 0xa47   : > { %16835 = vst [vmem:[%s20033_s10 + $0x18] sm:$0xff] %v16819_v33 }
 0xa48   : > { %16834 = vst [vmem:[%s20033_s10 + $0x10] sm:$0xff] %v16818_v34  ;;  %v18307_v48 = vpop.f32.mrb[108].mxu1 }
 0xa49   : > { %v16821_v14 = vadd.f32 %v18307_v48, %v17443_v49  ;;  %v16702_v36 = vpop.f32.mrb[109].mxu1 }
 0xa4a   : > { %v16820_v37 = vadd.f32 %v17443_v49, %v16702_v36 }
 0xa4b   : > { %16837 = vst [vmem:[%s20033_s10 + $0x28] sm:$0xff] %v16821_v14 }
 0xa4c   : > { %16836 = vst [vmem:[%s20033_s10 + $0x20] sm:$0xff] %v16820_v37  ;;  %v18310_v13 = vpop.f32.mrb[110].mxu1 }
 0xa4d   : > { %v16823_v23 = vadd.f32 %v18310_v13, %v17443_v49  ;;  %v16712_v42 = vpop.f32.mrb[111].mxu1 }
 0xa4e   : > { %v16822_v50 = vadd.f32 %v17443_v49, %v16712_v42 }
 0xa4f   : > { %16839 = vst [vmem:[%s20033_s10 + $0x38] sm:$0xff] %v16823_v23 }
 0xa50   : > { %16838 = vst [vmem:[%s20033_s10 + $0x30] sm:$0xff] %v16822_v50 }
 0xa52   : > { %v18313_v29 = vpop.f32.mrb[112].mxu1 }
 0xa53   : > { %v16825_v20 = vadd.f32 %v18313_v29, %v17443_v49  ;;  %v16722_v25 = vpop.f32.mrb[113].mxu1 }
 0xa54   : > { %v16824_v5 = vadd.f32 %v17443_v49, %v16722_v25 }
 0xa55   : > { %16841 = vst [vmem:[%s20033_s10 + $0x48] sm:$0xff] %v16825_v20 }
 0xa56   : > { %16840 = vst [vmem:[%s20033_s10 + $0x40] sm:$0xff] %v16824_v5 }
 0xa5a   : > { %v18316_v53 = vpop.f32.mrb[114].mxu1 }
 0xa5b   : > { %v16827_v52 = vadd.f32 %v18316_v53, %v17443_v49  ;;  %v16732_v60 = vpop.f32.mrb[115].mxu1 }
 0xa5c   : > { %v16826_v16 = vadd.f32 %v17443_v49, %v16732_v60 }
 0xa5d   : > { %16843 = vst [vmem:[%s20033_s10 + $0x58] sm:$0xff] %v16827_v52 }
 0xa5e   : > { %16842 = vst [vmem:[%s20033_s10 + $0x50] sm:$0xff] %v16826_v16 }
 0xa62   : > { %v18319_v57 = vpop.f32.mrb[116].mxu1 }
 0xa63   : > { %v16829_v51 = vadd.f32 %v18319_v57, %v17443_v49  ;;  %v16742_v18 = vpop.f32.mrb[117].mxu1 }
 0xa64   : > { %v16828_v38 = vadd.f32 %v17443_v49, %v16742_v18 }
 0xa65   : > { %16845 = vst [vmem:[%s20033_s10 + $0x68] sm:$0xff] %v16829_v51 }
 0xa66   : > { %16844 = vst [vmem:[%s20033_s10 + $0x60] sm:$0xff] %v16828_v38 }
 0xa6a   : > { %v18322_v62 = vpop.f32.mrb[118].mxu1 }
 0xa6b   : > { %v16831_v47 = vadd.f32 %v18322_v62, %v17443_v49  ;;  %v16752_v32 = vpop.f32.mrb[119].mxu1 }
 0xa6c   : > { %v16830_v63 = vadd.f32 %v17443_v49, %v16752_v32 }
 0xa6d   : > { %16847 = vst [vmem:[%s20033_s10 + $0x78] sm:$0xff] %v16831_v47 }
 0xa6e   : > { %16846 = vst [vmem:[%s20033_s10 + $0x70] sm:$0xff] %v16830_v63 }
 0xa6f   : > { %19515 = shalt.err (!%p19512_p11)
}
 0xa70   : > { %s19516_s10 = scalar_lea.hbm %s25665_s11, 2048  ;;  %s19520_s20 = scalar_lea.hbm %s26612_s9, 8192 }
 0xa71   : > { %p19517_p5 = scmp.ne.s32.totalorder %s25665_s11, %s19516_s10  ;;  %p19521_p13 = scmp.lt.u32.totalorder %s25665_s11, %s26612_s9 }
 0xa72   : > { %p19522_p9 = scmp.lt.u32.totalorder %s19520_s20, %s19516_s10  ;;  %p19524_p12 = scmp.lt.u32.totalorder %s19516_s10, %s25665_s11 }
 0xa73   : > { %p19518_p3 = pnand %p19517_p5, %p19874_p8 }
 0xa74   : > { %p19523_p0 = por %p19522_p9, %p19521_p13 }
 0xa75   : > { %p19519_p10 = pneg %p19518_p3 }
 0xa76   : > { %p19525_p7 = por %p19524_p12, %p19523_p0 }
 0xa78   : > { %p19526_p1 = pnand %p19525_p7, %p19519_p10 }
 0xa7a   : > { %19529 = shalt.err (!%p19526_p1)
}
 0xa7b   : > { %s19659_s21 = smov 128   ;;  %s19660_s17 = smov 8  }
 0xa7c   : > { %18835 = dma.vmem_to_hbm [thread:$0]  (%p19874_p8), %s25660_s4, 2048, %s25665_s11, %s16849_s16, %s19659_s21, %s19659_s21, %s19660_s17  }
 0xa7d PF: > { %s26613_s6 = sld [smem:[#allocation19_spill]]  ;;  %s26614_s8 = sld [smem:[#allocation23_spill]] }
 0xa7e   : > { %p18865_p4 = scmp.ge.s32.totalorder %s19636_s7, 2 }
 0xa83   : > { %s16879_s3 = sand.u32 1, %s26613_s6   ;;  %p26615_p6 = scmp.ne.s32.totalorder %s26614_s8, 0 }
 0xa84   : > { %s16880_s27 = scalar_lea.sflag [#allocation6], %s16879_s3 }
 0xa85   : > { %p18855_p2 = pnand %p18865_p4, %p26615_p6 }
 0xa87   : > { %19591 = dma.done.wait (!%p18855_p2), %s16880_s27, 2048  }
 0xa88   : > { %19593 = vsyncadd (!%p18855_p2), %s16880_s27, 4294965248  ;;  %s26_s7 = sadd.s32 1, %s19636_s7   ;;  %s26616_s14 = sld [smem:[#allocation24_spill]] }
 0xa89   : > { %p23_p11 = scmp.ge.s32.totalorder %s26_s7, 6   ;;  %s26617_s4 = sld [smem:[#allocation26_spill]] }
 0xa8a   : > { %s26618_s21 = smov %s19600_s22  ;;  %s26619_s22 = smov %s19604_s23 }
 0xa8b   : > { %s26620_s23 = smov %s19952_s5  ;;  %s26621_s24 = smov %s19612_s25 }
 0xa8c   : > { %s26622_s25 = smov %s19616_s26  ;;  %s26623_s26 = smov %s19897_s2 }
 0xa8d   : > { %s26624_s27 = smov %s19628_s29  ;;  %s26625_s28 = smov %s19632_s30 }
 0xa8e   : > { %s26626_s29 = smov %s26616_s14  ;;  %25 = sbr.rel (!%p23_p11) target bundleno = 18 (0x12), region = 118 }
 0xa8f   : > { %s26627_s30 = smov %s26617_s4 }
 0xa95   :  { %16885 = vsyncpa [#allocation5], 1 }
 0xa96   :  { %16887 = vsyncpa [#allocation5 + $0x1], 1 }
 0xa97   :  { %16888 = vsyncpa [#allocation8], 1 }
 0xa98   :  { %16890 = vsyncpa [#allocation8 + $0x1], 1 }
 0xa99   :  { %16891 = vsyncpa [#allocation11], 1 }
 0xa9a   :  { %16892 = vsyncpa [#allocation6], 1 }
 0xa9b   :  { %16894 = vsyncpa [#allocation6 + $0x1], 1 }

</bundles_post_ra>
